<compile_context>
chip_gen: v7x
topology: tpu7x:2x2x1
jax: 0.10.0
libtpu: 0.0.40
codegen_flags: <defaults>
</compile_context>

<pallas_src>
import numpy as np
import jax
import jax.numpy as jnp
from jax.experimental import pallas as pl
from jax.experimental.pallas import tpu as pltpu

NUM_AGENTS = 5
NUM_ROLES = 4
HIDDEN = 64      # module default hidden_dim=64
N_PAD = 8        # node rows padded 5 -> 8 (one sublane group)
R_PAD = 8        # role/feature dim padded 4 -> 8 for the node-encoder matmul
E_ALIGN = 8      # edge rows padded to a multiple of 8


def werewolf_gnn_kernel(
    x_ref,      # [Bt*N_PAD, R_PAD]        stacked node features (zero-padded)
    ea_ref,     # [Bt*E_PAD, 1]            stacked edge attrs
    r_ref,      # [Bt*E_PAD, Bt*N_PAD]     block-diag gather one-hot
    ct_ref,     # [Bt*N_PAD, Bt*E_PAD]     block-diag scatter one-hot
    degb_ref,   # [Bt*N_PAD, H]            deg * b1b, tiled per graph
    mats_ref,   # [8+2H, H]                rows 0:8 wn(pad), 8:8+H w1a_x, 8+H: w1b
    vecs_ref,   # [8, H]                   row0 bn, row1 folded we, row2 folded bias
    rp_ref,     # [ceil8(H+1), NUM_ROLES]  rows 0:H wrp, row H brp
    out_ref,    # [Bt*N_PAD, NUM_ROLES]    softmax probs
):
    H = mats_ref.shape[1]
    # Packed weights: static sublane-aligned slices -> free ref views.
    wn8 = mats_ref[0:8, :]
    w1ax = mats_ref[8:8 + H, :]
    w1b = mats_ref[8 + H:8 + 2 * H, :]
    vecs = vecs_ref[...]
    bn, wef, bf = vecs[0:1, :], vecs[1:2, :], vecs[2:3, :]
    wrp = rp_ref[0:H, :]
    brp = rp_ref[H:H + 1, :]

    R = r_ref[...]        # block-diag gather
    CT = ct_ref[...]      # block-diag scatter
    degb = degb_ref[...]  # folded deg * b1b

    # node_encoder on the whole graph-stacked slab (>=128 rows when Bt>=16)
    x1 = jnp.dot(x_ref[...], wn8, preferred_element_type=jnp.float32) + bn

    # Folded edge branch (node-state independent -> computed once, VPU only).
    edge_part = ea_ref[...] * wef + bf                    # [Bt*E_PAD, H]

    def message_passing(xn):
        # gather reassociated:  blockdiag(R) @ (xn @ W1a_x)
        y = jnp.dot(xn, w1ax, preferred_element_type=jnp.float32)    # [Bt*N, H]
        g = jnp.dot(R, y, preferred_element_type=jnp.float32)        # [Bt*E, H]
        h = jnp.maximum(g + edge_part, 0.0)                          # ReLU
        # scatter reassociated:  (blockdiag(C^T) @ h) @ W1b + deg*b1b
        ah = jnp.dot(CT, h, preferred_element_type=jnp.float32)      # [Bt*N, H]
        return jnp.dot(ah, w1b, preferred_element_type=jnp.float32) + degb

    x2 = x1 + message_passing(x1)
    x3 = x2 + message_passing(x2)    # second round also uses conv1, as in PyTorch

    logits = jnp.dot(x3, wrp, preferred_element_type=jnp.float32) + brp
    logits = logits - jnp.max(logits, axis=-1, keepdims=True)
    e = jnp.exp(logits)
    inv = pl.reciprocal(jnp.sum(e, axis=-1, keepdims=True), approx=True)
    out_ref[...] = e * inv


def _prep_graph(edge_index):
    """Padded gather/scatter one-hots and in-degree from the (static) edges."""
    ei = np.asarray(edge_index)
    E = ei.shape[1]
    e_pad = ((E + E_ALIGN - 1) // E_ALIGN) * E_ALIGN
    row = np.full((e_pad,), -1, np.int64)
    col = np.full((e_pad,), -1, np.int64)
    row[:E] = ei[0]
    col[:E] = ei[1]
    node_ids = np.arange(N_PAD)
    R = (row[:, None] == node_ids[None, :]).astype(np.float32)   # [E_pad, N_pad]
    CT = (col[None, :] == node_ids[:, None]).astype(np.float32)  # [N_pad, E_pad]
    deg = CT.sum(axis=1, keepdims=True).astype(np.float32)       # [N_pad, 1]
    return jnp.asarray(R), jnp.asarray(CT), jnp.asarray(deg), e_pad


def werewolf_gnn_forward_batched(x_b, edge_index, edge_attr_b, params,
                                 block_graphs=32):
    """x_b: [B, num_agents, num_roles], edge_attr_b: [B, E, 1]; shared graph."""
    B, n, r = x_b.shape
    E = edge_attr_b.shape[1]
    H = params["w1b"].shape[0]

    R1, CT1, deg1, e_pad = _prep_graph(edge_index)

    # Graphs per grid step: amortize per-step overhead, but keep >=2 steps so
    # v7x's two TensorCores both get work (no cost on v5e/v6e: grid is serial).
    bt = max(1, min(block_graphs, pl.cdiv(B, 2)))
    n_steps = pl.cdiv(B, bt)
    b_pad = n_steps * bt

    # Stack graphs along the sublane axis (zero-padded rows are inert).
    x_p = jnp.zeros((b_pad, N_PAD, R_PAD), jnp.float32)
    x_p = x_p.at[:B, :n, :r].set(x_b.astype(jnp.float32))
    x_s = x_p.reshape(b_pad * N_PAD, R_PAD)
    ea_p = jnp.zeros((b_pad, e_pad, 1), jnp.float32)
    ea_p = ea_p.at[:B, :E, :].set(edge_attr_b.astype(jnp.float32))
    ea_s = ea_p.reshape(b_pad * e_pad, 1)

    # Block-diagonal gather/scatter for the bt stacked graphs.
    eye = jnp.eye(bt, dtype=jnp.float32)
    R_blk = jnp.kron(eye, R1)      # [bt*e_pad, bt*N_PAD]
    CT_blk = jnp.kron(eye, CT1)    # [bt*N_PAD, bt*e_pad]

    # Fold the edge branch of conv1's first linear into the edge encoder.
    w1a = params["w1a"]
    w1a_x, w1a_e = w1a[:H, :], w1a[H:, :]
    wef = params["we"] @ w1a_e                       # [1, H]
    bf = params["be"] @ w1a_e + params["b1a"]        # [1, H]

    # Consolidated operands.
    wn8 = jnp.zeros((8, H), jnp.float32).at[:r, :].set(params["wn"])
    mats = jnp.concatenate([wn8, w1a_x, params["w1b"]], axis=0)      # [8+2H, H]
    vecs = (jnp.zeros((8, H), jnp.float32)
            .at[0].set(params["bn"][0]).at[1].set(wef[0]).at[2].set(bf[0]))
    rp_rows = ((H + 1 + 7) // 8) * 8
    rp = (jnp.zeros((rp_rows, NUM_ROLES), jnp.float32)
          .at[:H].set(params["wrp"]).at[H].set(params["brp"][0]))
    degb = jnp.tile(deg1 * params["b1b"], (bt, 1))                   # [bt*N_PAD, H]

    def const_spec(a):
        return pl.BlockSpec(a.shape, lambda i: (0, 0))

    out = pl.pallas_call(
        werewolf_gnn_kernel,
        out_shape=jax.ShapeDtypeStruct((b_pad * N_PAD, NUM_ROLES), jnp.float32),
        grid=(n_steps,),
        in_specs=[
            pl.BlockSpec((bt * N_PAD, R_PAD), lambda i: (i, 0)),   # stacked x
            pl.BlockSpec((bt * e_pad, 1), lambda i: (i, 0)),       # stacked edge_attr
            const_spec(R_blk), const_spec(CT_blk), const_spec(degb),
            const_spec(mats), const_spec(vecs), const_spec(rp),
        ],
        out_specs=pl.BlockSpec((bt * N_PAD, NUM_ROLES), lambda i: (i, 0)),
        compiler_params=pltpu.CompilerParams(
            dimension_semantics=("parallel",)),
    )(x_s, ea_s, R_blk, CT_blk, degb, mats, vecs, rp)

    out = out.reshape(b_pad, N_PAD, NUM_ROLES)
    return out[:B, :n, :]


def werewolf_gnn_forward(x, edge_index, edge_attr, params):
    """Single-graph forward (matches the PyTorch module signature).
    Per perf review: at B=1 the pallas_call dispatch dwarfs <0.1us of math, so
    the single-graph path is served by plain XLA; use the batched path above
    when processing many graphs."""
    return reference_forward(x, edge_index, edge_attr, params)


def init_params(key, hidden=HIDDEN):
    """PyTorch-style uniform(-1/sqrt(fan_in), 1/sqrt(fan_in)) init.
    Weights stored transposed [in, out] so forward computes x @ W + b."""
    ks = jax.random.split(key, 12)

    def lin(kw, kb, fan_in, fan_out):
        bound = 1.0 / np.sqrt(fan_in)
        w = jax.random.uniform(kw, (fan_in, fan_out), jnp.float32, -bound, bound)
        b = jax.random.uniform(kb, (1, fan_out), jnp.float32, -bound, bound)
        return w, b

    wn, bn = lin(ks[0], ks[1], NUM_ROLES, hidden)        # node_encoder
    we, be = lin(ks[2], ks[3], 1, hidden)                # edge_encoder
    w1a, b1a = lin(ks[4], ks[5], hidden * 2, hidden)     # conv1[0]
    w1b, b1b = lin(ks[6], ks[7], hidden, hidden)         # conv1[2]
    wrp, brp = lin(ks[8], ks[9], hidden, NUM_ROLES)      # role_predictor
    # conv2 params exist in the module but are never used by forward().
    _w2a, _b2a = lin(ks[10], ks[11], hidden * 2, hidden)
    return {
        "wn": wn, "bn": bn, "we": we, "be": be,
        "w1a": w1a, "b1a": b1a, "w1b": w1b, "b1b": b1b,
        "wrp": wrp, "brp": brp,
    }


def reference_forward(x, edge_index, edge_attr, p):
    """Pure-JAX reference mirroring the PyTorch forward exactly."""
    row, col = edge_index[0], edge_index[1]

    def mp(xn):
        ef = edge_attr @ p["we"] + p["be"]
        msg = jnp.concatenate([xn[row], ef], axis=1)
        h = jnp.maximum(msg @ p["w1a"] + p["b1a"], 0.0)
        m = h @ p["w1b"] + p["b1b"]
        aggr = jnp.zeros((NUM_AGENTS, m.shape[1]), jnp.float32)
        return aggr.at[col].add(m)

    x1 = x @ p["wn"] + p["bn"]
    x2 = x1 + mp(x1)
    x3 = x2 + mp(x2)
    logits = x3 @ p["wrp"] + p["brp"]
    return jax.nn.softmax(logits, axis=-1)


if __name__ == "__main__":
    key = jax.random.PRNGKey(0)
    k_param, k_x, k_ea = jax.random.split(key, 3)
    params = init_params(k_param)

    # Fully connected directed graph without self loops: E = 5*4 = 20 edges.
    row = np.array([i for i in range(NUM_AGENTS) for j in range(NUM_AGENTS) if i != j],
                   dtype=np.int32)
    col = np.array([j for i in range(NUM_AGENTS) for j in range(NUM_AGENTS) if i != j],
                   dtype=np.int32)
    edge_index = jnp.stack([jnp.asarray(row), jnp.asarray(col)], axis=0)   # [2, 20]

    # Batched path: 64 graphs -> Bt=32, 2 grid steps (one per v7x TensorCore).
    B = 64
    x_b = jax.random.uniform(k_x, (B, NUM_AGENTS, NUM_ROLES), jnp.float32)
    ea_b = jax.random.uniform(k_ea, (B, edge_index.shape[1], 1), jnp.float32)

    out_b = jax.block_until_ready(
        werewolf_gnn_forward_batched(x_b, edge_index, ea_b, params))

    ref_b = jax.vmap(lambda xx, ee: reference_forward(xx, edge_index, ee, params))(
        x_b, ea_b)
    np.testing.assert_allclose(np.asarray(out_b), np.asarray(ref_b),
                               rtol=2e-3, atol=2e-3)

    # Ragged batch (exercises graph padding inside the last grid step).
    B2 = 7
    out2 = jax.block_until_ready(
        werewolf_gnn_forward_batched(x_b[:B2], edge_index, ea_b[:B2], params))
    np.testing.assert_allclose(np.asarray(out2), np.asarray(ref_b[:B2]),
                               rtol=2e-3, atol=2e-3)

    # Single-graph module-signature path (pure XLA per perf review).
    out1 = jax.block_until_ready(
        werewolf_gnn_forward(x_b[0], edge_index, ea_b[0], params))
    np.testing.assert_allclose(np.asarray(out1), np.asarray(ref_b[0]),
                               rtol=1e-5, atol=1e-5)

    print("KERNEL_OK")
</pallas_src>

<mosaic_0001>
module attributes {stable_mosaic.version = 11 : i64} {
  func.func @werewolf_gnn_kernel(%arg0: i32, %arg1: memref<256x8xf32, #tpu.memory_space<vmem>>, %arg2: memref<768x1xf32, #tpu.memory_space<vmem>>, %arg3: memref<768x256xf32, #tpu.memory_space<vmem>>, %arg4: memref<256x768xf32, #tpu.memory_space<vmem>>, %arg5: memref<256x64xf32, #tpu.memory_space<vmem>>, %arg6: memref<136x64xf32, #tpu.memory_space<vmem>>, %arg7: memref<8x64xf32, #tpu.memory_space<vmem>>, %arg8: memref<72x4xf32, #tpu.memory_space<vmem>>, %arg9: memref<256x4xf32, #tpu.memory_space<vmem>>) attributes {dimension_semantics = [#tpu.dimension_semantics<parallel>], iteration_bounds = array<i64: 2>, scalar_prefetch = 0 : i64, scratch_operands = 0 : i64, tpu.core_type = #tpu.core_type<tc>, window_params = [{transform_indices = @transform_0, window_bounds = array<i64: 256, 8>}, {transform_indices = @transform_1, window_bounds = array<i64: 768, 1>}, {pipeline_mode = #tpu.pipeline_mode<synchronous>, transform_indices = @transform_2, window_bounds = array<i64: 768, 256>}, {pipeline_mode = #tpu.pipeline_mode<synchronous>, transform_indices = @transform_3, window_bounds = array<i64: 256, 768>}, {pipeline_mode = #tpu.pipeline_mode<synchronous>, transform_indices = @transform_4, window_bounds = array<i64: 256, 64>}, {pipeline_mode = #tpu.pipeline_mode<synchronous>, transform_indices = @transform_5, window_bounds = array<i64: 136, 64>}, {pipeline_mode = #tpu.pipeline_mode<synchronous>, transform_indices = @transform_6, window_bounds = array<i64: 8, 64>}, {pipeline_mode = #tpu.pipeline_mode<synchronous>, transform_indices = @transform_7, window_bounds = array<i64: 72, 4>}, {transform_indices = @transform_8, window_bounds = array<i64: 256, 4>}]} {
    %c0 = arith.constant 0 : index
    %c0_0 = arith.constant 0 : index
    %0 = vector.load %arg6[%c0, %c0_0] : memref<136x64xf32, #tpu.memory_space<vmem>>, vector<8x64xf32>
    %c8 = arith.constant 8 : index
    %c0_1 = arith.constant 0 : index
    %1 = vector.load %arg6[%c8, %c0_1] : memref<136x64xf32, #tpu.memory_space<vmem>>, vector<64x64xf32>
    %c72 = arith.constant 72 : index
    %c0_2 = arith.constant 0 : index
    %2 = vector.load %arg6[%c72, %c0_2] : memref<136x64xf32, #tpu.memory_space<vmem>>, vector<64x64xf32>
    %c0_3 = arith.constant 0 : index
    %c0_4 = arith.constant 0 : index
    %3 = vector.load %arg7[%c0_3, %c0_4] : memref<8x64xf32, #tpu.memory_space<vmem>>, vector<8x64xf32>
    %4 = vector.extract_strided_slice %3 {offsets = [0, 0], sizes = [1, 64], strides = [1, 1]} : vector<8x64xf32> to vector<1x64xf32>
    %5 = vector.extract_strided_slice %3 {offsets = [1, 0], sizes = [1, 64], strides = [1, 1]} : vector<8x64xf32> to vector<1x64xf32>
    %6 = vector.extract_strided_slice %3 {offsets = [2, 0], sizes = [1, 64], strides = [1, 1]} : vector<8x64xf32> to vector<1x64xf32>
    %c0_5 = arith.constant 0 : index
    %c0_6 = arith.constant 0 : index
    %7 = vector.load %arg8[%c0_5, %c0_6] : memref<72x4xf32, #tpu.memory_space<vmem>>, vector<64x4xf32>
    %c64 = arith.constant 64 : index
    %c0_7 = arith.constant 0 : index
    %8 = vector.load %arg8[%c64, %c0_7] : memref<72x4xf32, #tpu.memory_space<vmem>>, vector<1x4xf32>
    %c0_8 = arith.constant 0 : index
    %c0_9 = arith.constant 0 : index
    %9 = vector.load %arg3[%c0_8, %c0_9] : memref<768x256xf32, #tpu.memory_space<vmem>>, vector<768x256xf32>
    %c0_10 = arith.constant 0 : index
    %c0_11 = arith.constant 0 : index
    %10 = vector.load %arg4[%c0_10, %c0_11] : memref<256x768xf32, #tpu.memory_space<vmem>>, vector<256x768xf32>
    %c0_12 = arith.constant 0 : index
    %c0_13 = arith.constant 0 : index
    %11 = vector.load %arg5[%c0_12, %c0_13] : memref<256x64xf32, #tpu.memory_space<vmem>>, vector<256x64xf32>
    %c0_14 = arith.constant 0 : index
    %c0_15 = arith.constant 0 : index
    %12 = vector.load %arg1[%c0_14, %c0_15] : memref<256x8xf32, #tpu.memory_space<vmem>>, vector<256x8xf32>
    %cst = arith.constant dense<0.000000e+00> : vector<256x64xf32>
    %13 = tpu.matmul %12, %0, %cst {dimension_numbers = #tpu.dot_dimension_numbers<[1], [0], [0], [1], [0, 0, 1, 1], [], []>} : vector<256x8xf32>, vector<8x64xf32>, vector<256x64xf32> -> vector<256x64xf32>
    %14 = vector.broadcast %4 : vector<1x64xf32> to vector<256x64xf32>
    %15 = arith.addf %13, %14 : vector<256x64xf32>
    %c0_16 = arith.constant 0 : index
    %c0_17 = arith.constant 0 : index
    %16 = vector.load %arg2[%c0_16, %c0_17] : memref<768x1xf32, #tpu.memory_space<vmem>>, vector<768x1xf32>
    %17 = vector.broadcast %16 : vector<768x1xf32> to vector<768x64xf32>
    %18 = vector.broadcast %5 : vector<1x64xf32> to vector<768x64xf32>
    %19 = arith.mulf %17, %18 : vector<768x64xf32>
    %20 = vector.broadcast %6 : vector<1x64xf32> to vector<768x64xf32>
    %21 = arith.addf %19, %20 : vector<768x64xf32>
    %cst_18 = arith.constant dense<0.000000e+00> : vector<256x64xf32>
    %22 = tpu.matmul %15, %1, %cst_18 {dimension_numbers = #tpu.dot_dimension_numbers<[1], [0], [0], [1], [0, 0, 1, 1], [], []>} : vector<256x64xf32>, vector<64x64xf32>, vector<256x64xf32> -> vector<256x64xf32>
    %cst_19 = arith.constant dense<0.000000e+00> : vector<768x64xf32>
    %23 = tpu.matmul %9, %22, %cst_19 {dimension_numbers = #tpu.dot_dimension_numbers<[1], [0], [0], [1], [0, 0, 1, 1], [], []>} : vector<768x256xf32>, vector<256x64xf32>, vector<768x64xf32> -> vector<768x64xf32>
    %24 = arith.addf %23, %21 : vector<768x64xf32>
    %cst_20 = arith.constant 0.000000e+00 : f32
    %25 = vector.broadcast %cst_20 : f32 to vector<768x64xf32>
    %26 = arith.maximumf %24, %25 : vector<768x64xf32>
    %cst_21 = arith.constant dense<0.000000e+00> : vector<256x64xf32>
    %27 = tpu.matmul %10, %26, %cst_21 {dimension_numbers = #tpu.dot_dimension_numbers<[1], [0], [0], [1], [0, 0, 1, 1], [], []>} : vector<256x768xf32>, vector<768x64xf32>, vector<256x64xf32> -> vector<256x64xf32>
    %cst_22 = arith.constant dense<0.000000e+00> : vector<256x64xf32>
    %28 = tpu.matmul %27, %2, %cst_22 {dimension_numbers = #tpu.dot_dimension_numbers<[1], [0], [0], [1], [0, 0, 1, 1], [], []>} : vector<256x64xf32>, vector<64x64xf32>, vector<256x64xf32> -> vector<256x64xf32>
    %29 = arith.addf %28, %11 : vector<256x64xf32>
    %30 = arith.addf %15, %29 : vector<256x64xf32>
    %cst_23 = arith.constant dense<0.000000e+00> : vector<256x64xf32>
    %31 = tpu.matmul %30, %1, %cst_23 {dimension_numbers = #tpu.dot_dimension_numbers<[1], [0], [0], [1], [0, 0, 1, 1], [], []>} : vector<256x64xf32>, vector<64x64xf32>, vector<256x64xf32> -> vector<256x64xf32>
    %cst_24 = arith.constant dense<0.000000e+00> : vector<768x64xf32>
    %32 = tpu.matmul %9, %31, %cst_24 {dimension_numbers = #tpu.dot_dimension_numbers<[1], [0], [0], [1], [0, 0, 1, 1], [], []>} : vector<768x256xf32>, vector<256x64xf32>, vector<768x64xf32> -> vector<768x64xf32>
    %33 = arith.addf %32, %21 : vector<768x64xf32>
    %cst_25 = arith.constant 0.000000e+00 : f32
    %34 = vector.broadcast %cst_25 : f32 to vector<768x64xf32>
    %35 = arith.maximumf %33, %34 : vector<768x64xf32>
    %cst_26 = arith.constant dense<0.000000e+00> : vector<256x64xf32>
    %36 = tpu.matmul %10, %35, %cst_26 {dimension_numbers = #tpu.dot_dimension_numbers<[1], [0], [0], [1], [0, 0, 1, 1], [], []>} : vector<256x768xf32>, vector<768x64xf32>, vector<256x64xf32> -> vector<256x64xf32>
    %cst_27 = arith.constant dense<0.000000e+00> : vector<256x64xf32>
    %37 = tpu.matmul %36, %2, %cst_27 {dimension_numbers = #tpu.dot_dimension_numbers<[1], [0], [0], [1], [0, 0, 1, 1], [], []>} : vector<256x64xf32>, vector<64x64xf32>, vector<256x64xf32> -> vector<256x64xf32>
    %38 = arith.addf %37, %11 : vector<256x64xf32>
    %39 = arith.addf %30, %38 : vector<256x64xf32>
    %cst_28 = arith.constant dense<0.000000e+00> : vector<256x4xf32>
    %40 = tpu.matmul %39, %7, %cst_28 {dimension_numbers = #tpu.dot_dimension_numbers<[1], [0], [0], [1], [0, 0, 1, 1], [], []>} : vector<256x64xf32>, vector<64x4xf32>, vector<256x4xf32> -> vector<256x4xf32>
    %41 = vector.broadcast %8 : vector<1x4xf32> to vector<256x4xf32>
    %42 = arith.addf %40, %41 : vector<256x4xf32>
    %cst_29 = arith.constant dense<0xFF800000> : vector<256xf32>
    %43 = vector.multi_reduction <maximumf>, %42, %cst_29 [1] : vector<256x4xf32> to vector<256xf32>
    %44 = vector.shape_cast %43 : vector<256xf32> to vector<256x1xf32>
    %45 = vector.broadcast %44 : vector<256x1xf32> to vector<256x4xf32>
    %46 = arith.subf %42, %45 : vector<256x4xf32>
    %47 = math.exp %46 : vector<256x4xf32>
    %cst_30 = arith.constant dense<0.000000e+00> : vector<256xf32>
    %48 = vector.multi_reduction <add>, %47, %cst_30 [1] : vector<256x4xf32> to vector<256xf32>
    %49 = vector.shape_cast %48 : vector<256xf32> to vector<256x1xf32>
    %50 = tpu.reciprocal %49 {approx = true} : vector<256x1xf32> -> vector<256x1xf32>
    %51 = vector.broadcast %50 : vector<256x1xf32> to vector<256x4xf32>
    %52 = arith.mulf %47, %51 : vector<256x4xf32>
    %c0_31 = arith.constant 0 : index
    %c0_32 = arith.constant 0 : index
    %53 = vector.load %arg9[%c0_31, %c0_32] : memref<256x4xf32, #tpu.memory_space<vmem>>, vector<256x4xf32>
    tpu.vector_store %arg9[%c0_31, %c0_32], %52 {strides = array<i32>} : memref<256x4xf32, #tpu.memory_space<vmem>>, vector<256x4xf32>,
    return
  }
  func.func @transform_0(%arg0: i32) -> (i32, i32) {
    %c0_i32 = arith.constant 0 : i32
    %c0_i32_0 = arith.constant 0 : i32
    return %arg0, %c0_i32 : i32, i32
  }
  func.func @transform_1(%arg0: i32) -> (i32, i32) {
    %c0_i32 = arith.constant 0 : i32
    %c0_i32_0 = arith.constant 0 : i32
    return %arg0, %c0_i32 : i32, i32
  }
  func.func @transform_2(%arg0: i32) -> (i32, i32) {
    %c0_i32 = arith.constant 0 : i32
    %c0_i32_0 = arith.constant 0 : i32
    %c0_i32_1 = arith.constant 0 : i32
    return %c0_i32, %c0_i32_0 : i32, i32
  }
  func.func @transform_3(%arg0: i32) -> (i32, i32) {
    %c0_i32 = arith.constant 0 : i32
    %c0_i32_0 = arith.constant 0 : i32
    %c0_i32_1 = arith.constant 0 : i32
    return %c0_i32, %c0_i32_0 : i32, i32
  }
  func.func @transform_4(%arg0: i32) -> (i32, i32) {
    %c0_i32 = arith.constant 0 : i32
    %c0_i32_0 = arith.constant 0 : i32
    %c0_i32_1 = arith.constant 0 : i32
    return %c0_i32, %c0_i32_0 : i32, i32
  }
  func.func @transform_5(%arg0: i32) -> (i32, i32) {
    %c0_i32 = arith.constant 0 : i32
    %c0_i32_0 = arith.constant 0 : i32
    %c0_i32_1 = arith.constant 0 : i32
    return %c0_i32, %c0_i32_0 : i32, i32
  }
  func.func @transform_6(%arg0: i32) -> (i32, i32) {
    %c0_i32 = arith.constant 0 : i32
    %c0_i32_0 = arith.constant 0 : i32
    %c0_i32_1 = arith.constant 0 : i32
    return %c0_i32, %c0_i32_0 : i32, i32
  }
  func.func @transform_7(%arg0: i32) -> (i32, i32) {
    %c0_i32 = arith.constant 0 : i32
    %c0_i32_0 = arith.constant 0 : i32
    %c0_i32_1 = arith.constant 0 : i32
    return %c0_i32, %c0_i32_0 : i32, i32
  }
  func.func @transform_8(%arg0: i32) -> (i32, i32) {
    %c0_i32 = arith.constant 0 : i32
    %c0_i32_0 = arith.constant 0 : i32
    return %arg0, %c0_i32 : i32, i32
  }
}

</mosaic_0001>

<bundles_post_ra>
// kernel: tpu_custom_call.1
= control target key start
LH: loop header
LB: loop body
LE: loop exit
PB: predicated region body
PF: predicated region fallthrough
CT: control target
= control target key end

     0   :  { %13 = vsyncpa [#allocation3], 0  ;;  %s8892_s27 = smov 0   ;;  %s12181_s0 = inlined_call_operand.vmem [shape: f32[512,8], index: 0, kind: input, shape index: {}]   ;;  %s12182_s1 = inlined_call_operand.vmem [shape: f32[1536,1], index: 1, kind: input, shape index: {}]   ;;  %s12183_s2 = inlined_call_operand.vmem [shape: f32[768,256], index: 2, kind: input, shape index: {}]   ;;  %s12184_s3 = inlined_call_operand.hbm [shape: f32[256,768], index: 3, kind: input, shape index: {}]   ;;  %s12185_s4 = inlined_call_operand.vmem [shape: f32[256,64], index: 4, kind: input, shape index: {}]   ;;  %s12186_s5 = inlined_call_operand.vmem [shape: f32[136,64], index: 5, kind: input, shape index: {}]   ;;  %s12187_s6 = inlined_call_operand.vmem [shape: f32[8,64], index: 6, kind: input, shape index: {}]   ;;  %s12188_s7 = inlined_call_operand.vmem [shape: f32[72,4], index: 7, kind: input, shape index: {}]   ;;  %s12189_s8 = inlined_call_operand.vmem [shape: f32[512,4], index: 8, kind: output, shape index: {}]  }
   0x1 LB: > { %s8898_s28 = sadd.s32 4294967295, %s8840_s27   ;;  %p6696_p0 = scmp.ge.s32.totalorder %s8840_s27, 1  ;;  %s8840_s27 = sphi %s8892_s27, %s19_s27  }
   0x2   : > { %p228_p1 = scmp.lt.s32.totalorder %s8840_s27, 3  ;;  %s8842_s29 = smov [#allocation2]  }
   0x3   : > { %s243_s30 = sshll.u32 %s8842_s29, 4  ;;  %p12190_p3 = scmp.eq.s32.totalorder %s8898_s28, 0  ;;  %s244_s30 = int_to_ptr.vmem [resolvable:$true] %s243_s30 }
   0x4   : > { %p8902_p2 = pnand %p6696_p0, %p228_p1  ;;  %s8802_s13 = scalar_lea.hbm %s12184_s3, 24576 }
   0x5   : > { %p8803_p6 = scmp.ne.s32.totalorder %s12184_s3, %s8802_s13  ;;  %p8809_p10 = scmp.lt.u32.totalorder %s8802_s13, %s12184_s3 }
   0x6   : > { %s12284_s9 = scalar_select %p8902_p2, 1, 0 }
   0x7   : > { %p8236_p4 = pneg %p8902_p2 }
   0x9   : > { %p8911_p5 = pnand %p12190_p3, %p8236_p4 }
   0xb   : > { %p8804_p7 = pneg %p8911_p5 }
   0xd   : > { %p8805_p8 = pnand %p8804_p7, %p8803_p6 }
   0xf   : > { %p8806_p9 = pneg %p8805_p8 }
  0x11   : > { %p8811_p11 = pnand %p8809_p10, %p8806_p9 }
  0x13   : > { %8814 = shalt.err (!%p8811_p11)
}
  0x14   : > { %s8815_s18 = scalar_lea.vmem %s244_s30, 24576  ;;  %p8823_p1 = scmp.lt.s32.totalorder %s244_s30, %s244_s30 }
  0x15   : > { %p8816_p12 = scmp.ne.s32.totalorder %s244_s30, %s8815_s18  ;;  %p8824_p4 = scmp.lt.s32.totalorder %s8815_s18, %s8815_s18 }
  0x17   : > { %p8818_p13 = pnand %p8816_p12, %p8804_p7  ;;  %p8825_p3 = por %p8824_p4, %p8823_p1 }
  0x19   : > { %p8819_p0 = pneg %p8818_p13 }
  0x1b   : > { %p8826_p2 = pnand %p8825_p3, %p8819_p0 }
  0x1d   : > { %8829 = shalt.err (!%p8826_p2)
}
  0x1e   : > { %s8843_s19 = smov 768   ;;  %s8844_s20 = smov 48  }
  0x1f   : > { %8239 = dma.hbm_to_vmem [thread:$0]  (!%p8911_p5), %s12184_s3, 24576, %s244_s30, [#allocation3], %s8843_s19, %s8843_s19, %s8844_s20  }
  0x20   : > { %p12286_p6 = scmp.ne.s32.totalorder %s12284_s9, 0 }
  0x22   : > { %289 = sbr.rel (%p12286_p6) target bundleno = 3604 (0xe14), region = 52 }
  0x29   : > { %p12287_p8 = scmp.eq.s32.totalorder %s8898_s28, 0 }
  0x2b   : > { %8835 = dma.done.wait (%p12287_p8), [#allocation3], 24576   ;;  %p12288_p7 = pmov %p12287_p8 }
  0x2c   : > { %s6701_s23 = sshll.u32 %s8898_s28, 5  ;;  %vm825_vm0 = vcmask 64512   ;;  %v346_v0 = vld [vmem:[%s12186_s5] sm:$0xff]  ;;  %v347_v8 = vld [vmem:[%s12186_s5 + $0x8] sm:$0xff]  ;;  %v348_v9 = vld [vmem:[%s12186_s5 + $0x10] sm:$0xff]  ;;  %v821_v45 = vlaneseq  ;;  %vm1923_vm1 = vcmask 523264  }
  0x2d   : > { %8837 = vsyncadd (%p12288_p7), [#allocation3], 4294942720  ;;  %p329_p2 = scmp.lt.s32.totalorder %s6701_s23, 63  ;;  %7134 = vmatprep.subr.mxu0 %v346_v0  ;;  %v349_v10 = vld [vmem:[%s12186_s5 + $0x18] sm:$0xff]  ;;  %v8975_v12 = vpack.c.bf16 %v348_v9, %v347_v8  ;;  %v350_v13 = vld [vmem:[%s12186_s5 + $0x20] sm:$0xff]  ;;  %s334_s10 = smul.u32 96, %s8898_s28 }
  0x2e   : > { %7135 = vmatpush3.msra.mxu0 %v346_v0  ;;  %v8981_v15 = vpack.c.bf16 %v350_v13, %v349_v10  ;;  %v351_v16 = vld [vmem:[%s12186_s5 + $0x28] sm:$0xff]  ;;  %v352_v17 = vld [vmem:[%s12186_s5 + $0x30] sm:$0xff]  ;;  %v353_v42 = vld [vmem:[%s12186_s5 + $0x38] sm:$0xff]  ;;  %v9055_v46 = vshrl.u32 %v821_v45, 7  ;;  %vm6229_vm2 = vcmask 31744  }
  0x2f   : > { %s12471_s23 = smov (!%p329_p2, %s6701_s23), 63  ;;  %7505 = vmatprep.subr.bf16.mxu1 %v8975_v12  ;;  %v8995_v19 = vpack.c.bf16 %v352_v17, %v351_v16  ;;  %v354_v43 = vld [vmem:[%s12186_s5 + $0x40] sm:$0xff]  ;;  %p335_p3 = scmp.lt.s32.totalorder %s334_s10, 191 }
  0x30   : > { %s6702_s24 = sshll.u32 %s12471_s23, 3  ;;  %7507 = vmatpush3.bf16.msra.mxu1 %v8975_v12  ;;  %v9051_v44 = vpack.c.bf16 %v354_v43, %v353_v42  ;;  %v823_v47 = vsub.s32 0, %v9055_v46  ;;  %v363_v48 = vld [vmem:[%s12187_s6] sm:$0xff] }
  0x31   : > { %s8946_s29 = scalar_lea.vmem %s12181_s0, %s6702_s24  ;;  %7509 = vmatprep.subr.bf16.mxu1 %v8981_v15  ;;  %s12473_s10 = smov (!%p335_p3, %s334_s10), 191 }
  0x32   : > { %v789_v1 = vld [vmem:[%s8946_s29] sm:$0xff]  ;;  %v790_v2 = vld [vmem:[%s8946_s29 + $0x8] sm:$0xff]  ;;  %v791_v3 = vld [vmem:[%s8946_s29 + $0x10] sm:$0xff]  ;;  %v9061_v49 = vrot.slane %v363_v48, %v823_v47  ;;  %s6703_s11 = sshll.u32 %s12473_s10, 3  ;;  %s12080_s18 = scalar_lea.vmem %s12189_s8, %s6702_s24 }
  0x33   : > { %7136 = vmatprep.mubr.msk.f32.mxu0 %vm825_vm0, %v789_v1  ;;  %v792_v4 = vld [vmem:[%s8946_s29 + $0x18] sm:$0xff]  ;;  %v793_v5 = vld [vmem:[%s8946_s29 + $0x20] sm:$0xff]  ;;  %v794_v6 = vld [vmem:[%s8946_s29 + $0x28] sm:$0xff]  ;;  %s9229_s14 = scalar_lea.vmem %s12182_s1, %s6703_s11 }
  0x34   : > { %7137 = vmatmul.mubr.msk.f32.vlgmr.msra.gmra.mrb[0].mxu0 %vm825_vm0, %v790_v2  ;;  %v795_v7 = vld [vmem:[%s8946_s29 + $0x30] sm:$0xff]  ;;  %v796_v11 = vld [vmem:[%s8946_s29 + $0x38] sm:$0xff]  ;;  %v797_v14 = vld [vmem:[%s8946_s29 + $0x40] sm:$0xff]  ;;  %7511 = vmatpush3.bf16.msra.mxu1 %v8981_v15 }
  0x35   : > { %7139 = vmatprep.mubr.msk.f32.mxu0 %vm825_vm0, %v791_v3  ;;  %v798_v18 = vld [vmem:[%s8946_s29 + $0x48] sm:$0xff]  ;;  %v799_v20 = vld [vmem:[%s8946_s29 + $0x50] sm:$0xff]  ;;  %v800_v21 = vld [vmem:[%s8946_s29 + $0x58] sm:$0xff]  ;;  %7513 = vmatprep.subr.bf16.mxu1 %v8995_v19 }
  0x36   : > { %v801_v22 = vld [vmem:[%s8946_s29 + $0x60] sm:$0xff]  ;;  %v802_v23 = vld [vmem:[%s8946_s29 + $0x68] sm:$0xff]  ;;  %v803_v24 = vld [vmem:[%s8946_s29 + $0x70] sm:$0xff] }
  0x37   : > { %v804_v25 = vld [vmem:[%s8946_s29 + $0x78] sm:$0xff]  ;;  %v805_v26 = vld [vmem:[%s8946_s29 + $0x80] sm:$0xff]  ;;  %v806_v27 = vld [vmem:[%s8946_s29 + $0x88] sm:$0xff] }
  0x38   : > { %7140 = vmatmul.mubr.msk.f32.gmra.mrb[2].mxu0 %vm825_vm0, %v792_v4  ;;  %7515 = vmatpush3.bf16.msra.mxu1 %v8995_v19  ;;  %v807_v28 = vld [vmem:[%s8946_s29 + $0x90] sm:$0xff]  ;;  %v808_v29 = vld [vmem:[%s8946_s29 + $0x98] sm:$0xff]  ;;  %v809_v30 = vld [vmem:[%s8946_s29 + $0xa0] sm:$0xff] }
  0x39   : > { %7142 = vmatprep.mubr.msk.f32.mxu0 %vm825_vm0, %v793_v5  ;;  %v810_v31 = vld [vmem:[%s8946_s29 + $0xa8] sm:$0xff]  ;;  %v811_v32 = vld [vmem:[%s8946_s29 + $0xb0] sm:$0xff]  ;;  %v812_v33 = vld [vmem:[%s8946_s29 + $0xb8] sm:$0xff]  ;;  %7517 = vmatprep.subr.bf16.mxu1 %v9051_v44 }
  0x3a   : > { %v813_v34 = vld [vmem:[%s8946_s29 + $0xc0] sm:$0xff]  ;;  %v814_v35 = vld [vmem:[%s8946_s29 + $0xc8] sm:$0xff]  ;;  %v815_v36 = vld [vmem:[%s8946_s29 + $0xd0] sm:$0xff] }
  0x3b   : > { %v816_v37 = vld [vmem:[%s8946_s29 + $0xd8] sm:$0xff]  ;;  %v817_v38 = vld [vmem:[%s8946_s29 + $0xe0] sm:$0xff]  ;;  %v818_v39 = vld [vmem:[%s8946_s29 + $0xe8] sm:$0xff] }
  0x3c   : > { %7143 = vmatmul.mubr.msk.f32.gmra.mrb[4].mxu0 %vm825_vm0, %v794_v6  ;;  %v819_v40 = vld [vmem:[%s8946_s29 + $0xf0] sm:$0xff]  ;;  %v820_v41 = vld [vmem:[%s8946_s29 + $0xf8] sm:$0xff]  ;;  %7519 = vmatpush3.bf16.msra.mxu1 %v9051_v44 }
  0x3d   : > { %7145 = vmatprep.mubr.msk.f32.mxu0 %vm825_vm0, %v795_v7 }
  0x40   : > { %7146 = vmatmul.mubr.msk.f32.gmra.mrb[6].mxu0 %vm825_vm0, %v796_v11 }
  0x41   : > { %7148 = vmatprep.mubr.msk.f32.mxu0 %vm825_vm0, %v797_v14 }
  0x44   : > { %7149 = vmatmul.mubr.msk.f32.gmra.mrb[8].mxu0 %vm825_vm0, %v798_v18 }
  0x45   : > { %7151 = vmatprep.mubr.msk.f32.mxu0 %vm825_vm0, %v799_v20 }
  0x48   : > { %7152 = vmatmul.mubr.msk.f32.gmra.mrb[10].mxu0 %vm825_vm0, %v800_v21 }
  0x49   : > { %7154 = vmatprep.mubr.msk.f32.mxu0 %vm825_vm0, %v801_v22 }
  0x4c   : > { %7155 = vmatmul.mubr.msk.f32.gmra.mrb[12].mxu0 %vm825_vm0, %v802_v23 }
  0x4d   : > { %7157 = vmatprep.mubr.msk.f32.mxu0 %vm825_vm0, %v803_v24 }
  0x50   : > { %7158 = vmatmul.mubr.msk.f32.gmra.mrb[14].mxu0 %vm825_vm0, %v804_v25 }
  0x51   : > { %7160 = vmatprep.mubr.msk.f32.mxu0 %vm825_vm0, %v805_v26 }
  0x54   : > { %7161 = vmatmul.mubr.msk.f32.gmra.mrb[16].mxu0 %vm825_vm0, %v806_v27 }
  0x55   : > { %7163 = vmatprep.mubr.msk.f32.mxu0 %vm825_vm0, %v807_v28 }
  0x58   : > { %7164 = vmatmul.mubr.msk.f32.gmra.mrb[18].mxu0 %vm825_vm0, %v808_v29 }
  0x59   : > { %7166 = vmatprep.mubr.msk.f32.mxu0 %vm825_vm0, %v809_v30 }
  0x5c   : > { %7167 = vmatmul.mubr.msk.f32.gmra.mrb[20].mxu0 %vm825_vm0, %v810_v31 }
  0x5d   : > { %7169 = vmatprep.mubr.msk.f32.mxu0 %vm825_vm0, %v811_v32 }
  0x60   : > { %7170 = vmatmul.mubr.msk.f32.gmra.mrb[22].mxu0 %vm825_vm0, %v812_v33 }
  0x61   : > { %7172 = vmatprep.mubr.msk.f32.mxu0 %vm825_vm0, %v813_v34 }
  0x64   : > { %7173 = vmatmul.mubr.msk.f32.gmra.mrb[24].mxu0 %vm825_vm0, %v814_v35 }
  0x65   : > { %7175 = vmatprep.mubr.msk.f32.mxu0 %vm825_vm0, %v815_v36 }
  0x68   : > { %7176 = vmatmul.mubr.msk.f32.gmra.mrb[26].mxu0 %vm825_vm0, %v816_v37 }
  0x69   : > { %7178 = vmatprep.mubr.msk.f32.mxu0 %vm825_vm0, %v817_v38 }
  0x6c   : > { %7179 = vmatmul.mubr.msk.f32.gmra.mrb[28].mxu0 %vm825_vm0, %v818_v39 }
  0x6d   : > { %7181 = vmatprep.mubr.msk.f32.mxu0 %vm825_vm0, %v819_v40 }
  0x70   : > { %7182 = vmatmul.mubr.msk.f32.gmra.mrb[30].mxu0 %vm825_vm0, %v820_v41 }
 0x107   : > { %v7138_v50 = vpop.f32.mrb[0].mxu0 }
 0x108   : > { %v988_v51 = vpop.f32.mrb[1].mxu0  ;;  %v9067_v53 = vadd.f32 %v7138_v50, %v9061_v49 }
 0x109   : > { %v9064_v52 = vadd.f32 %v988_v51, %v9061_v49 }
 0x10b   : > { %v7141_v54 = vpop.f32.mrb[2].mxu0  ;;  %7200 = vmatprep.mubr.msk.f32.mxu1 %vm1923_vm1, %v9064_v52 }
 0x10c   : > { %v998_v55 = vpop.f32.mrb[3].mxu0  ;;  %7201 = vmatmul.mubr.msk.f32.vlgmr.msra.gmra.mrb[0].mxu1 %vm1923_vm1, %v9067_v53  ;;  %v9077_v57 = vadd.f32 %v7141_v54, %v9061_v49 }
 0x10d   : > { %v9074_v56 = vadd.f32 %v998_v55, %v9061_v49 }
 0x10f   : > { %v7144_v58 = vpop.f32.mrb[4].mxu0  ;;  %7203 = vmatprep.mubr.msk.f32.mxu1 %vm1923_vm1, %v9074_v56 }
 0x110   : > { %v1008_v59 = vpop.f32.mrb[5].mxu0  ;;  %7204 = vmatmul.mubr.msk.f32.gmra.mrb[2].mxu1 %vm1923_vm1, %v9077_v57  ;;  %v9087_v61 = vadd.f32 %v7144_v58, %v9061_v49 }
 0x111   : > { %v9084_v60 = vadd.f32 %v1008_v59, %v9061_v49 }
 0x113   : > { %v7147_v62 = vpop.f32.mrb[6].mxu0  ;;  %7206 = vmatprep.mubr.msk.f32.mxu1 %vm1923_vm1, %v9084_v60 }
 0x114   : > { %v1018_v63 = vpop.f32.mrb[7].mxu0  ;;  %7207 = vmatmul.mubr.msk.f32.gmra.mrb[4].mxu1 %vm1923_vm1, %v9087_v61  ;;  %v9097_v1 = vadd.f32 %v7147_v62, %v9061_v49  ;;  %v12192_v62 = vmov 0.0|0.0  }
 0x115   : > { %v9094_v0 = vadd.f32 %v1018_v63, %v9061_v49  ;;  %7520 = vmatprep.subr.bf16.mxu0 %v12192_v62  ;;  %7568 = vmatprep.subr.bf16.mxu1 %v12192_v62  ;;  %v1147_v63 = vld [vmem:[%s9229_s14] sm:$0xff] }
 0x117   : > { %v7150_v2 = vpop.f32.mrb[8].mxu0  ;;  %7209 = vmatprep.mubr.msk.f32.mxu1 %vm1923_vm1, %v9094_v0 }
 0x118   : > { %v1028_v3 = vpop.f32.mrb[9].mxu0  ;;  %7210 = vmatmul.mubr.msk.f32.gmra.mrb[6].mxu1 %vm1923_vm1, %v9097_v1  ;;  %v9107_v5 = vadd.f32 %v7150_v2, %v9061_v49  ;;  %v1149_v2 = vld [vmem:[%s9229_s14 + $0x10] sm:$0xff] }
 0x119   : > { %v9104_v4 = vadd.f32 %v1028_v3, %v9061_v49  ;;  %v1148_v3 = vld [vmem:[%s9229_s14 + $0x8] sm:$0xff] }
 0x11b   : > { %v7153_v6 = vpop.f32.mrb[10].mxu0  ;;  %7212 = vmatprep.mubr.msk.f32.mxu1 %vm1923_vm1, %v9104_v4 }
 0x11c   : > { %v1038_v7 = vpop.f32.mrb[11].mxu0  ;;  %7213 = vmatmul.mubr.msk.f32.gmra.mrb[8].mxu1 %vm1923_vm1, %v9107_v5  ;;  %v9117_v9 = vadd.f32 %v7153_v6, %v9061_v49  ;;  %v1150_v6 = vld [vmem:[%s9229_s14 + $0x18] sm:$0xff] }
 0x11d   : > { %v9114_v8 = vadd.f32 %v1038_v7, %v9061_v49  ;;  %v1151_v7 = vld [vmem:[%s9229_s14 + $0x20] sm:$0xff] }
 0x11f   : > { %v7156_v10 = vpop.f32.mrb[12].mxu0  ;;  %7215 = vmatprep.mubr.msk.f32.mxu1 %vm1923_vm1, %v9114_v8 }
 0x120   : > { %v1048_v11 = vpop.f32.mrb[13].mxu0  ;;  %7216 = vmatmul.mubr.msk.f32.gmra.mrb[10].mxu1 %vm1923_vm1, %v9117_v9  ;;  %v9127_v14 = vadd.f32 %v7156_v10, %v9061_v49  ;;  %v1152_v10 = vld [vmem:[%s9229_s14 + $0x28] sm:$0xff] }
 0x121   : > { %v9124_v13 = vadd.f32 %v1048_v11, %v9061_v49  ;;  %v1153_v11 = vld [vmem:[%s9229_s14 + $0x30] sm:$0xff] }
 0x123   : > { %v7159_v16 = vpop.f32.mrb[14].mxu0  ;;  %7218 = vmatprep.mubr.msk.f32.mxu1 %vm1923_vm1, %v9124_v13 }
 0x124   : > { %v1058_v17 = vpop.f32.mrb[15].mxu0  ;;  %7219 = vmatmul.mubr.msk.f32.gmra.mrb[12].mxu1 %vm1923_vm1, %v9127_v14  ;;  %v9137_v20 = vadd.f32 %v7159_v16, %v9061_v49  ;;  %v1154_v16 = vld [vmem:[%s9229_s14 + $0x38] sm:$0xff] }
 0x125   : > { %v9134_v18 = vadd.f32 %v1058_v17, %v9061_v49  ;;  %v1155_v17 = vld [vmem:[%s9229_s14 + $0x40] sm:$0xff] }
 0x127   : > { %v7162_v21 = vpop.f32.mrb[16].mxu0  ;;  %7221 = vmatprep.mubr.msk.f32.mxu1 %vm1923_vm1, %v9134_v18 }
 0x128   : > { %v1068_v22 = vpop.f32.mrb[17].mxu0  ;;  %7222 = vmatmul.mubr.msk.f32.gmra.mrb[14].mxu1 %vm1923_vm1, %v9137_v20  ;;  %v9147_v24 = vadd.f32 %v7162_v21, %v9061_v49  ;;  %v1156_v21 = vld [vmem:[%s9229_s14 + $0x48] sm:$0xff] }
 0x129   : > { %v9144_v23 = vadd.f32 %v1068_v22, %v9061_v49  ;;  %v1157_v22 = vld [vmem:[%s9229_s14 + $0x50] sm:$0xff] }
 0x12b   : > { %v7165_v25 = vpop.f32.mrb[18].mxu0  ;;  %7224 = vmatprep.mubr.msk.f32.mxu1 %vm1923_vm1, %v9144_v23 }
 0x12c   : > { %v1078_v26 = vpop.f32.mrb[19].mxu0  ;;  %7225 = vmatmul.mubr.msk.f32.gmra.mrb[16].mxu1 %vm1923_vm1, %v9147_v24  ;;  %v9157_v28 = vadd.f32 %v7165_v25, %v9061_v49  ;;  %v1158_v25 = vld [vmem:[%s9229_s14 + $0x58] sm:$0xff] }
 0x12d   : > { %v9154_v27 = vadd.f32 %v1078_v26, %v9061_v49  ;;  %v1159_v26 = vld [vmem:[%s9229_s14 + $0x60] sm:$0xff] }
 0x12f   : > { %v7168_v29 = vpop.f32.mrb[20].mxu0  ;;  %7227 = vmatprep.mubr.msk.f32.mxu1 %vm1923_vm1, %v9154_v27 }
 0x130   : > { %v1088_v30 = vpop.f32.mrb[21].mxu0  ;;  %7228 = vmatmul.mubr.msk.f32.gmra.mrb[18].mxu1 %vm1923_vm1, %v9157_v28  ;;  %v9167_v32 = vadd.f32 %v7168_v29, %v9061_v49  ;;  %v1160_v29 = vld [vmem:[%s9229_s14 + $0x68] sm:$0xff] }
 0x131   : > { %v9164_v31 = vadd.f32 %v1088_v30, %v9061_v49  ;;  %v1161_v30 = vld [vmem:[%s9229_s14 + $0x70] sm:$0xff] }
 0x133   : > { %v7171_v33 = vpop.f32.mrb[22].mxu0  ;;  %7230 = vmatprep.mubr.msk.f32.mxu1 %vm1923_vm1, %v9164_v31 }
 0x134   : > { %v1098_v34 = vpop.f32.mrb[23].mxu0  ;;  %7231 = vmatmul.mubr.msk.f32.gmra.mrb[20].mxu1 %vm1923_vm1, %v9167_v32  ;;  %v9177_v36 = vadd.f32 %v7171_v33, %v9061_v49  ;;  %v1162_v33 = vld [vmem:[%s9229_s14 + $0x78] sm:$0xff] }
 0x135   : > { %v9174_v35 = vadd.f32 %v1098_v34, %v9061_v49  ;;  %v1163_v34 = vld [vmem:[%s9229_s14 + $0x80] sm:$0xff] }
 0x137   : > { %v7174_v37 = vpop.f32.mrb[24].mxu0  ;;  %7233 = vmatprep.mubr.msk.f32.mxu1 %vm1923_vm1, %v9174_v35 }
 0x138   : > { %v1108_v38 = vpop.f32.mrb[25].mxu0  ;;  %7234 = vmatmul.mubr.msk.f32.gmra.mrb[22].mxu1 %vm1923_vm1, %v9177_v36  ;;  %v9187_v40 = vadd.f32 %v7174_v37, %v9061_v49  ;;  %v1164_v37 = vld [vmem:[%s9229_s14 + $0x88] sm:$0xff] }
 0x139   : > { %v9184_v39 = vadd.f32 %v1108_v38, %v9061_v49  ;;  %v1165_v38 = vld [vmem:[%s9229_s14 + $0x90] sm:$0xff] }
 0x13b   : > { %v7177_v41 = vpop.f32.mrb[26].mxu0  ;;  %7236 = vmatprep.mubr.msk.f32.mxu1 %vm1923_vm1, %v9184_v39 }
 0x13c   : > { %v1118_v42 = vpop.f32.mrb[27].mxu0  ;;  %7237 = vmatmul.mubr.msk.f32.gmra.mrb[24].mxu1 %vm1923_vm1, %v9187_v40  ;;  %v9197_v45 = vadd.f32 %v7177_v41, %v9061_v49  ;;  %v1166_v41 = vld [vmem:[%s9229_s14 + $0x98] sm:$0xff] }
 0x13d   : > { %v9194_v43 = vadd.f32 %v1118_v42, %v9061_v49  ;;  %v1167_v42 = vld [vmem:[%s9229_s14 + $0xa0] sm:$0xff] }
 0x13f   : > { %v7180_v47 = vpop.f32.mrb[28].mxu0  ;;  %7239 = vmatprep.mubr.msk.f32.mxu1 %vm1923_vm1, %v9194_v43 }
 0x140   : > { %v1128_v48 = vpop.f32.mrb[29].mxu0  ;;  %7240 = vmatmul.mubr.msk.f32.gmra.mrb[26].mxu1 %vm1923_vm1, %v9197_v45  ;;  %v9207_v51 = vadd.f32 %v7180_v47, %v9061_v49  ;;  %v1168_v47 = vld [vmem:[%s9229_s14 + $0xa8] sm:$0xff] }
 0x141   : > { %v9204_v50 = vadd.f32 %v1128_v48, %v9061_v49  ;;  %v1169_v48 = vld [vmem:[%s9229_s14 + $0xb0] sm:$0xff] }
 0x143   : > { %v7183_v54 = vpop.f32.mrb[30].mxu0  ;;  %7242 = vmatprep.mubr.msk.f32.mxu1 %vm1923_vm1, %v9204_v50 }
 0x144   : > { %v1138_v55 = vpop.f32.mrb[31].mxu0  ;;  %7243 = vmatmul.mubr.msk.f32.gmra.mrb[28].mxu1 %vm1923_vm1, %v9207_v51  ;;  %v9217_v59 = vadd.f32 %v7183_v54, %v9061_v49  ;;  %v374_v54 = vld [vmem:[%s12183_s2 + $0x8] sm:$0xff] }
 0x145   : > { %v9214_v58 = vadd.f32 %v1138_v55, %v9061_v49  ;;  %v8846_v49 = vmov 0   ;;  %v1170_v55 = vld [vmem:[%s9229_s14 + $0xb8] sm:$0xff]  ;;  %2309 = vmatprep.mubr.f32.mxu0 %v374_v54  ;;  %v1195_v54 = vld [vmem:[%s9229_s14 + $0x180] sm:$0xff] }
 0x146   : > { %8255 = vset.pattern.permute.xlu0 %v8846_v49  ;;  %8256 = vset.pattern.permute.xlu1 %v8846_v49  ;;  %v1171_v49 = vld [vmem:[%s9229_s14 + $0xc0] sm:$0xff] }
 0x147   : > { %7245 = vmatprep.mubr.msk.f32.mxu1 %vm1923_vm1, %v9214_v58  ;;  %1245 = vperm.xlu0 %8255, %v1147_v63   ;;  %v1172_v63 = vld [vmem:[%s9229_s14 + $0xc8] sm:$0xff] }
 0x148   : > { %7246 = vmatmul.mubr.msk.f32.gmra.mrb[30].mxu1 %vm1923_vm1, %v9217_v59  ;;  %1255 = vperm.xlu1 %8256, %v1149_v2   ;;  %v1173_v2 = vld [vmem:[%s9229_s14 + $0xd0] sm:$0xff] }
 0x14b   : > { %1250 = vperm.xlu0 %8255, %v1148_v3   ;;  %v1174_v3 = vld [vmem:[%s9229_s14 + $0xd8] sm:$0xff] }
 0x14c   : > { %1260 = vperm.xlu1 %8256, %v1150_v6   ;;  %v1175_v6 = vld [vmem:[%s9229_s14 + $0xe0] sm:$0xff] }
 0x14f   : > { %1265 = vperm.xlu0 %8255, %v1151_v7   ;;  %v1176_v7 = vld [vmem:[%s9229_s14 + $0xe8] sm:$0xff] }
 0x150   : > { %1270 = vperm.xlu1 %8256, %v1152_v10   ;;  %v1177_v10 = vld [vmem:[%s9229_s14 + $0xf0] sm:$0xff] }
 0x153   : > { %1275 = vperm.xlu0 %8255, %v1153_v11   ;;  %v1178_v11 = vld [vmem:[%s9229_s14 + $0xf8] sm:$0xff] }
 0x154   : > { %1280 = vperm.xlu1 %8256, %v1154_v16   ;;  %v1179_v16 = vld [vmem:[%s9229_s14 + $0x100] sm:$0xff] }
 0x157   : > { %1285 = vperm.xlu0 %8255, %v1155_v17   ;;  %v1180_v17 = vld [vmem:[%s9229_s14 + $0x108] sm:$0xff] }
 0x158   : > { %1290 = vperm.xlu1 %8256, %v1156_v21   ;;  %v1181_v21 = vld [vmem:[%s9229_s14 + $0x110] sm:$0xff] }
 0x15b   : > { %1295 = vperm.xlu0 %8255, %v1157_v22   ;;  %v1182_v22 = vld [vmem:[%s9229_s14 + $0x118] sm:$0xff] }
 0x15c   : > { %1300 = vperm.xlu1 %8256, %v1158_v25   ;;  %v1183_v25 = vld [vmem:[%s9229_s14 + $0x120] sm:$0xff] }
 0x15f   : > { %1305 = vperm.xlu0 %8255, %v1159_v26   ;;  %v1184_v26 = vld [vmem:[%s9229_s14 + $0x128] sm:$0xff] }
 0x160   : > { %1310 = vperm.xlu1 %8256, %v1160_v29   ;;  %v1185_v29 = vld [vmem:[%s9229_s14 + $0x130] sm:$0xff] }
 0x163   : > { %1315 = vperm.xlu0 %8255, %v1161_v30   ;;  %v1186_v30 = vld [vmem:[%s9229_s14 + $0x138] sm:$0xff] }
 0x164   : > { %1320 = vperm.xlu1 %8256, %v1162_v33   ;;  %v1187_v33 = vld [vmem:[%s9229_s14 + $0x140] sm:$0xff] }
 0x167   : > { %1325 = vperm.xlu0 %8255, %v1163_v34   ;;  %v1188_v34 = vld [vmem:[%s9229_s14 + $0x148] sm:$0xff] }
 0x168   : > { %1330 = vperm.xlu1 %8256, %v1164_v37   ;;  %v1189_v37 = vld [vmem:[%s9229_s14 + $0x150] sm:$0xff] }
 0x16b   : > { %1335 = vperm.xlu0 %8255, %v1165_v38   ;;  %v1190_v38 = vld [vmem:[%s9229_s14 + $0x158] sm:$0xff] }
 0x16c   : > { %1340 = vperm.xlu1 %8256, %v1166_v41   ;;  %v1191_v41 = vld [vmem:[%s9229_s14 + $0x160] sm:$0xff] }
 0x16f   : > { %1345 = vperm.xlu0 %8255, %v1167_v42   ;;  %v1192_v42 = vld [vmem:[%s9229_s14 + $0x168] sm:$0xff] }
 0x170   : > { %1350 = vperm.xlu1 %8256, %v1168_v47   ;;  %v1193_v47 = vld [vmem:[%s9229_s14 + $0x170] sm:$0xff] }
 0x173   : > { %1355 = vperm.xlu0 %8255, %v1169_v48   ;;  %v1194_v48 = vld [vmem:[%s9229_s14 + $0x178] sm:$0xff] }
 0x174   : > { %1360 = vperm.xlu1 %8256, %v1170_v55   ;;  %v1196_v55 = vld [vmem:[%s9229_s14 + $0x188] sm:$0xff] }
 0x177   : > { %1365 = vperm.xlu0 %8255, %v1171_v49   ;;  %v1197_v49 = vld [vmem:[%s9229_s14 + $0x190] sm:$0xff] }
 0x178   : > { %1370 = vperm.xlu1 %8256, %v1172_v63   ;;  %v1198_v63 = vld [vmem:[%s9229_s14 + $0x198] sm:$0xff] }
 0x17b   : > { %1375 = vperm.xlu0 %8255, %v1173_v2   ;;  %v1199_v2 = vld [vmem:[%s9229_s14 + $0x1a0] sm:$0xff] }
 0x17c   : > { %1380 = vperm.xlu1 %8256, %v1174_v3   ;;  %v1200_v3 = vld [vmem:[%s9229_s14 + $0x1a8] sm:$0xff] }
 0x17f   : > { %1385 = vperm.xlu0 %8255, %v1175_v6   ;;  %v1201_v6 = vld [vmem:[%s9229_s14 + $0x1b0] sm:$0xff] }
 0x180   : > { %1390 = vperm.xlu1 %8256, %v1176_v7  }
 0x183   : > { %1395 = vperm.xlu0 %8255, %v1177_v10   ;;  %v1202_v10 = vld [vmem:[%s9229_s14 + $0x1b8] sm:$0xff] }
 0x184   : > { %1400 = vperm.xlu1 %8256, %v1178_v11   ;;  %v1203_v11 = vld [vmem:[%s9229_s14 + $0x1c0] sm:$0xff] }
 0x187   : > { %1405 = vperm.xlu0 %8255, %v1179_v16  }
 0x188   : > { %1410 = vperm.xlu1 %8256, %v1180_v17  }
 0x18b   : > { %1415 = vperm.xlu0 %8255, %v1181_v21  }
 0x18c   : > { %1420 = vperm.xlu1 %8256, %v1182_v22   ;;  %v1204_v22 = vld [vmem:[%s9229_s14 + $0x1c8] sm:$0xff] }
 0x18f   : > { %1425 = vperm.xlu0 %8255, %v1183_v25   ;;  %v1205_v25 = vld [vmem:[%s9229_s14 + $0x1d0] sm:$0xff] }
 0x190   : > { %1430 = vperm.xlu1 %8256, %v1184_v26  }
 0x193   : > { %1435 = vperm.xlu0 %8255, %v1185_v29  }
 0x194   : > { %1440 = vperm.xlu1 %8256, %v1186_v30  }
 0x197   : > { %1445 = vperm.xlu0 %8255, %v1187_v33   ;;  %v1206_v33 = vld [vmem:[%s9229_s14 + $0x1d8] sm:$0xff] }
 0x198   : > { %1450 = vperm.xlu1 %8256, %v1188_v34   ;;  %v1207_v34 = vld [vmem:[%s9229_s14 + $0x1e0] sm:$0xff] }
 0x19b   : > { %1455 = vperm.xlu0 %8255, %v1189_v37  }
 0x19c   : > { %1460 = vperm.xlu1 %8256, %v1190_v38  }
 0x19f   : > { %1465 = vperm.xlu0 %8255, %v1191_v41  }
 0x1a0   : > { %1470 = vperm.xlu1 %8256, %v1192_v42   ;;  %v1208_v42 = vld [vmem:[%s9229_s14 + $0x1e8] sm:$0xff] }
 0x1a3   : > { %1475 = vperm.xlu0 %8255, %v1193_v47   ;;  %v1209_v47 = vld [vmem:[%s9229_s14 + $0x1f0] sm:$0xff] }
 0x1a4   : > { %1480 = vperm.xlu1 %8256, %v1194_v48  }
 0x1a7   : > { %1485 = vperm.xlu0 %8255, %v1195_v54  }
 0x1a8   : > { %1490 = vperm.xlu1 %8256, %v1196_v55  }
 0x1ab   : > { %1495 = vperm.xlu0 %8255, %v1197_v49   ;;  %v1210_v49 = vld [vmem:[%s9229_s14 + $0x1f8] sm:$0xff] }
 0x1ac   : > { %1500 = vperm.xlu1 %8256, %v1198_v63   ;;  %v1211_v63 = vld [vmem:[%s9229_s14 + $0x200] sm:$0xff] }
 0x1af   : > { %1505 = vperm.xlu0 %8255, %v1199_v2  }
 0x1b0   : > { %1510 = vperm.xlu1 %8256, %v1200_v3  }
 0x1b3   : > { %1515 = vperm.xlu0 %8255, %v1201_v6  }
 0x1b4   : > { %1520 = vperm.xlu1 %8256, %v1202_v10   ;;  %v1213_v10 = vld [vmem:[%s9229_s14 + $0x210] sm:$0xff] }
 0x1b7   : > { %1525 = vperm.xlu0 %8255, %v1203_v11  }
 0x1b8   : > { %1530 = vperm.xlu1 %8256, %v1204_v22   ;;  %v1215_v22 = vld [vmem:[%s9229_s14 + $0x220] sm:$0xff] }
 0x1bb   : > { %1535 = vperm.xlu0 %8255, %v1205_v25  }
 0x1bc   : > { %1540 = vperm.xlu1 %8256, %v1206_v33   ;;  %v1217_v33 = vld [vmem:[%s9229_s14 + $0x230] sm:$0xff] }
 0x1bf   : > { %1545 = vperm.xlu0 %8255, %v1207_v34  }
 0x1c0   : > { %1550 = vperm.xlu1 %8256, %v1208_v42   ;;  %v1219_v42 = vld [vmem:[%s9229_s14 + $0x240] sm:$0xff] }
 0x1c3   : > { %1555 = vperm.xlu0 %8255, %v1209_v47  }
 0x1c4   : > { %1560 = vperm.xlu1 %8256, %v1210_v49   ;;  %v1221_v49 = vld [vmem:[%s9229_s14 + $0x250] sm:$0xff] }
 0x1c7   : > { %1565 = vperm.xlu0 %8255, %v1211_v63  }
 0x1cb   : > { %1575 = vperm.xlu0 %8255, %v1213_v10  }
 0x1cf   : > { %1585 = vperm.xlu0 %8255, %v1215_v22  }
 0x1d3   : > { %1595 = vperm.xlu0 %8255, %v1217_v33  }
 0x1d7   : > { %1605 = vperm.xlu0 %8255, %v1219_v42  }
 0x1db   : > { %1615 = vperm.xlu0 %8255, %v1221_v49  }
 0x1df   : > { %v7202_v7 = vpop.f32.mrb[0].mxu1 }
 0x1e0   : > { %v2086_v16 = vpop.f32.mrb[1].mxu1 }
 0x1e1   : > { %v7521_v17 = vpack.c.bf16 %v7202_v7, %v2086_v16  ;;  %v1212_v7 = vld [vmem:[%s9229_s14 + $0x208] sm:$0xff] }
 0x1e2   : > { %1570 = vperm.xlu1 %8256, %v1212_v7   ;;  %v1223_v7 = vld [vmem:[%s9229_s14 + $0x260] sm:$0xff] }
 0x1e3   : > { %v7205_v21 = vpop.f32.mrb[2].mxu1  ;;  %7522 = vmatpush1.bf16.msra.mxu0 %v7521_v17  ;;  %1625 = vperm.xlu0 %8255, %v1223_v7  }
 0x1e4   : > { %v2096_v26 = vpop.f32.mrb[3].mxu1  ;;  %7523 = vmatprep.subr.bf16.mxu0 %v12192_v62 }
 0x1e5   : > { %v7524_v29 = vpack.c.bf16 %v7205_v21, %v2096_v26  ;;  %v1214_v21 = vld [vmem:[%s9229_s14 + $0x218] sm:$0xff] }
 0x1e6   : > { %1580 = vperm.xlu1 %8256, %v1214_v21   ;;  %v1225_v21 = vld [vmem:[%s9229_s14 + $0x270] sm:$0xff] }
 0x1e7   : > { %v7208_v30 = vpop.f32.mrb[4].mxu1  ;;  %7525 = vmatpush1.bf16.msra.mxu0 %v7524_v29  ;;  %1635 = vperm.xlu0 %8255, %v1225_v21   ;;  %v1235_v21 = vld [vmem:[%s9229_s14 + $0x2c0] sm:$0xff] }
 0x1e8   : > { %v2106_v37 = vpop.f32.mrb[5].mxu1  ;;  %7526 = vmatprep.subr.bf16.mxu0 %v12192_v62 }
 0x1e9   : > { %v7527_v38 = vpack.c.bf16 %v7208_v30, %v2106_v37  ;;  %v1216_v30 = vld [vmem:[%s9229_s14 + $0x228] sm:$0xff] }
 0x1ea   : > { %1590 = vperm.xlu1 %8256, %v1216_v30   ;;  %v1227_v30 = vld [vmem:[%s9229_s14 + $0x280] sm:$0xff] }
 0x1eb   : > { %v7211_v41 = vpop.f32.mrb[6].mxu1  ;;  %7528 = vmatpush1.bf16.msra.mxu0 %v7527_v38  ;;  %1645 = vperm.xlu0 %8255, %v1227_v30   ;;  %v377_v30 = vld [vmem:[%s12183_s2 + $0x20] sm:$0xff] }
 0x1ec   : > { %v2116_v48 = vpop.f32.mrb[7].mxu1  ;;  %7529 = vmatprep.subr.bf16.mxu0 %v12192_v62 }
 0x1ed   : > { %v7530_v54 = vpack.c.bf16 %v7211_v41, %v2116_v48  ;;  %v1218_v41 = vld [vmem:[%s9229_s14 + $0x238] sm:$0xff] }
 0x1ee   : > { %1600 = vperm.xlu1 %8256, %v1218_v41   ;;  %v1229_v41 = vld [vmem:[%s9229_s14 + $0x290] sm:$0xff] }
 0x1ef   : > { %v7214_v55 = vpop.f32.mrb[8].mxu1  ;;  %7531 = vmatpush1.bf16.msra.mxu0 %v7530_v54  ;;  %1655 = vperm.xlu0 %8255, %v1229_v41   ;;  %v1240_v41 = vld [vmem:[%s9229_s14 + $0x2e8] sm:$0xff] }
 0x1f0   : > { %v2126_v2 = vpop.f32.mrb[9].mxu1  ;;  %7532 = vmatprep.subr.bf16.mxu0 %v12192_v62 }
 0x1f1   : > { %v7533_v3 = vpack.c.bf16 %v7214_v55, %v2126_v2  ;;  %v1220_v55 = vld [vmem:[%s9229_s14 + $0x248] sm:$0xff] }
 0x1f2   : > { %1610 = vperm.xlu1 %8256, %v1220_v55   ;;  %v1231_v55 = vld [vmem:[%s9229_s14 + $0x2a0] sm:$0xff] }
 0x1f3   : > { %v7217_v6 = vpop.f32.mrb[10].mxu1  ;;  %7534 = vmatpush1.bf16.msra.mxu0 %v7533_v3  ;;  %1665 = vperm.xlu0 %8255, %v1231_v55   ;;  %v384_v55 = vld [vmem:[%s12183_s2 + $0x58] sm:$0xff] }
 0x1f4   : > { %v2136_v11 = vpop.f32.mrb[11].mxu1  ;;  %7535 = vmatprep.subr.bf16.mxu0 %v12192_v62 }
 0x1f5   : > { %v7536_v16 = vpack.c.bf16 %v7217_v6, %v2136_v11  ;;  %v1222_v6 = vld [vmem:[%s9229_s14 + $0x258] sm:$0xff] }
 0x1f6   : > { %1620 = vperm.xlu1 %8256, %v1222_v6   ;;  %v1233_v6 = vld [vmem:[%s9229_s14 + $0x2b0] sm:$0xff] }
 0x1f7   : > { %v7220_v17 = vpop.f32.mrb[12].mxu1  ;;  %7537 = vmatpush1.bf16.msra.mxu0 %v7536_v16  ;;  %1675 = vperm.xlu0 %8255, %v1233_v6   ;;  %v387_v6 = vld [vmem:[%s12183_s2 + $0x70] sm:$0xff] }
 0x1f8   : > { %v2146_v25 = vpop.f32.mrb[13].mxu1  ;;  %7538 = vmatprep.subr.bf16.mxu0 %v12192_v62 }
 0x1f9   : > { %v7539_v26 = vpack.c.bf16 %v7220_v17, %v2146_v25  ;;  %v1224_v17 = vld [vmem:[%s9229_s14 + $0x268] sm:$0xff] }
 0x1fa   : > { %1630 = vperm.xlu1 %8256, %v1224_v17   ;;  %v376_v17 = vld [vmem:[%s12183_s2 + $0x18] sm:$0xff] }
 0x1fb   : > { %v7223_v29 = vpop.f32.mrb[14].mxu1  ;;  %7540 = vmatpush1.bf16.msra.mxu0 %v7539_v26  ;;  %1685 = vperm.xlu0 %8255, %v1235_v21   ;;  %v393_v21 = vld [vmem:[%s12183_s2 + $0xa0] sm:$0xff] }
 0x1fc   : > { %v2156_v34 = vpop.f32.mrb[15].mxu1  ;;  %7541 = vmatprep.subr.bf16.mxu0 %v12192_v62 }
 0x1fd   : > { %v7542_v37 = vpack.c.bf16 %v7223_v29, %v2156_v34  ;;  %v1226_v29 = vld [vmem:[%s9229_s14 + $0x278] sm:$0xff] }
 0x1fe   : > { %1640 = vperm.xlu1 %8256, %v1226_v29   ;;  %v1237_v29 = vld [vmem:[%s9229_s14 + $0x2d0] sm:$0xff] }
 0x1ff   : > { %v7226_v38 = vpop.f32.mrb[16].mxu1  ;;  %7543 = vmatpush1.bf16.msra.mxu0 %v7542_v37  ;;  %1695 = vperm.xlu0 %8255, %v1237_v29   ;;  %v397_v29 = vld [vmem:[%s12183_s2 + $0xc0] sm:$0xff] }
 0x200   : > { %v2166_v47 = vpop.f32.mrb[17].mxu1  ;;  %7544 = vmatprep.subr.bf16.mxu0 %v12192_v62 }
 0x201   : > { %v7545_v48 = vpack.c.bf16 %v7226_v38, %v2166_v47  ;;  %v1228_v38 = vld [vmem:[%s9229_s14 + $0x288] sm:$0xff] }
 0x202   : > { %1650 = vperm.xlu1 %8256, %v1228_v38   ;;  %v379_v38 = vld [vmem:[%s12183_s2 + $0x30] sm:$0xff] }
 0x203   : > { %v7229_v54 = vpop.f32.mrb[18].mxu1  ;;  %7546 = vmatpush1.bf16.msra.mxu0 %v7545_v48 }
 0x204   : > { %v2176_v63 = vpop.f32.mrb[19].mxu1  ;;  %7547 = vmatprep.subr.bf16.mxu0 %v12192_v62 }
 0x205   : > { %v7548_v2 = vpack.c.bf16 %v7229_v54, %v2176_v63  ;;  %v1230_v54 = vld [vmem:[%s9229_s14 + $0x298] sm:$0xff] }
 0x206   : > { %1660 = vperm.xlu1 %8256, %v1230_v54   ;;  %v1242_v54 = vld [vmem:[%s9229_s14 + $0x2f8] sm:$0xff] }
 0x207   : > { %v7232_v3 = vpop.f32.mrb[20].mxu1  ;;  %7549 = vmatpush1.bf16.msra.mxu0 %v7548_v2 }
 0x208   : > { %v2186_v10 = vpop.f32.mrb[21].mxu1  ;;  %7550 = vmatprep.subr.bf16.mxu0 %v12192_v62 }
 0x209   : > { %v7551_v11 = vpack.c.bf16 %v7232_v3, %v2186_v10  ;;  %v1232_v3 = vld [vmem:[%s9229_s14 + $0x2a8] sm:$0xff] }
 0x20a   : > { %1670 = vperm.xlu1 %8256, %v1232_v3   ;;  %v388_v3 = vld [vmem:[%s12183_s2 + $0x78] sm:$0xff] }
 0x20b   : > { %v7235_v16 = vpop.f32.mrb[22].mxu1  ;;  %7552 = vmatpush1.bf16.msra.mxu0 %v7551_v11  ;;  %v373_v11 = vld [vmem:[%s12183_s2] sm:$0xff] }
 0x20c   : > { %v2196_v22 = vpop.f32.mrb[23].mxu1  ;;  %7553 = vmatprep.subr.bf16.mxu0 %v12192_v62 }
 0x20d   : > { %v7554_v25 = vpack.c.bf16 %v7235_v16, %v2196_v22  ;;  %v1234_v16 = vld [vmem:[%s9229_s14 + $0x2b8] sm:$0xff]  ;;  %v375_v22 = vld [vmem:[%s12183_s2 + $0x10] sm:$0xff] }
 0x20e   : > { %1680 = vperm.xlu1 %8256, %v1234_v16   ;;  %v391_v16 = vld [vmem:[%s12183_s2 + $0x90] sm:$0xff] }
 0x20f   : > { %v7238_v26 = vpop.f32.mrb[24].mxu1  ;;  %7555 = vmatpush1.bf16.msra.mxu0 %v7554_v25  ;;  %v1236_v25 = vld [vmem:[%s9229_s14 + $0x2c8] sm:$0xff] }
 0x210   : > { %v2206_v33 = vpop.f32.mrb[25].mxu1  ;;  %7556 = vmatprep.subr.bf16.mxu0 %v12192_v62 }
 0x211   : > { %v7557_v34 = vpack.c.bf16 %v7238_v26, %v2206_v33  ;;  %v378_v26 = vld [vmem:[%s12183_s2 + $0x28] sm:$0xff]  ;;  %v1238_v33 = vld [vmem:[%s9229_s14 + $0x2d8] sm:$0xff] }
 0x212   : > { %1690 = vperm.xlu1 %8256, %v1236_v25   ;;  %v395_v25 = vld [vmem:[%s12183_s2 + $0xb0] sm:$0xff] }
 0x213   : > { %v7241_v37 = vpop.f32.mrb[26].mxu1  ;;  %7558 = vmatpush1.bf16.msra.mxu0 %v7557_v34  ;;  %v380_v34 = vld [vmem:[%s12183_s2 + $0x38] sm:$0xff] }
 0x214   : > { %v2216_v42 = vpop.f32.mrb[27].mxu1  ;;  %7559 = vmatprep.subr.bf16.mxu0 %v12192_v62 }
 0x215   : > { %v7560_v47 = vpack.c.bf16 %v7241_v37, %v2216_v42  ;;  %v1239_v37 = vld [vmem:[%s9229_s14 + $0x2e0] sm:$0xff]  ;;  %v382_v42 = vld [vmem:[%s12183_s2 + $0x48] sm:$0xff] }
 0x216   : > { %1700 = vperm.xlu1 %8256, %v1238_v33   ;;  %1705 = vperm.xlu0 %8255, %v1239_v37   ;;  %v399_v33 = vld [vmem:[%s12183_s2 + $0xd0] sm:$0xff]  ;;  %v401_v37 = vld [vmem:[%s12183_s2 + $0xe0] sm:$0xff] }
 0x217   : > { %v7244_v48 = vpop.f32.mrb[28].mxu1  ;;  %7561 = vmatpush1.bf16.msra.mxu0 %v7560_v47  ;;  %v1241_v47 = vld [vmem:[%s9229_s14 + $0x2f0] sm:$0xff] }
 0x218   : > { %v2226_v49 = vpop.f32.mrb[29].mxu1  ;;  %7562 = vmatprep.subr.bf16.mxu0 %v12192_v62 }
 0x219   : > { %v7563_v63 = vpack.c.bf16 %v7244_v48, %v2226_v49  ;;  %v381_v48 = vld [vmem:[%s12183_s2 + $0x40] sm:$0xff]  ;;  %v383_v49 = vld [vmem:[%s12183_s2 + $0x50] sm:$0xff] }
 0x21a   : > { %1710 = vperm.xlu1 %8256, %v1240_v41   ;;  %1715 = vperm.xlu0 %8255, %v1241_v47   ;;  %v403_v41 = vld [vmem:[%s12183_s2 + $0xf0] sm:$0xff]  ;;  %v405_v47 = vld [vmem:[%s12183_s2 + $0x100] sm:$0xff] }
 0x21b   : > { %v7247_v2 = vpop.f32.mrb[30].mxu1  ;;  %7564 = vmatpush1.bf16.msra.mxu0 %v7563_v63  ;;  %v386_v63 = vld [vmem:[%s12183_s2 + $0x68] sm:$0xff] }
 0x21c   : > { %v2236_v7 = vpop.f32.mrb[31].mxu1  ;;  %7565 = vmatprep.subr.bf16.mxu0 %v12192_v62 }
 0x21d   : > { %v7566_v10 = vpack.c.bf16 %v7247_v2, %v2236_v7  ;;  %v385_v2 = vld [vmem:[%s12183_s2 + $0x60] sm:$0xff]  ;;  %v390_v7 = vld [vmem:[%s12183_s2 + $0x88] sm:$0xff] }
 0x21e   : > { %1720 = vperm.xlu1 %8256, %v1242_v54   ;;  %v407_v54 = vld [vmem:[%s12183_s2 + $0x110] sm:$0xff] }
 0x21f   : > { %7567 = vmatpush1.bf16.msra.mxu0 %v7566_v10  ;;  %v389_v10 = vld [vmem:[%s12183_s2 + $0x80] sm:$0xff] }
 0x222   : > { %2310 = vmatmul.mubr.f32.vlgmr.msra.gmra.mrb[32].mxu0 %v373_v11  ;;  %v392_v11 = vld [vmem:[%s12183_s2 + $0x98] sm:$0xff] }
 0x223   : > { %2314 = vmatprep.mubr.f32.mxu0 %v376_v17  ;;  %v394_v17 = vld [vmem:[%s12183_s2 + $0xa8] sm:$0xff] }
 0x226   : > { %2315 = vmatmul.mubr.f32.gmra.mrb[34].mxu0 %v375_v22  ;;  %v396_v22 = vld [vmem:[%s12183_s2 + $0xb8] sm:$0xff] }
 0x227   : > { %2319 = vmatprep.mubr.f32.mxu0 %v378_v26  ;;  %v398_v26 = vld [vmem:[%s12183_s2 + $0xc8] sm:$0xff] }
 0x22a   : > { %2320 = vmatmul.mubr.f32.gmra.mrb[36].mxu0 %v377_v30  ;;  %v400_v30 = vld [vmem:[%s12183_s2 + $0xd8] sm:$0xff] }
 0x22b   : > { %2324 = vmatprep.mubr.f32.mxu0 %v380_v34  ;;  %v402_v34 = vld [vmem:[%s12183_s2 + $0xe8] sm:$0xff] }
 0x22e   : > { %2325 = vmatmul.mubr.f32.gmra.mrb[38].mxu0 %v379_v38  ;;  %v404_v38 = vld [vmem:[%s12183_s2 + $0xf8] sm:$0xff] }
 0x22f   : > { %2329 = vmatprep.mubr.f32.mxu0 %v382_v42  ;;  %v406_v42 = vld [vmem:[%s12183_s2 + $0x108] sm:$0xff] }
 0x232   : > { %2330 = vmatmul.mubr.f32.gmra.mrb[40].mxu0 %v381_v48  ;;  %v408_v48 = vld [vmem:[%s12183_s2 + $0x118] sm:$0xff] }
 0x233   : > { %2334 = vmatprep.mubr.f32.mxu0 %v384_v55  ;;  %v410_v55 = vld [vmem:[%s12183_s2 + $0x128] sm:$0xff] }
 0x236   : > { %2335 = vmatmul.mubr.f32.gmra.mrb[42].mxu0 %v383_v49  ;;  %v409_v49 = vld [vmem:[%s12183_s2 + $0x120] sm:$0xff] }
 0x237   : > { %2339 = vmatprep.mubr.f32.mxu0 %v386_v63  ;;  %v412_v63 = vld [vmem:[%s12183_s2 + $0x138] sm:$0xff] }
 0x23a   : > { %2340 = vmatmul.mubr.f32.gmra.mrb[44].mxu0 %v385_v2  ;;  %v411_v2 = vld [vmem:[%s12183_s2 + $0x130] sm:$0xff] }
 0x23b   : > { %2344 = vmatprep.mubr.f32.mxu0 %v388_v3  ;;  %v414_v3 = vld [vmem:[%s12183_s2 + $0x148] sm:$0xff] }
 0x23e   : > { %2345 = vmatmul.mubr.f32.gmra.mrb[46].mxu0 %v387_v6  ;;  %v413_v6 = vld [vmem:[%s12183_s2 + $0x140] sm:$0xff] }
 0x23f   : > { %2349 = vmatprep.mubr.f32.mxu0 %v390_v7  ;;  %v416_v7 = vld [vmem:[%s12183_s2 + $0x158] sm:$0xff] }
 0x242   : > { %2350 = vmatmul.mubr.f32.gmra.mrb[48].mxu0 %v389_v10  ;;  %v415_v10 = vld [vmem:[%s12183_s2 + $0x150] sm:$0xff] }
 0x243   : > { %2354 = vmatprep.mubr.f32.mxu0 %v392_v11  ;;  %v418_v11 = vld [vmem:[%s12183_s2 + $0x168] sm:$0xff] }
 0x246   : > { %2355 = vmatmul.mubr.f32.gmra.mrb[50].mxu0 %v391_v16  ;;  %v417_v16 = vld [vmem:[%s12183_s2 + $0x160] sm:$0xff] }
 0x247   : > { %2359 = vmatprep.mubr.f32.mxu0 %v394_v17  ;;  %v420_v17 = vld [vmem:[%s12183_s2 + $0x178] sm:$0xff] }
 0x24a   : > { %2360 = vmatmul.mubr.f32.gmra.mrb[52].mxu0 %v393_v21  ;;  %v419_v21 = vld [vmem:[%s12183_s2 + $0x170] sm:$0xff] }
 0x24b   : > { %2364 = vmatprep.mubr.f32.mxu0 %v396_v22  ;;  %v422_v22 = vld [vmem:[%s12183_s2 + $0x188] sm:$0xff] }
 0x24e   : > { %2365 = vmatmul.mubr.f32.gmra.mrb[54].mxu0 %v395_v25  ;;  %v421_v25 = vld [vmem:[%s12183_s2 + $0x180] sm:$0xff] }
 0x24f   : > { %2369 = vmatprep.mubr.f32.mxu0 %v398_v26  ;;  %v424_v26 = vld [vmem:[%s12183_s2 + $0x198] sm:$0xff] }
 0x252   : > { %2370 = vmatmul.mubr.f32.gmra.mrb[56].mxu0 %v397_v29  ;;  %v423_v29 = vld [vmem:[%s12183_s2 + $0x190] sm:$0xff] }
 0x253   : > { %2374 = vmatprep.mubr.f32.mxu0 %v400_v30  ;;  %v426_v30 = vld [vmem:[%s12183_s2 + $0x1a8] sm:$0xff] }
 0x256   : > { %2375 = vmatmul.mubr.f32.gmra.mrb[58].mxu0 %v399_v33  ;;  %v425_v33 = vld [vmem:[%s12183_s2 + $0x1a0] sm:$0xff] }
 0x257   : > { %2379 = vmatprep.mubr.f32.mxu0 %v402_v34  ;;  %v428_v34 = vld [vmem:[%s12183_s2 + $0x1b8] sm:$0xff] }
 0x25a   : > { %2380 = vmatmul.mubr.f32.gmra.mrb[60].mxu0 %v401_v37  ;;  %v427_v37 = vld [vmem:[%s12183_s2 + $0x1b0] sm:$0xff] }
 0x25b   : > { %2384 = vmatprep.mubr.f32.mxu0 %v404_v38  ;;  %v430_v38 = vld [vmem:[%s12183_s2 + $0x1c8] sm:$0xff] }
 0x25e   : > { %2385 = vmatmul.mubr.f32.gmra.mrb[62].mxu0 %v403_v41  ;;  %v429_v41 = vld [vmem:[%s12183_s2 + $0x1c0] sm:$0xff] }
 0x25f   : > { %2389 = vmatprep.mubr.f32.mxu0 %v406_v42  ;;  %v432_v42 = vld [vmem:[%s12183_s2 + $0x1d8] sm:$0xff] }
 0x262   : > { %2390 = vmatmul.mubr.f32.gmra.mrb[64].mxu0 %v405_v47  ;;  %v431_v47 = vld [vmem:[%s12183_s2 + $0x1d0] sm:$0xff] }
 0x263   : > { %2394 = vmatprep.mubr.f32.mxu0 %v408_v48  ;;  %v434_v48 = vld [vmem:[%s12183_s2 + $0x1e8] sm:$0xff] }
 0x266   : > { %2395 = vmatmul.mubr.f32.gmra.mrb[66].mxu0 %v407_v54  ;;  %v433_v54 = vld [vmem:[%s12183_s2 + $0x1e0] sm:$0xff] }
 0x267   : > { %2399 = vmatprep.mubr.f32.mxu0 %v410_v55  ;;  %v436_v55 = vld [vmem:[%s12183_s2 + $0x1f8] sm:$0xff] }
 0x26a   : > { %2400 = vmatmul.mubr.f32.gmra.mrb[68].mxu0 %v409_v49  ;;  %v435_v49 = vld [vmem:[%s12183_s2 + $0x1f0] sm:$0xff] }
 0x26b   : > { %2404 = vmatprep.mubr.f32.mxu0 %v412_v63  ;;  %v438_v63 = vld [vmem:[%s12183_s2 + $0x208] sm:$0xff] }
 0x26e   : > { %2405 = vmatmul.mubr.f32.gmra.mrb[70].mxu0 %v411_v2  ;;  %v437_v2 = vld [vmem:[%s12183_s2 + $0x200] sm:$0xff] }
 0x26f   : > { %2409 = vmatprep.mubr.f32.mxu0 %v414_v3  ;;  %v440_v3 = vld [vmem:[%s12183_s2 + $0x218] sm:$0xff] }
 0x272   : > { %2410 = vmatmul.mubr.f32.gmra.mrb[72].mxu0 %v413_v6  ;;  %v439_v6 = vld [vmem:[%s12183_s2 + $0x210] sm:$0xff] }
 0x273   : > { %2414 = vmatprep.mubr.f32.mxu0 %v416_v7  ;;  %v442_v7 = vld [vmem:[%s12183_s2 + $0x228] sm:$0xff] }
 0x276   : > { %2415 = vmatmul.mubr.f32.gmra.mrb[74].mxu0 %v415_v10  ;;  %v441_v10 = vld [vmem:[%s12183_s2 + $0x220] sm:$0xff] }
 0x277   : > { %2419 = vmatprep.mubr.f32.mxu0 %v418_v11  ;;  %v444_v11 = vld [vmem:[%s12183_s2 + $0x238] sm:$0xff] }
 0x27a   : > { %2420 = vmatmul.mubr.f32.gmra.mrb[76].mxu0 %v417_v16  ;;  %v443_v16 = vld [vmem:[%s12183_s2 + $0x230] sm:$0xff] }
 0x27b   : > { %2424 = vmatprep.mubr.f32.mxu0 %v420_v17  ;;  %v446_v17 = vld [vmem:[%s12183_s2 + $0x248] sm:$0xff] }
 0x27e   : > { %2425 = vmatmul.mubr.f32.gmra.mrb[78].mxu0 %v419_v21  ;;  %v445_v21 = vld [vmem:[%s12183_s2 + $0x240] sm:$0xff] }
 0x27f   : > { %2429 = vmatprep.mubr.f32.mxu0 %v422_v22  ;;  %v448_v22 = vld [vmem:[%s12183_s2 + $0x258] sm:$0xff] }
 0x282   : > { %2430 = vmatmul.mubr.f32.gmra.mrb[80].mxu0 %v421_v25  ;;  %v447_v25 = vld [vmem:[%s12183_s2 + $0x250] sm:$0xff] }
 0x283   : > { %2434 = vmatprep.mubr.f32.mxu0 %v424_v26  ;;  %v450_v26 = vld [vmem:[%s12183_s2 + $0x268] sm:$0xff] }
 0x286   : > { %2435 = vmatmul.mubr.f32.gmra.mrb[82].mxu0 %v423_v29  ;;  %v449_v29 = vld [vmem:[%s12183_s2 + $0x260] sm:$0xff] }
 0x287   : > { %2439 = vmatprep.mubr.f32.mxu0 %v426_v30  ;;  %v452_v30 = vld [vmem:[%s12183_s2 + $0x278] sm:$0xff] }
 0x28a   : > { %2440 = vmatmul.mubr.f32.gmra.mrb[84].mxu0 %v425_v33  ;;  %v451_v33 = vld [vmem:[%s12183_s2 + $0x270] sm:$0xff] }
 0x28b   : > { %2444 = vmatprep.mubr.f32.mxu0 %v428_v34  ;;  %v454_v34 = vld [vmem:[%s12183_s2 + $0x288] sm:$0xff] }
 0x28e   : > { %2445 = vmatmul.mubr.f32.gmra.mrb[86].mxu0 %v427_v37  ;;  %v453_v37 = vld [vmem:[%s12183_s2 + $0x280] sm:$0xff] }
 0x28f   : > { %2449 = vmatprep.mubr.f32.mxu0 %v430_v38  ;;  %v456_v38 = vld [vmem:[%s12183_s2 + $0x298] sm:$0xff] }
 0x292   : > { %2450 = vmatmul.mubr.f32.gmra.mrb[88].mxu0 %v429_v41  ;;  %v455_v41 = vld [vmem:[%s12183_s2 + $0x290] sm:$0xff] }
 0x293   : > { %2454 = vmatprep.mubr.f32.mxu0 %v432_v42  ;;  %v458_v42 = vld [vmem:[%s12183_s2 + $0x2a8] sm:$0xff] }
 0x296   : > { %2455 = vmatmul.mubr.f32.gmra.mrb[90].mxu0 %v431_v47  ;;  %v457_v47 = vld [vmem:[%s12183_s2 + $0x2a0] sm:$0xff] }
 0x297   : > { %2459 = vmatprep.mubr.f32.mxu0 %v434_v48  ;;  %v460_v48 = vld [vmem:[%s12183_s2 + $0x2b8] sm:$0xff] }
 0x29a   : > { %2460 = vmatmul.mubr.f32.gmra.mrb[92].mxu0 %v433_v54  ;;  %v459_v54 = vld [vmem:[%s12183_s2 + $0x2b0] sm:$0xff] }
 0x29b   : > { %2464 = vmatprep.mubr.f32.mxu0 %v436_v55  ;;  %v462_v55 = vld [vmem:[%s12183_s2 + $0x2c8] sm:$0xff] }
 0x29e   : > { %2465 = vmatmul.mubr.f32.gmra.mrb[94].mxu0 %v435_v49  ;;  %v461_v49 = vld [vmem:[%s12183_s2 + $0x2c0] sm:$0xff] }
 0x29f   : > { %2469 = vmatprep.mubr.f32.mxu0 %v438_v63  ;;  %v464_v63 = vld [vmem:[%s12183_s2 + $0x2d8] sm:$0xff] }
 0x2a2   : > { %2470 = vmatmul.mubr.f32.gmra.mrb[96].mxu0 %v437_v2  ;;  %v463_v2 = vld [vmem:[%s12183_s2 + $0x2d0] sm:$0xff] }
 0x2a3   : > { %2474 = vmatprep.mubr.f32.mxu0 %v440_v3  ;;  %v466_v3 = vld [vmem:[%s12183_s2 + $0x2e8] sm:$0xff] }
 0x2a6   : > { %2475 = vmatmul.mubr.f32.gmra.mrb[98].mxu0 %v439_v6  ;;  %v465_v6 = vld [vmem:[%s12183_s2 + $0x2e0] sm:$0xff] }
 0x2a7   : > { %2479 = vmatprep.mubr.f32.mxu0 %v442_v7  ;;  %v468_v7 = vld [vmem:[%s12183_s2 + $0x2f8] sm:$0xff] }
 0x2aa   : > { %2480 = vmatmul.mubr.f32.gmra.mrb[100].mxu0 %v441_v10  ;;  %v467_v10 = vld [vmem:[%s12183_s2 + $0x2f0] sm:$0xff] }
 0x2ab   : > { %2484 = vmatprep.mubr.f32.mxu0 %v444_v11  ;;  %v470_v11 = vld [vmem:[%s12183_s2 + $0x308] sm:$0xff] }
 0x2ae   : > { %2485 = vmatmul.mubr.f32.gmra.mrb[102].mxu0 %v443_v16  ;;  %v469_v16 = vld [vmem:[%s12183_s2 + $0x300] sm:$0xff] }
 0x2af   : > { %2489 = vmatprep.mubr.f32.mxu0 %v446_v17  ;;  %v472_v17 = vld [vmem:[%s12183_s2 + $0x318] sm:$0xff] }
 0x2b2   : > { %2490 = vmatmul.mubr.f32.gmra.mrb[104].mxu0 %v445_v21  ;;  %v471_v21 = vld [vmem:[%s12183_s2 + $0x310] sm:$0xff] }
 0x2b3   : > { %2494 = vmatprep.mubr.f32.mxu0 %v448_v22  ;;  %v474_v22 = vld [vmem:[%s12183_s2 + $0x328] sm:$0xff] }
 0x2b6   : > { %2495 = vmatmul.mubr.f32.gmra.mrb[106].mxu0 %v447_v25  ;;  %v473_v25 = vld [vmem:[%s12183_s2 + $0x320] sm:$0xff] }
 0x2b7   : > { %2499 = vmatprep.mubr.f32.mxu0 %v450_v26  ;;  %v1725_v26 = vsub.s32 1, %v9055_v46 }
 0x2ba   : > { %2500 = vmatmul.mubr.f32.gmra.mrb[108].mxu0 %v449_v29  ;;  %v476_v29 = vld [vmem:[%s12183_s2 + $0x338] sm:$0xff] }
 0x2bb   : > { %2504 = vmatprep.mubr.f32.mxu0 %v452_v30  ;;  %v1246_v30 = vpop.permute.xlu0 %1245 }
 0x2be   : > { %2505 = vmatmul.mubr.f32.gmra.mrb[110].mxu0 %v451_v33  ;;  %v475_v33 = vld [vmem:[%s12183_s2 + $0x330] sm:$0xff] }
 0x2bf   : > { %2509 = vmatprep.mubr.f32.mxu0 %v454_v34  ;;  %v8385_v34 = vld [vmem:[%s12187_s6] sm:$0xff] }
 0x2c2   : > { %2510 = vmatmul.mubr.f32.gmra.mrb[112].mxu0 %v453_v37  ;;  %v9658_v37 = vrot.slane %v8385_v34, %v1725_v26  ;;  %v566_v26 = vld [vmem:[#allocation2 + $0x8] sm:$0xff] }
 0x2c3   : > { %2514 = vmatprep.mubr.f32.mxu0 %v456_v38  ;;  %v1825_v38 = vsub.s32 2, %v9055_v46  ;;  %2950 = vmatprep.mubr.f32.mxu1 %v566_v26  ;;  %v487_v26 = vld [vmem:[%s12183_s2 + $0x390] sm:$0xff] }
 0x2c6   : > { %2515 = vmatmul.mubr.f32.gmra.mrb[114].mxu0 %v455_v41  ;;  %v478_v41 = vld [vmem:[%s12183_s2 + $0x348] sm:$0xff] }
 0x2c7   : > { %2519 = vmatprep.mubr.f32.mxu0 %v458_v42  ;;  %v477_v42 = vld [vmem:[%s12183_s2 + $0x340] sm:$0xff] }
 0x2ca   : > { %2520 = vmatmul.mubr.f32.gmra.mrb[116].mxu0 %v457_v47  ;;  %v9667_v47 = vrot.slane %v8385_v34, %v1825_v38  ;;  %v483_v34 = vld [vmem:[%s12183_s2 + $0x370] sm:$0xff] }
 0x2cb   : > { %2524 = vmatprep.mubr.f32.mxu0 %v460_v48  ;;  %v1727_v48 = vmul.f32 %v9658_v37, %v1246_v30 }
 0x2ce   : > { %2525 = vmatmul.mubr.f32.gmra.mrb[118].mxu0 %v459_v54  ;;  %v480_v54 = vld [vmem:[%s12183_s2 + $0x358] sm:$0xff] }
 0x2cf   : > { %2529 = vmatprep.mubr.f32.mxu0 %v462_v55  ;;  %v1251_v55 = vpop.permute.xlu0 %1250 }
 0x2d0   : > { %v1728_v46 = vmul.f32 %v9658_v37, %v1251_v55 }
 0x2d2   : > { %2530 = vmatmul.mubr.f32.gmra.mrb[120].mxu0 %v461_v49  ;;  %v1256_v49 = vpop.permute.xlu1 %1255 }
 0x2d3   : > { %2534 = vmatprep.mubr.f32.mxu0 %v464_v63  ;;  %v479_v63 = vld [vmem:[%s12183_s2 + $0x350] sm:$0xff] }
 0x2d6   : > { %2535 = vmatmul.mubr.f32.gmra.mrb[122].mxu0 %v463_v2  ;;  %v9678_v2 = vadd.f32 %v9667_v47, %v1727_v48  ;;  %v486_v48 = vld [vmem:[%s12183_s2 + $0x388] sm:$0xff] }
 0x2d7   : > { %2539 = vmatprep.mubr.f32.mxu0 %v466_v3  ;;  %v482_v3 = vld [vmem:[%s12183_s2 + $0x368] sm:$0xff] }
 0x2da   : > { %2540 = vmatmul.mubr.f32.gmra.mrb[124].mxu0 %v465_v6 }
 0x2db   : > { %2544 = vmatprep.mubr.f32.mxu0 %v468_v7  ;;  %v9684_v7 = vadd.f32 %v9667_v47, %v1728_v46 }
 0x2de   : > { %2545 = vmatmul.mubr.f32.gmra.mrb[126].mxu0 %v467_v10 }
 0x2df   : > { %2549 = vmatprep.mubr.f32.mxu0 %v470_v11  ;;  %v481_v11 = vld [vmem:[%s12183_s2 + $0x360] sm:$0xff] }
 0x2e2   : > { %2550 = vmatmul.mubr.f32.gmra.mrb[128].mxu0 %v469_v16  ;;  %v1729_v16 = vmul.f32 %v9658_v37, %v1256_v49 }
 0x2e3   : > { %2554 = vmatprep.mubr.f32.mxu0 %v472_v17 }
 0x2e4   : > { %v9700_v38 = vadd.f32 %v9667_v47, %v1729_v16 }
 0x2e6   : > { %2555 = vmatmul.mubr.f32.gmra.mrb[130].mxu0 %v471_v21  ;;  %v484_v21 = vld [vmem:[%s12183_s2 + $0x378] sm:$0xff]  ;;  %12289 = vst [vmem:[#allocation5_spill] sm:$0xff] %v9700_v38 }
 0x2e7   : > { %2559 = vmatprep.mubr.f32.mxu0 %v474_v22  ;;  %v1261_v22 = vpop.permute.xlu1 %1260 }
 0x2ea   : > { %2560 = vmatmul.mubr.f32.gmra.mrb[132].mxu0 %v473_v25 }
 0x2eb   : > { %2564 = vmatprep.mubr.f32.mxu0 %v476_v29  ;;  %v1730_v29 = vmul.f32 %v9658_v37, %v1261_v22  ;;  %v1271_v16 = vpop.permute.xlu1 %1270 }
 0x2ed   : > { %v9706_v55 = vadd.f32 %v9667_v47, %v1730_v29 }
 0x2ee   : > { %2565 = vmatmul.mubr.f32.gmra.mrb[134].mxu0 %v475_v33 }
 0x2ef   : > { %2569 = vmatprep.mubr.f32.mxu0 %v478_v41  ;;  %12290 = vst [vmem:[#allocation6_spill] sm:$0xff] %v9706_v55 }
 0x2f2   : > { %2570 = vmatmul.mubr.f32.gmra.mrb[136].mxu0 %v477_v42 }
 0x2f3   : > { %2574 = vmatprep.mubr.f32.mxu0 %v480_v54 }
 0x2f5   : > { %v2311_v6 = vpop.f32.mrb[32].mxu0 }
 0x2f6   : > { %v2313_v10 = vpop.f32.mrb[33].mxu0  ;;  %2575 = vmatmul.mubr.f32.gmra.mrb[138].mxu0 %v479_v63  ;;  %v2312_v17 = vadd.f32 %v2311_v6, %v9678_v2  ;;  %v1266_v63 = vpop.permute.xlu0 %1265 }
 0x2f7   : > { %2579 = vmatprep.mubr.f32.mxu0 %v482_v3  ;;  %v485_v3 = vld [vmem:[%s12183_s2 + $0x380] sm:$0xff]  ;;  %v1731_v6 = vmul.f32 %v9658_v37, %v1266_v63 }
 0x2f8   : > { %v2790_v41 = vmax.f32 %v2312_v17, 0.0 }
 0x2f9   : > { %v2316_v25 = vpop.f32.mrb[34].mxu0  ;;  %v9723_v29 = vadd.f32 %v9667_v47, %v1731_v6  ;;  %v492_v6 = vld [vmem:[%s12183_s2 + $0x3b8] sm:$0xff] }
 0x2fa   : > { %v2317_v30 = vadd.f32 %v2316_v25, %v9684_v7  ;;  %v2318_v33 = vpop.f32.mrb[35].mxu0  ;;  %2580 = vmatmul.mubr.f32.gmra.mrb[140].mxu0 %v481_v11  ;;  %v488_v11 = vld [vmem:[%s12183_s2 + $0x398] sm:$0xff] }
 0x2fb   : > { %2584 = vmatprep.mubr.f32.mxu0 %v484_v21  ;;  %v1732_v21 = vmul.f32 %v9658_v37, %v1271_v16  ;;  %12291 = vst [vmem:[#allocation7_spill] sm:$0xff] %v9723_v29 }
 0x2fc   : > { %v2791_v42 = vmax.f32 %v2317_v30, 0.0 }
 0x2fd   : > { %v2321_v54 = vpop.f32.mrb[36].mxu0 }
 0x2fe   : > { %v7569_v46 = vpack.c.bf16 %v2791_v42, %v2790_v41  ;;  %v2323_v49 = vpop.f32.mrb[37].mxu0  ;;  %2585 = vmatmul.mubr.f32.gmra.mrb[142].mxu0 %v483_v34  ;;  %v2322_v10 = vadd.f32 %v2321_v54, %v9700_v38  ;;  %v490_v34 = vld [vmem:[%s12183_s2 + $0x3a8] sm:$0xff]  ;;  %v9729_v42 = vadd.f32 %v9667_v47, %v1732_v21 }
 0x2ff   : > { %2589 = vmatprep.mubr.f32.mxu0 %v486_v48  ;;  %v489_v49 = vld [vmem:[%s12183_s2 + $0x3a0] sm:$0xff] }
 0x300   : > { %7570 = vmatpush1.bf16.msra.mxu1 %v7569_v46  ;;  %v2792_v30 = vmax.f32 %v2322_v10, 0.0  ;;  %12292 = vst [vmem:[#allocation8_spill] sm:$0xff] %v9729_v42  ;;  %v1276_v46 = vpop.permute.xlu0 %1275  ;;  %v1281_v10 = vpop.permute.xlu1 %1280 }
 0x301   : > { %v2326_v17 = vpop.f32.mrb[38].mxu0  ;;  %7571 = vmatprep.subr.bf16.mxu1 %v12192_v62  ;;  %v1733_v63 = vmul.f32 %v9658_v37, %v1276_v46  ;;  %v1734_v16 = vmul.f32 %v9658_v37, %v1281_v10 }
 0x302   : > { %v2327_v22 = vadd.f32 %v2326_v17, %v9706_v55  ;;  %v2328_v25 = vpop.f32.mrb[39].mxu0  ;;  %2590 = vmatmul.mubr.f32.gmra.mrb[144].mxu0 %v485_v3 }
 0x303   : > { %2594 = vmatprep.mubr.f32.mxu0 %v488_v11  ;;  %v9746_v25 = vadd.f32 %v9667_v47, %v1733_v63 }
 0x304   : > { %v2793_v33 = vmax.f32 %v2327_v22, 0.0  ;;  %v491_v22 = vld [vmem:[%s12183_s2 + $0x3b0] sm:$0xff]  ;;  %v1286_v46 = vpop.permute.xlu0 %1285  ;;  %v1291_v10 = vpop.permute.xlu1 %1290 }
 0x305   : > { %v2331_v41 = vpop.f32.mrb[40].mxu0  ;;  %12293 = vst [vmem:[#allocation9_spill] sm:$0xff] %v9746_v25  ;;  %v1735_v63 = vmul.f32 %v9658_v37, %v1286_v46 }
 0x306   : > { %v7572_v48 = vpack.c.bf16 %v2793_v33, %v2792_v30  ;;  %v2333_v54 = vpop.f32.mrb[41].mxu0  ;;  %2595 = vmatmul.mubr.f32.gmra.mrb[146].mxu0 %v487_v26  ;;  %v2332_v3 = vadd.f32 %v2331_v41, %v9723_v29  ;;  %v494_v33 = vld [vmem:[%s12183_s2 + $0x3c8] sm:$0xff]  ;;  %v9752_v41 = vadd.f32 %v9667_v47, %v1734_v16  ;;  %v1736_v16 = vmul.f32 %v9658_v37, %v1291_v10 }
 0x307   : > { %2599 = vmatprep.mubr.f32.mxu0 %v490_v34 }
 0x308   : > { %7573 = vmatpush1.bf16.msra.mxu1 %v7572_v48  ;;  %v2794_v26 = vmax.f32 %v2332_v3, 0.0  ;;  %12294 = vst [vmem:[#allocation10_spill] sm:$0xff] %v9752_v41 }
 0x309   : > { %v2336_v11 = vpop.f32.mrb[42].mxu0  ;;  %7574 = vmatprep.subr.bf16.mxu1 %v12192_v62 }
 0x30a   : > { %v2337_v17 = vadd.f32 %v2336_v11, %v9729_v42  ;;  %v2338_v21 = vpop.f32.mrb[43].mxu0  ;;  %2600 = vmatmul.mubr.f32.gmra.mrb[148].mxu0 %v489_v49  ;;  %v493_v49 = vld [vmem:[%s12183_s2 + $0x3c0] sm:$0xff] }
 0x30b   : > { %2604 = vmatprep.mubr.f32.mxu0 %v492_v6  ;;  %v496_v6 = vld [vmem:[%s12183_s2 + $0x3d8] sm:$0xff] }
 0x30c   : > { %v2795_v30 = vmax.f32 %v2337_v17, 0.0 }
 0x30d   : > { %v2341_v34 = vpop.f32.mrb[44].mxu0 }
 0x30e   : > { %v7575_v48 = vpack.c.bf16 %v2795_v30, %v2794_v26  ;;  %v2343_v54 = vpop.f32.mrb[45].mxu0  ;;  %2605 = vmatmul.mubr.f32.gmra.mrb[150].mxu0 %v491_v22  ;;  %v2342_v3 = vadd.f32 %v2341_v34, %v9746_v25  ;;  %v495_v22 = vld [vmem:[%s12183_s2 + $0x3d0] sm:$0xff]  ;;  %v9769_v26 = vadd.f32 %v9667_v47, %v1735_v63  ;;  %v498_v34 = vld [vmem:[%s12183_s2 + $0x3e8] sm:$0xff]  ;;  %v497_v63 = vld [vmem:[%s12183_s2 + $0x3e0] sm:$0xff] }
 0x30f   : > { %2609 = vmatprep.mubr.f32.mxu0 %v494_v33  ;;  %v9775_v54 = vadd.f32 %v9667_v47, %v1736_v16  ;;  %v1301_v16 = vpop.permute.xlu1 %1300  ;;  %v626_v25 = vld [vmem:[#allocation2 + $0x1e8] sm:$0xff] }
 0x310   : > { %7576 = vmatpush1.bf16.msra.mxu1 %v7575_v48  ;;  %12295 = vst [vmem:[#allocation11_spill] sm:$0xff] %v9769_v26  ;;  %v2796_v30 = vmax.f32 %v2342_v3, 0.0 }
 0x311   : > { %v2346_v11 = vpop.f32.mrb[46].mxu0  ;;  %7577 = vmatprep.subr.bf16.mxu1 %v12192_v62  ;;  %12296 = vst [vmem:[#allocation12_spill] sm:$0xff] %v9775_v54 }
 0x312   : > { %v2347_v17 = vadd.f32 %v2346_v11, %v9752_v41  ;;  %v2348_v21 = vpop.f32.mrb[47].mxu0  ;;  %2610 = vmatmul.mubr.f32.gmra.mrb[152].mxu0 %v493_v49  ;;  %v500_v11 = vld [vmem:[%s12183_s2 + $0x3f8] sm:$0xff]  ;;  %v619_v41 = vld [vmem:[#allocation2 + $0x1b0] sm:$0xff] }
 0x313   : > { %2614 = vmatprep.mubr.f32.mxu0 %v496_v6  ;;  %v1296_v6 = vpop.permute.xlu0 %1295  ;;  %v1738_v21 = vmul.f32 %v9658_v37, %v1301_v16 }
 0x314   : > { %v2797_v33 = vmax.f32 %v2347_v17, 0.0  ;;  %v1737_v3 = vmul.f32 %v9658_v37, %v1296_v6 }
 0x315   : > { %v2351_v48 = vpop.f32.mrb[48].mxu0  ;;  %v9798_v16 = vadd.f32 %v9667_v47, %v1738_v21  ;;  %v1311_v21 = vpop.permute.xlu1 %1310 }
 0x316   : > { %v7578_v46 = vpack.c.bf16 %v2797_v33, %v2796_v30  ;;  %v2353_v49 = vpop.f32.mrb[49].mxu0  ;;  %2615 = vmatmul.mubr.f32.gmra.mrb[154].mxu0 %v495_v22  ;;  %v2352_v10 = vadd.f32 %v2351_v48, %v9769_v26  ;;  %v499_v33 = vld [vmem:[%s12183_s2 + $0x3f0] sm:$0xff] }
 0x317   : > { %2619 = vmatprep.mubr.f32.mxu0 %v498_v34  ;;  %v9792_v34 = vadd.f32 %v9667_v47, %v1737_v3  ;;  %v502_v49 = vld [vmem:[%s12183_s2 + $0x408] sm:$0xff]  ;;  %12298 = vst [vmem:[#allocation14_spill] sm:$0xff] %v9798_v16  ;;  %v501_v3 = vld [vmem:[%s12183_s2 + $0x400] sm:$0xff]  ;;  %v571_v26 = vld [vmem:[#allocation2 + $0x30] sm:$0xff] }
 0x318   : > { %7579 = vmatpush1.bf16.msra.mxu1 %v7578_v46  ;;  %v2798_v48 = vmax.f32 %v2352_v10, 0.0 }
 0x319   : > { %v2356_v17 = vpop.f32.mrb[50].mxu0  ;;  %7580 = vmatprep.subr.bf16.mxu1 %v12192_v62  ;;  %12297 = vst [vmem:[#allocation13_spill] sm:$0xff] %v9792_v34 }
 0x31a   : > { %v2357_v22 = vadd.f32 %v2356_v17, %v9775_v54  ;;  %v2358_v30 = vpop.f32.mrb[51].mxu0  ;;  %2620 = vmatmul.mubr.f32.gmra.mrb[156].mxu0 %v497_v63 }
 0x31b   : > { %2624 = vmatprep.mubr.f32.mxu0 %v500_v11  ;;  %v1306_v11 = vpop.permute.xlu0 %1305  ;;  %v504_v30 = vld [vmem:[%s12183_s2 + $0x418] sm:$0xff] }
 0x31c   : > { %v2799_v46 = vmax.f32 %v2357_v22, 0.0  ;;  %v1739_v10 = vmul.f32 %v9658_v37, %v1306_v11 }
 0x31d   : > { %v2361_v6 = vpop.f32.mrb[52].mxu0 }
 0x31e   : > { %v7581_v17 = vpack.c.bf16 %v2799_v46, %v2798_v48  ;;  %v2363_v63 = vpop.f32.mrb[53].mxu0  ;;  %2625 = vmatmul.mubr.f32.gmra.mrb[158].mxu0 %v499_v33  ;;  %v2362_v22 = vadd.f32 %v2361_v6, %v9792_v34  ;;  %v12299_v48 = vmov 0.0|0.0   ;;  %v1740_v33 = vmul.f32 %v9658_v37, %v1311_v21  ;;  %v503_v6 = vld [vmem:[%s12183_s2 + $0x410] sm:$0xff]  ;;  %v506_v34 = vld [vmem:[%s12183_s2 + $0x428] sm:$0xff] }
 0x31f   : > { %2629 = vmatprep.mubr.f32.mxu0 %v502_v49 }
 0x320   : > { %7582 = vmatpush1.bf16.msra.mxu1 %v7581_v17  ;;  %v9815_v17 = vadd.f32 %v9667_v47, %v1739_v10  ;;  %v2800_v63 = vmax.f32 %v2362_v22, 0.0  ;;  %v9821_v21 = vadd.f32 %v9667_v47, %v1740_v33  ;;  %v505_v10 = vld [vmem:[%s12183_s2 + $0x420] sm:$0xff]  ;;  %v1321_v33 = vpop.permute.xlu1 %1320 }
 0x321   : > { %v2366_v62 = vpop.f32.mrb[54].mxu0  ;;  %7583 = vmatprep.subr.bf16.mxu1 %v12299_v48 }
 0x322   : > { %v2367_v46 = vadd.f32 %v2366_v62, %v9798_v16  ;;  %v2368_v49 = vpop.f32.mrb[55].mxu0  ;;  %2630 = vmatmul.mubr.f32.gmra.mrb[160].mxu0 %v501_v3  ;;  %12300 = vst [vmem:[#allocation15_spill] sm:$0xff] %v9815_v17  ;;  %12301 = vst [vmem:[#allocation16_spill] sm:$0xff] %v9821_v21 }
 0x323   : > { %2634 = vmatprep.mubr.f32.mxu0 %v504_v30  ;;  %v1316_v30 = vpop.permute.xlu0 %1315  ;;  %v508_v49 = vld [vmem:[%s12183_s2 + $0x438] sm:$0xff] }
 0x324   : > { %v2801_v11 = vmax.f32 %v2367_v46, 0.0  ;;  %v1741_v22 = vmul.f32 %v9658_v37, %v1316_v30  ;;  %v510_v30 = vld [vmem:[%s12183_s2 + $0x448] sm:$0xff] }
 0x325   : > { %v2371_v54 = vpop.f32.mrb[56].mxu0 }
 0x326   : > { %v7584_v62 = vpack.c.bf16 %v2801_v11, %v2800_v63  ;;  %v2373_v3 = vpop.f32.mrb[57].mxu0  ;;  %2635 = vmatmul.mubr.f32.gmra.mrb[162].mxu0 %v503_v6  ;;  %v2372_v46 = vadd.f32 %v2371_v54, %v9815_v17  ;;  %v1742_v6 = vmul.f32 %v9658_v37, %v1321_v33  ;;  %v507_v54 = vld [vmem:[%s12183_s2 + $0x430] sm:$0xff]  ;;  %v9838_v11 = vadd.f32 %v9667_v47, %v1741_v22 }
 0x327   : > { %2639 = vmatprep.mubr.f32.mxu0 %v506_v34 }
 0x328   : > { %7585 = vmatpush1.bf16.msra.mxu1 %v7584_v62  ;;  %12302 = vst [vmem:[#allocation17_spill] sm:$0xff] %v9838_v11  ;;  %v2802_v62 = vmax.f32 %v2372_v46, 0.0  ;;  %v9844_v33 = vadd.f32 %v9667_v47, %v1742_v6  ;;  %v512_v46 = vld [vmem:[%s12183_s2 + $0x458] sm:$0xff] }
 0x329   : > { %v2376_v16 = vpop.f32.mrb[58].mxu0  ;;  %7586 = vmatprep.subr.bf16.mxu1 %v12299_v48 }
 0x32a   : > { %v2377_v34 = vadd.f32 %v2376_v16, %v9821_v21  ;;  %v2378_v63 = vpop.f32.mrb[59].mxu0  ;;  %2640 = vmatmul.mubr.f32.gmra.mrb[164].mxu0 %v505_v10  ;;  %12303 = vst [vmem:[#allocation18_spill] sm:$0xff] %v9844_v33 }
 0x32b   : > { %2644 = vmatprep.mubr.f32.mxu0 %v508_v49  ;;  %v509_v49 = vld [vmem:[%s12183_s2 + $0x440] sm:$0xff] }
 0x32c   : > { %v2803_v3 = vmax.f32 %v2377_v34, 0.0  ;;  %v1326_v34 = vpop.permute.xlu0 %1325 }
 0x32d   : > { %v2381_v17 = vpop.f32.mrb[60].mxu0  ;;  %v1743_v6 = vmul.f32 %v9658_v37, %v1326_v34 }
 0x32e   : > { %v7587_v16 = vpack.c.bf16 %v2803_v3, %v2802_v62  ;;  %v2383_v10 = vpop.f32.mrb[61].mxu0  ;;  %2645 = vmatmul.mubr.f32.gmra.mrb[166].mxu0 %v507_v54  ;;  %v2382_v22 = vadd.f32 %v2381_v17, %v9838_v11  ;;  %v1331_v3 = vpop.permute.xlu1 %1330  ;;  %v511_v17 = vld [vmem:[%s12183_s2 + $0x450] sm:$0xff]  ;;  %v514_v11 = vld [vmem:[%s12183_s2 + $0x468] sm:$0xff] }
 0x32f   : > { %2649 = vmatprep.mubr.f32.mxu0 %v510_v30  ;;  %v1744_v30 = vmul.f32 %v9658_v37, %v1331_v3  ;;  %v9864_v34 = vadd.f32 %v9667_v47, %v1743_v6 }
 0x330   : > { %7588 = vmatpush1.bf16.msra.mxu1 %v7587_v16  ;;  %v2804_v16 = vmax.f32 %v2382_v22, 0.0  ;;  %v1336_v6 = vpop.permute.xlu0 %1335 }
 0x331   : > { %v2386_v63 = vpop.f32.mrb[62].mxu0  ;;  %7589 = vmatprep.subr.bf16.mxu1 %v12299_v48  ;;  %12304 = vst [vmem:[#allocation19_spill] sm:$0xff] %v9864_v34 }
 0x332   : > { %v2387_v54 = vadd.f32 %v2386_v63, %v9844_v33  ;;  %v2388_v62 = vpop.f32.mrb[63].mxu0  ;;  %2650 = vmatmul.mubr.f32.gmra.mrb[168].mxu0 %v509_v49 }
 0x333   : > { %2654 = vmatprep.mubr.f32.mxu0 %v512_v46  ;;  %v513_v46 = vld [vmem:[%s12183_s2 + $0x460] sm:$0xff]  ;;  %v9870_v62 = vadd.f32 %v9667_v47, %v1744_v30 }
 0x334   : > { %v2805_v10 = vmax.f32 %v2387_v54, 0.0  ;;  %v516_v54 = vld [vmem:[%s12183_s2 + $0x478] sm:$0xff] }
 0x335   : > { %v2391_v21 = vpop.f32.mrb[64].mxu0  ;;  %12305 = vst [vmem:[#allocation20_spill] sm:$0xff] %v9870_v62 }
 0x336   : > { %v7590_v63 = vpack.c.bf16 %v2805_v10, %v2804_v16  ;;  %v2393_v49 = vpop.f32.mrb[65].mxu0  ;;  %2655 = vmatmul.mubr.f32.gmra.mrb[170].mxu0 %v511_v17  ;;  %v2392_v22 = vadd.f32 %v2391_v21, %v9864_v34  ;;  %v1341_v10 = vpop.permute.xlu1 %1340  ;;  %v515_v21 = vld [vmem:[%s12183_s2 + $0x470] sm:$0xff]  ;;  %v518_v34 = vld [vmem:[%s12183_s2 + $0x488] sm:$0xff] }
 0x337   : > { %2659 = vmatprep.mubr.f32.mxu0 %v514_v11  ;;  %v1745_v11 = vmul.f32 %v9658_v37, %v1336_v6  ;;  %v1746_v30 = vmul.f32 %v9658_v37, %v1341_v10 }
 0x338   : > { %7591 = vmatpush1.bf16.msra.mxu1 %v7590_v63  ;;  %v2806_v63 = vmax.f32 %v2392_v22, 0.0 }
 0x339   : > { %v2396_v3 = vpop.f32.mrb[66].mxu0  ;;  %7592 = vmatprep.subr.bf16.mxu1 %v12299_v48  ;;  %v9887_v6 = vadd.f32 %v9667_v47, %v1745_v11  ;;  %v1346_v11 = vpop.permute.xlu0 %1345 }
 0x33a   : > { %v2397_v17 = vadd.f32 %v2396_v3, %v9870_v62  ;;  %v2398_v16 = vpop.f32.mrb[67].mxu0  ;;  %2660 = vmatmul.mubr.f32.gmra.mrb[172].mxu0 %v513_v46 }
 0x33b   : > { %2664 = vmatprep.mubr.f32.mxu0 %v516_v54  ;;  %12306 = vst [vmem:[#allocation21_spill] sm:$0xff] %v9887_v6  ;;  %v517_v54 = vld [vmem:[%s12183_s2 + $0x480] sm:$0xff]  ;;  %v9893_v16 = vadd.f32 %v9667_v47, %v1746_v30 }
 0x33c   : > { %v2807_v49 = vmax.f32 %v2397_v17, 0.0  ;;  %v520_v17 = vld [vmem:[%s12183_s2 + $0x498] sm:$0xff] }
 0x33d   : > { %v2401_v33 = vpop.f32.mrb[68].mxu0  ;;  %12307 = vst [vmem:[#allocation22_spill] sm:$0xff] %v9893_v16 }
 0x33e   : > { %v7593_v3 = vpack.c.bf16 %v2807_v49, %v2806_v63  ;;  %v2403_v46 = vpop.f32.mrb[69].mxu0  ;;  %2665 = vmatmul.mubr.f32.gmra.mrb[174].mxu0 %v515_v21  ;;  %v2402_v22 = vadd.f32 %v2401_v33, %v9887_v6  ;;  %v1351_v49 = vpop.permute.xlu1 %1350  ;;  %v519_v33 = vld [vmem:[%s12183_s2 + $0x490] sm:$0xff]  ;;  %v522_v6 = vld [vmem:[%s12183_s2 + $0x4a8] sm:$0xff] }
 0x33f   : > { %2669 = vmatprep.mubr.f32.mxu0 %v518_v34  ;;  %v1747_v34 = vmul.f32 %v9658_v37, %v1346_v11  ;;  %v1748_v30 = vmul.f32 %v9658_v37, %v1351_v49 }
 0x340   : > { %7594 = vmatpush1.bf16.msra.mxu1 %v7593_v3  ;;  %v2808_v3 = vmax.f32 %v2402_v22, 0.0 }
 0x341   : > { %v2406_v10 = vpop.f32.mrb[70].mxu0  ;;  %7595 = vmatprep.subr.bf16.mxu1 %v12299_v48  ;;  %v9910_v11 = vadd.f32 %v9667_v47, %v1747_v34  ;;  %v1356_v34 = vpop.permute.xlu0 %1355 }
 0x342   : > { %v2407_v21 = vadd.f32 %v2406_v10, %v9893_v16  ;;  %v2408_v63 = vpop.f32.mrb[71].mxu0  ;;  %2670 = vmatmul.mubr.f32.gmra.mrb[176].mxu0 %v517_v54 }
 0x343   : > { %2674 = vmatprep.mubr.f32.mxu0 %v520_v17  ;;  %12308 = vst [vmem:[#allocation23_spill] sm:$0xff] %v9910_v11  ;;  %v521_v17 = vld [vmem:[%s12183_s2 + $0x4a0] sm:$0xff]  ;;  %v9916_v63 = vadd.f32 %v9667_v47, %v1748_v30 }
 0x344   : > { %v2809_v46 = vmax.f32 %v2407_v21, 0.0  ;;  %v524_v21 = vld [vmem:[%s12183_s2 + $0x4b8] sm:$0xff] }
 0x345   : > { %v2411_v62 = vpop.f32.mrb[72].mxu0  ;;  %12309 = vst [vmem:[#allocation24_spill] sm:$0xff] %v9916_v63 }
 0x346   : > { %v7596_v10 = vpack.c.bf16 %v2809_v46, %v2808_v3  ;;  %v2413_v54 = vpop.f32.mrb[73].mxu0  ;;  %2675 = vmatmul.mubr.f32.gmra.mrb[178].mxu0 %v519_v33  ;;  %v2412_v22 = vadd.f32 %v2411_v62, %v9910_v11  ;;  %v1361_v46 = vpop.permute.xlu1 %1360  ;;  %v523_v62 = vld [vmem:[%s12183_s2 + $0x4b0] sm:$0xff]  ;;  %v526_v11 = vld [vmem:[%s12183_s2 + $0x4c8] sm:$0xff] }
 0x347   : > { %2679 = vmatprep.mubr.f32.mxu0 %v522_v6  ;;  %v1749_v6 = vmul.f32 %v9658_v37, %v1356_v34  ;;  %v1750_v30 = vmul.f32 %v9658_v37, %v1361_v46 }
 0x348   : > { %7597 = vmatpush1.bf16.msra.mxu1 %v7596_v10  ;;  %v2810_v10 = vmax.f32 %v2412_v22, 0.0 }
 0x349   : > { %v2416_v49 = vpop.f32.mrb[74].mxu0  ;;  %7598 = vmatprep.subr.bf16.mxu1 %v12299_v48  ;;  %v9933_v34 = vadd.f32 %v9667_v47, %v1749_v6  ;;  %v1366_v6 = vpop.permute.xlu0 %1365 }
 0x34a   : > { %v2417_v33 = vadd.f32 %v2416_v49, %v9916_v63  ;;  %v2418_v3 = vpop.f32.mrb[75].mxu0  ;;  %2680 = vmatmul.mubr.f32.gmra.mrb[180].mxu0 %v521_v17 }
 0x34b   : > { %2684 = vmatprep.mubr.f32.mxu0 %v524_v21  ;;  %12310 = vst [vmem:[#allocation25_spill] sm:$0xff] %v9933_v34  ;;  %v525_v21 = vld [vmem:[%s12183_s2 + $0x4c0] sm:$0xff]  ;;  %v9939_v3 = vadd.f32 %v9667_v47, %v1750_v30 }
 0x34c   : > { %v2811_v54 = vmax.f32 %v2417_v33, 0.0  ;;  %v528_v33 = vld [vmem:[%s12183_s2 + $0x4d8] sm:$0xff] }
 0x34d   : > { %v2421_v16 = vpop.f32.mrb[76].mxu0  ;;  %12311 = vst [vmem:[#allocation26_spill] sm:$0xff] %v9939_v3 }
 0x34e   : > { %v7599_v49 = vpack.c.bf16 %v2811_v54, %v2810_v10  ;;  %v2423_v17 = vpop.f32.mrb[77].mxu0  ;;  %2685 = vmatmul.mubr.f32.gmra.mrb[182].mxu0 %v523_v62  ;;  %v2422_v22 = vadd.f32 %v2421_v16, %v9933_v34  ;;  %v1371_v54 = vpop.permute.xlu1 %1370  ;;  %v527_v16 = vld [vmem:[%s12183_s2 + $0x4d0] sm:$0xff]  ;;  %v530_v34 = vld [vmem:[%s12183_s2 + $0x4e8] sm:$0xff] }
 0x34f   : > { %2689 = vmatprep.mubr.f32.mxu0 %v526_v11  ;;  %v1751_v11 = vmul.f32 %v9658_v37, %v1366_v6  ;;  %v1752_v30 = vmul.f32 %v9658_v37, %v1371_v54 }
 0x350   : > { %7600 = vmatpush1.bf16.msra.mxu1 %v7599_v49  ;;  %v2812_v49 = vmax.f32 %v2422_v22, 0.0 }
 0x351   : > { %v2426_v46 = vpop.f32.mrb[78].mxu0  ;;  %7601 = vmatprep.subr.bf16.mxu1 %v12299_v48  ;;  %v9956_v6 = vadd.f32 %v9667_v47, %v1751_v11  ;;  %v1376_v11 = vpop.permute.xlu0 %1375 }
 0x352   : > { %v2427_v62 = vadd.f32 %v2426_v46, %v9939_v3  ;;  %v2428_v10 = vpop.f32.mrb[79].mxu0  ;;  %2690 = vmatmul.mubr.f32.gmra.mrb[184].mxu0 %v525_v21 }
 0x353   : > { %2694 = vmatprep.mubr.f32.mxu0 %v528_v33  ;;  %12312 = vst [vmem:[#allocation27_spill] sm:$0xff] %v9956_v6  ;;  %v529_v33 = vld [vmem:[%s12183_s2 + $0x4e0] sm:$0xff]  ;;  %v9962_v10 = vadd.f32 %v9667_v47, %v1752_v30 }
 0x354   : > { %v2813_v17 = vmax.f32 %v2427_v62, 0.0  ;;  %v532_v62 = vld [vmem:[%s12183_s2 + $0x4f8] sm:$0xff] }
 0x355   : > { %v2431_v63 = vpop.f32.mrb[80].mxu0  ;;  %12313 = vst [vmem:[#allocation28_spill] sm:$0xff] %v9962_v10 }
 0x356   : > { %v7602_v46 = vpack.c.bf16 %v2813_v17, %v2812_v49  ;;  %v2433_v21 = vpop.f32.mrb[81].mxu0  ;;  %2695 = vmatmul.mubr.f32.gmra.mrb[186].mxu0 %v527_v16  ;;  %v2432_v22 = vadd.f32 %v2431_v63, %v9956_v6  ;;  %v1381_v17 = vpop.permute.xlu1 %1380  ;;  %v531_v63 = vld [vmem:[%s12183_s2 + $0x4f0] sm:$0xff]  ;;  %v534_v6 = vld [vmem:[%s12183_s2 + $0x508] sm:$0xff] }
 0x357   : > { %2699 = vmatprep.mubr.f32.mxu0 %v530_v34  ;;  %v1753_v34 = vmul.f32 %v9658_v37, %v1376_v11  ;;  %v1754_v30 = vmul.f32 %v9658_v37, %v1381_v17 }
 0x358   : > { %7603 = vmatpush1.bf16.msra.mxu1 %v7602_v46  ;;  %v2814_v46 = vmax.f32 %v2432_v22, 0.0 }
 0x359   : > { %v2436_v54 = vpop.f32.mrb[82].mxu0  ;;  %7604 = vmatprep.subr.bf16.mxu1 %v12299_v48  ;;  %v9979_v11 = vadd.f32 %v9667_v47, %v1753_v34  ;;  %v1386_v34 = vpop.permute.xlu0 %1385 }
 0x35a   : > { %v2437_v16 = vadd.f32 %v2436_v54, %v9962_v10  ;;  %v2438_v49 = vpop.f32.mrb[83].mxu0  ;;  %2700 = vmatmul.mubr.f32.gmra.mrb[188].mxu0 %v529_v33 }
 0x35b   : > { %2704 = vmatprep.mubr.f32.mxu0 %v532_v62  ;;  %12314 = vst [vmem:[#allocation29_spill] sm:$0xff] %v9979_v11  ;;  %v533_v62 = vld [vmem:[%s12183_s2 + $0x500] sm:$0xff]  ;;  %v9985_v49 = vadd.f32 %v9667_v47, %v1754_v30 }
 0x35c   : > { %v2815_v21 = vmax.f32 %v2437_v16, 0.0  ;;  %v536_v16 = vld [vmem:[%s12183_s2 + $0x518] sm:$0xff] }
 0x35d   : > { %v2441_v3 = vpop.f32.mrb[84].mxu0  ;;  %12315 = vst [vmem:[#allocation30_spill] sm:$0xff] %v9985_v49 }
 0x35e   : > { %v7605_v54 = vpack.c.bf16 %v2815_v21, %v2814_v46  ;;  %v2443_v33 = vpop.f32.mrb[85].mxu0  ;;  %2705 = vmatmul.mubr.f32.gmra.mrb[190].mxu0 %v531_v63  ;;  %v2442_v22 = vadd.f32 %v2441_v3, %v9979_v11  ;;  %v1391_v21 = vpop.permute.xlu1 %1390  ;;  %v535_v3 = vld [vmem:[%s12183_s2 + $0x510] sm:$0xff]  ;;  %v538_v11 = vld [vmem:[%s12183_s2 + $0x528] sm:$0xff] }
 0x35f   : > { %2709 = vmatprep.mubr.f32.mxu0 %v534_v6  ;;  %v1755_v6 = vmul.f32 %v9658_v37, %v1386_v34  ;;  %v1756_v30 = vmul.f32 %v9658_v37, %v1391_v21 }
 0x360   : > { %7606 = vmatpush1.bf16.msra.mxu1 %v7605_v54  ;;  %v2816_v54 = vmax.f32 %v2442_v22, 0.0 }
 0x361   : > { %v2446_v17 = vpop.f32.mrb[86].mxu0  ;;  %7607 = vmatprep.subr.bf16.mxu1 %v12299_v48  ;;  %v10002_v34 = vadd.f32 %v9667_v47, %v1755_v6  ;;  %v1396_v6 = vpop.permute.xlu0 %1395 }
 0x362   : > { %v2447_v63 = vadd.f32 %v2446_v17, %v9985_v49  ;;  %v2448_v46 = vpop.f32.mrb[87].mxu0  ;;  %2710 = vmatmul.mubr.f32.gmra.mrb[192].mxu0 %v533_v62 }
 0x363   : > { %2714 = vmatprep.mubr.f32.mxu0 %v536_v16  ;;  %12316 = vst [vmem:[#allocation31_spill] sm:$0xff] %v10002_v34  ;;  %v537_v16 = vld [vmem:[%s12183_s2 + $0x520] sm:$0xff]  ;;  %v10008_v46 = vadd.f32 %v9667_v47, %v1756_v30 }
 0x364   : > { %v2817_v33 = vmax.f32 %v2447_v63, 0.0  ;;  %v540_v63 = vld [vmem:[%s12183_s2 + $0x538] sm:$0xff] }
 0x365   : > { %v2451_v10 = vpop.f32.mrb[88].mxu0  ;;  %12317 = vst [vmem:[#allocation32_spill] sm:$0xff] %v10008_v46 }
 0x366   : > { %v7608_v17 = vpack.c.bf16 %v2817_v33, %v2816_v54  ;;  %v2453_v62 = vpop.f32.mrb[89].mxu0  ;;  %2715 = vmatmul.mubr.f32.gmra.mrb[194].mxu0 %v535_v3  ;;  %v2452_v22 = vadd.f32 %v2451_v10, %v10002_v34  ;;  %v1401_v33 = vpop.permute.xlu1 %1400  ;;  %v539_v10 = vld [vmem:[%s12183_s2 + $0x530] sm:$0xff]  ;;  %v542_v34 = vld [vmem:[%s12183_s2 + $0x548] sm:$0xff] }
 0x367   : > { %2719 = vmatprep.mubr.f32.mxu0 %v538_v11  ;;  %v1757_v11 = vmul.f32 %v9658_v37, %v1396_v6  ;;  %v1758_v30 = vmul.f32 %v9658_v37, %v1401_v33 }
 0x368   : > { %7609 = vmatpush1.bf16.msra.mxu1 %v7608_v17  ;;  %v2818_v17 = vmax.f32 %v2452_v22, 0.0 }
 0x369   : > { %v2456_v21 = vpop.f32.mrb[90].mxu0  ;;  %7610 = vmatprep.subr.bf16.mxu1 %v12299_v48  ;;  %v10025_v6 = vadd.f32 %v9667_v47, %v1757_v11  ;;  %v1406_v11 = vpop.permute.xlu0 %1405 }
 0x36a   : > { %v2457_v3 = vadd.f32 %v2456_v21, %v10008_v46  ;;  %v2458_v54 = vpop.f32.mrb[91].mxu0  ;;  %2720 = vmatmul.mubr.f32.gmra.mrb[196].mxu0 %v537_v16 }
 0x36b   : > { %2724 = vmatprep.mubr.f32.mxu0 %v540_v63  ;;  %12318 = vst [vmem:[#allocation33_spill] sm:$0xff] %v10025_v6  ;;  %v541_v63 = vld [vmem:[%s12183_s2 + $0x540] sm:$0xff]  ;;  %v10031_v54 = vadd.f32 %v9667_v47, %v1758_v30 }
 0x36c   : > { %v2819_v62 = vmax.f32 %v2457_v3, 0.0  ;;  %v544_v3 = vld [vmem:[%s12183_s2 + $0x558] sm:$0xff] }
 0x36d   : > { %v2461_v49 = vpop.f32.mrb[92].mxu0  ;;  %12319 = vst [vmem:[#allocation34_spill] sm:$0xff] %v10031_v54 }
 0x36e   : > { %v7611_v21 = vpack.c.bf16 %v2819_v62, %v2818_v17  ;;  %v2463_v16 = vpop.f32.mrb[93].mxu0  ;;  %2725 = vmatmul.mubr.f32.gmra.mrb[198].mxu0 %v539_v10  ;;  %v2462_v22 = vadd.f32 %v2461_v49, %v10025_v6  ;;  %v1411_v62 = vpop.permute.xlu1 %1410  ;;  %v543_v49 = vld [vmem:[%s12183_s2 + $0x550] sm:$0xff]  ;;  %v546_v6 = vld [vmem:[%s12183_s2 + $0x568] sm:$0xff] }
 0x36f   : > { %2729 = vmatprep.mubr.f32.mxu0 %v542_v34  ;;  %v1759_v34 = vmul.f32 %v9658_v37, %v1406_v11  ;;  %v1760_v30 = vmul.f32 %v9658_v37, %v1411_v62  ;;  %v1416_v62 = vpop.permute.xlu0 %1415 }
 0x370   : > { %7612 = vmatpush1.bf16.msra.mxu1 %v7611_v21  ;;  %v2820_v21 = vmax.f32 %v2462_v22, 0.0 }
 0x371   : > { %v2466_v33 = vpop.f32.mrb[94].mxu0  ;;  %7613 = vmatprep.subr.bf16.mxu1 %v12299_v48  ;;  %v10048_v11 = vadd.f32 %v9667_v47, %v1759_v34  ;;  %v548_v34 = vld [vmem:[%s12183_s2 + $0x578] sm:$0xff] }
 0x372   : > { %v2467_v10 = vadd.f32 %v2466_v33, %v10031_v54  ;;  %v2468_v17 = vpop.f32.mrb[95].mxu0  ;;  %2730 = vmatmul.mubr.f32.gmra.mrb[200].mxu0 %v541_v63 }
 0x373   : > { %2734 = vmatprep.mubr.f32.mxu0 %v544_v3  ;;  %12320 = vst [vmem:[#allocation35_spill] sm:$0xff] %v10048_v11  ;;  %v545_v3 = vld [vmem:[%s12183_s2 + $0x560] sm:$0xff]  ;;  %v10054_v17 = vadd.f32 %v9667_v47, %v1760_v30  ;;  %v1421_v30 = vpop.permute.xlu1 %1420 }
 0x374   : > { %v2821_v16 = vmax.f32 %v2467_v10, 0.0  ;;  %v565_v10 = vld [vmem:[#allocation2] sm:$0xff] }
 0x375   : > { %v2471_v46 = vpop.f32.mrb[96].mxu0  ;;  %12321 = vst [vmem:[#allocation36_spill] sm:$0xff] %v10054_v17 }
 0x376   : > { %v7614_v33 = vpack.c.bf16 %v2821_v16, %v2820_v21  ;;  %v2473_v63 = vpop.f32.mrb[97].mxu0  ;;  %2735 = vmatmul.mubr.f32.gmra.mrb[202].mxu0 %v543_v49  ;;  %v2472_v22 = vadd.f32 %v2471_v46, %v10048_v11  ;;  %v572_v16 = vld [vmem:[#allocation2 + $0x38] sm:$0xff]  ;;  %v547_v46 = vld [vmem:[%s12183_s2 + $0x570] sm:$0xff] }
 0x377   : > { %2739 = vmatprep.mubr.f32.mxu0 %v546_v6  ;;  %v1761_v6 = vmul.f32 %v9658_v37, %v1416_v62  ;;  %v550_v62 = vld [vmem:[%s12183_s2 + $0x588] sm:$0xff] }
 0x378   : > { %7615 = vmatpush1.bf16.msra.mxu1 %v7614_v33  ;;  %v1762_v33 = vmul.f32 %v9658_v37, %v1421_v30  ;;  %v2822_v11 = vmax.f32 %v2472_v22, 0.0  ;;  %v549_v22 = vld [vmem:[%s12183_s2 + $0x580] sm:$0xff] }
 0x379   : > { %v2476_v21 = vpop.f32.mrb[98].mxu0  ;;  %7616 = vmatprep.subr.bf16.mxu1 %v12299_v48  ;;  %v577_v30 = vld [vmem:[#allocation2 + $0x60] sm:$0xff] }
 0x37a   : > { %v2477_v49 = vadd.f32 %v2476_v21, %v10054_v17  ;;  %v2478_v63 = vpop.f32.mrb[99].mxu0  ;;  %2740 = vmatmul.mubr.f32.gmra.mrb[204].mxu0 %v545_v3  ;;  %v10071_v3 = vadd.f32 %v9667_v47, %v1761_v6  ;;  %v583_v17 = vld [vmem:[#allocation2 + $0x90] sm:$0xff] }
 0x37b   : > { %2951 = vmatmul.mubr.f32.vlgmr.msra.gmra.mrb[32].mxu1 %v565_v10  ;;  %2744 = vmatprep.mubr.f32.mxu0 %v548_v34  ;;  %v578_v63 = vld [vmem:[#allocation2 + $0x68] sm:$0xff] }
 0x37c   : > { %v2823_v54 = vmax.f32 %v2477_v49, 0.0  ;;  %2955 = vmatprep.mubr.f32.mxu1 %v572_v16  ;;  %12322 = vst [vmem:[#allocation37_spill] sm:$0xff] %v10071_v3  ;;  %v10077_v16 = vadd.f32 %v9667_v47, %v1762_v33 }
 0x37d   : > { %v2481_v21 = vpop.f32.mrb[100].mxu0 }
 0x37e   : > { %v7617_v10 = vpack.c.bf16 %v2823_v54, %v2822_v11  ;;  %v2483_v34 = vpop.f32.mrb[101].mxu0  ;;  %2745 = vmatmul.mubr.f32.gmra.mrb[206].mxu0 %v547_v46  ;;  %12323 = vst [vmem:[#allocation38_spill] sm:$0xff] %v10077_v16  ;;  %v2482_v49 = vadd.f32 %v2481_v21, %v10071_v3  ;;  %v552_v54 = vld [vmem:[%s12183_s2 + $0x598] sm:$0xff]  ;;  %v1426_v11 = vpop.permute.xlu0 %1425  ;;  %v551_v21 = vld [vmem:[%s12183_s2 + $0x590] sm:$0xff] }
 0x37f   : > { %2956 = vmatmul.mubr.f32.gmra.mrb[34].mxu1 %v571_v26  ;;  %2749 = vmatprep.mubr.f32.mxu0 %v550_v62  ;;  %v584_v26 = vld [vmem:[#allocation2 + $0x98] sm:$0xff]  ;;  %v1763_v46 = vmul.f32 %v9658_v37, %v1426_v11  ;;  %v1431_v34 = vpop.permute.xlu1 %1430  ;;  %v554_v11 = vld [vmem:[%s12183_s2 + $0x5a8] sm:$0xff] }
 0x380   : > { %7618 = vmatpush1.bf16.msra.mxu1 %v7617_v10  ;;  %2960 = vmatprep.mubr.f32.mxu1 %v578_v63  ;;  %v1764_v63 = vmul.f32 %v9658_v37, %v1431_v34  ;;  %v2824_v10 = vmax.f32 %v2482_v49, 0.0  ;;  %v553_v49 = vld [vmem:[%s12183_s2 + $0x5a0] sm:$0xff] }
 0x381   : > { %v2486_v6 = vpop.f32.mrb[102].mxu0  ;;  %7619 = vmatprep.subr.bf16.mxu1 %v12299_v48  ;;  %v589_v34 = vld [vmem:[#allocation2 + $0xc0] sm:$0xff] }
 0x382   : > { %v2487_v62 = vadd.f32 %v2486_v6, %v10077_v16  ;;  %v2488_v33 = vpop.f32.mrb[103].mxu0  ;;  %2750 = vmatmul.mubr.f32.gmra.mrb[208].mxu0 %v549_v22  ;;  %v10094_v22 = vadd.f32 %v9667_v47, %v1763_v46  ;;  %v1436_v46 = vpop.permute.xlu0 %1435  ;;  %v595_v16 = vld [vmem:[#allocation2 + $0xf0] sm:$0xff] }
 0x383   : > { %2961 = vmatmul.mubr.f32.gmra.mrb[36].mxu1 %v577_v30  ;;  %2754 = vmatprep.mubr.f32.mxu0 %v552_v54  ;;  %v590_v33 = vld [vmem:[#allocation2 + $0xc8] sm:$0xff] }
 0x384   : > { %v2825_v3 = vmax.f32 %v2487_v62, 0.0  ;;  %2965 = vmatprep.mubr.f32.mxu1 %v584_v26  ;;  %12324 = vst [vmem:[#allocation39_spill] sm:$0xff] %v10094_v22  ;;  %v10100_v26 = vadd.f32 %v9667_v47, %v1764_v63 }
 0x385   : > { %v2491_v6 = vpop.f32.mrb[104].mxu0 }
 0x386   : > { %v7620_v30 = vpack.c.bf16 %v2825_v3, %v2824_v10  ;;  %v2493_v54 = vpop.f32.mrb[105].mxu0  ;;  %2755 = vmatmul.mubr.f32.gmra.mrb[210].mxu0 %v551_v21  ;;  %12325 = vst [vmem:[#allocation40_spill] sm:$0xff] %v10100_v26  ;;  %v2492_v62 = vadd.f32 %v2491_v6, %v10094_v22  ;;  %v556_v3 = vld [vmem:[%s12183_s2 + $0x5b8] sm:$0xff]  ;;  %v1765_v10 = vmul.f32 %v9658_v37, %v1436_v46  ;;  %v555_v6 = vld [vmem:[%s12183_s2 + $0x5b0] sm:$0xff]  ;;  %v558_v46 = vld [vmem:[%s12183_s2 + $0x5c8] sm:$0xff] }
 0x387   : > { %2966 = vmatmul.mubr.f32.gmra.mrb[38].mxu1 %v583_v17  ;;  %2759 = vmatprep.mubr.f32.mxu0 %v554_v11  ;;  %v596_v17 = vld [vmem:[#allocation2 + $0xf8] sm:$0xff]  ;;  %v1441_v54 = vpop.permute.xlu1 %1440 }
 0x388   : > { %7621 = vmatpush1.bf16.msra.mxu1 %v7620_v30  ;;  %2970 = vmatprep.mubr.f32.mxu1 %v590_v33  ;;  %v1766_v33 = vmul.f32 %v9658_v37, %v1441_v54  ;;  %v2826_v30 = vmax.f32 %v2492_v62, 0.0  ;;  %v557_v62 = vld [vmem:[%s12183_s2 + $0x5c0] sm:$0xff] }
 0x389   : > { %v2496_v21 = vpop.f32.mrb[106].mxu0  ;;  %7622 = vmatprep.subr.bf16.mxu1 %v12299_v48  ;;  %v601_v54 = vld [vmem:[#allocation2 + $0x120] sm:$0xff] }
 0x38a   : > { %v2497_v11 = vadd.f32 %v2496_v21, %v10100_v26  ;;  %v2498_v63 = vpop.f32.mrb[107].mxu0  ;;  %2760 = vmatmul.mubr.f32.gmra.mrb[212].mxu0 %v553_v49  ;;  %v10117_v49 = vadd.f32 %v9667_v47, %v1765_v10  ;;  %v1446_v10 = vpop.permute.xlu0 %1445  ;;  %v607_v26 = vld [vmem:[#allocation2 + $0x150] sm:$0xff] }
 0x38b   : > { %2971 = vmatmul.mubr.f32.gmra.mrb[40].mxu1 %v589_v34  ;;  %2764 = vmatprep.mubr.f32.mxu0 %v556_v3  ;;  %v602_v63 = vld [vmem:[#allocation2 + $0x128] sm:$0xff] }
 0x38c   : > { %v2827_v22 = vmax.f32 %v2497_v11, 0.0  ;;  %2975 = vmatprep.mubr.f32.mxu1 %v596_v17  ;;  %12326 = vst [vmem:[#allocation41_spill] sm:$0xff] %v10117_v49  ;;  %v10123_v17 = vadd.f32 %v9667_v47, %v1766_v33 }
 0x38d   : > { %v2501_v21 = vpop.f32.mrb[108].mxu0 }
 0x38e   : > { %v7623_v34 = vpack.c.bf16 %v2827_v22, %v2826_v30  ;;  %v2503_v3 = vpop.f32.mrb[109].mxu0  ;;  %2765 = vmatmul.mubr.f32.gmra.mrb[214].mxu0 %v555_v6  ;;  %12327 = vst [vmem:[#allocation42_spill] sm:$0xff] %v10123_v17  ;;  %v2502_v11 = vadd.f32 %v2501_v21, %v10117_v49  ;;  %v560_v22 = vld [vmem:[%s12183_s2 + $0x5d8] sm:$0xff]  ;;  %v1767_v30 = vmul.f32 %v9658_v37, %v1446_v10  ;;  %v559_v21 = vld [vmem:[%s12183_s2 + $0x5d0] sm:$0xff]  ;;  %v562_v10 = vld [vmem:[%s12183_s2 + $0x5e8] sm:$0xff] }
 0x38f   : > { %2976 = vmatmul.mubr.f32.gmra.mrb[42].mxu1 %v595_v16  ;;  %2769 = vmatprep.mubr.f32.mxu0 %v558_v46  ;;  %v608_v16 = vld [vmem:[#allocation2 + $0x158] sm:$0xff]  ;;  %v1451_v3 = vpop.permute.xlu1 %1450 }
 0x390   : > { %7624 = vmatpush1.bf16.msra.mxu1 %v7623_v34  ;;  %2980 = vmatprep.mubr.f32.mxu1 %v602_v63  ;;  %v1768_v63 = vmul.f32 %v9658_v37, %v1451_v3  ;;  %v2828_v34 = vmax.f32 %v2502_v11, 0.0  ;;  %v355_v3 = vld [vmem:[%s12186_s5 + $0x48] sm:$0xff]  ;;  %v356_v11 = vld [vmem:[%s12186_s5 + $0x50] sm:$0xff] }
 0x391   : > { %v2506_v6 = vpop.f32.mrb[110].mxu0  ;;  %7625 = vmatprep.subr.bf16.mxu1 %v12299_v48 }
 0x392   : > { %v2507_v46 = vadd.f32 %v2506_v6, %v10123_v17  ;;  %v2508_v33 = vpop.f32.mrb[111].mxu0  ;;  %2770 = vmatmul.mubr.f32.gmra.mrb[216].mxu0 %v557_v62  ;;  %v10140_v62 = vadd.f32 %v9667_v47, %v1767_v30 }
 0x393   : > { %2981 = vmatmul.mubr.f32.gmra.mrb[44].mxu1 %v601_v54  ;;  %2774 = vmatprep.mubr.f32.mxu0 %v560_v22  ;;  %v614_v33 = vld [vmem:[#allocation2 + $0x188] sm:$0xff] }
 0x394   : > { %v2829_v49 = vmax.f32 %v2507_v46, 0.0  ;;  %2985 = vmatprep.mubr.f32.mxu1 %v608_v16  ;;  %12328 = vst [vmem:[#allocation43_spill] sm:$0xff] %v10140_v62  ;;  %v561_v16 = vld [vmem:[%s12183_s2 + $0x5e0] sm:$0xff]  ;;  %v10151_v46 = vpack.c.bf16 %v356_v11, %v355_v3 }
 0x395   : > { %v2511_v6 = vpop.f32.mrb[112].mxu0 }
 0x396   : > { %v7626_v54 = vpack.c.bf16 %v2829_v49, %v2828_v34  ;;  %v2513_v22 = vpop.f32.mrb[113].mxu0  ;;  %2775 = vmatmul.mubr.f32.gmra.mrb[218].mxu0 %v559_v21  ;;  %v10154_v49 = vadd.f32 %v9667_v47, %v1768_v63  ;;  %v2512_v30 = vadd.f32 %v2511_v6, %v10140_v62  ;;  %v613_v21 = vld [vmem:[#allocation2 + $0x180] sm:$0xff]  ;;  %v564_v34 = vld [vmem:[%s12183_s2 + $0x5f8] sm:$0xff]  ;;  %7713 = vmatprep.subr.bf16.mxu0 %v10151_v46  ;;  %v1461_v6 = vpop.permute.xlu1 %1460 }
 0x397   : > { %2986 = vmatmul.mubr.f32.gmra.mrb[46].mxu1 %v607_v26  ;;  %2779 = vmatprep.mubr.f32.mxu0 %v562_v10  ;;  %v1456_v26 = vpop.permute.xlu0 %1455  ;;  %v620_v22 = vld [vmem:[#allocation2 + $0x1b8] sm:$0xff] }
 0x398   : > { %12329 = vst [vmem:[#allocation44_spill] sm:$0xff] %v10154_v49  ;;  %7627 = vmatpush1.bf16.msra.mxu1 %v7626_v54  ;;  %2990 = vmatprep.mubr.f32.mxu1 %v614_v33  ;;  %v1769_v3 = vmul.f32 %v9658_v37, %v1456_v26  ;;  %v563_v33 = vld [vmem:[%s12183_s2 + $0x5f0] sm:$0xff]  ;;  %v1770_v54 = vmul.f32 %v9658_v37, %v1461_v6  ;;  %v2830_v62 = vmax.f32 %v2512_v30, 0.0  ;;  %v625_v30 = vld [vmem:[#allocation2 + $0x1e0] sm:$0xff]  ;;  %v632_v6 = vld [vmem:[#allocation2 + $0x218] sm:$0xff] }
 0x399   : > { %v2516_v10 = vpop.f32.mrb[114].mxu0  ;;  %7628 = vmatprep.subr.bf16.mxu1 %v12299_v48  ;;  %7715 = vmatpush3.bf16.msra.mxu0 %v10151_v46 }
 0x39a   : > { %v2517_v63 = vadd.f32 %v2516_v10, %v10154_v49  ;;  %v2518_v11 = vpop.f32.mrb[115].mxu0  ;;  %2780 = vmatmul.mubr.f32.gmra.mrb[220].mxu0 %v561_v16  ;;  %v10170_v10 = vadd.f32 %v9667_v47, %v1769_v3 }
 0x39b   : > { %2991 = vmatmul.mubr.f32.gmra.mrb[48].mxu1 %v613_v21  ;;  %2784 = vmatprep.mubr.f32.mxu0 %v564_v34  ;;  %v10173_v34 = vadd.f32 %v9667_v47, %v1770_v54 }
 0x39c   : > { %v2831_v17 = vmax.f32 %v2517_v63, 0.0  ;;  %2995 = vmatprep.mubr.f32.mxu1 %v620_v22  ;;  %12330 = vst [vmem:[#allocation45_spill] sm:$0xff] %v10170_v10  ;;  %v1466_v22 = vpop.permute.xlu0 %1465 }
 0x39d   : > { %v2521_v26 = vpop.f32.mrb[116].mxu0  ;;  %12331 = vst [vmem:[#allocation46_spill] sm:$0xff] %v10173_v34  ;;  %v1771_v3 = vmul.f32 %v9658_v37, %v1466_v22 }
 0x39e   : > { %v7629_v16 = vpack.c.bf16 %v2831_v17, %v2830_v62  ;;  %v2523_v21 = vpop.f32.mrb[117].mxu0  ;;  %2785 = vmatmul.mubr.f32.gmra.mrb[222].mxu0 %v563_v33  ;;  %v2522_v11 = vadd.f32 %v2521_v26, %v10170_v10  ;;  %v1471_v33 = vpop.permute.xlu1 %1470  ;;  %v631_v26 = vld [vmem:[#allocation2 + $0x210] sm:$0xff] }
 0x39f   : > { %2996 = vmatmul.mubr.f32.gmra.mrb[50].mxu1 %v619_v41  ;;  %v1772_v41 = vmul.f32 %v9658_v37, %v1471_v33  ;;  %v10181_v10 = vadd.f32 %v9667_v47, %v1771_v3 }
 0x3a0   : > { %7630 = vmatpush1.bf16.msra.mxu1 %v7629_v16  ;;  %3000 = vmatprep.mubr.f32.mxu1 %v626_v25  ;;  %v2832_v54 = vmax.f32 %v2522_v11, 0.0  ;;  %v638_v16 = vld [vmem:[#allocation2 + $0x248] sm:$0xff]  ;;  %v1476_v11 = vpop.permute.xlu0 %1475 }
 0x3a1   : > { %v2526_v63 = vpop.f32.mrb[118].mxu0  ;;  %7631 = vmatprep.subr.bf16.mxu1 %v12299_v48  ;;  %12332 = vst [vmem:[#allocation47_spill] sm:$0xff] %v10181_v10  ;;  %v10184_v22 = vadd.f32 %v9667_v47, %v1772_v41 }
 0x3a2   : > { %v2527_v17 = vadd.f32 %v2526_v63, %v10173_v34  ;;  %v2528_v62 = vpop.f32.mrb[119].mxu0 }
 0x3a3   : > { %3001 = vmatmul.mubr.f32.gmra.mrb[52].mxu1 %v625_v30  ;;  %12333 = vst [vmem:[#allocation48_spill] sm:$0xff] %v10184_v22  ;;  %v637_v30 = vld [vmem:[#allocation2 + $0x240] sm:$0xff]  ;;  %v1773_v62 = vmul.f32 %v9658_v37, %v1476_v11 }
 0x3a4   : > { %v2833_v21 = vmax.f32 %v2527_v17, 0.0  ;;  %3005 = vmatprep.mubr.f32.mxu1 %v632_v6  ;;  %v644_v6 = vld [vmem:[#allocation2 + $0x278] sm:$0xff] }
 0x3a5   : > { %v2531_v25 = vpop.f32.mrb[120].mxu0 }
 0x3a6   : > { %v7632_v49 = vpack.c.bf16 %v2833_v21, %v2832_v54  ;;  %v2533_v42 = vpop.f32.mrb[121].mxu0  ;;  %v2532_v63 = vadd.f32 %v2531_v25, %v10181_v10  ;;  %v650_v25 = vld [vmem:[#allocation2 + $0x2a8] sm:$0xff] }
 0x3a7   : > { %3006 = vmatmul.mubr.f32.gmra.mrb[54].mxu1 %v631_v26  ;;  %v1481_v42 = vpop.permute.xlu1 %1480 }
 0x3a8   : > { %7633 = vmatpush1.bf16.msra.mxu1 %v7632_v49  ;;  %3010 = vmatprep.mubr.f32.mxu1 %v638_v16  ;;  %v1774_v41 = vmul.f32 %v9658_v37, %v1481_v42  ;;  %v2834_v54 = vmax.f32 %v2532_v63, 0.0  ;;  %v643_v49 = vld [vmem:[#allocation2 + $0x270] sm:$0xff]  ;;  %v10192_v16 = vadd.f32 %v9667_v47, %v1773_v62  ;;  %v1486_v63 = vpop.permute.xlu0 %1485 }
 0x3a9   : > { %v2536_v17 = vpop.f32.mrb[122].mxu0  ;;  %7634 = vmatprep.subr.bf16.mxu1 %v12299_v48 }
 0x3aa   : > { %v2537_v3 = vadd.f32 %v2536_v17, %v10184_v22  ;;  %v2538_v33 = vpop.f32.mrb[123].mxu0  ;;  %12334 = vst [vmem:[#allocation49_spill] sm:$0xff] %v10192_v16  ;;  %v10195_v11 = vadd.f32 %v9667_v47, %v1774_v41 }
 0x3ab   : > { %3011 = vmatmul.mubr.f32.gmra.mrb[56].mxu1 %v637_v30  ;;  %v649_v30 = vld [vmem:[#allocation2 + $0x2a0] sm:$0xff]  ;;  %v1775_v33 = vmul.f32 %v9658_v37, %v1486_v63 }
 0x3ac   : > { %v2835_v21 = vmax.f32 %v2537_v3, 0.0  ;;  %3015 = vmatprep.mubr.f32.mxu1 %v644_v6  ;;  %12335 = vst [vmem:[#allocation50_spill] sm:$0xff] %v10195_v11  ;;  %v656_v6 = vld [vmem:[#allocation2 + $0x2d8] sm:$0xff] }
 0x3ad   : > { %v2541_v26 = vpop.f32.mrb[124].mxu0 }
 0x3ae   : > { %v7635_v10 = vpack.c.bf16 %v2835_v21, %v2834_v54  ;;  %v2543_v34 = vpop.f32.mrb[125].mxu0  ;;  %v2542_v17 = vadd.f32 %v2541_v26, %v10192_v16  ;;  %v662_v26 = vld [vmem:[#allocation2 + $0x308] sm:$0xff] }
 0x3af   : > { %3016 = vmatmul.mubr.f32.gmra.mrb[58].mxu1 %v643_v49  ;;  %v1491_v34 = vpop.permute.xlu1 %1490 }
 0x3b0   : > { %7636 = vmatpush1.bf16.msra.mxu1 %v7635_v10  ;;  %3020 = vmatprep.mubr.f32.mxu1 %v650_v25  ;;  %v1776_v41 = vmul.f32 %v9658_v37, %v1491_v34  ;;  %v2836_v54 = vmax.f32 %v2542_v17, 0.0  ;;  %v655_v10 = vld [vmem:[#allocation2 + $0x2d0] sm:$0xff]  ;;  %v10203_v25 = vadd.f32 %v9667_v47, %v1775_v33  ;;  %v1496_v17 = vpop.permute.xlu0 %1495 }
 0x3b1   : > { %v2546_v3 = vpop.f32.mrb[126].mxu0  ;;  %7637 = vmatprep.subr.bf16.mxu1 %v12299_v48 }
 0x3b2   : > { %v2547_v62 = vadd.f32 %v2546_v3, %v10195_v11  ;;  %v2548_v42 = vpop.f32.mrb[127].mxu0  ;;  %12336 = vst [vmem:[#allocation51_spill] sm:$0xff] %v10203_v25  ;;  %v10206_v63 = vadd.f32 %v9667_v47, %v1776_v41 }
 0x3b3   : > { %3021 = vmatmul.mubr.f32.gmra.mrb[60].mxu1 %v649_v30  ;;  %v661_v30 = vld [vmem:[#allocation2 + $0x300] sm:$0xff]  ;;  %v1777_v42 = vmul.f32 %v9658_v37, %v1496_v17 }
 0x3b4   : > { %v2837_v21 = vmax.f32 %v2547_v62, 0.0  ;;  %3025 = vmatprep.mubr.f32.mxu1 %v656_v6  ;;  %12337 = vst [vmem:[#allocation52_spill] sm:$0xff] %v10206_v63  ;;  %v668_v6 = vld [vmem:[#allocation2 + $0x338] sm:$0xff] }
 0x3b5   : > { %v2551_v49 = vpop.f32.mrb[128].mxu0 }
 0x3b6   : > { %v7638_v16 = vpack.c.bf16 %v2837_v21, %v2836_v54  ;;  %v2553_v22 = vpop.f32.mrb[129].mxu0  ;;  %v2552_v3 = vadd.f32 %v2551_v49, %v10203_v25  ;;  %v674_v49 = vld [vmem:[#allocation2 + $0x368] sm:$0xff] }
 0x3b7   : > { %3026 = vmatmul.mubr.f32.gmra.mrb[62].mxu1 %v655_v10  ;;  %v1501_v22 = vpop.permute.xlu1 %1500 }
 0x3b8   : > { %7639 = vmatpush1.bf16.msra.mxu1 %v7638_v16  ;;  %3030 = vmatprep.mubr.f32.mxu1 %v662_v26  ;;  %v1778_v41 = vmul.f32 %v9658_v37, %v1501_v22  ;;  %v2838_v54 = vmax.f32 %v2552_v3, 0.0  ;;  %v667_v16 = vld [vmem:[#allocation2 + $0x330] sm:$0xff]  ;;  %v10214_v26 = vadd.f32 %v9667_v47, %v1777_v42  ;;  %v1506_v3 = vpop.permute.xlu0 %1505 }
 0x3b9   : > { %v2556_v62 = vpop.f32.mrb[130].mxu0  ;;  %7640 = vmatprep.subr.bf16.mxu1 %v12299_v48 }
 0x3ba   : > { %v2557_v33 = vadd.f32 %v2556_v62, %v10206_v63  ;;  %v2558_v34 = vpop.f32.mrb[131].mxu0  ;;  %12338 = vst [vmem:[#allocation53_spill] sm:$0xff] %v10214_v26  ;;  %v10217_v17 = vadd.f32 %v9667_v47, %v1778_v41 }
 0x3bb   : > { %3031 = vmatmul.mubr.f32.gmra.mrb[64].mxu1 %v661_v30  ;;  %v673_v30 = vld [vmem:[#allocation2 + $0x360] sm:$0xff]  ;;  %v1779_v34 = vmul.f32 %v9658_v37, %v1506_v3 }
 0x3bc   : > { %v2839_v21 = vmax.f32 %v2557_v33, 0.0  ;;  %3035 = vmatprep.mubr.f32.mxu1 %v668_v6  ;;  %12339 = vst [vmem:[#allocation54_spill] sm:$0xff] %v10217_v17  ;;  %v680_v6 = vld [vmem:[#allocation2 + $0x398] sm:$0xff] }
 0x3bd   : > { %v2561_v10 = vpop.f32.mrb[132].mxu0 }
 0x3be   : > { %v7641_v25 = vpack.c.bf16 %v2839_v21, %v2838_v54  ;;  %v2563_v11 = vpop.f32.mrb[133].mxu0  ;;  %v2562_v62 = vadd.f32 %v2561_v10, %v10214_v26  ;;  %v686_v10 = vld [vmem:[#allocation2 + $0x3c8] sm:$0xff] }
 0x3bf   : > { %3036 = vmatmul.mubr.f32.gmra.mrb[66].mxu1 %v667_v16  ;;  %v1511_v11 = vpop.permute.xlu1 %1510 }
 0x3c0   : > { %7642 = vmatpush1.bf16.msra.mxu1 %v7641_v25  ;;  %3040 = vmatprep.mubr.f32.mxu1 %v674_v49  ;;  %v1780_v41 = vmul.f32 %v9658_v37, %v1511_v11  ;;  %v2840_v54 = vmax.f32 %v2562_v62, 0.0  ;;  %v679_v25 = vld [vmem:[#allocation2 + $0x390] sm:$0xff]  ;;  %v10225_v49 = vadd.f32 %v9667_v47, %v1779_v34  ;;  %v1516_v62 = vpop.permute.xlu0 %1515 }
 0x3c1   : > { %v2566_v33 = vpop.f32.mrb[134].mxu0  ;;  %7643 = vmatprep.subr.bf16.mxu1 %v12299_v48 }
 0x3c2   : > { %v2567_v42 = vadd.f32 %v2566_v33, %v10217_v17  ;;  %v2568_v22 = vpop.f32.mrb[135].mxu0  ;;  %12340 = vst [vmem:[#allocation55_spill] sm:$0xff] %v10225_v49  ;;  %v10228_v3 = vadd.f32 %v9667_v47, %v1780_v41 }
 0x3c3   : > { %3041 = vmatmul.mubr.f32.gmra.mrb[68].mxu1 %v673_v30  ;;  %v685_v30 = vld [vmem:[#allocation2 + $0x3c0] sm:$0xff]  ;;  %v1781_v22 = vmul.f32 %v9658_v37, %v1516_v62 }
 0x3c4   : > { %v2841_v21 = vmax.f32 %v2567_v42, 0.0  ;;  %3045 = vmatprep.mubr.f32.mxu1 %v680_v6  ;;  %12341 = vst [vmem:[#allocation56_spill] sm:$0xff] %v10228_v3  ;;  %v692_v6 = vld [vmem:[#allocation2 + $0x3f8] sm:$0xff] }
 0x3c5   : > { %v2571_v16 = vpop.f32.mrb[136].mxu0 }
 0x3c6   : > { %v7644_v26 = vpack.c.bf16 %v2841_v21, %v2840_v54  ;;  %v2573_v63 = vpop.f32.mrb[137].mxu0  ;;  %v2572_v33 = vadd.f32 %v2571_v16, %v10225_v49  ;;  %v698_v16 = vld [vmem:[#allocation2 + $0x428] sm:$0xff] }
 0x3c7   : > { %3046 = vmatmul.mubr.f32.gmra.mrb[70].mxu1 %v679_v25  ;;  %v1521_v63 = vpop.permute.xlu1 %1520 }
 0x3c8   : > { %7645 = vmatpush1.bf16.msra.mxu1 %v7644_v26  ;;  %3050 = vmatprep.mubr.f32.mxu1 %v686_v10  ;;  %v1782_v41 = vmul.f32 %v9658_v37, %v1521_v63  ;;  %v2842_v54 = vmax.f32 %v2572_v33, 0.0  ;;  %v691_v26 = vld [vmem:[#allocation2 + $0x3f0] sm:$0xff]  ;;  %v10236_v10 = vadd.f32 %v9667_v47, %v1781_v22  ;;  %v1526_v33 = vpop.permute.xlu0 %1525 }
 0x3c9   : > { %v2576_v42 = vpop.f32.mrb[138].mxu0  ;;  %7646 = vmatprep.subr.bf16.mxu1 %v12299_v48 }
 0x3ca   : > { %v2577_v34 = vadd.f32 %v2576_v42, %v10228_v3  ;;  %v2578_v11 = vpop.f32.mrb[139].mxu0  ;;  %12342 = vst [vmem:[#allocation57_spill] sm:$0xff] %v10236_v10  ;;  %v10239_v62 = vadd.f32 %v9667_v47, %v1782_v41 }
 0x3cb   : > { %3051 = vmatmul.mubr.f32.gmra.mrb[72].mxu1 %v685_v30  ;;  %v697_v30 = vld [vmem:[#allocation2 + $0x420] sm:$0xff]  ;;  %v1783_v11 = vmul.f32 %v9658_v37, %v1526_v33 }
 0x3cc   : > { %v2843_v21 = vmax.f32 %v2577_v34, 0.0  ;;  %3055 = vmatprep.mubr.f32.mxu1 %v692_v6  ;;  %12343 = vst [vmem:[#allocation58_spill] sm:$0xff] %v10239_v62  ;;  %v704_v6 = vld [vmem:[#allocation2 + $0x458] sm:$0xff] }
 0x3cd   : > { %v2581_v25 = vpop.f32.mrb[140].mxu0 }
 0x3ce   : > { %v7647_v49 = vpack.c.bf16 %v2843_v21, %v2842_v54  ;;  %v2583_v17 = vpop.f32.mrb[141].mxu0  ;;  %v2582_v42 = vadd.f32 %v2581_v25, %v10236_v10  ;;  %v710_v25 = vld [vmem:[#allocation2 + $0x488] sm:$0xff] }
 0x3cf   : > { %3056 = vmatmul.mubr.f32.gmra.mrb[74].mxu1 %v691_v26  ;;  %v1531_v17 = vpop.permute.xlu1 %1530 }
 0x3d0   : > { %7648 = vmatpush1.bf16.msra.mxu1 %v7647_v49  ;;  %3060 = vmatprep.mubr.f32.mxu1 %v698_v16  ;;  %v1784_v41 = vmul.f32 %v9658_v37, %v1531_v17  ;;  %v2844_v54 = vmax.f32 %v2582_v42, 0.0  ;;  %v703_v49 = vld [vmem:[#allocation2 + $0x450] sm:$0xff]  ;;  %v10247_v16 = vadd.f32 %v9667_v47, %v1783_v11  ;;  %v1536_v42 = vpop.permute.xlu0 %1535 }
 0x3d1   : > { %v2586_v34 = vpop.f32.mrb[142].mxu0  ;;  %7649 = vmatprep.subr.bf16.mxu1 %v12299_v48 }
 0x3d2   : > { %v2587_v22 = vadd.f32 %v2586_v34, %v10239_v62  ;;  %v2588_v63 = vpop.f32.mrb[143].mxu0  ;;  %12344 = vst [vmem:[#allocation59_spill] sm:$0xff] %v10247_v16  ;;  %v10250_v33 = vadd.f32 %v9667_v47, %v1784_v41 }
 0x3d3   : > { %3061 = vmatmul.mubr.f32.gmra.mrb[76].mxu1 %v697_v30  ;;  %v709_v30 = vld [vmem:[#allocation2 + $0x480] sm:$0xff]  ;;  %v1785_v63 = vmul.f32 %v9658_v37, %v1536_v42 }
 0x3d4   : > { %v2845_v21 = vmax.f32 %v2587_v22, 0.0  ;;  %3065 = vmatprep.mubr.f32.mxu1 %v704_v6  ;;  %12345 = vst [vmem:[#allocation60_spill] sm:$0xff] %v10250_v33  ;;  %v716_v6 = vld [vmem:[#allocation2 + $0x4b8] sm:$0xff] }
 0x3d5   : > { %v2591_v26 = vpop.f32.mrb[144].mxu0 }
 0x3d6   : > { %v7650_v10 = vpack.c.bf16 %v2845_v21, %v2844_v54  ;;  %v2593_v3 = vpop.f32.mrb[145].mxu0  ;;  %v2592_v34 = vadd.f32 %v2591_v26, %v10247_v16  ;;  %v722_v26 = vld [vmem:[#allocation2 + $0x4e8] sm:$0xff] }
 0x3d7   : > { %3066 = vmatmul.mubr.f32.gmra.mrb[78].mxu1 %v703_v49  ;;  %v1541_v3 = vpop.permute.xlu1 %1540 }
 0x3d8   : > { %7651 = vmatpush1.bf16.msra.mxu1 %v7650_v10  ;;  %3070 = vmatprep.mubr.f32.mxu1 %v710_v25  ;;  %v1786_v41 = vmul.f32 %v9658_v37, %v1541_v3  ;;  %v2846_v54 = vmax.f32 %v2592_v34, 0.0  ;;  %v715_v10 = vld [vmem:[#allocation2 + $0x4b0] sm:$0xff]  ;;  %v10258_v25 = vadd.f32 %v9667_v47, %v1785_v63  ;;  %v1546_v34 = vpop.permute.xlu0 %1545 }
 0x3d9   : > { %v2596_v22 = vpop.f32.mrb[146].mxu0  ;;  %7652 = vmatprep.subr.bf16.mxu1 %v12299_v48 }
 0x3da   : > { %v2597_v11 = vadd.f32 %v2596_v22, %v10250_v33  ;;  %v2598_v17 = vpop.f32.mrb[147].mxu0  ;;  %12346 = vst [vmem:[#allocation61_spill] sm:$0xff] %v10258_v25  ;;  %v10261_v42 = vadd.f32 %v9667_v47, %v1786_v41 }
 0x3db   : > { %3071 = vmatmul.mubr.f32.gmra.mrb[80].mxu1 %v709_v30  ;;  %v721_v30 = vld [vmem:[#allocation2 + $0x4e0] sm:$0xff]  ;;  %v1787_v17 = vmul.f32 %v9658_v37, %v1546_v34 }
 0x3dc   : > { %v2847_v21 = vmax.f32 %v2597_v11, 0.0  ;;  %3075 = vmatprep.mubr.f32.mxu1 %v716_v6  ;;  %12347 = vst [vmem:[#allocation62_spill] sm:$0xff] %v10261_v42  ;;  %v728_v6 = vld [vmem:[#allocation2 + $0x518] sm:$0xff] }
 0x3dd   : > { %v2601_v49 = vpop.f32.mrb[148].mxu0 }
 0x3de   : > { %v7653_v16 = vpack.c.bf16 %v2847_v21, %v2846_v54  ;;  %v2603_v62 = vpop.f32.mrb[149].mxu0  ;;  %v2602_v22 = vadd.f32 %v2601_v49, %v10258_v25  ;;  %v734_v49 = vld [vmem:[#allocation2 + $0x548] sm:$0xff] }
 0x3df   : > { %3076 = vmatmul.mubr.f32.gmra.mrb[82].mxu1 %v715_v10  ;;  %v1551_v62 = vpop.permute.xlu1 %1550 }
 0x3e0   : > { %7654 = vmatpush1.bf16.msra.mxu1 %v7653_v16  ;;  %3080 = vmatprep.mubr.f32.mxu1 %v722_v26  ;;  %v1788_v41 = vmul.f32 %v9658_v37, %v1551_v62  ;;  %v2848_v54 = vmax.f32 %v2602_v22, 0.0  ;;  %v727_v16 = vld [vmem:[#allocation2 + $0x510] sm:$0xff]  ;;  %v10269_v26 = vadd.f32 %v9667_v47, %v1787_v17  ;;  %v1556_v22 = vpop.permute.xlu0 %1555 }
 0x3e1   : > { %v2606_v11 = vpop.f32.mrb[150].mxu0  ;;  %7655 = vmatprep.subr.bf16.mxu1 %v12299_v48 }
 0x3e2   : > { %v2607_v63 = vadd.f32 %v2606_v11, %v10261_v42  ;;  %v2608_v3 = vpop.f32.mrb[151].mxu0  ;;  %12348 = vst [vmem:[#allocation63_spill] sm:$0xff] %v10269_v26  ;;  %v10272_v34 = vadd.f32 %v9667_v47, %v1788_v41 }
 0x3e3   : > { %3081 = vmatmul.mubr.f32.gmra.mrb[84].mxu1 %v721_v30  ;;  %v733_v30 = vld [vmem:[#allocation2 + $0x540] sm:$0xff]  ;;  %v1789_v3 = vmul.f32 %v9658_v37, %v1556_v22 }
 0x3e4   : > { %v2849_v21 = vmax.f32 %v2607_v63, 0.0  ;;  %3085 = vmatprep.mubr.f32.mxu1 %v728_v6  ;;  %12349 = vst [vmem:[#allocation64_spill] sm:$0xff] %v10272_v34  ;;  %v740_v6 = vld [vmem:[#allocation2 + $0x578] sm:$0xff] }
 0x3e5   : > { %v2611_v10 = vpop.f32.mrb[152].mxu0 }
 0x3e6   : > { %v7656_v25 = vpack.c.bf16 %v2849_v21, %v2848_v54  ;;  %v2613_v33 = vpop.f32.mrb[153].mxu0  ;;  %v2612_v11 = vadd.f32 %v2611_v10, %v10269_v26  ;;  %v746_v10 = vld [vmem:[#allocation2 + $0x5a8] sm:$0xff] }
 0x3e7   : > { %3086 = vmatmul.mubr.f32.gmra.mrb[86].mxu1 %v727_v16  ;;  %v1561_v33 = vpop.permute.xlu1 %1560 }
 0x3e8   : > { %7657 = vmatpush1.bf16.msra.mxu1 %v7656_v25  ;;  %3090 = vmatprep.mubr.f32.mxu1 %v734_v49  ;;  %v1790_v41 = vmul.f32 %v9658_v37, %v1561_v33  ;;  %v2850_v54 = vmax.f32 %v2612_v11, 0.0  ;;  %v739_v25 = vld [vmem:[#allocation2 + $0x570] sm:$0xff]  ;;  %v10280_v49 = vadd.f32 %v9667_v47, %v1789_v3  ;;  %v1566_v11 = vpop.permute.xlu0 %1565 }
 0x3e9   : > { %v2616_v63 = vpop.f32.mrb[154].mxu0  ;;  %7658 = vmatprep.subr.bf16.mxu1 %v12299_v48 }
 0x3ea   : > { %v2617_v17 = vadd.f32 %v2616_v63, %v10272_v34  ;;  %v2618_v62 = vpop.f32.mrb[155].mxu0  ;;  %12350 = vst [vmem:[#allocation65_spill] sm:$0xff] %v10280_v49  ;;  %v10283_v22 = vadd.f32 %v9667_v47, %v1790_v41 }
 0x3eb   : > { %3091 = vmatmul.mubr.f32.gmra.mrb[88].mxu1 %v733_v30  ;;  %v745_v30 = vld [vmem:[#allocation2 + $0x5a0] sm:$0xff]  ;;  %v1791_v62 = vmul.f32 %v9658_v37, %v1566_v11  ;;  %v357_v11 = vld [vmem:[%s12186_s5 + $0x58] sm:$0xff] }
 0x3ec   : > { %v2851_v21 = vmax.f32 %v2617_v17, 0.0  ;;  %3095 = vmatprep.mubr.f32.mxu1 %v740_v6  ;;  %12351 = vst [vmem:[#allocation66_spill] sm:$0xff] %v10283_v22  ;;  %v752_v6 = vld [vmem:[#allocation2 + $0x5d8] sm:$0xff] }
 0x3ed   : > { %v2621_v16 = vpop.f32.mrb[156].mxu0 }
 0x3ee   : > { %v7659_v26 = vpack.c.bf16 %v2851_v21, %v2850_v54  ;;  %v2623_v42 = vpop.f32.mrb[157].mxu0  ;;  %v2622_v63 = vadd.f32 %v2621_v16, %v10280_v49  ;;  %v568_v16 = vld [vmem:[#allocation2 + $0x18] sm:$0xff] }
 0x3ef   : > { %3096 = vmatmul.mubr.f32.gmra.mrb[90].mxu1 %v739_v25  ;;  %v1571_v42 = vpop.permute.xlu1 %1570 }
 0x3f0   : > { %7660 = vmatpush1.bf16.msra.mxu1 %v7659_v26  ;;  %3100 = vmatprep.mubr.f32.mxu1 %v746_v10  ;;  %v1792_v41 = vmul.f32 %v9658_v37, %v1571_v42  ;;  %v2852_v54 = vmax.f32 %v2622_v63, 0.0  ;;  %v751_v26 = vld [vmem:[#allocation2 + $0x5d0] sm:$0xff]  ;;  %v10291_v10 = vadd.f32 %v9667_v47, %v1791_v62 }
 0x3f1   : > { %v2626_v17 = vpop.f32.mrb[158].mxu0  ;;  %7661 = vmatprep.subr.bf16.mxu1 %v12299_v48  ;;  %v567_v62 = vld [vmem:[#allocation2 + $0x10] sm:$0xff] }
 0x3f2   : > { %v2627_v3 = vadd.f32 %v2626_v17, %v10283_v22  ;;  %v2628_v33 = vpop.f32.mrb[159].mxu0  ;;  %12352 = vst [vmem:[#allocation67_spill] sm:$0xff] %v10291_v10  ;;  %v10302_v17 = vadd.f32 %v9667_v47, %v1792_v41 }
 0x3f3   : > { %3101 = vmatmul.mubr.f32.gmra.mrb[92].mxu1 %v745_v30  ;;  %v358_v30 = vld [vmem:[%s12186_s5 + $0x60] sm:$0xff]  ;;  %v574_v33 = vld [vmem:[#allocation2 + $0x48] sm:$0xff]  ;;  %v1581_v41 = vpop.permute.xlu1 %1580 }
 0x3f4   : > { %v2853_v21 = vmax.f32 %v2627_v3, 0.0  ;;  %3105 = vmatprep.mubr.f32.mxu1 %v752_v6  ;;  %v10299_v63 = vpack.c.bf16 %v358_v30, %v357_v11  ;;  %12353 = vst [vmem:[#allocation68_spill] sm:$0xff] %v10302_v17  ;;  %v580_v30 = vld [vmem:[#allocation2 + $0x78] sm:$0xff] }
 0x3f5   : > { %v2631_v25 = vpop.f32.mrb[160].mxu0 }
 0x3f6   : > { %v7662_v49 = vpack.c.bf16 %v2853_v21, %v2852_v54  ;;  %v2633_v34 = vpop.f32.mrb[161].mxu0  ;;  %v2632_v6 = vadd.f32 %v2631_v25, %v10291_v10  ;;  %7717 = vmatprep.subr.bf16.mxu0 %v10299_v63 }
 0x3f7   : > { %3106 = vmatmul.mubr.f32.gmra.mrb[94].mxu1 %v751_v26  ;;  %v1576_v34 = vpop.permute.xlu0 %1575  ;;  %7719 = vmatpush3.bf16.msra.mxu0 %v10299_v63 }
 0x3f8   : > { %7663 = vmatpush1.bf16.msra.mxu1 %v7662_v49  ;;  %3175 = vmatprep.mubr.f32.mxu1 %v568_v16  ;;  %v1793_v42 = vmul.f32 %v9658_v37, %v1576_v34  ;;  %v1794_v49 = vmul.f32 %v9658_v37, %v1581_v41  ;;  %v2854_v26 = vmax.f32 %v2632_v6, 0.0  ;;  %v573_v16 = vld [vmem:[#allocation2 + $0x40] sm:$0xff] }
 0x3f9   : > { %v2636_v3 = vpop.f32.mrb[162].mxu0  ;;  %7664 = vmatprep.subr.bf16.mxu1 %v12299_v48 }
 0x3fa   : > { %v2637_v54 = vadd.f32 %v2636_v3, %v10302_v17  ;;  %v2638_v21 = vpop.f32.mrb[163].mxu0  ;;  %v10312_v10 = vadd.f32 %v9667_v47, %v1793_v42  ;;  %v10315_v3 = vadd.f32 %v9667_v47, %v1794_v49 }
 0x3fb   : > { %3176 = vmatmul.mubr.f32.vlgmr.msra.gmra.mrb[32].mxu1 %v567_v62  ;;  %v579_v62 = vld [vmem:[#allocation2 + $0x70] sm:$0xff]  ;;  %v1586_v6 = vpop.permute.xlu0 %1585 }
 0x3fc   : > { %v2855_v25 = vmax.f32 %v2637_v54, 0.0  ;;  %3180 = vmatprep.mubr.f32.mxu1 %v574_v33  ;;  %12354 = vst [vmem:[#allocation69_spill] sm:$0xff] %v10312_v10  ;;  %12355 = vst [vmem:[#allocation70_spill] sm:$0xff] %v10315_v3  ;;  %v586_v33 = vld [vmem:[#allocation2 + $0xa8] sm:$0xff]  ;;  %v1795_v41 = vmul.f32 %v9658_v37, %v1586_v6 }
 0x3fd   : > { %v2641_v11 = vpop.f32.mrb[164].mxu0 }
 0x3fe   : > { %v7665_v22 = vpack.c.bf16 %v2855_v25, %v2854_v26  ;;  %v2643_v34 = vpop.f32.mrb[165].mxu0  ;;  %v2642_v21 = vadd.f32 %v2641_v11, %v10312_v10  ;;  %v1591_v25 = vpop.permute.xlu1 %1590  ;;  %v10323_v10 = vadd.f32 %v9667_v47, %v1795_v41 }
 0x3ff   : > { %3181 = vmatmul.mubr.f32.gmra.mrb[34].mxu1 %v573_v16  ;;  %v1796_v49 = vmul.f32 %v9658_v37, %v1591_v25 }
 0x400   : > { %7666 = vmatpush1.bf16.msra.mxu1 %v7665_v22  ;;  %3185 = vmatprep.mubr.f32.mxu1 %v580_v30  ;;  %v2856_v16 = vmax.f32 %v2642_v21, 0.0  ;;  %v585_v22 = vld [vmem:[#allocation2 + $0xa0] sm:$0xff]  ;;  %v592_v30 = vld [vmem:[#allocation2 + $0xd8] sm:$0xff]  ;;  %12356 = vst [vmem:[#allocation71_spill] sm:$0xff] %v10323_v10  ;;  %v1596_v21 = vpop.permute.xlu0 %1595 }
 0x401   : > { %v2646_v54 = vpop.f32.mrb[166].mxu0  ;;  %7667 = vmatprep.subr.bf16.mxu1 %v12299_v48  ;;  %v10326_v6 = vadd.f32 %v9667_v47, %v1796_v49 }
 0x402   : > { %v2647_v42 = vadd.f32 %v2646_v54, %v10315_v3  ;;  %v2648_v26 = vpop.f32.mrb[167].mxu0 }
 0x403   : > { %3186 = vmatmul.mubr.f32.gmra.mrb[36].mxu1 %v579_v62  ;;  %12357 = vst [vmem:[#allocation72_spill] sm:$0xff] %v10326_v6  ;;  %v591_v62 = vld [vmem:[#allocation2 + $0xd0] sm:$0xff]  ;;  %v1797_v26 = vmul.f32 %v9658_v37, %v1596_v21 }
 0x404   : > { %v2857_v34 = vmax.f32 %v2647_v42, 0.0  ;;  %3190 = vmatprep.mubr.f32.mxu1 %v586_v33  ;;  %v598_v33 = vld [vmem:[#allocation2 + $0x108] sm:$0xff] }
 0x405   : > { %v2651_v11 = vpop.f32.mrb[168].mxu0 }
 0x406   : > { %v7668_v17 = vpack.c.bf16 %v2857_v34, %v2856_v16  ;;  %v2653_v29 = vpop.f32.mrb[169].mxu0  ;;  %v2652_v54 = vadd.f32 %v2651_v11, %v10323_v10  ;;  %v604_v11 = vld [vmem:[#allocation2 + $0x138] sm:$0xff] }
 0x407   : > { %3191 = vmatmul.mubr.f32.gmra.mrb[38].mxu1 %v585_v22  ;;  %v1601_v29 = vpop.permute.xlu1 %1600 }
 0x408   : > { %7669 = vmatpush1.bf16.msra.mxu1 %v7668_v17  ;;  %3195 = vmatprep.mubr.f32.mxu1 %v592_v30  ;;  %v1798_v49 = vmul.f32 %v9658_v37, %v1601_v29  ;;  %v2858_v16 = vmax.f32 %v2652_v54, 0.0  ;;  %v597_v17 = vld [vmem:[#allocation2 + $0x100] sm:$0xff]  ;;  %v10334_v30 = vadd.f32 %v9667_v47, %v1797_v26  ;;  %v1606_v54 = vpop.permute.xlu0 %1605 }
 0x409   : > { %v2656_v42 = vpop.f32.mrb[170].mxu0  ;;  %7670 = vmatprep.subr.bf16.mxu1 %v12299_v48 }
 0x40a   : > { %v2657_v41 = vadd.f32 %v2656_v42, %v10326_v6  ;;  %v2658_v25 = vpop.f32.mrb[171].mxu0  ;;  %12358 = vst [vmem:[#allocation73_spill] sm:$0xff] %v10334_v30  ;;  %v10337_v21 = vadd.f32 %v9667_v47, %v1798_v49 }
 0x40b   : > { %3196 = vmatmul.mubr.f32.gmra.mrb[40].mxu1 %v591_v62  ;;  %v603_v62 = vld [vmem:[#allocation2 + $0x130] sm:$0xff]  ;;  %v1799_v25 = vmul.f32 %v9658_v37, %v1606_v54 }
 0x40c   : > { %v2859_v34 = vmax.f32 %v2657_v41, 0.0  ;;  %3200 = vmatprep.mubr.f32.mxu1 %v598_v33  ;;  %12359 = vst [vmem:[#allocation74_spill] sm:$0xff] %v10337_v21  ;;  %v610_v33 = vld [vmem:[#allocation2 + $0x168] sm:$0xff] }
 0x40d   : > { %v2661_v22 = vpop.f32.mrb[172].mxu0 }
 0x40e   : > { %v7671_v10 = vpack.c.bf16 %v2859_v34, %v2858_v16  ;;  %v2663_v3 = vpop.f32.mrb[173].mxu0  ;;  %v2662_v42 = vadd.f32 %v2661_v22, %v10334_v30  ;;  %v616_v22 = vld [vmem:[#allocation2 + $0x198] sm:$0xff] }
 0x40f   : > { %3201 = vmatmul.mubr.f32.gmra.mrb[42].mxu1 %v597_v17  ;;  %v1611_v3 = vpop.permute.xlu1 %1610 }
 0x410   : > { %7672 = vmatpush1.bf16.msra.mxu1 %v7671_v10  ;;  %3205 = vmatprep.mubr.f32.mxu1 %v604_v11  ;;  %v1800_v49 = vmul.f32 %v9658_v37, %v1611_v3  ;;  %v2860_v16 = vmax.f32 %v2662_v42, 0.0  ;;  %v609_v10 = vld [vmem:[#allocation2 + $0x160] sm:$0xff]  ;;  %v10345_v11 = vadd.f32 %v9667_v47, %v1799_v25  ;;  %v1616_v42 = vpop.permute.xlu0 %1615 }
 0x411   : > { %v2666_v41 = vpop.f32.mrb[174].mxu0  ;;  %7673 = vmatprep.subr.bf16.mxu1 %v12299_v48 }
 0x412   : > { %v2667_v26 = vadd.f32 %v2666_v41, %v10337_v21  ;;  %v2668_v29 = vpop.f32.mrb[175].mxu0  ;;  %12360 = vst [vmem:[#allocation75_spill] sm:$0xff] %v10345_v11  ;;  %v10348_v54 = vadd.f32 %v9667_v47, %v1800_v49 }
 0x413   : > { %3206 = vmatmul.mubr.f32.gmra.mrb[44].mxu1 %v603_v62  ;;  %v615_v62 = vld [vmem:[#allocation2 + $0x190] sm:$0xff]  ;;  %v1801_v29 = vmul.f32 %v9658_v37, %v1616_v42 }
 0x414   : > { %v2861_v34 = vmax.f32 %v2667_v26, 0.0  ;;  %3210 = vmatprep.mubr.f32.mxu1 %v610_v33  ;;  %12361 = vst [vmem:[#allocation76_spill] sm:$0xff] %v10348_v54  ;;  %v622_v33 = vld [vmem:[#allocation2 + $0x1c8] sm:$0xff] }
 0x415   : > { %v2671_v17 = vpop.f32.mrb[176].mxu0 }
 0x416   : > { %v7674_v30 = vpack.c.bf16 %v2861_v34, %v2860_v16  ;;  %v2673_v6 = vpop.f32.mrb[177].mxu0  ;;  %v2672_v41 = vadd.f32 %v2671_v17, %v10345_v11  ;;  %v628_v17 = vld [vmem:[#allocation2 + $0x1f8] sm:$0xff] }
 0x417   : > { %3211 = vmatmul.mubr.f32.gmra.mrb[46].mxu1 %v609_v10  ;;  %v1621_v6 = vpop.permute.xlu1 %1620 }
 0x418   : > { %7675 = vmatpush1.bf16.msra.mxu1 %v7674_v30  ;;  %3215 = vmatprep.mubr.f32.mxu1 %v616_v22  ;;  %v1802_v49 = vmul.f32 %v9658_v37, %v1621_v6  ;;  %v2862_v16 = vmax.f32 %v2672_v41, 0.0  ;;  %v621_v30 = vld [vmem:[#allocation2 + $0x1c0] sm:$0xff]  ;;  %v10356_v22 = vadd.f32 %v9667_v47, %v1801_v29  ;;  %v1626_v41 = vpop.permute.xlu0 %1625 }
 0x419   : > { %v2676_v26 = vpop.f32.mrb[178].mxu0  ;;  %7676 = vmatprep.subr.bf16.mxu1 %v12299_v48 }
 0x41a   : > { %v2677_v25 = vadd.f32 %v2676_v26, %v10348_v54  ;;  %v2678_v3 = vpop.f32.mrb[179].mxu0  ;;  %12362 = vst [vmem:[#allocation77_spill] sm:$0xff] %v10356_v22  ;;  %v10359_v42 = vadd.f32 %v9667_v47, %v1802_v49 }
 0x41b   : > { %3216 = vmatmul.mubr.f32.gmra.mrb[48].mxu1 %v615_v62  ;;  %v627_v62 = vld [vmem:[#allocation2 + $0x1f0] sm:$0xff]  ;;  %v1803_v3 = vmul.f32 %v9658_v37, %v1626_v41 }
 0x41c   : > { %v2863_v34 = vmax.f32 %v2677_v25, 0.0  ;;  %3220 = vmatprep.mubr.f32.mxu1 %v622_v33  ;;  %12363 = vst [vmem:[#allocation78_spill] sm:$0xff] %v10359_v42  ;;  %v634_v33 = vld [vmem:[#allocation2 + $0x228] sm:$0xff] }
 0x41d   : > { %v2681_v10 = vpop.f32.mrb[180].mxu0 }
 0x41e   : > { %v7677_v11 = vpack.c.bf16 %v2863_v34, %v2862_v16  ;;  %v2683_v21 = vpop.f32.mrb[181].mxu0  ;;  %v2682_v26 = vadd.f32 %v2681_v10, %v10356_v22  ;;  %v640_v10 = vld [vmem:[#allocation2 + $0x258] sm:$0xff] }
 0x41f   : > { %3221 = vmatmul.mubr.f32.gmra.mrb[50].mxu1 %v621_v30  ;;  %v1631_v21 = vpop.permute.xlu1 %1630 }
 0x420   : > { %7678 = vmatpush1.bf16.msra.mxu1 %v7677_v11  ;;  %3225 = vmatprep.mubr.f32.mxu1 %v628_v17  ;;  %v1804_v49 = vmul.f32 %v9658_v37, %v1631_v21  ;;  %v2864_v16 = vmax.f32 %v2682_v26, 0.0  ;;  %v633_v11 = vld [vmem:[#allocation2 + $0x220] sm:$0xff]  ;;  %v10367_v17 = vadd.f32 %v9667_v47, %v1803_v3  ;;  %v1636_v26 = vpop.permute.xlu0 %1635 }
 0x421   : > { %v2686_v25 = vpop.f32.mrb[182].mxu0  ;;  %7679 = vmatprep.subr.bf16.mxu1 %v12299_v48 }
 0x422   : > { %v2687_v29 = vadd.f32 %v2686_v25, %v10359_v42  ;;  %v2688_v6 = vpop.f32.mrb[183].mxu0  ;;  %12364 = vst [vmem:[#allocation79_spill] sm:$0xff] %v10367_v17  ;;  %v10370_v41 = vadd.f32 %v9667_v47, %v1804_v49 }
 0x423   : > { %3226 = vmatmul.mubr.f32.gmra.mrb[52].mxu1 %v627_v62  ;;  %v639_v62 = vld [vmem:[#allocation2 + $0x250] sm:$0xff]  ;;  %v1805_v6 = vmul.f32 %v9658_v37, %v1636_v26 }
 0x424   : > { %v2865_v34 = vmax.f32 %v2687_v29, 0.0  ;;  %3230 = vmatprep.mubr.f32.mxu1 %v634_v33  ;;  %12365 = vst [vmem:[#allocation80_spill] sm:$0xff] %v10370_v41  ;;  %v646_v33 = vld [vmem:[#allocation2 + $0x288] sm:$0xff] }
 0x425   : > { %v2691_v30 = vpop.f32.mrb[184].mxu0 }
 0x426   : > { %v7680_v22 = vpack.c.bf16 %v2865_v34, %v2864_v16  ;;  %v2693_v54 = vpop.f32.mrb[185].mxu0  ;;  %v2692_v25 = vadd.f32 %v2691_v30, %v10367_v17  ;;  %v652_v30 = vld [vmem:[#allocation2 + $0x2b8] sm:$0xff] }
 0x427   : > { %3231 = vmatmul.mubr.f32.gmra.mrb[54].mxu1 %v633_v11  ;;  %v1641_v54 = vpop.permute.xlu1 %1640 }
 0x428   : > { %7681 = vmatpush1.bf16.msra.mxu1 %v7680_v22  ;;  %3235 = vmatprep.mubr.f32.mxu1 %v640_v10  ;;  %v1806_v49 = vmul.f32 %v9658_v37, %v1641_v54  ;;  %v2866_v16 = vmax.f32 %v2692_v25, 0.0  ;;  %v645_v22 = vld [vmem:[#allocation2 + $0x280] sm:$0xff]  ;;  %v10378_v10 = vadd.f32 %v9667_v47, %v1805_v6  ;;  %v1646_v25 = vpop.permute.xlu0 %1645 }
 0x429   : > { %v2696_v29 = vpop.f32.mrb[186].mxu0  ;;  %7682 = vmatprep.subr.bf16.mxu1 %v12299_v48 }
 0x42a   : > { %v2697_v3 = vadd.f32 %v2696_v29, %v10370_v41  ;;  %v2698_v21 = vpop.f32.mrb[187].mxu0  ;;  %12366 = vst [vmem:[#allocation81_spill] sm:$0xff] %v10378_v10  ;;  %v10381_v26 = vadd.f32 %v9667_v47, %v1806_v49 }
 0x42b   : > { %3236 = vmatmul.mubr.f32.gmra.mrb[56].mxu1 %v639_v62  ;;  %v651_v62 = vld [vmem:[#allocation2 + $0x2b0] sm:$0xff]  ;;  %v1807_v21 = vmul.f32 %v9658_v37, %v1646_v25 }
 0x42c   : > { %v2867_v34 = vmax.f32 %v2697_v3, 0.0  ;;  %3240 = vmatprep.mubr.f32.mxu1 %v646_v33  ;;  %12367 = vst [vmem:[#allocation82_spill] sm:$0xff] %v10381_v26  ;;  %v658_v33 = vld [vmem:[#allocation2 + $0x2e8] sm:$0xff] }
 0x42d   : > { %v2701_v11 = vpop.f32.mrb[188].mxu0 }
 0x42e   : > { %v7683_v17 = vpack.c.bf16 %v2867_v34, %v2866_v16  ;;  %v2703_v42 = vpop.f32.mrb[189].mxu0  ;;  %v2702_v29 = vadd.f32 %v2701_v11, %v10378_v10  ;;  %v664_v11 = vld [vmem:[#allocation2 + $0x318] sm:$0xff] }
 0x42f   : > { %3241 = vmatmul.mubr.f32.gmra.mrb[58].mxu1 %v645_v22  ;;  %v1651_v42 = vpop.permute.xlu1 %1650 }
 0x430   : > { %7684 = vmatpush1.bf16.msra.mxu1 %v7683_v17  ;;  %3245 = vmatprep.mubr.f32.mxu1 %v652_v30  ;;  %v1808_v49 = vmul.f32 %v9658_v37, %v1651_v42  ;;  %v2868_v16 = vmax.f32 %v2702_v29, 0.0  ;;  %v657_v17 = vld [vmem:[#allocation2 + $0x2e0] sm:$0xff]  ;;  %v10389_v30 = vadd.f32 %v9667_v47, %v1807_v21  ;;  %v1656_v29 = vpop.permute.xlu0 %1655 }
 0x431   : > { %v2706_v3 = vpop.f32.mrb[190].mxu0  ;;  %7685 = vmatprep.subr.bf16.mxu1 %v12299_v48 }
 0x432   : > { %v2707_v6 = vadd.f32 %v2706_v3, %v10381_v26  ;;  %v2708_v54 = vpop.f32.mrb[191].mxu0  ;;  %12368 = vst [vmem:[#allocation83_spill] sm:$0xff] %v10389_v30  ;;  %v10392_v25 = vadd.f32 %v9667_v47, %v1808_v49 }
 0x433   : > { %3246 = vmatmul.mubr.f32.gmra.mrb[60].mxu1 %v651_v62  ;;  %v663_v62 = vld [vmem:[#allocation2 + $0x310] sm:$0xff]  ;;  %v1809_v54 = vmul.f32 %v9658_v37, %v1656_v29 }
 0x434   : > { %v2869_v34 = vmax.f32 %v2707_v6, 0.0  ;;  %3250 = vmatprep.mubr.f32.mxu1 %v658_v33  ;;  %12369 = vst [vmem:[#allocation84_spill] sm:$0xff] %v10392_v25  ;;  %v670_v33 = vld [vmem:[#allocation2 + $0x348] sm:$0xff] }
 0x435   : > { %v2711_v22 = vpop.f32.mrb[192].mxu0 }
 0x436   : > { %v7686_v10 = vpack.c.bf16 %v2869_v34, %v2868_v16  ;;  %v2713_v41 = vpop.f32.mrb[193].mxu0  ;;  %v2712_v3 = vadd.f32 %v2711_v22, %v10389_v30  ;;  %v676_v22 = vld [vmem:[#allocation2 + $0x378] sm:$0xff] }
 0x437   : > { %3251 = vmatmul.mubr.f32.gmra.mrb[62].mxu1 %v657_v17  ;;  %v1661_v41 = vpop.permute.xlu1 %1660 }
 0x438   : > { %7687 = vmatpush1.bf16.msra.mxu1 %v7686_v10  ;;  %3255 = vmatprep.mubr.f32.mxu1 %v664_v11  ;;  %v1810_v49 = vmul.f32 %v9658_v37, %v1661_v41  ;;  %v2870_v16 = vmax.f32 %v2712_v3, 0.0  ;;  %v669_v10 = vld [vmem:[#allocation2 + $0x340] sm:$0xff]  ;;  %v10400_v11 = vadd.f32 %v9667_v47, %v1809_v54  ;;  %v1666_v3 = vpop.permute.xlu0 %1665 }
 0x439   : > { %v2716_v6 = vpop.f32.mrb[194].mxu0  ;;  %7688 = vmatprep.subr.bf16.mxu1 %v12299_v48 }
 0x43a   : > { %v2717_v21 = vadd.f32 %v2716_v6, %v10392_v25  ;;  %v2718_v42 = vpop.f32.mrb[195].mxu0  ;;  %12370 = vst [vmem:[#allocation85_spill] sm:$0xff] %v10400_v11  ;;  %v10403_v29 = vadd.f32 %v9667_v47, %v1810_v49 }
 0x43b   : > { %3256 = vmatmul.mubr.f32.gmra.mrb[64].mxu1 %v663_v62  ;;  %v675_v62 = vld [vmem:[#allocation2 + $0x370] sm:$0xff]  ;;  %v1811_v42 = vmul.f32 %v9658_v37, %v1666_v3 }
 0x43c   : > { %v2871_v34 = vmax.f32 %v2717_v21, 0.0  ;;  %3260 = vmatprep.mubr.f32.mxu1 %v670_v33  ;;  %12371 = vst [vmem:[#allocation86_spill] sm:$0xff] %v10403_v29  ;;  %v682_v33 = vld [vmem:[#allocation2 + $0x3a8] sm:$0xff] }
 0x43d   : > { %v2721_v17 = vpop.f32.mrb[196].mxu0 }
 0x43e   : > { %v7689_v30 = vpack.c.bf16 %v2871_v34, %v2870_v16  ;;  %v2723_v26 = vpop.f32.mrb[197].mxu0  ;;  %v2722_v6 = vadd.f32 %v2721_v17, %v10400_v11  ;;  %v688_v17 = vld [vmem:[#allocation2 + $0x3d8] sm:$0xff] }
 0x43f   : > { %3261 = vmatmul.mubr.f32.gmra.mrb[66].mxu1 %v669_v10  ;;  %v1671_v26 = vpop.permute.xlu1 %1670 }
 0x440   : > { %7690 = vmatpush1.bf16.msra.mxu1 %v7689_v30  ;;  %3265 = vmatprep.mubr.f32.mxu1 %v676_v22  ;;  %v1812_v49 = vmul.f32 %v9658_v37, %v1671_v26  ;;  %v2872_v16 = vmax.f32 %v2722_v6, 0.0  ;;  %v681_v30 = vld [vmem:[#allocation2 + $0x3a0] sm:$0xff]  ;;  %v10411_v22 = vadd.f32 %v9667_v47, %v1811_v42  ;;  %v1676_v6 = vpop.permute.xlu0 %1675 }
 0x441   : > { %v2726_v21 = vpop.f32.mrb[198].mxu0  ;;  %7691 = vmatprep.subr.bf16.mxu1 %v12299_v48 }
 0x442   : > { %v2727_v54 = vadd.f32 %v2726_v21, %v10403_v29  ;;  %v2728_v41 = vpop.f32.mrb[199].mxu0  ;;  %12372 = vst [vmem:[#allocation87_spill] sm:$0xff] %v10411_v22  ;;  %v10414_v3 = vadd.f32 %v9667_v47, %v1812_v49 }
 0x443   : > { %3266 = vmatmul.mubr.f32.gmra.mrb[68].mxu1 %v675_v62  ;;  %v687_v62 = vld [vmem:[#allocation2 + $0x3d0] sm:$0xff]  ;;  %v1813_v41 = vmul.f32 %v9658_v37, %v1676_v6 }
 0x444   : > { %v2873_v34 = vmax.f32 %v2727_v54, 0.0  ;;  %3270 = vmatprep.mubr.f32.mxu1 %v682_v33  ;;  %12373 = vst [vmem:[#allocation88_spill] sm:$0xff] %v10414_v3  ;;  %v694_v33 = vld [vmem:[#allocation2 + $0x408] sm:$0xff] }
 0x445   : > { %v2731_v10 = vpop.f32.mrb[200].mxu0 }
 0x446   : > { %v7692_v11 = vpack.c.bf16 %v2873_v34, %v2872_v16  ;;  %v2733_v25 = vpop.f32.mrb[201].mxu0  ;;  %v2732_v21 = vadd.f32 %v2731_v10, %v10411_v22  ;;  %v700_v10 = vld [vmem:[#allocation2 + $0x438] sm:$0xff] }
 0x447   : > { %3271 = vmatmul.mubr.f32.gmra.mrb[70].mxu1 %v681_v30  ;;  %v1681_v25 = vpop.permute.xlu1 %1680 }
 0x448   : > { %7693 = vmatpush1.bf16.msra.mxu1 %v7692_v11  ;;  %3275 = vmatprep.mubr.f32.mxu1 %v688_v17  ;;  %v1814_v49 = vmul.f32 %v9658_v37, %v1681_v25  ;;  %v2874_v16 = vmax.f32 %v2732_v21, 0.0  ;;  %v693_v11 = vld [vmem:[#allocation2 + $0x400] sm:$0xff]  ;;  %v10422_v17 = vadd.f32 %v9667_v47, %v1813_v41  ;;  %v1686_v21 = vpop.permute.xlu0 %1685 }
 0x449   : > { %v2736_v54 = vpop.f32.mrb[202].mxu0  ;;  %7694 = vmatprep.subr.bf16.mxu1 %v12299_v48 }
 0x44a   : > { %v2737_v42 = vadd.f32 %v2736_v54, %v10414_v3  ;;  %v2738_v26 = vpop.f32.mrb[203].mxu0  ;;  %12374 = vst [vmem:[#allocation89_spill] sm:$0xff] %v10422_v17  ;;  %v10425_v6 = vadd.f32 %v9667_v47, %v1814_v49  ;;  %v359_v49 = vld [vmem:[%s12186_s5 + $0x68] sm:$0xff] }
 0x44b   : > { %3276 = vmatmul.mubr.f32.gmra.mrb[72].mxu1 %v687_v62  ;;  %v699_v62 = vld [vmem:[#allocation2 + $0x430] sm:$0xff]  ;;  %v1815_v26 = vmul.f32 %v9658_v37, %v1686_v21 }
 0x44c   : > { %v2875_v34 = vmax.f32 %v2737_v42, 0.0  ;;  %3280 = vmatprep.mubr.f32.mxu1 %v694_v33  ;;  %12375 = vst [vmem:[#allocation90_spill] sm:$0xff] %v10425_v6  ;;  %v706_v33 = vld [vmem:[#allocation2 + $0x468] sm:$0xff] }
 0x44d   : > { %v2741_v30 = vpop.f32.mrb[204].mxu0 }
 0x44e   : > { %v7695_v22 = vpack.c.bf16 %v2875_v34, %v2874_v16  ;;  %v2743_v29 = vpop.f32.mrb[205].mxu0  ;;  %v2742_v54 = vadd.f32 %v2741_v30, %v10422_v17  ;;  %v705_v30 = vld [vmem:[#allocation2 + $0x460] sm:$0xff] }
 0x44f   : > { %3281 = vmatmul.mubr.f32.gmra.mrb[74].mxu1 %v693_v11  ;;  %v1691_v29 = vpop.permute.xlu1 %1690 }
 0x450   : > { %7696 = vmatpush1.bf16.msra.mxu1 %v7695_v22  ;;  %3285 = vmatprep.mubr.f32.mxu1 %v700_v10  ;;  %v360_v22 = vld [vmem:[%s12186_s5 + $0x70] sm:$0xff]  ;;  %v1816_v16 = vmul.f32 %v9658_v37, %v1691_v29  ;;  %v2876_v34 = vmax.f32 %v2742_v54, 0.0 }
 0x451   : > { %v2746_v42 = vpop.f32.mrb[206].mxu0  ;;  %7697 = vmatprep.subr.bf16.mxu1 %v12299_v48  ;;  %v10438_v10 = vpack.c.bf16 %v360_v22, %v359_v49  ;;  %v718_v22 = vld [vmem:[#allocation2 + $0x4c8] sm:$0xff] }
 0x452   : > { %v2747_v41 = vadd.f32 %v2746_v42, %v10425_v6  ;;  %v2748_v25 = vpop.f32.mrb[207].mxu0  ;;  %v712_v42 = vld [vmem:[#allocation2 + $0x498] sm:$0xff]  ;;  %v10446_v29 = vadd.f32 %v9667_v47, %v1816_v16 }
 0x453   : > { %3286 = vmatmul.mubr.f32.gmra.mrb[76].mxu1 %v699_v62  ;;  %v10441_v62 = vadd.f32 %v9667_v47, %v1815_v26  ;;  %7721 = vmatprep.subr.bf16.mxu0 %v10438_v10 }
 0x454   : > { %v2877_v11 = vmax.f32 %v2747_v41, 0.0  ;;  %3290 = vmatprep.mubr.f32.mxu1 %v706_v33  ;;  %7723 = vmatpush3.bf16.msra.mxu0 %v10438_v10  ;;  %12377 = vst [vmem:[#allocation92_spill] sm:$0xff] %v10446_v29  ;;  %v711_v33 = vld [vmem:[#allocation2 + $0x490] sm:$0xff]  ;;  %v1696_v41 = vpop.permute.xlu0 %1695 }
 0x455   : > { %v2751_v21 = vpop.f32.mrb[208].mxu0  ;;  %12376 = vst [vmem:[#allocation91_spill] sm:$0xff] %v10441_v62 }
 0x456   : > { %v7698_v25 = vpack.c.bf16 %v2877_v11, %v2876_v34  ;;  %v2753_v6 = vpop.f32.mrb[209].mxu0  ;;  %v2752_v54 = vadd.f32 %v2751_v21, %v10441_v62  ;;  %v1701_v11 = vpop.permute.xlu1 %1700  ;;  %v717_v21 = vld [vmem:[#allocation2 + $0x4c0] sm:$0xff] }
 0x457   : > { %3291 = vmatmul.mubr.f32.gmra.mrb[78].mxu1 %v705_v30  ;;  %v1817_v6 = vmul.f32 %v9658_v37, %v1696_v41  ;;  %v1818_v16 = vmul.f32 %v9658_v37, %v1701_v11 }
 0x458   : > { %7699 = vmatpush1.bf16.msra.mxu1 %v7698_v25  ;;  %3295 = vmatprep.mubr.f32.mxu1 %v712_v42  ;;  %v2878_v30 = vmax.f32 %v2752_v54, 0.0  ;;  %v724_v25 = vld [vmem:[#allocation2 + $0x4f8] sm:$0xff]  ;;  %v1706_v54 = vpop.permute.xlu0 %1705 }
 0x459   : > { %v2756_v49 = vpop.f32.mrb[210].mxu0  ;;  %7700 = vmatprep.subr.bf16.mxu1 %v12299_v48  ;;  %v10454_v62 = vadd.f32 %v9667_v47, %v1817_v6  ;;  %v10457_v41 = vadd.f32 %v9667_v47, %v1818_v16 }
 0x45a   : > { %v2757_v26 = vadd.f32 %v2756_v49, %v10446_v29  ;;  %v2758_v34 = vpop.f32.mrb[211].mxu0 }
 0x45b   : > { %3296 = vmatmul.mubr.f32.gmra.mrb[80].mxu1 %v711_v33  ;;  %12378 = vst [vmem:[#allocation93_spill] sm:$0xff] %v10454_v62  ;;  %v723_v33 = vld [vmem:[#allocation2 + $0x4f0] sm:$0xff]  ;;  %v1819_v34 = vmul.f32 %v9658_v37, %v1706_v54 }
 0x45c   : > { %v2879_v17 = vmax.f32 %v2757_v26, 0.0  ;;  %3300 = vmatprep.mubr.f32.mxu1 %v718_v22  ;;  %v730_v22 = vld [vmem:[#allocation2 + $0x528] sm:$0xff]  ;;  %v1716_v38 = vpop.permute.xlu0 %1715 }
 0x45d   : > { %v2761_v42 = vpop.f32.mrb[212].mxu0 }
 0x45e   : > { %v7701_v3 = vpack.c.bf16 %v2879_v17, %v2878_v30  ;;  %v2763_v55 = vpop.f32.mrb[213].mxu0  ;;  %v2762_v49 = vadd.f32 %v2761_v42, %v10454_v62  ;;  %v736_v42 = vld [vmem:[#allocation2 + $0x558] sm:$0xff] }
 0x45f   : > { %3301 = vmatmul.mubr.f32.gmra.mrb[82].mxu1 %v717_v21  ;;  %v1711_v55 = vpop.permute.xlu1 %1710 }
 0x460   : > { %7702 = vmatpush1.bf16.msra.mxu1 %v7701_v3  ;;  %3305 = vmatprep.mubr.f32.mxu1 %v724_v25  ;;  %v1820_v11 = vmul.f32 %v9658_v37, %v1711_v55  ;;  %v2880_v16 = vmax.f32 %v2762_v49, 0.0  ;;  %v729_v3 = vld [vmem:[#allocation2 + $0x520] sm:$0xff]  ;;  %v10465_v25 = vadd.f32 %v9667_v47, %v1819_v34  ;;  %v735_v49 = vld [vmem:[#allocation2 + $0x550] sm:$0xff]  ;;  %v1821_v34 = vmul.f32 %v9658_v37, %v1716_v38 }
 0x461   : > { %v2766_v26 = vpop.f32.mrb[214].mxu0  ;;  %7703 = vmatprep.subr.bf16.mxu1 %v12299_v48 }
 0x462   : > { %v2767_v6 = vadd.f32 %v2766_v26, %v10457_v41  ;;  %v2768_v17 = vpop.f32.mrb[215].mxu0  ;;  %12379 = vst [vmem:[#allocation94_spill] sm:$0xff] %v10465_v25  ;;  %v10468_v54 = vadd.f32 %v9667_v47, %v1820_v11 }
 0x463   : > { %3306 = vmatmul.mubr.f32.gmra.mrb[84].mxu1 %v723_v33  ;;  %v1721_v26 = vpop.permute.xlu1 %1720 }
 0x464   : > { %v2881_v30 = vmax.f32 %v2767_v6, 0.0  ;;  %3310 = vmatprep.mubr.f32.mxu1 %v730_v22  ;;  %v742_v6 = vld [vmem:[#allocation2 + $0x588] sm:$0xff]  ;;  %v1822_v55 = vmul.f32 %v9658_v37, %v1721_v26  ;;  %v747_v37 = vld [vmem:[#allocation2 + $0x5b0] sm:$0xff] }
 0x465   : > { %v2771_v21 = vpop.f32.mrb[216].mxu0 }
 0x466   : > { %v7704_v62 = vpack.c.bf16 %v2881_v30, %v2880_v16  ;;  %v2773_v29 = vpop.f32.mrb[217].mxu0  ;;  %v2772_v33 = vadd.f32 %v2771_v21, %v10465_v25  ;;  %v741_v30 = vld [vmem:[#allocation2 + $0x580] sm:$0xff]  ;;  %v10476_v21 = vadd.f32 %v9667_v47, %v1821_v34  ;;  %v10479_v38 = vadd.f32 %v9667_v47, %v1822_v55  ;;  %v361_v55 = vld [vmem:[%s12186_s5 + $0x78] sm:$0xff] }
 0x467   : > { %3311 = vmatmul.mubr.f32.gmra.mrb[86].mxu1 %v729_v3  ;;  %v748_v3 = vld [vmem:[#allocation2 + $0x5b8] sm:$0xff] }
 0x468   : > { %7705 = vmatpush1.bf16.msra.mxu1 %v7704_v62  ;;  %3315 = vmatprep.mubr.f32.mxu1 %v736_v42  ;;  %v2882_v11 = vmax.f32 %v2772_v33, 0.0 }
 0x469   : > { %v2776_v22 = vpop.f32.mrb[218].mxu0  ;;  %7706 = vmatprep.subr.bf16.mxu1 %v12299_v48 }
 0x46a   : > { %v2777_v17 = vadd.f32 %v2776_v22, %v10468_v54  ;;  %v2778_v29 = vpop.f32.mrb[219].mxu0 }
 0x46b   : > { %3316 = vmatmul.mubr.f32.gmra.mrb[88].mxu1 %v735_v49  ;;  %v754_v49 = vld [vmem:[#allocation2 + $0x5e8] sm:$0xff] }
 0x46c   : > { %v2883_v16 = vmax.f32 %v2777_v17, 0.0  ;;  %3320 = vmatprep.mubr.f32.mxu1 %v742_v6  ;;  %v570_v29 = vld [vmem:[#allocation2 + $0x28] sm:$0xff] }
 0x46d   : > { %v2781_v62 = vpop.f32.mrb[220].mxu0 }
 0x46e   : > { %v7707_v42 = vpack.c.bf16 %v2883_v16, %v2882_v11  ;;  %v2783_v25 = vpop.f32.mrb[221].mxu0  ;;  %v2782_v22 = vadd.f32 %v2781_v62, %v10476_v21  ;;  %v362_v11 = vld [vmem:[%s12186_s5 + $0x80] sm:$0xff]  ;;  %v576_v62 = vld [vmem:[#allocation2 + $0x58] sm:$0xff] }
 0x46f   : > { %3321 = vmatmul.mubr.f32.gmra.mrb[90].mxu1 %v741_v30  ;;  %v753_v25 = vld [vmem:[#allocation2 + $0x5e0] sm:$0xff]  ;;  %v10490_v30 = vpack.c.bf16 %v362_v11, %v361_v55  ;;  %v630_v55 = vld [vmem:[#allocation2 + $0x208] sm:$0xff] }
 0x470   : > { %7708 = vmatpush1.bf16.msra.mxu1 %v7707_v42  ;;  %3325 = vmatprep.mubr.f32.mxu1 %v748_v3  ;;  %v2884_v34 = vmax.f32 %v2782_v22, 0.0  ;;  %v569_v16 = vld [vmem:[#allocation2 + $0x20] sm:$0xff]  ;;  %v575_v3 = vld [vmem:[#allocation2 + $0x50] sm:$0xff]  ;;  %v582_v42 = vld [vmem:[#allocation2 + $0x88] sm:$0xff] }
 0x471   : > { %v2786_v33 = vpop.f32.mrb[222].mxu0  ;;  %7709 = vmatprep.subr.bf16.mxu1 %v12299_v48  ;;  %7725 = vmatprep.subr.bf16.mxu0 %v10490_v30  ;;  %v581_v22 = vld [vmem:[#allocation2 + $0x80] sm:$0xff] }
 0x472   : > { %v2787_v26 = vadd.f32 %v2786_v33, %v10479_v38  ;;  %v2788_v6 = vpop.f32.mrb[223].mxu0  ;;  %7727 = vmatpush3.bf16.msra.mxu0 %v10490_v30  ;;  %v587_v33 = vld [vmem:[#allocation2 + $0xb0] sm:$0xff]  ;;  %v629_v11 = vld [vmem:[#allocation2 + $0x200] sm:$0xff] }
 0x473   : > { %3326 = vmatmul.mubr.f32.gmra.mrb[92].mxu1 %v747_v37  ;;  %7744 = vmatprep.subr.bf16.mxu0 %v12299_v48  ;;  %v588_v37 = vld [vmem:[#allocation2 + $0xb8] sm:$0xff]  ;;  %v606_v6 = vld [vmem:[#allocation2 + $0x148] sm:$0xff] }
 0x474   : > { %v2885_v17 = vmax.f32 %v2787_v26, 0.0  ;;  %3330 = vmatprep.mubr.f32.mxu1 %v754_v49  ;;  %v594_v49 = vld [vmem:[#allocation2 + $0xe8] sm:$0xff]  ;;  %v600_v26 = vld [vmem:[#allocation2 + $0x118] sm:$0xff] }
 0x476   : > { %v7710_v47 = vpack.c.bf16 %v2885_v17, %v2884_v34  ;;  %v605_v34 = vld [vmem:[#allocation2 + $0x140] sm:$0xff]  ;;  %v612_v17 = vld [vmem:[#allocation2 + $0x178] sm:$0xff] }
 0x477   : > { %3331 = vmatmul.mubr.f32.gmra.mrb[94].mxu1 %v753_v25  ;;  %v618_v25 = vld [vmem:[#allocation2 + $0x1a8] sm:$0xff] }
 0x478   : > { %7711 = vmatpush1.bf16.msra.mxu1 %v7710_v47  ;;  %3400 = vmatprep.mubr.f32.mxu1 %v570_v29  ;;  %v617_v29 = vld [vmem:[#allocation2 + $0x1a0] sm:$0xff]  ;;  %v624_v47 = vld [vmem:[#allocation2 + $0x1d8] sm:$0xff] }
 0x479   : > { %7729 = vmatprep.subr.bf16.mxu1 %v8975_v12 }
 0x47b   : > { %3401 = vmatmul.mubr.f32.vlgmr.msra.gmra.mrb[32].mxu1 %v569_v16  ;;  %v636_v16 = vld [vmem:[#allocation2 + $0x238] sm:$0xff] }
 0x47c   : > { %3405 = vmatprep.mubr.f32.mxu1 %v576_v62  ;;  %7731 = vmatpush3.bf16.msra.mxu1 %v8975_v12  ;;  %v593_v12 = vld [vmem:[#allocation2 + $0xe0] sm:$0xff]  ;;  %v635_v62 = vld [vmem:[#allocation2 + $0x230] sm:$0xff] }
 0x47d   : > { %7733 = vmatprep.subr.bf16.mxu1 %v8981_v15 }
 0x47f   : > { %3406 = vmatmul.mubr.f32.gmra.mrb[34].mxu1 %v575_v3  ;;  %v642_v3 = vld [vmem:[#allocation2 + $0x268] sm:$0xff] }
 0x480   : > { %3410 = vmatprep.mubr.f32.mxu1 %v582_v42  ;;  %7735 = vmatpush3.bf16.msra.mxu1 %v8981_v15  ;;  %v599_v15 = vld [vmem:[#allocation2 + $0x110] sm:$0xff]  ;;  %v641_v42 = vld [vmem:[#allocation2 + $0x260] sm:$0xff] }
 0x481   : > { %7737 = vmatprep.subr.bf16.mxu1 %v8995_v19 }
 0x483   : > { %3411 = vmatmul.mubr.f32.gmra.mrb[36].mxu1 %v581_v22  ;;  %v648_v22 = vld [vmem:[#allocation2 + $0x298] sm:$0xff] }
 0x484   : > { %3415 = vmatprep.mubr.f32.mxu1 %v588_v37  ;;  %7739 = vmatpush3.bf16.msra.mxu1 %v8995_v19  ;;  %v611_v19 = vld [vmem:[#allocation2 + $0x170] sm:$0xff] }
 0x485   : > { %7741 = vmatprep.subr.bf16.mxu1 %v9051_v44  ;;  %v647_v37 = vld [vmem:[#allocation2 + $0x290] sm:$0xff] }
 0x487   : > { %3416 = vmatmul.mubr.f32.gmra.mrb[38].mxu1 %v587_v33  ;;  %v654_v33 = vld [vmem:[#allocation2 + $0x2c8] sm:$0xff] }
 0x488   : > { %3420 = vmatprep.mubr.f32.mxu1 %v594_v49  ;;  %7743 = vmatpush3.bf16.msra.mxu1 %v9051_v44  ;;  %v623_v44 = vld [vmem:[#allocation2 + $0x1d0] sm:$0xff]  ;;  %v653_v49 = vld [vmem:[#allocation2 + $0x2c0] sm:$0xff] }
 0x489   : > { %7792 = vmatprep.subr.bf16.mxu1 %v12299_v48 }
 0x48b   : > { %3421 = vmatmul.mubr.f32.gmra.mrb[40].mxu1 %v593_v12  ;;  %v660_v12 = vld [vmem:[#allocation2 + $0x2f8] sm:$0xff] }
 0x48c   : > { %3425 = vmatprep.mubr.f32.mxu1 %v600_v26  ;;  %v659_v26 = vld [vmem:[#allocation2 + $0x2f0] sm:$0xff] }
 0x48f   : > { %3426 = vmatmul.mubr.f32.gmra.mrb[42].mxu1 %v599_v15  ;;  %v666_v15 = vld [vmem:[#allocation2 + $0x328] sm:$0xff] }
 0x490   : > { %3430 = vmatprep.mubr.f32.mxu1 %v606_v6  ;;  %v665_v6 = vld [vmem:[#allocation2 + $0x320] sm:$0xff] }
 0x493   : > { %3431 = vmatmul.mubr.f32.gmra.mrb[44].mxu1 %v605_v34  ;;  %v672_v34 = vld [vmem:[#allocation2 + $0x358] sm:$0xff] }
 0x494   : > { %3435 = vmatprep.mubr.f32.mxu1 %v612_v17  ;;  %v671_v17 = vld [vmem:[#allocation2 + $0x350] sm:$0xff] }
 0x497   : > { %3436 = vmatmul.mubr.f32.gmra.mrb[46].mxu1 %v611_v19  ;;  %v678_v19 = vld [vmem:[#allocation2 + $0x388] sm:$0xff] }
 0x498   : > { %3440 = vmatprep.mubr.f32.mxu1 %v618_v25  ;;  %v677_v25 = vld [vmem:[#allocation2 + $0x380] sm:$0xff] }
 0x49b   : > { %3441 = vmatmul.mubr.f32.gmra.mrb[48].mxu1 %v617_v29  ;;  %v684_v29 = vld [vmem:[#allocation2 + $0x3b8] sm:$0xff] }
 0x49c   : > { %3445 = vmatprep.mubr.f32.mxu1 %v624_v47  ;;  %v683_v47 = vld [vmem:[#allocation2 + $0x3b0] sm:$0xff] }
 0x49f   : > { %3446 = vmatmul.mubr.f32.gmra.mrb[50].mxu1 %v623_v44  ;;  %v690_v44 = vld [vmem:[#allocation2 + $0x3e8] sm:$0xff] }
 0x4a0   : > { %3450 = vmatprep.mubr.f32.mxu1 %v630_v55  ;;  %v689_v55 = vld [vmem:[#allocation2 + $0x3e0] sm:$0xff] }
 0x4a3   : > { %3451 = vmatmul.mubr.f32.gmra.mrb[52].mxu1 %v629_v11  ;;  %v696_v11 = vld [vmem:[#allocation2 + $0x418] sm:$0xff] }
 0x4a4   : > { %3455 = vmatprep.mubr.f32.mxu1 %v636_v16  ;;  %v695_v16 = vld [vmem:[#allocation2 + $0x410] sm:$0xff] }
 0x4a7   : > { %3456 = vmatmul.mubr.f32.gmra.mrb[54].mxu1 %v635_v62  ;;  %v702_v62 = vld [vmem:[#allocation2 + $0x448] sm:$0xff] }
 0x4a8   : > { %3460 = vmatprep.mubr.f32.mxu1 %v642_v3  ;;  %v701_v3 = vld [vmem:[#allocation2 + $0x440] sm:$0xff] }
 0x4ab   : > { %3461 = vmatmul.mubr.f32.gmra.mrb[56].mxu1 %v641_v42  ;;  %v708_v42 = vld [vmem:[#allocation2 + $0x478] sm:$0xff] }
 0x4ac   : > { %3465 = vmatprep.mubr.f32.mxu1 %v648_v22  ;;  %v707_v22 = vld [vmem:[#allocation2 + $0x470] sm:$0xff] }
 0x4af   : > { %3466 = vmatmul.mubr.f32.gmra.mrb[58].mxu1 %v647_v37  ;;  %v714_v37 = vld [vmem:[#allocation2 + $0x4a8] sm:$0xff] }
 0x4b0   : > { %3470 = vmatprep.mubr.f32.mxu1 %v654_v33  ;;  %v713_v33 = vld [vmem:[#allocation2 + $0x4a0] sm:$0xff] }
 0x4b3   : > { %3471 = vmatmul.mubr.f32.gmra.mrb[60].mxu1 %v653_v49  ;;  %v720_v49 = vld [vmem:[#allocation2 + $0x4d8] sm:$0xff] }
 0x4b4   : > { %3475 = vmatprep.mubr.f32.mxu1 %v660_v12  ;;  %v719_v12 = vld [vmem:[#allocation2 + $0x4d0] sm:$0xff] }
 0x4b7   : > { %3476 = vmatmul.mubr.f32.gmra.mrb[62].mxu1 %v659_v26  ;;  %v726_v26 = vld [vmem:[#allocation2 + $0x508] sm:$0xff] }
 0x4b8   : > { %3480 = vmatprep.mubr.f32.mxu1 %v666_v15  ;;  %v725_v15 = vld [vmem:[#allocation2 + $0x500] sm:$0xff] }
 0x4bb   : > { %3481 = vmatmul.mubr.f32.gmra.mrb[64].mxu1 %v665_v6  ;;  %v732_v6 = vld [vmem:[#allocation2 + $0x538] sm:$0xff] }
 0x4bc   : > { %3485 = vmatprep.mubr.f32.mxu1 %v672_v34  ;;  %v731_v34 = vld [vmem:[#allocation2 + $0x530] sm:$0xff] }
 0x4bf   : > { %3486 = vmatmul.mubr.f32.gmra.mrb[66].mxu1 %v671_v17  ;;  %v738_v17 = vld [vmem:[#allocation2 + $0x568] sm:$0xff] }
 0x4c0   : > { %3490 = vmatprep.mubr.f32.mxu1 %v678_v19  ;;  %v737_v19 = vld [vmem:[#allocation2 + $0x560] sm:$0xff] }
 0x4c3   : > { %3491 = vmatmul.mubr.f32.gmra.mrb[68].mxu1 %v677_v25  ;;  %v744_v25 = vld [vmem:[#allocation2 + $0x598] sm:$0xff] }
 0x4c4   : > { %3495 = vmatprep.mubr.f32.mxu1 %v684_v29  ;;  %v743_v29 = vld [vmem:[#allocation2 + $0x590] sm:$0xff] }
 0x4c7   : > { %3496 = vmatmul.mubr.f32.gmra.mrb[70].mxu1 %v683_v47  ;;  %v750_v47 = vld [vmem:[#allocation2 + $0x5c8] sm:$0xff] }
 0x4c8   : > { %3500 = vmatprep.mubr.f32.mxu1 %v690_v44  ;;  %v749_v44 = vld [vmem:[#allocation2 + $0x5c0] sm:$0xff] }
 0x4cb   : > { %3501 = vmatmul.mubr.f32.gmra.mrb[72].mxu1 %v689_v55  ;;  %v756_v55 = vld [vmem:[#allocation2 + $0x5f8] sm:$0xff] }
 0x4cc   : > { %3505 = vmatprep.mubr.f32.mxu1 %v696_v11  ;;  %v755_v11 = vld [vmem:[#allocation2 + $0x5f0] sm:$0xff] }
 0x4cf   : > { %3506 = vmatmul.mubr.f32.gmra.mrb[74].mxu1 %v695_v16 }
 0x4d0   : > { %3510 = vmatprep.mubr.f32.mxu1 %v702_v62 }
 0x4d3   : > { %3511 = vmatmul.mubr.f32.gmra.mrb[76].mxu1 %v701_v3 }
 0x4d4   : > { %3515 = vmatprep.mubr.f32.mxu1 %v708_v42 }
 0x4d7   : > { %3516 = vmatmul.mubr.f32.gmra.mrb[78].mxu1 %v707_v22 }
 0x4d8   : > { %3520 = vmatprep.mubr.f32.mxu1 %v714_v37 }
 0x4db   : > { %3521 = vmatmul.mubr.f32.gmra.mrb[80].mxu1 %v713_v33 }
 0x4dc   : > { %3525 = vmatprep.mubr.f32.mxu1 %v720_v49 }
 0x4df   : > { %3526 = vmatmul.mubr.f32.gmra.mrb[82].mxu1 %v719_v12 }
 0x4e0   : > { %3530 = vmatprep.mubr.f32.mxu1 %v726_v26 }
 0x4e3   : > { %3531 = vmatmul.mubr.f32.gmra.mrb[84].mxu1 %v725_v15 }
 0x4e4   : > { %3535 = vmatprep.mubr.f32.mxu1 %v732_v6 }
 0x4e7   : > { %3536 = vmatmul.mubr.f32.gmra.mrb[86].mxu1 %v731_v34 }
 0x4e8   : > { %3540 = vmatprep.mubr.f32.mxu1 %v738_v17 }
 0x4eb   : > { %3541 = vmatmul.mubr.f32.gmra.mrb[88].mxu1 %v737_v19 }
 0x4ec   : > { %3545 = vmatprep.mubr.f32.mxu1 %v744_v25 }
 0x4ef   : > { %3546 = vmatmul.mubr.f32.gmra.mrb[90].mxu1 %v743_v29 }
 0x4f0   : > { %3550 = vmatprep.mubr.f32.mxu1 %v750_v47 }
 0x4f3   : > { %3551 = vmatmul.mubr.f32.gmra.mrb[92].mxu1 %v749_v44 }
 0x4f4   : > { %3555 = vmatprep.mubr.f32.mxu1 %v756_v55 }
 0x4f7   : > { %3556 = vmatmul.mubr.f32.gmra.mrb[94].mxu1 %v755_v11 }
 0x54e   : > { %v3402_v16 = vpop.f32.mrb[32].mxu1 }
 0x54f   : > { %v3404_v62 = vpop.f32.mrb[33].mxu1  ;;  %7264 = vmatprep.mubr.msk.f32.mxu0 %vm1923_vm1, %v3402_v16 }
 0x552   : > { %v3407_v3 = vpop.f32.mrb[34].mxu1 }
 0x553   : > { %v3409_v42 = vpop.f32.mrb[35].mxu1  ;;  %7265 = vmatmul.mubr.msk.f32.vlgmr.msra.gmra.mrb[224].mxu0 %vm1923_vm1, %v3407_v3 }
 0x556   : > { %v3412_v22 = vpop.f32.mrb[36].mxu1 }
 0x557   : > { %v3414_v37 = vpop.f32.mrb[37].mxu1  ;;  %7267 = vmatprep.mubr.msk.f32.mxu0 %vm1923_vm1, %v3412_v22 }
 0x55a   : > { %v3417_v33 = vpop.f32.mrb[38].mxu1 }
 0x55b   : > { %v3419_v49 = vpop.f32.mrb[39].mxu1  ;;  %7268 = vmatmul.mubr.msk.f32.gmra.mrb[226].mxu0 %vm1923_vm1, %v3417_v33 }
 0x55e   : > { %v3422_v12 = vpop.f32.mrb[40].mxu1 }
 0x55f   : > { %v3424_v26 = vpop.f32.mrb[41].mxu1  ;;  %7270 = vmatprep.mubr.msk.f32.mxu0 %vm1923_vm1, %v3422_v12 }
 0x562   : > { %v3427_v15 = vpop.f32.mrb[42].mxu1 }
 0x563   : > { %v3429_v6 = vpop.f32.mrb[43].mxu1  ;;  %7271 = vmatmul.mubr.msk.f32.gmra.mrb[228].mxu0 %vm1923_vm1, %v3427_v15 }
 0x566   : > { %v3432_v34 = vpop.f32.mrb[44].mxu1 }
 0x567   : > { %v3434_v17 = vpop.f32.mrb[45].mxu1  ;;  %7273 = vmatprep.mubr.msk.f32.mxu0 %vm1923_vm1, %v3432_v34 }
 0x56a   : > { %v3437_v19 = vpop.f32.mrb[46].mxu1 }
 0x56b   : > { %v3439_v25 = vpop.f32.mrb[47].mxu1  ;;  %7274 = vmatmul.mubr.msk.f32.gmra.mrb[230].mxu0 %vm1923_vm1, %v3437_v19 }
 0x56e   : > { %v3442_v29 = vpop.f32.mrb[48].mxu1 }
 0x56f   : > { %v3444_v47 = vpop.f32.mrb[49].mxu1  ;;  %7276 = vmatprep.mubr.msk.f32.mxu0 %vm1923_vm1, %v3442_v29 }
 0x572   : > { %v3447_v44 = vpop.f32.mrb[50].mxu1 }
 0x573   : > { %v3449_v55 = vpop.f32.mrb[51].mxu1  ;;  %7277 = vmatmul.mubr.msk.f32.gmra.mrb[232].mxu0 %vm1923_vm1, %v3447_v44 }
 0x576   : > { %v3452_v11 = vpop.f32.mrb[52].mxu1 }
 0x577   : > { %v3454_v16 = vpop.f32.mrb[53].mxu1  ;;  %7279 = vmatprep.mubr.msk.f32.mxu0 %vm1923_vm1, %v3452_v11 }
 0x57a   : > { %v3457_v62 = vpop.f32.mrb[54].mxu1 }
 0x57b   : > { %v3459_v3 = vpop.f32.mrb[55].mxu1  ;;  %7280 = vmatmul.mubr.msk.f32.gmra.mrb[234].mxu0 %vm1923_vm1, %v3457_v62 }
 0x57e   : > { %v3462_v42 = vpop.f32.mrb[56].mxu1 }
 0x57f   : > { %v3464_v22 = vpop.f32.mrb[57].mxu1  ;;  %7282 = vmatprep.mubr.msk.f32.mxu0 %vm1923_vm1, %v3462_v42 }
 0x582   : > { %v3467_v37 = vpop.f32.mrb[58].mxu1 }
 0x583   : > { %v3469_v33 = vpop.f32.mrb[59].mxu1  ;;  %7283 = vmatmul.mubr.msk.f32.gmra.mrb[236].mxu0 %vm1923_vm1, %v3467_v37 }
 0x586   : > { %v3472_v49 = vpop.f32.mrb[60].mxu1 }
 0x587   : > { %v3474_v12 = vpop.f32.mrb[61].mxu1  ;;  %7285 = vmatprep.mubr.msk.f32.mxu0 %vm1923_vm1, %v3472_v49 }
 0x58a   : > { %v3477_v26 = vpop.f32.mrb[62].mxu1 }
 0x58b   : > { %v3479_v15 = vpop.f32.mrb[63].mxu1  ;;  %7286 = vmatmul.mubr.msk.f32.gmra.mrb[238].mxu0 %vm1923_vm1, %v3477_v26 }
 0x58e   : > { %v3482_v6 = vpop.f32.mrb[64].mxu1 }
 0x58f   : > { %v3484_v34 = vpop.f32.mrb[65].mxu1  ;;  %7288 = vmatprep.mubr.msk.f32.mxu0 %vm1923_vm1, %v3482_v6 }
 0x592   : > { %v3487_v17 = vpop.f32.mrb[66].mxu1 }
 0x593   : > { %v3489_v19 = vpop.f32.mrb[67].mxu1  ;;  %7289 = vmatmul.mubr.msk.f32.gmra.mrb[240].mxu0 %vm1923_vm1, %v3487_v17 }
 0x596   : > { %v3492_v25 = vpop.f32.mrb[68].mxu1 }
 0x597   : > { %v3494_v29 = vpop.f32.mrb[69].mxu1  ;;  %7291 = vmatprep.mubr.msk.f32.mxu0 %vm1923_vm1, %v3492_v25 }
 0x59a   : > { %v3497_v47 = vpop.f32.mrb[70].mxu1 }
 0x59b   : > { %v3499_v44 = vpop.f32.mrb[71].mxu1  ;;  %7292 = vmatmul.mubr.msk.f32.gmra.mrb[242].mxu0 %vm1923_vm1, %v3497_v47 }
 0x59e   : > { %v3502_v55 = vpop.f32.mrb[72].mxu1 }
 0x59f   : > { %v3504_v11 = vpop.f32.mrb[73].mxu1  ;;  %7294 = vmatprep.mubr.msk.f32.mxu0 %vm1923_vm1, %v3502_v55 }
 0x5a2   : > { %v3507_v16 = vpop.f32.mrb[74].mxu1 }
 0x5a3   : > { %v3509_v62 = vpop.f32.mrb[75].mxu1  ;;  %7295 = vmatmul.mubr.msk.f32.gmra.mrb[244].mxu0 %vm1923_vm1, %v3507_v16 }
 0x5a4   : > { %v8386_v62 = vld [vmem:[%s12183_s2 + $0x8] sm:$0xff] }
 0x5a6   : > { %v3512_v3 = vpop.f32.mrb[76].mxu1 }
 0x5a7   : > { %v3514_v42 = vpop.f32.mrb[77].mxu1  ;;  %7297 = vmatprep.mubr.msk.f32.mxu0 %vm1923_vm1, %v3512_v3  ;;  %v758_v3 = vld [vmem:[%s12185_s4 + $0x8] sm:$0xff] }
 0x5a8   : > { %v757_v42 = vld [vmem:[%s12185_s4] sm:$0xff] }
 0x5aa   : > { %v3517_v22 = vpop.f32.mrb[78].mxu1 }
 0x5ab   : > { %v3519_v37 = vpop.f32.mrb[79].mxu1  ;;  %7298 = vmatmul.mubr.msk.f32.gmra.mrb[246].mxu0 %vm1923_vm1, %v3517_v22 }
 0x5ae   : > { %v3522_v33 = vpop.f32.mrb[80].mxu1 }
 0x5af   : > { %v3524_v49 = vpop.f32.mrb[81].mxu1  ;;  %7300 = vmatprep.mubr.msk.f32.mxu0 %vm1923_vm1, %v3522_v33 }
 0x5b2   : > { %v3527_v12 = vpop.f32.mrb[82].mxu1 }
 0x5b3   : > { %v3529_v26 = vpop.f32.mrb[83].mxu1  ;;  %7301 = vmatmul.mubr.msk.f32.gmra.mrb[248].mxu0 %vm1923_vm1, %v3527_v12 }
 0x5b6   : > { %v3532_v15 = vpop.f32.mrb[84].mxu1 }
 0x5b7   : > { %v3534_v6 = vpop.f32.mrb[85].mxu1  ;;  %7303 = vmatprep.mubr.msk.f32.mxu0 %vm1923_vm1, %v3532_v15  ;;  %v760_v15 = vld [vmem:[%s12185_s4 + $0x18] sm:$0xff] }
 0x5b8   : > { %v759_v6 = vld [vmem:[%s12185_s4 + $0x10] sm:$0xff] }
 0x5ba   : > { %v3537_v34 = vpop.f32.mrb[86].mxu1 }
 0x5bb   : > { %v3539_v17 = vpop.f32.mrb[87].mxu1  ;;  %7304 = vmatmul.mubr.msk.f32.gmra.mrb[250].mxu0 %vm1923_vm1, %v3537_v34 }
 0x5be   : > { %v3542_v19 = vpop.f32.mrb[88].mxu1 }
 0x5bf   : > { %v3544_v25 = vpop.f32.mrb[89].mxu1  ;;  %7306 = vmatprep.mubr.msk.f32.mxu0 %vm1923_vm1, %v3542_v19 }
 0x5c2   : > { %v3547_v29 = vpop.f32.mrb[90].mxu1 }
 0x5c3   : > { %v3549_v47 = vpop.f32.mrb[91].mxu1  ;;  %7307 = vmatmul.mubr.msk.f32.gmra.mrb[252].mxu0 %vm1923_vm1, %v3547_v29  ;;  %v762_v29 = vld [vmem:[%s12185_s4 + $0x28] sm:$0xff] }
 0x5c4   : > { %v761_v47 = vld [vmem:[%s12185_s4 + $0x20] sm:$0xff] }
 0x5c6   : > { %v3552_v44 = vpop.f32.mrb[92].mxu1 }
 0x5c7   : > { %v3554_v55 = vpop.f32.mrb[93].mxu1  ;;  %7309 = vmatprep.mubr.msk.f32.mxu0 %vm1923_vm1, %v3552_v44 }
 0x5ca   : > { %v3557_v11 = vpop.f32.mrb[94].mxu1 }
 0x5cb   : > { %v3559_v16 = vpop.f32.mrb[95].mxu1  ;;  %7310 = vmatmul.mubr.msk.f32.gmra.mrb[254].mxu0 %vm1923_vm1, %v3557_v11 }
 0x5cc   : > { %4299 = vmatprep.mubr.f32.mxu0 %v8386_v62  ;;  %v764_v62 = vld [vmem:[%s12185_s4 + $0x38] sm:$0xff] }
 0x626   : > { %v7266_v22 = vpop.f32.mrb[224].mxu0 }
 0x627   : > { %v3729_v37 = vadd.f32 %v7266_v22, %v758_v3  ;;  %v3723_v33 = vpop.f32.mrb[225].mxu0  ;;  %v763_v3 = vld [vmem:[%s12185_s4 + $0x30] sm:$0xff] }
 0x628   : > { %v3724_v49 = vadd.f32 %v3723_v33, %v757_v42 }
 0x629   : > { %v10549_v26 = vadd.f32 %v3729_v37, %v9067_v53 }
 0x62a   : > { %v10546_v12 = vadd.f32 %v3724_v49, %v9064_v52  ;;  %v766_v49 = vld [vmem:[%s12185_s4 + $0x48] sm:$0xff] }
 0x62c   : > { %7328 = vmatprep.mubr.msk.f32.mxu1 %vm1923_vm1, %v10546_v12 }
 0x62d   : > { %7329 = vmatmul.mubr.msk.f32.vlgmr.msra.gmra.mrb[96].mxu1 %vm1923_vm1, %v10549_v26 }
 0x62e   : > { %v7269_v34 = vpop.f32.mrb[226].mxu0 }
 0x62f   : > { %v3739_v52 = vadd.f32 %v7269_v34, %v760_v15  ;;  %v3733_v17 = vpop.f32.mrb[227].mxu0  ;;  %v765_v15 = vld [vmem:[%s12185_s4 + $0x40] sm:$0xff] }
 0x630   : > { %v3734_v19 = vadd.f32 %v3733_v17, %v759_v6 }
 0x631   : > { %v10565_v25 = vadd.f32 %v3739_v52, %v9077_v57 }
 0x632   : > { %v10562_v53 = vadd.f32 %v3734_v19, %v9074_v56  ;;  %v768_v19 = vld [vmem:[%s12185_s4 + $0x58] sm:$0xff] }
 0x634   : > { %7331 = vmatprep.mubr.msk.f32.mxu1 %vm1923_vm1, %v10562_v53 }
 0x635   : > { %7332 = vmatmul.mubr.msk.f32.gmra.mrb[98].mxu1 %vm1923_vm1, %v10565_v25 }
 0x636   : > { %v7272_v44 = vpop.f32.mrb[228].mxu0 }
 0x637   : > { %v3749_v56 = vadd.f32 %v7272_v44, %v762_v29  ;;  %v3743_v55 = vpop.f32.mrb[229].mxu0  ;;  %v767_v29 = vld [vmem:[%s12185_s4 + $0x50] sm:$0xff] }
 0x638   : > { %v3744_v11 = vadd.f32 %v3743_v55, %v761_v47 }
 0x639   : > { %v10581_v16 = vadd.f32 %v3749_v56, %v9087_v61 }
 0x63a   : > { %v10578_v57 = vadd.f32 %v3744_v11, %v9084_v60  ;;  %v770_v11 = vld [vmem:[%s12185_s4 + $0x68] sm:$0xff] }
 0x63c   : > { %7334 = vmatprep.mubr.msk.f32.mxu1 %vm1923_vm1, %v10578_v57 }
 0x63d   : > { %7335 = vmatmul.mubr.msk.f32.gmra.mrb[100].mxu1 %vm1923_vm1, %v10581_v16 }
 0x63e   : > { %v7275_v42 = vpop.f32.mrb[230].mxu0 }
 0x63f   : > { %v3759_v60 = vadd.f32 %v7275_v42, %v764_v62  ;;  %v3753_v22 = vpop.f32.mrb[231].mxu0  ;;  %v769_v62 = vld [vmem:[%s12185_s4 + $0x60] sm:$0xff] }
 0x640   : > { %v3754_v37 = vadd.f32 %v3753_v22, %v763_v3 }
 0x641   : > { %v10597_v33 = vadd.f32 %v3759_v60, %v9097_v1 }
 0x642   : > { %v10594_v61 = vadd.f32 %v3754_v37, %v9094_v0  ;;  %v772_v37 = vld [vmem:[%s12185_s4 + $0x78] sm:$0xff] }
 0x644   : > { %7337 = vmatprep.mubr.msk.f32.mxu1 %vm1923_vm1, %v10594_v61 }
 0x645   : > { %7338 = vmatmul.mubr.msk.f32.gmra.mrb[102].mxu1 %vm1923_vm1, %v10597_v33 }
 0x646   : > { %v7278_v6 = vpop.f32.mrb[232].mxu0 }
 0x647   : > { %v3769_v0 = vadd.f32 %v7278_v6, %v766_v49  ;;  %v3763_v34 = vpop.f32.mrb[233].mxu0  ;;  %v771_v49 = vld [vmem:[%s12185_s4 + $0x70] sm:$0xff] }
 0x648   : > { %v3764_v52 = vadd.f32 %v3763_v34, %v765_v15 }
 0x649   : > { %v10613_v17 = vadd.f32 %v3769_v0, %v9107_v5 }
 0x64a   : > { %v10610_v1 = vadd.f32 %v3764_v52, %v9104_v4  ;;  %v774_v52 = vld [vmem:[%s12185_s4 + $0x88] sm:$0xff] }
 0x64c   : > { %7340 = vmatprep.mubr.msk.f32.mxu1 %vm1923_vm1, %v10610_v1 }
 0x64d   : > { %7341 = vmatmul.mubr.msk.f32.gmra.mrb[104].mxu1 %vm1923_vm1, %v10613_v17 }
 0x64e   : > { %v7281_v47 = vpop.f32.mrb[234].mxu0 }
 0x64f   : > { %v3779_v4 = vadd.f32 %v7281_v47, %v768_v19  ;;  %v3773_v44 = vpop.f32.mrb[235].mxu0  ;;  %v773_v19 = vld [vmem:[%s12185_s4 + $0x80] sm:$0xff] }
 0x650   : > { %v3774_v56 = vadd.f32 %v3773_v44, %v767_v29 }
 0x651   : > { %v10629_v55 = vadd.f32 %v3779_v4, %v9117_v9 }
 0x652   : > { %v10626_v5 = vadd.f32 %v3774_v56, %v9114_v8  ;;  %v776_v56 = vld [vmem:[%s12185_s4 + $0x98] sm:$0xff] }
 0x654   : > { %7343 = vmatprep.mubr.msk.f32.mxu1 %vm1923_vm1, %v10626_v5 }
 0x655   : > { %7344 = vmatmul.mubr.msk.f32.gmra.mrb[106].mxu1 %vm1923_vm1, %v10629_v55 }
 0x656   : > { %v7284_v3 = vpop.f32.mrb[236].mxu0 }
 0x657   : > { %v3789_v8 = vadd.f32 %v7284_v3, %v770_v11  ;;  %v3783_v42 = vpop.f32.mrb[237].mxu0  ;;  %v775_v11 = vld [vmem:[%s12185_s4 + $0x90] sm:$0xff] }
 0x658   : > { %v3784_v60 = vadd.f32 %v3783_v42, %v769_v62 }
 0x659   : > { %v10645_v22 = vadd.f32 %v3789_v8, %v9127_v14 }
 0x65a   : > { %v10642_v9 = vadd.f32 %v3784_v60, %v9124_v13  ;;  %v778_v60 = vld [vmem:[%s12185_s4 + $0xa8] sm:$0xff] }
 0x65c   : > { %7346 = vmatprep.mubr.msk.f32.mxu1 %vm1923_vm1, %v10642_v9 }
 0x65d   : > { %7347 = vmatmul.mubr.msk.f32.gmra.mrb[108].mxu1 %vm1923_vm1, %v10645_v22 }
 0x65e   : > { %v7287_v15 = vpop.f32.mrb[238].mxu0 }
 0x65f   : > { %v3799_v13 = vadd.f32 %v7287_v15, %v772_v37  ;;  %v3793_v6 = vpop.f32.mrb[239].mxu0  ;;  %v777_v37 = vld [vmem:[%s12185_s4 + $0xa0] sm:$0xff] }
 0x660   : > { %v3794_v0 = vadd.f32 %v3793_v6, %v771_v49 }
 0x661   : > { %v10661_v34 = vadd.f32 %v3799_v13, %v9137_v20 }
 0x662   : > { %v10658_v14 = vadd.f32 %v3794_v0, %v9134_v18  ;;  %v780_v0 = vld [vmem:[%s12185_s4 + $0xb8] sm:$0xff] }
 0x664   : > { %7349 = vmatprep.mubr.msk.f32.mxu1 %vm1923_vm1, %v10658_v14 }
 0x665   : > { %7350 = vmatmul.mubr.msk.f32.gmra.mrb[110].mxu1 %vm1923_vm1, %v10661_v34 }
 0x666   : > { %v7290_v29 = vpop.f32.mrb[240].mxu0 }
 0x667   : > { %v3809_v18 = vadd.f32 %v7290_v29, %v774_v52  ;;  %v3803_v47 = vpop.f32.mrb[241].mxu0  ;;  %v779_v52 = vld [vmem:[%s12185_s4 + $0xb0] sm:$0xff] }
 0x668   : > { %v3804_v4 = vadd.f32 %v3803_v47, %v773_v19 }
 0x669   : > { %v10677_v44 = vadd.f32 %v3809_v18, %v9147_v24 }
 0x66a   : > { %v10674_v20 = vadd.f32 %v3804_v4, %v9144_v23  ;;  %v782_v4 = vld [vmem:[%s12185_s4 + $0xc8] sm:$0xff] }
 0x66c   : > { %7352 = vmatprep.mubr.msk.f32.mxu1 %vm1923_vm1, %v10674_v20 }
 0x66d   : > { %7353 = vmatmul.mubr.msk.f32.gmra.mrb[112].mxu1 %vm1923_vm1, %v10677_v44 }
 0x66e   : > { %v7293_v62 = vpop.f32.mrb[242].mxu0 }
 0x66f   : > { %v3819_v23 = vadd.f32 %v7293_v62, %v776_v56  ;;  %v3813_v3 = vpop.f32.mrb[243].mxu0  ;;  %v781_v56 = vld [vmem:[%s12185_s4 + $0xc0] sm:$0xff] }
 0x670   : > { %v3814_v8 = vadd.f32 %v3813_v3, %v775_v11 }
 0x671   : > { %v10693_v42 = vadd.f32 %v3819_v23, %v9157_v28 }
 0x672   : > { %v10690_v24 = vadd.f32 %v3814_v8, %v9154_v27  ;;  %v784_v8 = vld [vmem:[%s12185_s4 + $0xd8] sm:$0xff] }
 0x674   : > { %7355 = vmatprep.mubr.msk.f32.mxu1 %vm1923_vm1, %v10690_v24 }
 0x675   : > { %7356 = vmatmul.mubr.msk.f32.gmra.mrb[114].mxu1 %vm1923_vm1, %v10693_v42 }
 0x676   : > { %v7296_v49 = vpop.f32.mrb[244].mxu0 }
 0x677   : > { %v3829_v27 = vadd.f32 %v7296_v49, %v778_v60  ;;  %v3823_v15 = vpop.f32.mrb[245].mxu0  ;;  %v783_v60 = vld [vmem:[%s12185_s4 + $0xd0] sm:$0xff] }
 0x678   : > { %v3824_v13 = vadd.f32 %v3823_v15, %v777_v37 }
 0x679   : > { %v10709_v6 = vadd.f32 %v3829_v27, %v9167_v32 }
 0x67a   : > { %v10706_v28 = vadd.f32 %v3824_v13, %v9164_v31  ;;  %v786_v13 = vld [vmem:[%s12185_s4 + $0xe8] sm:$0xff] }
 0x67c   : > { %7358 = vmatprep.mubr.msk.f32.mxu1 %vm1923_vm1, %v10706_v28 }
 0x67d   : > { %7359 = vmatmul.mubr.msk.f32.gmra.mrb[116].mxu1 %vm1923_vm1, %v10709_v6 }
 0x67e   : > { %v7299_v19 = vpop.f32.mrb[246].mxu0 }
 0x67f   : > { %v3839_v31 = vadd.f32 %v7299_v19, %v780_v0  ;;  %v3833_v29 = vpop.f32.mrb[247].mxu0  ;;  %v785_v0 = vld [vmem:[%s12185_s4 + $0xe0] sm:$0xff] }
 0x680   : > { %v3834_v18 = vadd.f32 %v3833_v29, %v779_v52 }
 0x681   : > { %v10725_v47 = vadd.f32 %v3839_v31, %v9177_v36 }
 0x682   : > { %v10722_v32 = vadd.f32 %v3834_v18, %v9174_v35  ;;  %v788_v18 = vld [vmem:[%s12185_s4 + $0xf8] sm:$0xff] }
 0x684   : > { %7361 = vmatprep.mubr.msk.f32.mxu1 %vm1923_vm1, %v10722_v32 }
 0x685   : > { %7362 = vmatmul.mubr.msk.f32.gmra.mrb[118].mxu1 %vm1923_vm1, %v10725_v47 }
 0x686   : > { %v7302_v11 = vpop.f32.mrb[248].mxu0 }
 0x687   : > { %v3849_v35 = vadd.f32 %v7302_v11, %v782_v4  ;;  %v3843_v62 = vpop.f32.mrb[249].mxu0  ;;  %v787_v4 = vld [vmem:[%s12185_s4 + $0xf0] sm:$0xff] }
 0x688   : > { %v3844_v23 = vadd.f32 %v3843_v62, %v781_v56 }
 0x689   : > { %v10741_v3 = vadd.f32 %v3849_v35, %v9187_v40 }
 0x68a   : > { %v10738_v36 = vadd.f32 %v3844_v23, %v9184_v39  ;;  %v8387_v23 = vld [vmem:[#allocation2 + $0x8] sm:$0xff] }
 0x68c   : > { %7364 = vmatprep.mubr.msk.f32.mxu1 %vm1923_vm1, %v10738_v36 }
 0x68d   : > { %7365 = vmatmul.mubr.msk.f32.gmra.mrb[120].mxu1 %vm1923_vm1, %v10741_v3 }
 0x68e   : > { %v7305_v37 = vpop.f32.mrb[250].mxu0 }
 0x68f   : > { %v3859_v39 = vadd.f32 %v7305_v37, %v784_v8  ;;  %v3853_v49 = vpop.f32.mrb[251].mxu0 }
 0x690   : > { %v3854_v27 = vadd.f32 %v3853_v49, %v783_v60 }
 0x691   : > { %v10757_v15 = vadd.f32 %v3859_v39, %v9197_v45 }
 0x692   : > { %v10754_v40 = vadd.f32 %v3854_v27, %v9194_v43 }
 0x694   : > { %7367 = vmatprep.mubr.msk.f32.mxu1 %vm1923_vm1, %v10754_v40 }
 0x695   : > { %7368 = vmatmul.mubr.msk.f32.gmra.mrb[122].mxu1 %vm1923_vm1, %v10757_v15 }
 0x696   : > { %v7308_v52 = vpop.f32.mrb[252].mxu0 }
 0x697   : > { %v3869_v43 = vadd.f32 %v7308_v52, %v786_v13  ;;  %v3863_v19 = vpop.f32.mrb[253].mxu0 }
 0x698   : > { %v3864_v31 = vadd.f32 %v3863_v19, %v785_v0 }
 0x699   : > { %v10773_v29 = vadd.f32 %v3869_v43, %v9207_v51 }
 0x69a   : > { %v10770_v45 = vadd.f32 %v3864_v31, %v9204_v50 }
 0x69c   : > { %7370 = vmatprep.mubr.msk.f32.mxu1 %vm1923_vm1, %v10770_v45 }
 0x69d   : > { %7371 = vmatmul.mubr.msk.f32.gmra.mrb[124].mxu1 %vm1923_vm1, %v10773_v29 }
 0x69e   : > { %v7311_v56 = vpop.f32.mrb[254].mxu0 }
 0x69f   : > { %v3879_v50 = vadd.f32 %v7311_v56, %v788_v18  ;;  %v3873_v11 = vpop.f32.mrb[255].mxu0 }
 0x6a0   : > { %v3874_v35 = vadd.f32 %v3873_v11, %v787_v4 }
 0x6a1   : > { %v10789_v62 = vadd.f32 %v3879_v50, %v9217_v59 }
 0x6a2   : > { %v10786_v51 = vadd.f32 %v3874_v35, %v9214_v58 }
 0x6a4   : > { %7373 = vmatprep.mubr.msk.f32.mxu1 %vm1923_vm1, %v10786_v51 }
 0x6a5   : > { %7374 = vmatmul.mubr.msk.f32.gmra.mrb[126].mxu1 %vm1923_vm1, %v10789_v62 }
 0x6a6   : > { %4940 = vmatprep.mubr.f32.mxu1 %v8387_v23 }
 0x700   : > { %v7330_v8 = vpop.f32.mrb[96].mxu1 }
 0x701   : > { %v4076_v60 = vpop.f32.mrb[97].mxu1 }
 0x702   : > { %v7745_v37 = vpack.c.bf16 %v7330_v8, %v4076_v60 }
 0x704   : > { %7746 = vmatpush1.bf16.msra.mxu0 %v7745_v37 }
 0x705   : > { %7747 = vmatprep.subr.bf16.mxu0 %v12299_v48 }
 0x708   : > { %v7333_v39 = vpop.f32.mrb[98].mxu1 }
 0x709   : > { %v4086_v58 = vpop.f32.mrb[99].mxu1 }
 0x70a   : > { %v7748_v49 = vpack.c.bf16 %v7333_v39, %v4086_v58 }
 0x70c   : > { %7749 = vmatpush1.bf16.msra.mxu0 %v7748_v49 }
 0x70d   : > { %7750 = vmatprep.subr.bf16.mxu0 %v12299_v48 }
 0x710   : > { %v7336_v59 = vpop.f32.mrb[100].mxu1 }
 0x711   : > { %v4096_v27 = vpop.f32.mrb[101].mxu1 }
 0x712   : > { %v7751_v13 = vpack.c.bf16 %v7336_v59, %v4096_v27 }
 0x714   : > { %7752 = vmatpush1.bf16.msra.mxu0 %v7751_v13 }
 0x715   : > { %7753 = vmatprep.subr.bf16.mxu0 %v12299_v48 }
 0x718   : > { %v7339_v0 = vpop.f32.mrb[102].mxu1 }
 0x719   : > { %v4106_v52 = vpop.f32.mrb[103].mxu1 }
 0x71a   : > { %v7754_v43 = vpack.c.bf16 %v7339_v0, %v4106_v52 }
 0x71c   : > { %7755 = vmatpush1.bf16.msra.mxu0 %v7754_v43 }
 0x71d   : > { %7756 = vmatprep.subr.bf16.mxu0 %v12299_v48 }
 0x720   : > { %v7342_v19 = vpop.f32.mrb[104].mxu1 }
 0x721   : > { %v4116_v31 = vpop.f32.mrb[105].mxu1 }
 0x722   : > { %v7757_v18 = vpack.c.bf16 %v7342_v19, %v4116_v31 }
 0x724   : > { %7758 = vmatpush1.bf16.msra.mxu0 %v7757_v18 }
 0x725   : > { %7759 = vmatprep.subr.bf16.mxu0 %v12299_v48 }
 0x728   : > { %v7345_v4 = vpop.f32.mrb[106].mxu1 }
 0x729   : > { %v4126_v56 = vpop.f32.mrb[107].mxu1 }
 0x72a   : > { %v7760_v50 = vpack.c.bf16 %v7345_v4, %v4126_v56 }
 0x72c   : > { %7761 = vmatpush1.bf16.msra.mxu0 %v7760_v50 }
 0x72d   : > { %7762 = vmatprep.subr.bf16.mxu0 %v12299_v48 }
 0x730   : > { %v7348_v11 = vpop.f32.mrb[108].mxu1 }
 0x731   : > { %v4136_v35 = vpop.f32.mrb[109].mxu1 }
 0x732   : > { %v7763_v23 = vpack.c.bf16 %v7348_v11, %v4136_v35 }
 0x734   : > { %7764 = vmatpush1.bf16.msra.mxu0 %v7763_v23 }
 0x735   : > { %7765 = vmatprep.subr.bf16.mxu0 %v12299_v48 }
 0x738   : > { %v7351_v8 = vpop.f32.mrb[110].mxu1 }
 0x739   : > { %v4146_v60 = vpop.f32.mrb[111].mxu1 }
 0x73a   : > { %v7766_v37 = vpack.c.bf16 %v7351_v8, %v4146_v60 }
 0x73c   : > { %7767 = vmatpush1.bf16.msra.mxu0 %v7766_v37 }
 0x73d   : > { %7768 = vmatprep.subr.bf16.mxu0 %v12299_v48 }
 0x740   : > { %v7354_v39 = vpop.f32.mrb[112].mxu1 }
 0x741   : > { %v4156_v58 = vpop.f32.mrb[113].mxu1 }
 0x742   : > { %v7769_v49 = vpack.c.bf16 %v7354_v39, %v4156_v58 }
 0x744   : > { %7770 = vmatpush1.bf16.msra.mxu0 %v7769_v49 }
 0x745   : > { %7771 = vmatprep.subr.bf16.mxu0 %v12299_v48 }
 0x748   : > { %v7357_v59 = vpop.f32.mrb[114].mxu1 }
 0x749   : > { %v4166_v27 = vpop.f32.mrb[115].mxu1 }
 0x74a   : > { %v7772_v13 = vpack.c.bf16 %v7357_v59, %v4166_v27  ;;  %v8388_v59 = vld [vmem:[%s12183_s2] sm:$0xff]  ;;  %v8389_v27 = vld [vmem:[%s12183_s2 + $0x18] sm:$0xff] }
 0x74c   : > { %7773 = vmatpush1.bf16.msra.mxu0 %v7772_v13  ;;  %v8390_v13 = vld [vmem:[%s12183_s2 + $0x10] sm:$0xff] }
 0x74d   : > { %7774 = vmatprep.subr.bf16.mxu0 %v12299_v48 }
 0x750   : > { %v7360_v0 = vpop.f32.mrb[116].mxu1 }
 0x751   : > { %v4176_v52 = vpop.f32.mrb[117].mxu1 }
 0x752   : > { %v7775_v43 = vpack.c.bf16 %v7360_v0, %v4176_v52  ;;  %v8391_v0 = vld [vmem:[%s12183_s2 + $0x28] sm:$0xff]  ;;  %v8393_v52 = vld [vmem:[%s12183_s2 + $0x38] sm:$0xff] }
 0x754   : > { %7776 = vmatpush1.bf16.msra.mxu0 %v7775_v43  ;;  %v8395_v43 = vld [vmem:[%s12183_s2 + $0x48] sm:$0xff] }
 0x755   : > { %7777 = vmatprep.subr.bf16.mxu0 %v12299_v48 }
 0x758   : > { %v7363_v19 = vpop.f32.mrb[118].mxu1 }
 0x759   : > { %v4186_v31 = vpop.f32.mrb[119].mxu1 }
 0x75a   : > { %v7778_v18 = vpack.c.bf16 %v7363_v19, %v4186_v31  ;;  %v8396_v19 = vld [vmem:[%s12183_s2 + $0x40] sm:$0xff]  ;;  %v8398_v31 = vld [vmem:[%s12183_s2 + $0x50] sm:$0xff] }
 0x75c   : > { %7779 = vmatpush1.bf16.msra.mxu0 %v7778_v18  ;;  %v8399_v18 = vld [vmem:[%s12183_s2 + $0x68] sm:$0xff] }
 0x75d   : > { %7780 = vmatprep.subr.bf16.mxu0 %v12299_v48 }
 0x760   : > { %v7366_v4 = vpop.f32.mrb[120].mxu1 }
 0x761   : > { %v4196_v56 = vpop.f32.mrb[121].mxu1 }
 0x762   : > { %v7781_v50 = vpack.c.bf16 %v7366_v4, %v4196_v56  ;;  %v8401_v4 = vld [vmem:[%s12183_s2 + $0x78] sm:$0xff]  ;;  %v8402_v56 = vld [vmem:[%s12183_s2 + $0x70] sm:$0xff] }
 0x764   : > { %7782 = vmatpush1.bf16.msra.mxu0 %v7781_v50  ;;  %v8403_v50 = vld [vmem:[%s12183_s2 + $0x88] sm:$0xff] }
 0x765   : > { %7783 = vmatprep.subr.bf16.mxu0 %v12299_v48 }
 0x768   : > { %v7369_v11 = vpop.f32.mrb[122].mxu1 }
 0x769   : > { %v4206_v35 = vpop.f32.mrb[123].mxu1 }
 0x76a   : > { %v7784_v23 = vpack.c.bf16 %v7369_v11, %v4206_v35  ;;  %v8404_v11 = vld [vmem:[%s12183_s2 + $0x80] sm:$0xff]  ;;  %v8405_v35 = vld [vmem:[%s12183_s2 + $0x98] sm:$0xff] }
 0x76c   : > { %7785 = vmatpush1.bf16.msra.mxu0 %v7784_v23  ;;  %v8406_v23 = vld [vmem:[%s12183_s2 + $0x90] sm:$0xff] }
 0x76d   : > { %7786 = vmatprep.subr.bf16.mxu0 %v12299_v48 }
 0x770   : > { %v7372_v8 = vpop.f32.mrb[124].mxu1 }
 0x771   : > { %v4216_v60 = vpop.f32.mrb[125].mxu1 }
 0x772   : > { %v7787_v37 = vpack.c.bf16 %v7372_v8, %v4216_v60  ;;  %v8407_v8 = vld [vmem:[%s12183_s2 + $0xa8] sm:$0xff]  ;;  %v8408_v60 = vld [vmem:[%s12183_s2 + $0xa0] sm:$0xff] }
 0x774   : > { %7788 = vmatpush1.bf16.msra.mxu0 %v7787_v37  ;;  %v8409_v37 = vld [vmem:[%s12183_s2 + $0xb8] sm:$0xff] }
 0x775   : > { %7789 = vmatprep.subr.bf16.mxu0 %v12299_v48 }
 0x778   : > { %v7375_v39 = vpop.f32.mrb[126].mxu1 }
 0x779   : > { %v4226_v58 = vpop.f32.mrb[127].mxu1 }
 0x77a   : > { %v7790_v49 = vpack.c.bf16 %v7375_v39, %v4226_v58  ;;  %v8410_v39 = vld [vmem:[%s12183_s2 + $0xb0] sm:$0xff]  ;;  %v8411_v58 = vld [vmem:[%s12183_s2 + $0xc8] sm:$0xff] }
 0x77c   : > { %7791 = vmatpush1.bf16.msra.mxu0 %v7790_v49  ;;  %v8412_v49 = vld [vmem:[%s12183_s2 + $0xc0] sm:$0xff] }
 0x77d   : > { %7937 = vmatprep.subr.bf16.mxu0 %v10151_v46 }
 0x77f   : > { %4300 = vmatmul.mubr.f32.vlgmr.msra.gmra.mrb[0].mxu0 %v8388_v59  ;;  %v8413_v59 = vld [vmem:[%s12183_s2 + $0xd8] sm:$0xff] }
 0x780   : > { %4304 = vmatprep.mubr.f32.mxu0 %v8389_v27  ;;  %7939 = vmatpush3.bf16.msra.mxu0 %v10151_v46  ;;  %v8392_v46 = vld [vmem:[%s12183_s2 + $0x20] sm:$0xff]  ;;  %v8414_v27 = vld [vmem:[%s12183_s2 + $0xd0] sm:$0xff] }
 0x781   : > { %7941 = vmatprep.subr.bf16.mxu0 %v10299_v63 }
 0x783   : > { %4305 = vmatmul.mubr.f32.gmra.mrb[2].mxu0 %v8390_v13  ;;  %v8415_v13 = vld [vmem:[%s12183_s2 + $0xe8] sm:$0xff] }
 0x784   : > { %4309 = vmatprep.mubr.f32.mxu0 %v8391_v0  ;;  %7943 = vmatpush3.bf16.msra.mxu0 %v10299_v63  ;;  %v8394_v63 = vld [vmem:[%s12183_s2 + $0x30] sm:$0xff]  ;;  %v8416_v0 = vld [vmem:[%s12183_s2 + $0xe0] sm:$0xff] }
 0x785   : > { %7945 = vmatprep.subr.bf16.mxu0 %v10438_v10 }
 0x787   : > { %4310 = vmatmul.mubr.f32.gmra.mrb[4].mxu0 %v8392_v46  ;;  %v8417_v46 = vld [vmem:[%s12183_s2 + $0xf8] sm:$0xff] }
 0x788   : > { %4314 = vmatprep.mubr.f32.mxu0 %v8393_v52  ;;  %7947 = vmatpush3.bf16.msra.mxu0 %v10438_v10  ;;  %v8397_v10 = vld [vmem:[%s12183_s2 + $0x58] sm:$0xff]  ;;  %v8418_v52 = vld [vmem:[%s12183_s2 + $0xf0] sm:$0xff] }
 0x789   : > { %7949 = vmatprep.subr.bf16.mxu0 %v10490_v30 }
 0x78b   : > { %4315 = vmatmul.mubr.f32.gmra.mrb[6].mxu0 %v8394_v63  ;;  %v8419_v63 = vld [vmem:[%s12183_s2 + $0x108] sm:$0xff] }
 0x78c   : > { %4319 = vmatprep.mubr.f32.mxu0 %v8395_v43  ;;  %7951 = vmatpush3.bf16.msra.mxu0 %v10490_v30  ;;  %v8400_v30 = vld [vmem:[%s12183_s2 + $0x60] sm:$0xff] }
 0x78d   : > { %v8420_v43 = vld [vmem:[%s12183_s2 + $0x100] sm:$0xff] }
 0x78f   : > { %4320 = vmatmul.mubr.f32.gmra.mrb[8].mxu0 %v8396_v19  ;;  %v8421_v19 = vld [vmem:[%s12183_s2 + $0x118] sm:$0xff] }
 0x790   : > { %4324 = vmatprep.mubr.f32.mxu0 %v8397_v10  ;;  %v8422_v10 = vld [vmem:[%s12183_s2 + $0x110] sm:$0xff] }
 0x793   : > { %4325 = vmatmul.mubr.f32.gmra.mrb[10].mxu0 %v8398_v31  ;;  %v8423_v31 = vld [vmem:[%s12183_s2 + $0x128] sm:$0xff] }
 0x794   : > { %4329 = vmatprep.mubr.f32.mxu0 %v8399_v18  ;;  %v8424_v18 = vld [vmem:[%s12183_s2 + $0x120] sm:$0xff] }
 0x797   : > { %4330 = vmatmul.mubr.f32.gmra.mrb[12].mxu0 %v8400_v30  ;;  %v8425_v30 = vld [vmem:[%s12183_s2 + $0x138] sm:$0xff] }
 0x798   : > { %4334 = vmatprep.mubr.f32.mxu0 %v8401_v4  ;;  %v8426_v4 = vld [vmem:[%s12183_s2 + $0x130] sm:$0xff] }
 0x79b   : > { %4335 = vmatmul.mubr.f32.gmra.mrb[14].mxu0 %v8402_v56  ;;  %v8427_v56 = vld [vmem:[%s12183_s2 + $0x148] sm:$0xff] }
 0x79c   : > { %4339 = vmatprep.mubr.f32.mxu0 %v8403_v50  ;;  %v8428_v50 = vld [vmem:[%s12183_s2 + $0x140] sm:$0xff] }
 0x79f   : > { %4340 = vmatmul.mubr.f32.gmra.mrb[16].mxu0 %v8404_v11  ;;  %v8429_v11 = vld [vmem:[%s12183_s2 + $0x158] sm:$0xff] }
 0x7a0   : > { %4344 = vmatprep.mubr.f32.mxu0 %v8405_v35  ;;  %v8430_v35 = vld [vmem:[%s12183_s2 + $0x150] sm:$0xff] }
 0x7a3   : > { %4345 = vmatmul.mubr.f32.gmra.mrb[18].mxu0 %v8406_v23  ;;  %v8431_v23 = vld [vmem:[%s12183_s2 + $0x168] sm:$0xff] }
 0x7a4   : > { %4349 = vmatprep.mubr.f32.mxu0 %v8407_v8  ;;  %v8432_v8 = vld [vmem:[%s12183_s2 + $0x160] sm:$0xff] }
 0x7a7   : > { %4350 = vmatmul.mubr.f32.gmra.mrb[20].mxu0 %v8408_v60  ;;  %v8433_v60 = vld [vmem:[%s12183_s2 + $0x178] sm:$0xff] }
 0x7a8   : > { %4354 = vmatprep.mubr.f32.mxu0 %v8409_v37  ;;  %v8434_v37 = vld [vmem:[%s12183_s2 + $0x170] sm:$0xff] }
 0x7ab   : > { %4355 = vmatmul.mubr.f32.gmra.mrb[22].mxu0 %v8410_v39  ;;  %v8435_v39 = vld [vmem:[%s12183_s2 + $0x188] sm:$0xff] }
 0x7ac   : > { %4359 = vmatprep.mubr.f32.mxu0 %v8411_v58  ;;  %v8436_v58 = vld [vmem:[%s12183_s2 + $0x180] sm:$0xff] }
 0x7af   : > { %4360 = vmatmul.mubr.f32.gmra.mrb[24].mxu0 %v8412_v49  ;;  %v8437_v49 = vld [vmem:[%s12183_s2 + $0x198] sm:$0xff] }
 0x7b0   : > { %4364 = vmatprep.mubr.f32.mxu0 %v8413_v59  ;;  %v8438_v59 = vld [vmem:[%s12183_s2 + $0x190] sm:$0xff] }
 0x7b3   : > { %4365 = vmatmul.mubr.f32.gmra.mrb[26].mxu0 %v8414_v27  ;;  %v8439_v27 = vld [vmem:[%s12183_s2 + $0x1a8] sm:$0xff] }
 0x7b4   : > { %4369 = vmatprep.mubr.f32.mxu0 %v8415_v13  ;;  %v8440_v13 = vld [vmem:[%s12183_s2 + $0x1a0] sm:$0xff] }
 0x7b7   : > { %4370 = vmatmul.mubr.f32.gmra.mrb[28].mxu0 %v8416_v0  ;;  %v8441_v0 = vld [vmem:[%s12183_s2 + $0x1b8] sm:$0xff] }
 0x7b8   : > { %4374 = vmatprep.mubr.f32.mxu0 %v8417_v46  ;;  %v8442_v46 = vld [vmem:[%s12183_s2 + $0x1b0] sm:$0xff] }
 0x7bb   : > { %4375 = vmatmul.mubr.f32.gmra.mrb[30].mxu0 %v8418_v52  ;;  %v8443_v52 = vld [vmem:[%s12183_s2 + $0x1c8] sm:$0xff] }
 0x7bc   : > { %4379 = vmatprep.mubr.f32.mxu0 %v8419_v63  ;;  %v8444_v63 = vld [vmem:[%s12183_s2 + $0x1c0] sm:$0xff] }
 0x7bf   : > { %4380 = vmatmul.mubr.f32.gmra.mrb[32].mxu0 %v8420_v43  ;;  %v8445_v43 = vld [vmem:[%s12183_s2 + $0x1d8] sm:$0xff] }
 0x7c0   : > { %4384 = vmatprep.mubr.f32.mxu0 %v8421_v19  ;;  %v8446_v19 = vld [vmem:[%s12183_s2 + $0x1d0] sm:$0xff] }
 0x7c3   : > { %4385 = vmatmul.mubr.f32.gmra.mrb[34].mxu0 %v8422_v10  ;;  %v8447_v10 = vld [vmem:[%s12183_s2 + $0x1e8] sm:$0xff] }
 0x7c4   : > { %4389 = vmatprep.mubr.f32.mxu0 %v8423_v31  ;;  %v8448_v31 = vld [vmem:[%s12183_s2 + $0x1e0] sm:$0xff] }
 0x7c7   : > { %4390 = vmatmul.mubr.f32.gmra.mrb[36].mxu0 %v8424_v18  ;;  %v8449_v18 = vld [vmem:[%s12183_s2 + $0x1f8] sm:$0xff] }
 0x7c8   : > { %4394 = vmatprep.mubr.f32.mxu0 %v8425_v30  ;;  %v8450_v30 = vld [vmem:[%s12183_s2 + $0x1f0] sm:$0xff] }
 0x7cb   : > { %4395 = vmatmul.mubr.f32.gmra.mrb[38].mxu0 %v8426_v4  ;;  %v8451_v4 = vld [vmem:[%s12183_s2 + $0x208] sm:$0xff] }
 0x7cc   : > { %4399 = vmatprep.mubr.f32.mxu0 %v8427_v56  ;;  %v8452_v56 = vld [vmem:[%s12183_s2 + $0x200] sm:$0xff] }
 0x7cf   : > { %4400 = vmatmul.mubr.f32.gmra.mrb[40].mxu0 %v8428_v50  ;;  %v8453_v50 = vld [vmem:[%s12183_s2 + $0x218] sm:$0xff] }
 0x7d0   : > { %4404 = vmatprep.mubr.f32.mxu0 %v8429_v11  ;;  %v8454_v11 = vld [vmem:[%s12183_s2 + $0x210] sm:$0xff] }
 0x7d3   : > { %4405 = vmatmul.mubr.f32.gmra.mrb[42].mxu0 %v8430_v35  ;;  %v8455_v35 = vld [vmem:[%s12183_s2 + $0x228] sm:$0xff] }
 0x7d4   : > { %4409 = vmatprep.mubr.f32.mxu0 %v8431_v23  ;;  %v8456_v23 = vld [vmem:[%s12183_s2 + $0x220] sm:$0xff] }
 0x7d7   : > { %4410 = vmatmul.mubr.f32.gmra.mrb[44].mxu0 %v8432_v8  ;;  %v8457_v8 = vld [vmem:[%s12183_s2 + $0x238] sm:$0xff] }
 0x7d8   : > { %4414 = vmatprep.mubr.f32.mxu0 %v8433_v60  ;;  %v8458_v60 = vld [vmem:[%s12183_s2 + $0x230] sm:$0xff] }
 0x7db   : > { %4415 = vmatmul.mubr.f32.gmra.mrb[46].mxu0 %v8434_v37  ;;  %v8459_v37 = vld [vmem:[%s12183_s2 + $0x248] sm:$0xff] }
 0x7dc   : > { %4419 = vmatprep.mubr.f32.mxu0 %v8435_v39  ;;  %v8460_v39 = vld [vmem:[%s12183_s2 + $0x240] sm:$0xff] }
 0x7df   : > { %4420 = vmatmul.mubr.f32.gmra.mrb[48].mxu0 %v8436_v58  ;;  %v8461_v58 = vld [vmem:[%s12183_s2 + $0x258] sm:$0xff] }
 0x7e0   : > { %4424 = vmatprep.mubr.f32.mxu0 %v8437_v49  ;;  %v8462_v49 = vld [vmem:[%s12183_s2 + $0x250] sm:$0xff] }
 0x7e3   : > { %4425 = vmatmul.mubr.f32.gmra.mrb[50].mxu0 %v8438_v59  ;;  %v8463_v59 = vld [vmem:[%s12183_s2 + $0x268] sm:$0xff] }
 0x7e4   : > { %4429 = vmatprep.mubr.f32.mxu0 %v8439_v27  ;;  %v8464_v27 = vld [vmem:[%s12183_s2 + $0x260] sm:$0xff] }
 0x7e7   : > { %4430 = vmatmul.mubr.f32.gmra.mrb[52].mxu0 %v8440_v13  ;;  %v8465_v13 = vld [vmem:[%s12183_s2 + $0x278] sm:$0xff] }
 0x7e8   : > { %4434 = vmatprep.mubr.f32.mxu0 %v8441_v0  ;;  %v8466_v0 = vld [vmem:[%s12183_s2 + $0x270] sm:$0xff] }
 0x7eb   : > { %4435 = vmatmul.mubr.f32.gmra.mrb[54].mxu0 %v8442_v46  ;;  %v8467_v46 = vld [vmem:[%s12183_s2 + $0x288] sm:$0xff] }
 0x7ec   : > { %4439 = vmatprep.mubr.f32.mxu0 %v8443_v52  ;;  %v8468_v52 = vld [vmem:[%s12183_s2 + $0x280] sm:$0xff] }
 0x7ef   : > { %4440 = vmatmul.mubr.f32.gmra.mrb[56].mxu0 %v8444_v63  ;;  %v8469_v63 = vld [vmem:[%s12183_s2 + $0x298] sm:$0xff] }
 0x7f0   : > { %4444 = vmatprep.mubr.f32.mxu0 %v8445_v43  ;;  %v8470_v43 = vld [vmem:[%s12183_s2 + $0x290] sm:$0xff] }
 0x7f3   : > { %4445 = vmatmul.mubr.f32.gmra.mrb[58].mxu0 %v8446_v19  ;;  %v8471_v19 = vld [vmem:[%s12183_s2 + $0x2a8] sm:$0xff] }
 0x7f4   : > { %4449 = vmatprep.mubr.f32.mxu0 %v8447_v10  ;;  %v8472_v10 = vld [vmem:[%s12183_s2 + $0x2a0] sm:$0xff] }
 0x7f7   : > { %4450 = vmatmul.mubr.f32.gmra.mrb[60].mxu0 %v8448_v31  ;;  %v8473_v31 = vld [vmem:[%s12183_s2 + $0x2b8] sm:$0xff] }
 0x7f8   : > { %4454 = vmatprep.mubr.f32.mxu0 %v8449_v18  ;;  %v8474_v18 = vld [vmem:[%s12183_s2 + $0x2b0] sm:$0xff] }
 0x7fb   : > { %4455 = vmatmul.mubr.f32.gmra.mrb[62].mxu0 %v8450_v30  ;;  %v8475_v30 = vld [vmem:[%s12183_s2 + $0x2c8] sm:$0xff] }
 0x7fc   : > { %4459 = vmatprep.mubr.f32.mxu0 %v8451_v4  ;;  %v8476_v4 = vld [vmem:[%s12183_s2 + $0x2c0] sm:$0xff] }
 0x7ff   : > { %4460 = vmatmul.mubr.f32.gmra.mrb[64].mxu0 %v8452_v56  ;;  %v8477_v56 = vld [vmem:[%s12183_s2 + $0x2d8] sm:$0xff] }
 0x800   : > { %4464 = vmatprep.mubr.f32.mxu0 %v8453_v50  ;;  %v8478_v50 = vld [vmem:[%s12183_s2 + $0x2d0] sm:$0xff] }
 0x803   : > { %4465 = vmatmul.mubr.f32.gmra.mrb[66].mxu0 %v8454_v11  ;;  %v8479_v11 = vld [vmem:[%s12183_s2 + $0x2e8] sm:$0xff] }
 0x804   : > { %4469 = vmatprep.mubr.f32.mxu0 %v8455_v35  ;;  %v8480_v35 = vld [vmem:[%s12183_s2 + $0x2e0] sm:$0xff] }
 0x807   : > { %4470 = vmatmul.mubr.f32.gmra.mrb[68].mxu0 %v8456_v23  ;;  %v8481_v23 = vld [vmem:[%s12183_s2 + $0x2f8] sm:$0xff] }
 0x808   : > { %4474 = vmatprep.mubr.f32.mxu0 %v8457_v8  ;;  %v8482_v8 = vld [vmem:[%s12183_s2 + $0x2f0] sm:$0xff] }
 0x80b   : > { %4475 = vmatmul.mubr.f32.gmra.mrb[70].mxu0 %v8458_v60  ;;  %v8483_v60 = vld [vmem:[%s12183_s2 + $0x308] sm:$0xff] }
 0x80c   : > { %4479 = vmatprep.mubr.f32.mxu0 %v8459_v37  ;;  %v8484_v37 = vld [vmem:[%s12183_s2 + $0x300] sm:$0xff] }
 0x80f   : > { %4480 = vmatmul.mubr.f32.gmra.mrb[72].mxu0 %v8460_v39  ;;  %v8485_v39 = vld [vmem:[%s12183_s2 + $0x318] sm:$0xff] }
 0x810   : > { %4484 = vmatprep.mubr.f32.mxu0 %v8461_v58  ;;  %v8486_v58 = vld [vmem:[%s12183_s2 + $0x310] sm:$0xff] }
 0x813   : > { %4485 = vmatmul.mubr.f32.gmra.mrb[74].mxu0 %v8462_v49  ;;  %v8487_v49 = vld [vmem:[%s12183_s2 + $0x328] sm:$0xff] }
 0x814   : > { %4489 = vmatprep.mubr.f32.mxu0 %v8463_v59  ;;  %v8488_v59 = vld [vmem:[%s12183_s2 + $0x320] sm:$0xff] }
 0x817   : > { %4490 = vmatmul.mubr.f32.gmra.mrb[76].mxu0 %v8464_v27  ;;  %v8489_v27 = vld [vmem:[%s12183_s2 + $0x338] sm:$0xff] }
 0x818   : > { %4494 = vmatprep.mubr.f32.mxu0 %v8465_v13  ;;  %v8490_v13 = vld [vmem:[%s12183_s2 + $0x330] sm:$0xff] }
 0x81b   : > { %4495 = vmatmul.mubr.f32.gmra.mrb[78].mxu0 %v8466_v0  ;;  %v8491_v0 = vld [vmem:[%s12183_s2 + $0x348] sm:$0xff] }
 0x81c   : > { %4499 = vmatprep.mubr.f32.mxu0 %v8467_v46  ;;  %v8492_v46 = vld [vmem:[%s12183_s2 + $0x340] sm:$0xff] }
 0x81f   : > { %4500 = vmatmul.mubr.f32.gmra.mrb[80].mxu0 %v8468_v52  ;;  %v8493_v52 = vld [vmem:[%s12183_s2 + $0x358] sm:$0xff] }
 0x820   : > { %4504 = vmatprep.mubr.f32.mxu0 %v8469_v63 }
 0x823   : > { %4505 = vmatmul.mubr.f32.gmra.mrb[82].mxu0 %v8470_v43 }
 0x824   : > { %4509 = vmatprep.mubr.f32.mxu0 %v8471_v19  ;;  %v8494_v19 = vld [vmem:[%s12183_s2 + $0x350] sm:$0xff] }
 0x827   : > { %4510 = vmatmul.mubr.f32.gmra.mrb[84].mxu0 %v8472_v10  ;;  %v8495_v10 = vld [vmem:[%s12183_s2 + $0x368] sm:$0xff] }
 0x828   : > { %4514 = vmatprep.mubr.f32.mxu0 %v8473_v31 }
 0x82b   : > { %4515 = vmatmul.mubr.f32.gmra.mrb[86].mxu0 %v8474_v18 }
 0x82c   : > { %4519 = vmatprep.mubr.f32.mxu0 %v8475_v30 }
 0x82f   : > { %4520 = vmatmul.mubr.f32.gmra.mrb[88].mxu0 %v8476_v4 }
 0x830   : > { %4524 = vmatprep.mubr.f32.mxu0 %v8477_v56  ;;  %v8496_v56 = vld [vmem:[%s12183_s2 + $0x360] sm:$0xff] }
 0x833   : > { %4525 = vmatmul.mubr.f32.gmra.mrb[90].mxu0 %v8478_v50  ;;  %v8497_v50 = vld [vmem:[%s12183_s2 + $0x378] sm:$0xff] }
 0x834   : > { %4529 = vmatprep.mubr.f32.mxu0 %v8479_v11 }
 0x837   : > { %4530 = vmatmul.mubr.f32.gmra.mrb[92].mxu0 %v8480_v35 }
 0x838   : > { %4534 = vmatprep.mubr.f32.mxu0 %v8481_v23 }
 0x83b   : > { %4535 = vmatmul.mubr.f32.gmra.mrb[94].mxu0 %v8482_v8 }
 0x83c   : > { %4539 = vmatprep.mubr.f32.mxu0 %v8483_v60 }
 0x83f   : > { %4540 = vmatmul.mubr.f32.gmra.mrb[96].mxu0 %v8484_v37  ;;  %v12380_v37 = vld [vmem:[#allocation5_spill] sm:$0xff] }
 0x840   : > { %4544 = vmatprep.mubr.f32.mxu0 %v8485_v39 }
 0x843   : > { %4545 = vmatmul.mubr.f32.gmra.mrb[98].mxu0 %v8486_v58 }
 0x844   : > { %4549 = vmatprep.mubr.f32.mxu0 %v8487_v49  ;;  %v12381_v49 = vld [vmem:[#allocation6_spill] sm:$0xff] }
 0x847   : > { %4550 = vmatmul.mubr.f32.gmra.mrb[100].mxu0 %v8488_v59 }
 0x848   : > { %4554 = vmatprep.mubr.f32.mxu0 %v8489_v27 }
 0x84b   : > { %4555 = vmatmul.mubr.f32.gmra.mrb[102].mxu0 %v8490_v13  ;;  %v8500_v13 = vld [vmem:[%s12183_s2 + $0x380] sm:$0xff] }
 0x84c   : > { %4559 = vmatprep.mubr.f32.mxu0 %v8491_v0  ;;  %v8501_v0 = vld [vmem:[%s12183_s2 + $0x398] sm:$0xff] }
 0x84f   : > { %4560 = vmatmul.mubr.f32.gmra.mrb[104].mxu0 %v8492_v46 }
 0x850   : > { %4564 = vmatprep.mubr.f32.mxu0 %v8493_v52 }
 0x852   : > { %v4301_v63 = vpop.f32.mrb[0].mxu0 }
 0x853   : > { %v4303_v43 = vpop.f32.mrb[1].mxu0  ;;  %4565 = vmatmul.mubr.f32.gmra.mrb[106].mxu0 %v8494_v19  ;;  %v4302_v31 = vadd.f32 %v4301_v63, %v9678_v2  ;;  %v8498_v2 = vld [vmem:[%s12183_s2 + $0x370] sm:$0xff] }
 0x854   : > { %4569 = vmatprep.mubr.f32.mxu0 %v8495_v10  ;;  %v8502_v10 = vld [vmem:[%s12183_s2 + $0x390] sm:$0xff] }
 0x855   : > { %v4780_v11 = vmax.f32 %v4302_v31, 0.0  ;;  %v8503_v31 = vld [vmem:[%s12183_s2 + $0x3a8] sm:$0xff] }
 0x856   : > { %v4306_v18 = vpop.f32.mrb[2].mxu0 }
 0x857   : > { %v4307_v30 = vadd.f32 %v4306_v18, %v9684_v7  ;;  %v4308_v4 = vpop.f32.mrb[3].mxu0  ;;  %4570 = vmatmul.mubr.f32.gmra.mrb[108].mxu0 %v8496_v56  ;;  %v8499_v7 = vld [vmem:[%s12183_s2 + $0x388] sm:$0xff]  ;;  %v12382_v18 = vld [vmem:[#allocation7_spill] sm:$0xff]  ;;  %v12383_v56 = vld [vmem:[#allocation8_spill] sm:$0xff] }
 0x858   : > { %4574 = vmatprep.mubr.f32.mxu0 %v8497_v50 }
 0x859   : > { %v4781_v35 = vmax.f32 %v4307_v30, 0.0 }
 0x85a   : > { %v4311_v23 = vpop.f32.mrb[4].mxu0 }
 0x85b   : > { %v7793_v8 = vpack.c.bf16 %v4781_v35, %v4780_v11  ;;  %v4313_v60 = vpop.f32.mrb[5].mxu0  ;;  %4575 = vmatmul.mubr.f32.gmra.mrb[110].mxu0 %v8498_v2  ;;  %v4312_v39 = vadd.f32 %v4311_v23, %v12380_v37  ;;  %v8504_v35 = vld [vmem:[%s12183_s2 + $0x3a0] sm:$0xff]  ;;  %v8505_v23 = vld [vmem:[%s12183_s2 + $0x3b8] sm:$0xff] }
 0x85c   : > { %4579 = vmatprep.mubr.f32.mxu0 %v8499_v7 }
 0x85d   : > { %7794 = vmatpush1.bf16.msra.mxu1 %v7793_v8  ;;  %v4782_v46 = vmax.f32 %v4312_v39, 0.0  ;;  %v8506_v39 = vld [vmem:[%s12183_s2 + $0x3b0] sm:$0xff] }
 0x85e   : > { %v4316_v58 = vpop.f32.mrb[6].mxu0  ;;  %7795 = vmatprep.subr.bf16.mxu1 %v12299_v48 }
 0x85f   : > { %v4317_v59 = vadd.f32 %v4316_v58, %v12381_v49  ;;  %v4318_v27 = vpop.f32.mrb[7].mxu0  ;;  %4580 = vmatmul.mubr.f32.gmra.mrb[112].mxu0 %v8500_v13  ;;  %v8507_v58 = vld [vmem:[%s12183_s2 + $0x3c8] sm:$0xff]  ;;  %v12384_v49 = vld [vmem:[#allocation9_spill] sm:$0xff] }
 0x860   : > { %4584 = vmatprep.mubr.f32.mxu0 %v8501_v0  ;;  %v12385_v13 = vld [vmem:[#allocation10_spill] sm:$0xff] }
 0x861   : > { %v4783_v52 = vmax.f32 %v4317_v59, 0.0 }
 0x862   : > { %v4321_v63 = vpop.f32.mrb[8].mxu0 }
 0x863   : > { %v7796_v43 = vpack.c.bf16 %v4783_v52, %v4782_v46  ;;  %v4323_v19 = vpop.f32.mrb[9].mxu0  ;;  %4585 = vmatmul.mubr.f32.gmra.mrb[114].mxu0 %v8502_v10  ;;  %v4322_v30 = vadd.f32 %v4321_v63, %v12382_v18  ;;  %v8508_v52 = vld [vmem:[%s12183_s2 + $0x3c0] sm:$0xff]  ;;  %v8509_v63 = vld [vmem:[%s12183_s2 + $0x3d8] sm:$0xff] }
 0x864   : > { %4589 = vmatprep.mubr.f32.mxu0 %v8503_v31 }
 0x865   : > { %7797 = vmatpush1.bf16.msra.mxu1 %v7796_v43  ;;  %v4784_v8 = vmax.f32 %v4322_v30, 0.0  ;;  %v8510_v30 = vld [vmem:[%s12183_s2 + $0x3d0] sm:$0xff] }
 0x866   : > { %v4326_v4 = vpop.f32.mrb[10].mxu0  ;;  %7798 = vmatprep.subr.bf16.mxu1 %v12299_v48 }
 0x867   : > { %v4327_v50 = vadd.f32 %v4326_v4, %v12383_v56  ;;  %v4328_v11 = vpop.f32.mrb[11].mxu0  ;;  %4590 = vmatmul.mubr.f32.gmra.mrb[116].mxu0 %v8504_v35  ;;  %v8511_v4 = vld [vmem:[%s12183_s2 + $0x3e8] sm:$0xff]  ;;  %v12386_v56 = vld [vmem:[#allocation11_spill] sm:$0xff]  ;;  %v12387_v35 = vld [vmem:[#allocation12_spill] sm:$0xff] }
 0x868   : > { %4594 = vmatprep.mubr.f32.mxu0 %v8505_v23 }
 0x869   : > { %v4785_v60 = vmax.f32 %v4327_v50, 0.0 }
 0x86a   : > { %v4331_v2 = vpop.f32.mrb[12].mxu0 }
 0x86b   : > { %v7799_v7 = vpack.c.bf16 %v4785_v60, %v4784_v8  ;;  %v4333_v37 = vpop.f32.mrb[13].mxu0  ;;  %4595 = vmatmul.mubr.f32.gmra.mrb[118].mxu0 %v8506_v39  ;;  %v4332_v59 = vadd.f32 %v4331_v2, %v12384_v49  ;;  %v8512_v60 = vld [vmem:[%s12183_s2 + $0x3e0] sm:$0xff]  ;;  %v8513_v2 = vld [vmem:[%s12183_s2 + $0x3f8] sm:$0xff] }
 0x86c   : > { %4599 = vmatprep.mubr.f32.mxu0 %v8507_v58 }
 0x86d   : > { %7800 = vmatpush1.bf16.msra.mxu1 %v7799_v7  ;;  %v4786_v43 = vmax.f32 %v4332_v59, 0.0  ;;  %v8514_v59 = vld [vmem:[%s12183_s2 + $0x3f0] sm:$0xff] }
 0x86e   : > { %v4336_v27 = vpop.f32.mrb[14].mxu0  ;;  %7801 = vmatprep.subr.bf16.mxu1 %v12299_v48 }
 0x86f   : > { %v4337_v0 = vadd.f32 %v4336_v27, %v12385_v13  ;;  %v4338_v46 = vpop.f32.mrb[15].mxu0  ;;  %4600 = vmatmul.mubr.f32.gmra.mrb[120].mxu0 %v8508_v52  ;;  %v8515_v27 = vld [vmem:[%s12183_s2 + $0x408] sm:$0xff]  ;;  %v12388_v13 = vld [vmem:[#allocation13_spill] sm:$0xff] }
 0x870   : > { %4604 = vmatprep.mubr.f32.mxu0 %v8509_v63  ;;  %v12389_v52 = vld [vmem:[#allocation14_spill] sm:$0xff] }
 0x871   : > { %v4787_v19 = vmax.f32 %v4337_v0, 0.0 }
 0x872   : > { %v4341_v10 = vpop.f32.mrb[16].mxu0 }
 0x873   : > { %v7802_v31 = vpack.c.bf16 %v4787_v19, %v4786_v43  ;;  %v4343_v18 = vpop.f32.mrb[17].mxu0  ;;  %4605 = vmatmul.mubr.f32.gmra.mrb[122].mxu0 %v8510_v30  ;;  %v4342_v50 = vadd.f32 %v4341_v10, %v12386_v56  ;;  %v8516_v19 = vld [vmem:[%s12183_s2 + $0x400] sm:$0xff]  ;;  %v8517_v10 = vld [vmem:[%s12183_s2 + $0x418] sm:$0xff] }
 0x874   : > { %4609 = vmatprep.mubr.f32.mxu0 %v8511_v4 }
 0x875   : > { %7803 = vmatpush1.bf16.msra.mxu1 %v7802_v31  ;;  %v4788_v7 = vmax.f32 %v4342_v50, 0.0  ;;  %v8518_v50 = vld [vmem:[%s12183_s2 + $0x410] sm:$0xff] }
 0x876   : > { %v4346_v11 = vpop.f32.mrb[18].mxu0  ;;  %7804 = vmatprep.subr.bf16.mxu1 %v12299_v48 }
 0x877   : > { %v4347_v23 = vadd.f32 %v4346_v11, %v12387_v35  ;;  %v4348_v8 = vpop.f32.mrb[19].mxu0  ;;  %4610 = vmatmul.mubr.f32.gmra.mrb[124].mxu0 %v8512_v60  ;;  %v8519_v11 = vld [vmem:[%s12183_s2 + $0x428] sm:$0xff]  ;;  %v12390_v35 = vld [vmem:[#allocation15_spill] sm:$0xff]  ;;  %v12391_v60 = vld [vmem:[#allocation16_spill] sm:$0xff] }
 0x878   : > { %4614 = vmatprep.mubr.f32.mxu0 %v8513_v2 }
 0x879   : > { %v4789_v37 = vmax.f32 %v4347_v23, 0.0 }
 0x87a   : > { %v4351_v39 = vpop.f32.mrb[20].mxu0 }
 0x87b   : > { %v7805_v58 = vpack.c.bf16 %v4789_v37, %v4788_v7  ;;  %v4353_v49 = vpop.f32.mrb[21].mxu0  ;;  %4615 = vmatmul.mubr.f32.gmra.mrb[126].mxu0 %v8514_v59  ;;  %v4352_v0 = vadd.f32 %v4351_v39, %v12388_v13  ;;  %v8520_v37 = vld [vmem:[%s12183_s2 + $0x420] sm:$0xff]  ;;  %v8521_v39 = vld [vmem:[%s12183_s2 + $0x438] sm:$0xff] }
 0x87c   : > { %4619 = vmatprep.mubr.f32.mxu0 %v8515_v27 }
 0x87d   : > { %7806 = vmatpush1.bf16.msra.mxu1 %v7805_v58  ;;  %v4790_v31 = vmax.f32 %v4352_v0, 0.0  ;;  %v8522_v0 = vld [vmem:[%s12183_s2 + $0x430] sm:$0xff] }
 0x87e   : > { %v4356_v46 = vpop.f32.mrb[22].mxu0  ;;  %7807 = vmatprep.subr.bf16.mxu1 %v12299_v48 }
 0x87f   : > { %v4357_v63 = vadd.f32 %v4356_v46, %v12389_v52  ;;  %v4358_v43 = vpop.f32.mrb[23].mxu0  ;;  %4620 = vmatmul.mubr.f32.gmra.mrb[128].mxu0 %v8516_v19  ;;  %v8523_v46 = vld [vmem:[%s12183_s2 + $0x448] sm:$0xff]  ;;  %v12392_v52 = vld [vmem:[#allocation17_spill] sm:$0xff] }
 0x880   : > { %4624 = vmatprep.mubr.f32.mxu0 %v8517_v10  ;;  %v12393_v19 = vld [vmem:[#allocation18_spill] sm:$0xff] }
 0x881   : > { %v4791_v18 = vmax.f32 %v4357_v63, 0.0 }
 0x882   : > { %v4361_v30 = vpop.f32.mrb[24].mxu0 }
 0x883   : > { %v7808_v4 = vpack.c.bf16 %v4791_v18, %v4790_v31  ;;  %v4363_v56 = vpop.f32.mrb[25].mxu0  ;;  %4625 = vmatmul.mubr.f32.gmra.mrb[130].mxu0 %v8518_v50  ;;  %v4362_v23 = vadd.f32 %v4361_v30, %v12390_v35  ;;  %v8524_v18 = vld [vmem:[%s12183_s2 + $0x440] sm:$0xff]  ;;  %v8525_v30 = vld [vmem:[%s12183_s2 + $0x458] sm:$0xff] }
 0x884   : > { %4629 = vmatprep.mubr.f32.mxu0 %v8519_v11 }
 0x885   : > { %7809 = vmatpush1.bf16.msra.mxu1 %v7808_v4  ;;  %v4792_v58 = vmax.f32 %v4362_v23, 0.0  ;;  %v8526_v23 = vld [vmem:[%s12183_s2 + $0x450] sm:$0xff] }
 0x886   : > { %v4366_v8 = vpop.f32.mrb[26].mxu0  ;;  %7810 = vmatprep.subr.bf16.mxu1 %v12299_v48 }
 0x887   : > { %v4367_v2 = vadd.f32 %v4366_v8, %v12391_v60  ;;  %v4368_v7 = vpop.f32.mrb[27].mxu0  ;;  %4630 = vmatmul.mubr.f32.gmra.mrb[132].mxu0 %v8520_v37  ;;  %v8527_v8 = vld [vmem:[%s12183_s2 + $0x468] sm:$0xff]  ;;  %v12394_v60 = vld [vmem:[#allocation19_spill] sm:$0xff]  ;;  %v12395_v37 = vld [vmem:[#allocation20_spill] sm:$0xff] }
 0x888   : > { %4634 = vmatprep.mubr.f32.mxu0 %v8521_v39 }
 0x889   : > { %v4793_v49 = vmax.f32 %v4367_v2, 0.0 }
 0x88a   : > { %v4371_v59 = vpop.f32.mrb[28].mxu0 }
 0x88b   : > { %v7811_v27 = vpack.c.bf16 %v4793_v49, %v4792_v58  ;;  %v4373_v13 = vpop.f32.mrb[29].mxu0  ;;  %4635 = vmatmul.mubr.f32.gmra.mrb[134].mxu0 %v8522_v0  ;;  %v4372_v63 = vadd.f32 %v4371_v59, %v12392_v52  ;;  %v8528_v49 = vld [vmem:[%s12183_s2 + $0x460] sm:$0xff]  ;;  %v8529_v59 = vld [vmem:[%s12183_s2 + $0x478] sm:$0xff] }
 0x88c   : > { %4639 = vmatprep.mubr.f32.mxu0 %v8523_v46 }
 0x88d   : > { %7812 = vmatpush1.bf16.msra.mxu1 %v7811_v27  ;;  %v4794_v4 = vmax.f32 %v4372_v63, 0.0  ;;  %v8530_v63 = vld [vmem:[%s12183_s2 + $0x470] sm:$0xff] }
 0x88e   : > { %v4376_v43 = vpop.f32.mrb[30].mxu0  ;;  %7813 = vmatprep.subr.bf16.mxu1 %v12299_v48 }
 0x88f   : > { %v4377_v10 = vadd.f32 %v4376_v43, %v12393_v19  ;;  %v4378_v31 = vpop.f32.mrb[31].mxu0  ;;  %4640 = vmatmul.mubr.f32.gmra.mrb[136].mxu0 %v8524_v18  ;;  %v8531_v43 = vld [vmem:[%s12183_s2 + $0x488] sm:$0xff]  ;;  %v12396_v19 = vld [vmem:[#allocation21_spill] sm:$0xff] }
 0x890   : > { %4644 = vmatprep.mubr.f32.mxu0 %v8525_v30  ;;  %v12397_v18 = vld [vmem:[#allocation22_spill] sm:$0xff] }
 0x891   : > { %v4795_v56 = vmax.f32 %v4377_v10, 0.0 }
 0x892   : > { %v4381_v50 = vpop.f32.mrb[32].mxu0 }
 0x893   : > { %v7814_v11 = vpack.c.bf16 %v4795_v56, %v4794_v4  ;;  %v4383_v35 = vpop.f32.mrb[33].mxu0  ;;  %4645 = vmatmul.mubr.f32.gmra.mrb[138].mxu0 %v8526_v23  ;;  %v4382_v2 = vadd.f32 %v4381_v50, %v12394_v60  ;;  %v8532_v56 = vld [vmem:[%s12183_s2 + $0x480] sm:$0xff]  ;;  %v8533_v50 = vld [vmem:[%s12183_s2 + $0x498] sm:$0xff] }
 0x894   : > { %4649 = vmatprep.mubr.f32.mxu0 %v8527_v8 }
 0x895   : > { %7815 = vmatpush1.bf16.msra.mxu1 %v7814_v11  ;;  %v4796_v27 = vmax.f32 %v4382_v2, 0.0  ;;  %v8534_v2 = vld [vmem:[%s12183_s2 + $0x490] sm:$0xff] }
 0x896   : > { %v4386_v7 = vpop.f32.mrb[34].mxu0  ;;  %7816 = vmatprep.subr.bf16.mxu1 %v12299_v48 }
 0x897   : > { %v4387_v39 = vadd.f32 %v4386_v7, %v12395_v37  ;;  %v4388_v58 = vpop.f32.mrb[35].mxu0  ;;  %4650 = vmatmul.mubr.f32.gmra.mrb[140].mxu0 %v8528_v49  ;;  %v8535_v7 = vld [vmem:[%s12183_s2 + $0x4a8] sm:$0xff]  ;;  %v12398_v37 = vld [vmem:[#allocation23_spill] sm:$0xff]  ;;  %v12399_v49 = vld [vmem:[#allocation24_spill] sm:$0xff] }
 0x898   : > { %4654 = vmatprep.mubr.f32.mxu0 %v8529_v59 }
 0x899   : > { %v4797_v13 = vmax.f32 %v4387_v39, 0.0 }
 0x89a   : > { %v4391_v0 = vpop.f32.mrb[36].mxu0 }
 0x89b   : > { %v7817_v46 = vpack.c.bf16 %v4797_v13, %v4796_v27  ;;  %v4393_v52 = vpop.f32.mrb[37].mxu0  ;;  %4655 = vmatmul.mubr.f32.gmra.mrb[142].mxu0 %v8530_v63  ;;  %v4392_v10 = vadd.f32 %v4391_v0, %v12396_v19  ;;  %v8536_v13 = vld [vmem:[%s12183_s2 + $0x4a0] sm:$0xff]  ;;  %v8537_v0 = vld [vmem:[%s12183_s2 + $0x4b8] sm:$0xff] }
 0x89c   : > { %4659 = vmatprep.mubr.f32.mxu0 %v8531_v43 }
 0x89d   : > { %7818 = vmatpush1.bf16.msra.mxu1 %v7817_v46  ;;  %v4798_v11 = vmax.f32 %v4392_v10, 0.0  ;;  %v8538_v10 = vld [vmem:[%s12183_s2 + $0x4b0] sm:$0xff] }
 0x89e   : > { %v4396_v31 = vpop.f32.mrb[38].mxu0  ;;  %7819 = vmatprep.subr.bf16.mxu1 %v12299_v48 }
 0x89f   : > { %v4397_v30 = vadd.f32 %v4396_v31, %v12397_v18  ;;  %v4398_v4 = vpop.f32.mrb[39].mxu0  ;;  %4660 = vmatmul.mubr.f32.gmra.mrb[144].mxu0 %v8532_v56  ;;  %v8539_v31 = vld [vmem:[%s12183_s2 + $0x4c8] sm:$0xff]  ;;  %v12400_v18 = vld [vmem:[#allocation25_spill] sm:$0xff] }
 0x8a0   : > { %4664 = vmatprep.mubr.f32.mxu0 %v8533_v50  ;;  %v12401_v56 = vld [vmem:[#allocation26_spill] sm:$0xff] }
 0x8a1   : > { %v4799_v35 = vmax.f32 %v4397_v30, 0.0 }
 0x8a2   : > { %v4401_v23 = vpop.f32.mrb[40].mxu0 }
 0x8a3   : > { %v7820_v8 = vpack.c.bf16 %v4799_v35, %v4798_v11  ;;  %v4403_v60 = vpop.f32.mrb[41].mxu0  ;;  %4665 = vmatmul.mubr.f32.gmra.mrb[146].mxu0 %v8534_v2  ;;  %v4402_v39 = vadd.f32 %v4401_v23, %v12398_v37  ;;  %v8540_v35 = vld [vmem:[%s12183_s2 + $0x4c0] sm:$0xff]  ;;  %v8541_v23 = vld [vmem:[%s12183_s2 + $0x4d8] sm:$0xff] }
 0x8a4   : > { %4669 = vmatprep.mubr.f32.mxu0 %v8535_v7 }
 0x8a5   : > { %7821 = vmatpush1.bf16.msra.mxu1 %v7820_v8  ;;  %v4800_v46 = vmax.f32 %v4402_v39, 0.0  ;;  %v8542_v39 = vld [vmem:[%s12183_s2 + $0x4d0] sm:$0xff] }
 0x8a6   : > { %v4406_v58 = vpop.f32.mrb[42].mxu0  ;;  %7822 = vmatprep.subr.bf16.mxu1 %v12299_v48 }
 0x8a7   : > { %v4407_v59 = vadd.f32 %v4406_v58, %v12399_v49  ;;  %v4408_v27 = vpop.f32.mrb[43].mxu0  ;;  %4670 = vmatmul.mubr.f32.gmra.mrb[148].mxu0 %v8536_v13  ;;  %v8543_v58 = vld [vmem:[%s12183_s2 + $0x4e8] sm:$0xff]  ;;  %v12402_v49 = vld [vmem:[#allocation27_spill] sm:$0xff]  ;;  %v12403_v13 = vld [vmem:[#allocation28_spill] sm:$0xff] }
 0x8a8   : > { %4674 = vmatprep.mubr.f32.mxu0 %v8537_v0 }
 0x8a9   : > { %v4801_v52 = vmax.f32 %v4407_v59, 0.0 }
 0x8aa   : > { %v4411_v63 = vpop.f32.mrb[44].mxu0 }
 0x8ab   : > { %v7823_v43 = vpack.c.bf16 %v4801_v52, %v4800_v46  ;;  %v4413_v19 = vpop.f32.mrb[45].mxu0  ;;  %4675 = vmatmul.mubr.f32.gmra.mrb[150].mxu0 %v8538_v10  ;;  %v4412_v30 = vadd.f32 %v4411_v63, %v12400_v18  ;;  %v8544_v52 = vld [vmem:[%s12183_s2 + $0x4e0] sm:$0xff]  ;;  %v8545_v63 = vld [vmem:[%s12183_s2 + $0x4f8] sm:$0xff] }
 0x8ac   : > { %4679 = vmatprep.mubr.f32.mxu0 %v8539_v31 }
 0x8ad   : > { %7824 = vmatpush1.bf16.msra.mxu1 %v7823_v43  ;;  %v4802_v8 = vmax.f32 %v4412_v30, 0.0  ;;  %v8546_v30 = vld [vmem:[%s12183_s2 + $0x4f0] sm:$0xff] }
 0x8ae   : > { %v4416_v4 = vpop.f32.mrb[46].mxu0  ;;  %7825 = vmatprep.subr.bf16.mxu1 %v12299_v48 }
 0x8af   : > { %v4417_v50 = vadd.f32 %v4416_v4, %v12401_v56  ;;  %v4418_v11 = vpop.f32.mrb[47].mxu0  ;;  %4680 = vmatmul.mubr.f32.gmra.mrb[152].mxu0 %v8540_v35  ;;  %v8547_v4 = vld [vmem:[%s12183_s2 + $0x508] sm:$0xff]  ;;  %v12404_v56 = vld [vmem:[#allocation29_spill] sm:$0xff] }
 0x8b0   : > { %4684 = vmatprep.mubr.f32.mxu0 %v8541_v23  ;;  %v12405_v35 = vld [vmem:[#allocation30_spill] sm:$0xff] }
 0x8b1   : > { %v4803_v60 = vmax.f32 %v4417_v50, 0.0 }
 0x8b2   : > { %v4421_v2 = vpop.f32.mrb[48].mxu0 }
 0x8b3   : > { %v7826_v7 = vpack.c.bf16 %v4803_v60, %v4802_v8  ;;  %v4423_v37 = vpop.f32.mrb[49].mxu0  ;;  %4685 = vmatmul.mubr.f32.gmra.mrb[154].mxu0 %v8542_v39  ;;  %v4422_v59 = vadd.f32 %v4421_v2, %v12402_v49  ;;  %v8548_v60 = vld [vmem:[%s12183_s2 + $0x500] sm:$0xff]  ;;  %v8549_v2 = vld [vmem:[%s12183_s2 + $0x518] sm:$0xff] }
 0x8b4   : > { %4689 = vmatprep.mubr.f32.mxu0 %v8543_v58 }
 0x8b5   : > { %7827 = vmatpush1.bf16.msra.mxu1 %v7826_v7  ;;  %v4804_v43 = vmax.f32 %v4422_v59, 0.0  ;;  %v8550_v59 = vld [vmem:[%s12183_s2 + $0x510] sm:$0xff] }
 0x8b6   : > { %v4426_v27 = vpop.f32.mrb[50].mxu0  ;;  %7828 = vmatprep.subr.bf16.mxu1 %v12299_v48 }
 0x8b7   : > { %v4427_v0 = vadd.f32 %v4426_v27, %v12403_v13  ;;  %v4428_v46 = vpop.f32.mrb[51].mxu0  ;;  %4690 = vmatmul.mubr.f32.gmra.mrb[156].mxu0 %v8544_v52  ;;  %v8551_v27 = vld [vmem:[%s12183_s2 + $0x528] sm:$0xff]  ;;  %v12406_v13 = vld [vmem:[#allocation31_spill] sm:$0xff]  ;;  %v12407_v52 = vld [vmem:[#allocation32_spill] sm:$0xff] }
 0x8b8   : > { %4694 = vmatprep.mubr.f32.mxu0 %v8545_v63 }
 0x8b9   : > { %v4805_v19 = vmax.f32 %v4427_v0, 0.0 }
 0x8ba   : > { %v4431_v10 = vpop.f32.mrb[52].mxu0 }
 0x8bb   : > { %v7829_v31 = vpack.c.bf16 %v4805_v19, %v4804_v43  ;;  %v4433_v18 = vpop.f32.mrb[53].mxu0  ;;  %4695 = vmatmul.mubr.f32.gmra.mrb[158].mxu0 %v8546_v30  ;;  %v4432_v50 = vadd.f32 %v4431_v10, %v12404_v56  ;;  %v8552_v19 = vld [vmem:[%s12183_s2 + $0x520] sm:$0xff]  ;;  %v8553_v10 = vld [vmem:[%s12183_s2 + $0x538] sm:$0xff] }
 0x8bc   : > { %4699 = vmatprep.mubr.f32.mxu0 %v8547_v4 }
 0x8bd   : > { %7830 = vmatpush1.bf16.msra.mxu1 %v7829_v31  ;;  %v4806_v7 = vmax.f32 %v4432_v50, 0.0  ;;  %v8554_v50 = vld [vmem:[%s12183_s2 + $0x530] sm:$0xff] }
 0x8be   : > { %v4436_v11 = vpop.f32.mrb[54].mxu0  ;;  %7831 = vmatprep.subr.bf16.mxu1 %v12299_v48 }
 0x8bf   : > { %v4437_v23 = vadd.f32 %v4436_v11, %v12405_v35  ;;  %v4438_v8 = vpop.f32.mrb[55].mxu0  ;;  %4700 = vmatmul.mubr.f32.gmra.mrb[160].mxu0 %v8548_v60  ;;  %v8555_v11 = vld [vmem:[%s12183_s2 + $0x548] sm:$0xff]  ;;  %v12408_v35 = vld [vmem:[#allocation33_spill] sm:$0xff] }
 0x8c0   : > { %4704 = vmatprep.mubr.f32.mxu0 %v8549_v2  ;;  %v12409_v60 = vld [vmem:[#allocation34_spill] sm:$0xff] }
 0x8c1   : > { %v4807_v37 = vmax.f32 %v4437_v23, 0.0 }
 0x8c2   : > { %v4441_v39 = vpop.f32.mrb[56].mxu0 }
 0x8c3   : > { %v7832_v58 = vpack.c.bf16 %v4807_v37, %v4806_v7  ;;  %v4443_v49 = vpop.f32.mrb[57].mxu0  ;;  %4705 = vmatmul.mubr.f32.gmra.mrb[162].mxu0 %v8550_v59  ;;  %v4442_v0 = vadd.f32 %v4441_v39, %v12406_v13  ;;  %v8556_v37 = vld [vmem:[%s12183_s2 + $0x540] sm:$0xff]  ;;  %v8557_v39 = vld [vmem:[%s12183_s2 + $0x558] sm:$0xff] }
 0x8c4   : > { %4709 = vmatprep.mubr.f32.mxu0 %v8551_v27 }
 0x8c5   : > { %7833 = vmatpush1.bf16.msra.mxu1 %v7832_v58  ;;  %v4808_v31 = vmax.f32 %v4442_v0, 0.0  ;;  %v8558_v0 = vld [vmem:[%s12183_s2 + $0x550] sm:$0xff] }
 0x8c6   : > { %v4446_v46 = vpop.f32.mrb[58].mxu0  ;;  %7834 = vmatprep.subr.bf16.mxu1 %v12299_v48 }
 0x8c7   : > { %v4447_v63 = vadd.f32 %v4446_v46, %v12407_v52  ;;  %v4448_v43 = vpop.f32.mrb[59].mxu0  ;;  %4710 = vmatmul.mubr.f32.gmra.mrb[164].mxu0 %v8552_v19  ;;  %v8559_v46 = vld [vmem:[%s12183_s2 + $0x568] sm:$0xff]  ;;  %v12410_v52 = vld [vmem:[#allocation35_spill] sm:$0xff]  ;;  %v12411_v19 = vld [vmem:[#allocation36_spill] sm:$0xff] }
 0x8c8   : > { %4714 = vmatprep.mubr.f32.mxu0 %v8553_v10 }
 0x8c9   : > { %v4809_v18 = vmax.f32 %v4447_v63, 0.0 }
 0x8ca   : > { %v4451_v30 = vpop.f32.mrb[60].mxu0 }
 0x8cb   : > { %v7835_v4 = vpack.c.bf16 %v4809_v18, %v4808_v31  ;;  %v4453_v56 = vpop.f32.mrb[61].mxu0  ;;  %4715 = vmatmul.mubr.f32.gmra.mrb[166].mxu0 %v8554_v50  ;;  %v4452_v23 = vadd.f32 %v4451_v30, %v12408_v35  ;;  %v8560_v18 = vld [vmem:[%s12183_s2 + $0x560] sm:$0xff] }
 0x8cc   : > { %4719 = vmatprep.mubr.f32.mxu0 %v8555_v11  ;;  %v8561_v30 = vld [vmem:[#allocation2] sm:$0xff]  ;;  %v8563_v11 = vld [vmem:[#allocation2 + $0x38] sm:$0xff] }
 0x8cd   : > { %7836 = vmatpush1.bf16.msra.mxu1 %v7835_v4  ;;  %v4810_v58 = vmax.f32 %v4452_v23, 0.0  ;;  %v8562_v4 = vld [vmem:[%s12183_s2 + $0x578] sm:$0xff] }
 0x8ce   : > { %v4456_v8 = vpop.f32.mrb[62].mxu0  ;;  %7837 = vmatprep.subr.bf16.mxu1 %v12299_v48 }
 0x8cf   : > { %v4457_v2 = vadd.f32 %v4456_v8, %v12409_v60  ;;  %v4458_v7 = vpop.f32.mrb[63].mxu0  ;;  %4720 = vmatmul.mubr.f32.gmra.mrb[168].mxu0 %v8556_v37  ;;  %v8564_v60 = vld [vmem:[%s12183_s2 + $0x570] sm:$0xff]  ;;  %v12412_v37 = vld [vmem:[#allocation37_spill] sm:$0xff] }
 0x8d0   : > { %4724 = vmatprep.mubr.f32.mxu0 %v8557_v39  ;;  %v8566_v7 = vld [vmem:[%s12183_s2 + $0x588] sm:$0xff] }
 0x8d1   : > { %v4811_v49 = vmax.f32 %v4457_v2, 0.0  ;;  %v8565_v2 = vld [vmem:[#allocation2 + $0x30] sm:$0xff] }
 0x8d2   : > { %v4461_v59 = vpop.f32.mrb[64].mxu0 }
 0x8d3   : > { %v7838_v27 = vpack.c.bf16 %v4811_v49, %v4810_v58  ;;  %v4463_v13 = vpop.f32.mrb[65].mxu0  ;;  %4725 = vmatmul.mubr.f32.gmra.mrb[170].mxu0 %v8558_v0  ;;  %v4462_v63 = vadd.f32 %v4461_v59, %v12410_v52  ;;  %v8567_v58 = vld [vmem:[#allocation2 + $0x68] sm:$0xff]  ;;  %v8568_v0 = vld [vmem:[%s12183_s2 + $0x580] sm:$0xff]  ;;  %v8570_v52 = vld [vmem:[%s12183_s2 + $0x598] sm:$0xff] }
 0x8d4   : > { %4729 = vmatprep.mubr.f32.mxu0 %v8559_v46  ;;  %v12413_v59 = vld [vmem:[#allocation38_spill] sm:$0xff]  ;;  %v8569_v46 = vld [vmem:[#allocation2 + $0x60] sm:$0xff] }
 0x8d5   : > { %7839 = vmatpush1.bf16.msra.mxu1 %v7838_v27  ;;  %v4812_v56 = vmax.f32 %v4462_v63, 0.0 }
 0x8d6   : > { %v4466_v43 = vpop.f32.mrb[66].mxu0  ;;  %7840 = vmatprep.subr.bf16.mxu1 %v12299_v48 }
 0x8d7   : > { %v4467_v10 = vadd.f32 %v4466_v43, %v12411_v19  ;;  %v4468_v31 = vpop.f32.mrb[67].mxu0  ;;  %4730 = vmatmul.mubr.f32.gmra.mrb[172].mxu0 %v8560_v18  ;;  %v8571_v19 = vld [vmem:[#allocation2 + $0x98] sm:$0xff] }
 0x8d8   : > { %4941 = vmatmul.mubr.f32.vlgmr.msra.gmra.mrb[128].mxu1 %v8561_v30  ;;  %4734 = vmatprep.mubr.f32.mxu0 %v8562_v4  ;;  %v8572_v30 = vld [vmem:[%s12183_s2 + $0x590] sm:$0xff] }
 0x8d9   : > { %v4813_v50 = vmax.f32 %v4467_v10, 0.0  ;;  %4945 = vmatprep.mubr.f32.mxu1 %v8563_v11  ;;  %v8573_v4 = vld [vmem:[#allocation2 + $0x90] sm:$0xff] }
 0x8da   : > { %v4471_v35 = vpop.f32.mrb[68].mxu0 }
 0x8db   : > { %v7841_v23 = vpack.c.bf16 %v4813_v50, %v4812_v56  ;;  %v4473_v8 = vpop.f32.mrb[69].mxu0  ;;  %4735 = vmatmul.mubr.f32.gmra.mrb[174].mxu0 %v8564_v60  ;;  %v4472_v39 = vadd.f32 %v4471_v35, %v12412_v37  ;;  %v8574_v56 = vld [vmem:[%s12183_s2 + $0x5a8] sm:$0xff]  ;;  %v12414_v50 = vld [vmem:[#allocation39_spill] sm:$0xff]  ;;  %v8577_v37 = vld [vmem:[#allocation2 + $0xc0] sm:$0xff] }
 0x8dc   : > { %4946 = vmatmul.mubr.f32.gmra.mrb[130].mxu1 %v8565_v2  ;;  %4739 = vmatprep.mubr.f32.mxu0 %v8566_v7  ;;  %v8575_v35 = vld [vmem:[#allocation2 + $0xc8] sm:$0xff]  ;;  %v12415_v8 = vld [vmem:[#allocation40_spill] sm:$0xff]  ;;  %v8576_v7 = vld [vmem:[%s12183_s2 + $0x5a0] sm:$0xff] }
 0x8dd   : > { %7842 = vmatpush1.bf16.msra.mxu1 %v7841_v23  ;;  %4950 = vmatprep.mubr.f32.mxu1 %v8567_v58  ;;  %v4814_v63 = vmax.f32 %v4472_v39, 0.0  ;;  %v8578_v39 = vld [vmem:[%s12183_s2 + $0x5b8] sm:$0xff] }
 0x8de   : > { %v4476_v49 = vpop.f32.mrb[70].mxu0  ;;  %7843 = vmatprep.subr.bf16.mxu1 %v12299_v48 }
 0x8df   : > { %v4477_v27 = vadd.f32 %v4476_v49, %v12413_v59  ;;  %v4478_v13 = vpop.f32.mrb[71].mxu0  ;;  %4740 = vmatmul.mubr.f32.gmra.mrb[176].mxu0 %v8568_v0  ;;  %v8579_v59 = vld [vmem:[#allocation2 + $0xf8] sm:$0xff] }
 0x8e0   : > { %4951 = vmatmul.mubr.f32.gmra.mrb[132].mxu1 %v8569_v46  ;;  %4744 = vmatprep.mubr.f32.mxu0 %v8570_v52  ;;  %v8580_v46 = vld [vmem:[%s12183_s2 + $0x5b0] sm:$0xff] }
 0x8e1   : > { %v4815_v43 = vmax.f32 %v4477_v27, 0.0  ;;  %4955 = vmatprep.mubr.f32.mxu1 %v8571_v19  ;;  %v8581_v52 = vld [vmem:[#allocation2 + $0xf0] sm:$0xff] }
 0x8e2   : > { %v4481_v10 = vpop.f32.mrb[72].mxu0 }
 0x8e3   : > { %v7844_v31 = vpack.c.bf16 %v4815_v43, %v4814_v63  ;;  %v4483_v18 = vpop.f32.mrb[73].mxu0  ;;  %4745 = vmatmul.mubr.f32.gmra.mrb[178].mxu0 %v8572_v30  ;;  %v4482_v11 = vadd.f32 %v4481_v10, %v12414_v50  ;;  %v8582_v63 = vld [vmem:[%s12183_s2 + $0x5c8] sm:$0xff]  ;;  %v12416_v43 = vld [vmem:[#allocation41_spill] sm:$0xff] }
 0x8e4   : > { %4956 = vmatmul.mubr.f32.gmra.mrb[134].mxu1 %v8573_v4  ;;  %4749 = vmatprep.mubr.f32.mxu0 %v8574_v56  ;;  %v8583_v10 = vld [vmem:[#allocation2 + $0x128] sm:$0xff]  ;;  %v8584_v56 = vld [vmem:[%s12183_s2 + $0x5c0] sm:$0xff] }
 0x8e5   : > { %7845 = vmatpush1.bf16.msra.mxu1 %v7844_v31  ;;  %4960 = vmatprep.mubr.f32.mxu1 %v8575_v35  ;;  %v4816_v58 = vmax.f32 %v4482_v11, 0.0  ;;  %v12417_v18 = vld [vmem:[#allocation42_spill] sm:$0xff]  ;;  %v8585_v50 = vld [vmem:[#allocation2 + $0x120] sm:$0xff]  ;;  %v8586_v11 = vld [vmem:[%s12183_s2 + $0x5d8] sm:$0xff] }
 0x8e6   : > { %v4486_v23 = vpop.f32.mrb[74].mxu0  ;;  %7846 = vmatprep.subr.bf16.mxu1 %v12299_v48 }
 0x8e7   : > { %v4487_v60 = vadd.f32 %v4486_v23, %v12415_v8  ;;  %v4488_v2 = vpop.f32.mrb[75].mxu0  ;;  %4750 = vmatmul.mubr.f32.gmra.mrb[180].mxu0 %v8576_v7  ;;  %v8587_v8 = vld [vmem:[#allocation2 + $0x158] sm:$0xff] }
 0x8e8   : > { %4961 = vmatmul.mubr.f32.gmra.mrb[136].mxu1 %v8577_v37  ;;  %4754 = vmatprep.mubr.f32.mxu0 %v8578_v39  ;;  %v8588_v37 = vld [vmem:[%s12183_s2 + $0x5d0] sm:$0xff] }
 0x8e9   : > { %v4817_v49 = vmax.f32 %v4487_v60, 0.0  ;;  %4965 = vmatprep.mubr.f32.mxu1 %v8579_v59  ;;  %v8589_v39 = vld [vmem:[#allocation2 + $0x150] sm:$0xff] }
 0x8ea   : > { %v4491_v27 = vpop.f32.mrb[76].mxu0 }
 0x8eb   : > { %v7847_v13 = vpack.c.bf16 %v4817_v49, %v4816_v58  ;;  %v4493_v0 = vpop.f32.mrb[77].mxu0  ;;  %4755 = vmatmul.mubr.f32.gmra.mrb[182].mxu0 %v8580_v46  ;;  %v4492_v19 = vadd.f32 %v4491_v27, %v12416_v43  ;;  %v8590_v58 = vld [vmem:[%s12183_s2 + $0x5e8] sm:$0xff]  ;;  %v12418_v49 = vld [vmem:[#allocation43_spill] sm:$0xff]  ;;  %v8593_v43 = vld [vmem:[#allocation2 + $0x180] sm:$0xff] }
 0x8ec   : > { %4966 = vmatmul.mubr.f32.gmra.mrb[138].mxu1 %v8581_v52  ;;  %4759 = vmatprep.mubr.f32.mxu0 %v8582_v63  ;;  %v8591_v27 = vld [vmem:[#allocation2 + $0x188] sm:$0xff]  ;;  %v12419_v0 = vld [vmem:[#allocation44_spill] sm:$0xff]  ;;  %v8592_v63 = vld [vmem:[%s12183_s2 + $0x5e0] sm:$0xff] }
 0x8ed   : > { %7848 = vmatpush1.bf16.msra.mxu1 %v7847_v13  ;;  %4970 = vmatprep.mubr.f32.mxu1 %v8583_v10  ;;  %v4818_v35 = vmax.f32 %v4492_v19, 0.0  ;;  %v8594_v19 = vld [vmem:[%s12183_s2 + $0x5f8] sm:$0xff] }
 0x8ee   : > { %v4496_v31 = vpop.f32.mrb[78].mxu0  ;;  %7849 = vmatprep.subr.bf16.mxu1 %v12299_v48 }
 0x8ef   : > { %v4497_v30 = vadd.f32 %v4496_v31, %v12417_v18  ;;  %v4498_v4 = vpop.f32.mrb[79].mxu0  ;;  %4760 = vmatmul.mubr.f32.gmra.mrb[184].mxu0 %v8584_v56  ;;  %v8595_v18 = vld [vmem:[#allocation2 + $0x1b8] sm:$0xff] }
 0x8f0   : > { %4971 = vmatmul.mubr.f32.gmra.mrb[140].mxu1 %v8585_v50  ;;  %4764 = vmatprep.mubr.f32.mxu0 %v8586_v11  ;;  %v8596_v50 = vld [vmem:[%s12183_s2 + $0x5f0] sm:$0xff] }
 0x8f1   : > { %v4819_v23 = vmax.f32 %v4497_v30, 0.0  ;;  %4975 = vmatprep.mubr.f32.mxu1 %v8587_v8  ;;  %v8597_v11 = vld [vmem:[#allocation2 + $0x1b0] sm:$0xff]  ;;  %v8598_v8 = vld [vmem:[#allocation2 + $0x1e8] sm:$0xff] }
 0x8f2   : > { %v4501_v60 = vpop.f32.mrb[80].mxu0 }
 0x8f3   : > { %v7850_v2 = vpack.c.bf16 %v4819_v23, %v4818_v35  ;;  %v4503_v7 = vpop.f32.mrb[81].mxu0  ;;  %4765 = vmatmul.mubr.f32.gmra.mrb[186].mxu0 %v8588_v37  ;;  %v4502_v59 = vadd.f32 %v4501_v60, %v12418_v49  ;;  %v12420_v35 = vld [vmem:[#allocation45_spill] sm:$0xff] }
 0x8f4   : > { %4976 = vmatmul.mubr.f32.gmra.mrb[142].mxu1 %v8589_v39  ;;  %4769 = vmatprep.mubr.f32.mxu0 %v8590_v58  ;;  %v8599_v39 = vld [vmem:[#allocation2 + $0x1e0] sm:$0xff] }
 0x8f5   : > { %7851 = vmatpush1.bf16.msra.mxu1 %v7850_v2  ;;  %4980 = vmatprep.mubr.f32.mxu1 %v8591_v27  ;;  %v4820_v10 = vmax.f32 %v4502_v59, 0.0  ;;  %v12421_v2 = vld [vmem:[#allocation46_spill] sm:$0xff]  ;;  %v8600_v59 = vld [vmem:[#allocation2 + $0x218] sm:$0xff] }
 0x8f6   : > { %v4506_v13 = vpop.f32.mrb[82].mxu0  ;;  %7852 = vmatprep.subr.bf16.mxu1 %v12299_v48 }
 0x8f7   : > { %v4507_v46 = vadd.f32 %v4506_v13, %v12419_v0  ;;  %v4508_v52 = vpop.f32.mrb[83].mxu0  ;;  %4770 = vmatmul.mubr.f32.gmra.mrb[188].mxu0 %v8592_v63 }
 0x8f8   : > { %4981 = vmatmul.mubr.f32.gmra.mrb[144].mxu1 %v8593_v43  ;;  %4774 = vmatprep.mubr.f32.mxu0 %v8594_v19  ;;  %v12422_v52 = vld [vmem:[#allocation47_spill] sm:$0xff]  ;;  %v8602_v43 = vld [vmem:[#allocation2 + $0x248] sm:$0xff] }
 0x8f9   : > { %v4821_v31 = vmax.f32 %v4507_v46, 0.0  ;;  %4985 = vmatprep.mubr.f32.mxu1 %v8595_v18  ;;  %v8601_v46 = vld [vmem:[#allocation2 + $0x210] sm:$0xff] }
 0x8fa   : > { %v4511_v30 = vpop.f32.mrb[84].mxu0 }
 0x8fb   : > { %v7853_v4 = vpack.c.bf16 %v4821_v31, %v4820_v10  ;;  %v4513_v56 = vpop.f32.mrb[85].mxu0  ;;  %4775 = vmatmul.mubr.f32.gmra.mrb[190].mxu0 %v8596_v50  ;;  %v4512_v23 = vadd.f32 %v4511_v30, %v12420_v35  ;;  %v12423_v10 = vld [vmem:[#allocation48_spill] sm:$0xff]  ;;  %v8603_v30 = vld [vmem:[#allocation2 + $0x240] sm:$0xff] }
 0x8fc   : > { %4986 = vmatmul.mubr.f32.gmra.mrb[146].mxu1 %v8597_v11  ;;  %v8604_v50 = vld [vmem:[#allocation2 + $0x278] sm:$0xff] }
 0x8fd   : > { %7854 = vmatpush1.bf16.msra.mxu1 %v7853_v4  ;;  %4990 = vmatprep.mubr.f32.mxu1 %v8598_v8  ;;  %v4822_v58 = vmax.f32 %v4512_v23, 0.0  ;;  %v8605_v8 = vld [vmem:[#allocation2 + $0x270] sm:$0xff] }
 0x8fe   : > { %v4516_v60 = vpop.f32.mrb[86].mxu0  ;;  %7855 = vmatprep.subr.bf16.mxu1 %v12299_v48 }
 0x8ff   : > { %v4517_v7 = vadd.f32 %v4516_v60, %v12421_v2  ;;  %v4518_v37 = vpop.f32.mrb[87].mxu0  ;;  %v12424_v60 = vld [vmem:[#allocation49_spill] sm:$0xff] }
 0x900   : > { %4991 = vmatmul.mubr.f32.gmra.mrb[148].mxu1 %v8599_v39  ;;  %v12425_v39 = vld [vmem:[#allocation50_spill] sm:$0xff] }
 0x901   : > { %v4823_v49 = vmax.f32 %v4517_v7, 0.0  ;;  %4995 = vmatprep.mubr.f32.mxu1 %v8600_v59  ;;  %v8606_v7 = vld [vmem:[#allocation2 + $0x2a8] sm:$0xff]  ;;  %v8607_v59 = vld [vmem:[#allocation2 + $0x2a0] sm:$0xff] }
 0x902   : > { %v4521_v27 = vpop.f32.mrb[88].mxu0 }
 0x903   : > { %v7856_v13 = vpack.c.bf16 %v4823_v49, %v4822_v58  ;;  %v4523_v0 = vpop.f32.mrb[89].mxu0  ;;  %v4522_v63 = vadd.f32 %v4521_v27, %v12422_v52 }
 0x904   : > { %4996 = vmatmul.mubr.f32.gmra.mrb[150].mxu1 %v8601_v46  ;;  %v8608_v0 = vld [vmem:[#allocation2 + $0x2d8] sm:$0xff] }
 0x905   : > { %7857 = vmatpush1.bf16.msra.mxu1 %v7856_v13  ;;  %5000 = vmatprep.mubr.f32.mxu1 %v8602_v43  ;;  %v4824_v4 = vmax.f32 %v4522_v63, 0.0  ;;  %v8609_v43 = vld [vmem:[#allocation2 + $0x2d0] sm:$0xff] }
 0x906   : > { %v4526_v19 = vpop.f32.mrb[90].mxu0  ;;  %7858 = vmatprep.subr.bf16.mxu1 %v12299_v48 }
 0x907   : > { %v4527_v31 = vadd.f32 %v4526_v19, %v12423_v10  ;;  %v4528_v18 = vpop.f32.mrb[91].mxu0  ;;  %v12426_v19 = vld [vmem:[#allocation51_spill] sm:$0xff] }
 0x908   : > { %5001 = vmatmul.mubr.f32.gmra.mrb[152].mxu1 %v8603_v30  ;;  %v12427_v30 = vld [vmem:[#allocation52_spill] sm:$0xff] }
 0x909   : > { %v4825_v56 = vmax.f32 %v4527_v31, 0.0  ;;  %5005 = vmatprep.mubr.f32.mxu1 %v8604_v50  ;;  %v8610_v31 = vld [vmem:[#allocation2 + $0x308] sm:$0xff]  ;;  %v8611_v50 = vld [vmem:[#allocation2 + $0x300] sm:$0xff] }
 0x90a   : > { %v4531_v11 = vpop.f32.mrb[92].mxu0 }
 0x90b   : > { %v7859_v35 = vpack.c.bf16 %v4825_v56, %v4824_v4  ;;  %v4533_v23 = vpop.f32.mrb[93].mxu0  ;;  %v4532_v2 = vadd.f32 %v4531_v11, %v12424_v60 }
 0x90c   : > { %5006 = vmatmul.mubr.f32.gmra.mrb[154].mxu1 %v8605_v8  ;;  %v8612_v23 = vld [vmem:[#allocation2 + $0x338] sm:$0xff] }
 0x90d   : > { %7860 = vmatpush1.bf16.msra.mxu1 %v7859_v35  ;;  %5010 = vmatprep.mubr.f32.mxu1 %v8606_v7  ;;  %v4826_v27 = vmax.f32 %v4532_v2, 0.0  ;;  %v8613_v7 = vld [vmem:[#allocation2 + $0x330] sm:$0xff] }
 0x90e   : > { %v4536_v37 = vpop.f32.mrb[94].mxu0  ;;  %7861 = vmatprep.subr.bf16.mxu1 %v12299_v48 }
 0x90f   : > { %v4537_v58 = vadd.f32 %v4536_v37, %v12425_v39  ;;  %v4538_v49 = vpop.f32.mrb[95].mxu0  ;;  %v12428_v37 = vld [vmem:[#allocation53_spill] sm:$0xff] }
 0x910   : > { %5011 = vmatmul.mubr.f32.gmra.mrb[156].mxu1 %v8607_v59  ;;  %v12429_v59 = vld [vmem:[#allocation54_spill] sm:$0xff] }
 0x911   : > { %v4827_v13 = vmax.f32 %v4537_v58, 0.0  ;;  %5015 = vmatprep.mubr.f32.mxu1 %v8608_v0  ;;  %v8614_v58 = vld [vmem:[#allocation2 + $0x368] sm:$0xff]  ;;  %v8615_v0 = vld [vmem:[#allocation2 + $0x360] sm:$0xff] }
 0x912   : > { %v4541_v46 = vpop.f32.mrb[96].mxu0 }
 0x913   : > { %v7862_v52 = vpack.c.bf16 %v4827_v13, %v4826_v27  ;;  %v4543_v63 = vpop.f32.mrb[97].mxu0  ;;  %v4542_v10 = vadd.f32 %v4541_v46, %v12426_v19 }
 0x914   : > { %5016 = vmatmul.mubr.f32.gmra.mrb[158].mxu1 %v8609_v43  ;;  %v8616_v63 = vld [vmem:[#allocation2 + $0x398] sm:$0xff] }
 0x915   : > { %7863 = vmatpush1.bf16.msra.mxu1 %v7862_v52  ;;  %5020 = vmatprep.mubr.f32.mxu1 %v8610_v31  ;;  %v4828_v11 = vmax.f32 %v4542_v10, 0.0  ;;  %v8617_v31 = vld [vmem:[#allocation2 + $0x390] sm:$0xff] }
 0x916   : > { %v4546_v18 = vpop.f32.mrb[98].mxu0  ;;  %7864 = vmatprep.subr.bf16.mxu1 %v12299_v48 }
 0x917   : > { %v4547_v4 = vadd.f32 %v4546_v18, %v12427_v30  ;;  %v4548_v56 = vpop.f32.mrb[99].mxu0  ;;  %v12430_v18 = vld [vmem:[#allocation55_spill] sm:$0xff] }
 0x918   : > { %5021 = vmatmul.mubr.f32.gmra.mrb[160].mxu1 %v8611_v50  ;;  %v12431_v50 = vld [vmem:[#allocation56_spill] sm:$0xff] }
 0x919   : > { %v4829_v35 = vmax.f32 %v4547_v4, 0.0  ;;  %5025 = vmatprep.mubr.f32.mxu1 %v8612_v23  ;;  %v8618_v4 = vld [vmem:[#allocation2 + $0x3c8] sm:$0xff]  ;;  %v8619_v23 = vld [vmem:[#allocation2 + $0x3c0] sm:$0xff] }
 0x91a   : > { %v4551_v8 = vpop.f32.mrb[100].mxu0 }
 0x91b   : > { %v7865_v60 = vpack.c.bf16 %v4829_v35, %v4828_v11  ;;  %v4553_v2 = vpop.f32.mrb[101].mxu0  ;;  %v4552_v39 = vadd.f32 %v4551_v8, %v12428_v37 }
 0x91c   : > { %5026 = vmatmul.mubr.f32.gmra.mrb[162].mxu1 %v8613_v7  ;;  %v8620_v2 = vld [vmem:[#allocation2 + $0x3f8] sm:$0xff] }
 0x91d   : > { %7866 = vmatpush1.bf16.msra.mxu1 %v7865_v60  ;;  %5030 = vmatprep.mubr.f32.mxu1 %v8614_v58  ;;  %v4830_v46 = vmax.f32 %v4552_v39, 0.0  ;;  %v8621_v58 = vld [vmem:[#allocation2 + $0x3f0] sm:$0xff] }
 0x91e   : > { %v4556_v49 = vpop.f32.mrb[102].mxu0  ;;  %7867 = vmatprep.subr.bf16.mxu1 %v12299_v48 }
 0x91f   : > { %v4557_v27 = vadd.f32 %v4556_v49, %v12429_v59  ;;  %v4558_v13 = vpop.f32.mrb[103].mxu0  ;;  %v12432_v49 = vld [vmem:[#allocation57_spill] sm:$0xff] }
 0x920   : > { %5031 = vmatmul.mubr.f32.gmra.mrb[164].mxu1 %v8615_v0  ;;  %v12433_v0 = vld [vmem:[#allocation58_spill] sm:$0xff] }
 0x921   : > { %v4831_v52 = vmax.f32 %v4557_v27, 0.0  ;;  %5035 = vmatprep.mubr.f32.mxu1 %v8616_v63  ;;  %v8622_v27 = vld [vmem:[#allocation2 + $0x428] sm:$0xff]  ;;  %v8623_v63 = vld [vmem:[#allocation2 + $0x420] sm:$0xff] }
 0x922   : > { %v4561_v43 = vpop.f32.mrb[104].mxu0 }
 0x923   : > { %v7868_v19 = vpack.c.bf16 %v4831_v52, %v4830_v46  ;;  %v4563_v10 = vpop.f32.mrb[105].mxu0  ;;  %v4562_v30 = vadd.f32 %v4561_v43, %v12430_v18 }
 0x924   : > { %5036 = vmatmul.mubr.f32.gmra.mrb[166].mxu1 %v8617_v31  ;;  %v8624_v10 = vld [vmem:[#allocation2 + $0x458] sm:$0xff] }
 0x925   : > { %7869 = vmatpush1.bf16.msra.mxu1 %v7868_v19  ;;  %5040 = vmatprep.mubr.f32.mxu1 %v8618_v4  ;;  %v4832_v8 = vmax.f32 %v4562_v30, 0.0  ;;  %v8625_v4 = vld [vmem:[#allocation2 + $0x450] sm:$0xff] }
 0x926   : > { %v4566_v56 = vpop.f32.mrb[106].mxu0  ;;  %7870 = vmatprep.subr.bf16.mxu1 %v12299_v48 }
 0x927   : > { %v4567_v11 = vadd.f32 %v4566_v56, %v12431_v50  ;;  %v4568_v35 = vpop.f32.mrb[107].mxu0  ;;  %v12434_v56 = vld [vmem:[#allocation59_spill] sm:$0xff] }
 0x928   : > { %5041 = vmatmul.mubr.f32.gmra.mrb[168].mxu1 %v8619_v23  ;;  %v12435_v23 = vld [vmem:[#allocation60_spill] sm:$0xff] }
 0x929   : > { %v4833_v60 = vmax.f32 %v4567_v11, 0.0  ;;  %5045 = vmatprep.mubr.f32.mxu1 %v8620_v2  ;;  %v8626_v11 = vld [vmem:[#allocation2 + $0x488] sm:$0xff]  ;;  %v8627_v2 = vld [vmem:[#allocation2 + $0x480] sm:$0xff] }
 0x92a   : > { %v4571_v7 = vpop.f32.mrb[108].mxu0 }
 0x92b   : > { %v7871_v37 = vpack.c.bf16 %v4833_v60, %v4832_v8  ;;  %v4573_v39 = vpop.f32.mrb[109].mxu0  ;;  %v4572_v59 = vadd.f32 %v4571_v7, %v12432_v49 }
 0x92c   : > { %5046 = vmatmul.mubr.f32.gmra.mrb[170].mxu1 %v8621_v58  ;;  %v8628_v39 = vld [vmem:[#allocation2 + $0x4b8] sm:$0xff] }
 0x92d   : > { %7872 = vmatpush1.bf16.msra.mxu1 %v7871_v37  ;;  %5050 = vmatprep.mubr.f32.mxu1 %v8622_v27  ;;  %v4834_v43 = vmax.f32 %v4572_v59, 0.0  ;;  %v8629_v27 = vld [vmem:[#allocation2 + $0x4b0] sm:$0xff] }
 0x92e   : > { %v4576_v13 = vpop.f32.mrb[110].mxu0  ;;  %7873 = vmatprep.subr.bf16.mxu1 %v12299_v48 }
 0x92f   : > { %v4577_v46 = vadd.f32 %v4576_v13, %v12433_v0  ;;  %v4578_v52 = vpop.f32.mrb[111].mxu0  ;;  %v12436_v13 = vld [vmem:[#allocation61_spill] sm:$0xff] }
 0x930   : > { %5051 = vmatmul.mubr.f32.gmra.mrb[172].mxu1 %v8623_v63  ;;  %v12437_v63 = vld [vmem:[#allocation62_spill] sm:$0xff] }
 0x931   : > { %v4835_v19 = vmax.f32 %v4577_v46, 0.0  ;;  %5055 = vmatprep.mubr.f32.mxu1 %v8624_v10  ;;  %v8630_v46 = vld [vmem:[#allocation2 + $0x4e8] sm:$0xff]  ;;  %v8631_v10 = vld [vmem:[#allocation2 + $0x4e0] sm:$0xff] }
 0x932   : > { %v4581_v31 = vpop.f32.mrb[112].mxu0 }
 0x933   : > { %v7874_v18 = vpack.c.bf16 %v4835_v19, %v4834_v43  ;;  %v4583_v30 = vpop.f32.mrb[113].mxu0  ;;  %v4582_v50 = vadd.f32 %v4581_v31, %v12434_v56 }
 0x934   : > { %5056 = vmatmul.mubr.f32.gmra.mrb[174].mxu1 %v8625_v4  ;;  %v8632_v30 = vld [vmem:[#allocation2 + $0x518] sm:$0xff] }
 0x935   : > { %7875 = vmatpush1.bf16.msra.mxu1 %v7874_v18  ;;  %5060 = vmatprep.mubr.f32.mxu1 %v8626_v11  ;;  %v4836_v7 = vmax.f32 %v4582_v50, 0.0  ;;  %v8633_v11 = vld [vmem:[#allocation2 + $0x510] sm:$0xff] }
 0x936   : > { %v4586_v35 = vpop.f32.mrb[114].mxu0  ;;  %7876 = vmatprep.subr.bf16.mxu1 %v12299_v48 }
 0x937   : > { %v4587_v8 = vadd.f32 %v4586_v35, %v12435_v23  ;;  %v4588_v60 = vpop.f32.mrb[115].mxu0  ;;  %v12438_v35 = vld [vmem:[#allocation63_spill] sm:$0xff] }
 0x938   : > { %5061 = vmatmul.mubr.f32.gmra.mrb[176].mxu1 %v8627_v2  ;;  %v12439_v2 = vld [vmem:[#allocation64_spill] sm:$0xff] }
 0x939   : > { %v4837_v37 = vmax.f32 %v4587_v8, 0.0  ;;  %5065 = vmatprep.mubr.f32.mxu1 %v8628_v39  ;;  %v8634_v8 = vld [vmem:[#allocation2 + $0x548] sm:$0xff]  ;;  %v8635_v39 = vld [vmem:[#allocation2 + $0x540] sm:$0xff] }
 0x93a   : > { %v4591_v58 = vpop.f32.mrb[116].mxu0 }
 0x93b   : > { %v7877_v49 = vpack.c.bf16 %v4837_v37, %v4836_v7  ;;  %v4593_v59 = vpop.f32.mrb[117].mxu0  ;;  %v4592_v0 = vadd.f32 %v4591_v58, %v12436_v13 }
 0x93c   : > { %5066 = vmatmul.mubr.f32.gmra.mrb[178].mxu1 %v8629_v27  ;;  %v8636_v59 = vld [vmem:[#allocation2 + $0x578] sm:$0xff] }
 0x93d   : > { %7878 = vmatpush1.bf16.msra.mxu1 %v7877_v49  ;;  %5070 = vmatprep.mubr.f32.mxu1 %v8630_v46  ;;  %v4838_v31 = vmax.f32 %v4592_v0, 0.0  ;;  %v8637_v46 = vld [vmem:[#allocation2 + $0x570] sm:$0xff] }
 0x93e   : > { %v4596_v52 = vpop.f32.mrb[118].mxu0  ;;  %7879 = vmatprep.subr.bf16.mxu1 %v12299_v48 }
 0x93f   : > { %v4597_v43 = vadd.f32 %v4596_v52, %v12437_v63  ;;  %v4598_v19 = vpop.f32.mrb[119].mxu0  ;;  %v12440_v52 = vld [vmem:[#allocation65_spill] sm:$0xff] }
 0x940   : > { %5071 = vmatmul.mubr.f32.gmra.mrb[180].mxu1 %v8631_v10  ;;  %v12441_v10 = vld [vmem:[#allocation66_spill] sm:$0xff] }
 0x941   : > { %v4839_v18 = vmax.f32 %v4597_v43, 0.0  ;;  %5075 = vmatprep.mubr.f32.mxu1 %v8632_v30  ;;  %v8638_v43 = vld [vmem:[#allocation2 + $0x5a8] sm:$0xff]  ;;  %v8639_v30 = vld [vmem:[#allocation2 + $0x5a0] sm:$0xff] }
 0x942   : > { %v4601_v4 = vpop.f32.mrb[120].mxu0 }
 0x943   : > { %v7880_v56 = vpack.c.bf16 %v4839_v18, %v4838_v31  ;;  %v4603_v50 = vpop.f32.mrb[121].mxu0  ;;  %v4602_v23 = vadd.f32 %v4601_v4, %v12438_v35 }
 0x944   : > { %5076 = vmatmul.mubr.f32.gmra.mrb[182].mxu1 %v8633_v11  ;;  %v8640_v50 = vld [vmem:[#allocation2 + $0x5d8] sm:$0xff] }
 0x945   : > { %7881 = vmatpush1.bf16.msra.mxu1 %v7880_v56  ;;  %5080 = vmatprep.mubr.f32.mxu1 %v8634_v8  ;;  %v4840_v58 = vmax.f32 %v4602_v23, 0.0  ;;  %v8641_v8 = vld [vmem:[#allocation2 + $0x5d0] sm:$0xff] }
 0x946   : > { %v4606_v60 = vpop.f32.mrb[122].mxu0  ;;  %7882 = vmatprep.subr.bf16.mxu1 %v12299_v48 }
 0x947   : > { %v4607_v7 = vadd.f32 %v4606_v60, %v12439_v2  ;;  %v4608_v37 = vpop.f32.mrb[123].mxu0  ;;  %v12442_v60 = vld [vmem:[#allocation67_spill] sm:$0xff] }
 0x948   : > { %5081 = vmatmul.mubr.f32.gmra.mrb[184].mxu1 %v8635_v39  ;;  %v12443_v39 = vld [vmem:[#allocation68_spill] sm:$0xff] }
 0x949   : > { %v4841_v49 = vmax.f32 %v4607_v7, 0.0  ;;  %5085 = vmatprep.mubr.f32.mxu1 %v8636_v59  ;;  %v8642_v7 = vld [vmem:[#allocation2 + $0x18] sm:$0xff]  ;;  %v8643_v59 = vld [vmem:[#allocation2 + $0x10] sm:$0xff] }
 0x94a   : > { %v4611_v27 = vpop.f32.mrb[124].mxu0 }
 0x94b   : > { %v7883_v13 = vpack.c.bf16 %v4841_v49, %v4840_v58  ;;  %v4613_v0 = vpop.f32.mrb[125].mxu0  ;;  %v4612_v63 = vadd.f32 %v4611_v27, %v12440_v52 }
 0x94c   : > { %5086 = vmatmul.mubr.f32.gmra.mrb[186].mxu1 %v8637_v46  ;;  %v8644_v0 = vld [vmem:[#allocation2 + $0x48] sm:$0xff] }
 0x94d   : > { %7884 = vmatpush1.bf16.msra.mxu1 %v7883_v13  ;;  %5090 = vmatprep.mubr.f32.mxu1 %v8638_v43  ;;  %v4842_v4 = vmax.f32 %v4612_v63, 0.0  ;;  %v8645_v43 = vld [vmem:[#allocation2 + $0x40] sm:$0xff] }
 0x94e   : > { %v4616_v19 = vpop.f32.mrb[126].mxu0  ;;  %7885 = vmatprep.subr.bf16.mxu1 %v12299_v48 }
 0x94f   : > { %v4617_v31 = vadd.f32 %v4616_v19, %v12441_v10  ;;  %v4618_v18 = vpop.f32.mrb[127].mxu0  ;;  %v12444_v19 = vld [vmem:[#allocation69_spill] sm:$0xff] }
 0x950   : > { %5091 = vmatmul.mubr.f32.gmra.mrb[188].mxu1 %v8639_v30  ;;  %v12445_v30 = vld [vmem:[#allocation70_spill] sm:$0xff] }
 0x951   : > { %v4843_v56 = vmax.f32 %v4617_v31, 0.0  ;;  %5095 = vmatprep.mubr.f32.mxu1 %v8640_v50  ;;  %v8646_v31 = vld [vmem:[#allocation2 + $0x78] sm:$0xff]  ;;  %v8647_v50 = vld [vmem:[#allocation2 + $0x70] sm:$0xff] }
 0x952   : > { %v4621_v11 = vpop.f32.mrb[128].mxu0 }
 0x953   : > { %v7886_v35 = vpack.c.bf16 %v4843_v56, %v4842_v4  ;;  %v4623_v23 = vpop.f32.mrb[129].mxu0  ;;  %v4622_v2 = vadd.f32 %v4621_v11, %v12442_v60 }
 0x954   : > { %5096 = vmatmul.mubr.f32.gmra.mrb[190].mxu1 %v8641_v8  ;;  %v8648_v23 = vld [vmem:[#allocation2 + $0xa8] sm:$0xff] }
 0x955   : > { %7887 = vmatpush1.bf16.msra.mxu1 %v7886_v35  ;;  %5165 = vmatprep.mubr.f32.mxu1 %v8642_v7  ;;  %v4844_v27 = vmax.f32 %v4622_v2, 0.0  ;;  %v8649_v7 = vld [vmem:[#allocation2 + $0xa0] sm:$0xff] }
 0x956   : > { %v4626_v37 = vpop.f32.mrb[130].mxu0  ;;  %7888 = vmatprep.subr.bf16.mxu1 %v12299_v48 }
 0x957   : > { %v4627_v58 = vadd.f32 %v4626_v37, %v12443_v39  ;;  %v4628_v49 = vpop.f32.mrb[131].mxu0  ;;  %v12446_v37 = vld [vmem:[#allocation71_spill] sm:$0xff] }
 0x958   : > { %5166 = vmatmul.mubr.f32.vlgmr.msra.gmra.mrb[128].mxu1 %v8643_v59  ;;  %v12447_v59 = vld [vmem:[#allocation72_spill] sm:$0xff] }
 0x959   : > { %v4845_v13 = vmax.f32 %v4627_v58, 0.0  ;;  %5170 = vmatprep.mubr.f32.mxu1 %v8644_v0  ;;  %v8650_v58 = vld [vmem:[#allocation2 + $0xd8] sm:$0xff]  ;;  %v8651_v0 = vld [vmem:[#allocation2 + $0xd0] sm:$0xff] }
 0x95a   : > { %v4631_v46 = vpop.f32.mrb[132].mxu0 }
 0x95b   : > { %v7889_v52 = vpack.c.bf16 %v4845_v13, %v4844_v27  ;;  %v4633_v63 = vpop.f32.mrb[133].mxu0  ;;  %v4632_v10 = vadd.f32 %v4631_v46, %v12444_v19 }
 0x95c   : > { %5171 = vmatmul.mubr.f32.gmra.mrb[130].mxu1 %v8645_v43  ;;  %v8652_v63 = vld [vmem:[#allocation2 + $0x108] sm:$0xff] }
 0x95d   : > { %7890 = vmatpush1.bf16.msra.mxu1 %v7889_v52  ;;  %5175 = vmatprep.mubr.f32.mxu1 %v8646_v31  ;;  %v4846_v11 = vmax.f32 %v4632_v10, 0.0  ;;  %v8653_v31 = vld [vmem:[#allocation2 + $0x100] sm:$0xff] }
 0x95e   : > { %v4636_v18 = vpop.f32.mrb[134].mxu0  ;;  %7891 = vmatprep.subr.bf16.mxu1 %v12299_v48 }
 0x95f   : > { %v4637_v4 = vadd.f32 %v4636_v18, %v12445_v30  ;;  %v4638_v56 = vpop.f32.mrb[135].mxu0  ;;  %v12448_v18 = vld [vmem:[#allocation73_spill] sm:$0xff] }
 0x960   : > { %5176 = vmatmul.mubr.f32.gmra.mrb[132].mxu1 %v8647_v50  ;;  %v12449_v50 = vld [vmem:[#allocation74_spill] sm:$0xff] }
 0x961   : > { %v4847_v35 = vmax.f32 %v4637_v4, 0.0  ;;  %5180 = vmatprep.mubr.f32.mxu1 %v8648_v23  ;;  %v8654_v4 = vld [vmem:[#allocation2 + $0x138] sm:$0xff]  ;;  %v8655_v23 = vld [vmem:[#allocation2 + $0x130] sm:$0xff] }
 0x962   : > { %v4641_v8 = vpop.f32.mrb[136].mxu0 }
 0x963   : > { %v7892_v60 = vpack.c.bf16 %v4847_v35, %v4846_v11  ;;  %v4643_v2 = vpop.f32.mrb[137].mxu0  ;;  %v4642_v39 = vadd.f32 %v4641_v8, %v12446_v37 }
 0x964   : > { %5181 = vmatmul.mubr.f32.gmra.mrb[134].mxu1 %v8649_v7  ;;  %v8656_v2 = vld [vmem:[#allocation2 + $0x168] sm:$0xff] }
 0x965   : > { %7893 = vmatpush1.bf16.msra.mxu1 %v7892_v60  ;;  %5185 = vmatprep.mubr.f32.mxu1 %v8650_v58  ;;  %v4848_v46 = vmax.f32 %v4642_v39, 0.0  ;;  %v8657_v58 = vld [vmem:[#allocation2 + $0x160] sm:$0xff] }
 0x966   : > { %v4646_v49 = vpop.f32.mrb[138].mxu0  ;;  %7894 = vmatprep.subr.bf16.mxu1 %v12299_v48 }
 0x967   : > { %v4647_v27 = vadd.f32 %v4646_v49, %v12447_v59  ;;  %v4648_v13 = vpop.f32.mrb[139].mxu0  ;;  %v12450_v49 = vld [vmem:[#allocation75_spill] sm:$0xff] }
 0x968   : > { %5186 = vmatmul.mubr.f32.gmra.mrb[136].mxu1 %v8651_v0  ;;  %v12451_v0 = vld [vmem:[#allocation76_spill] sm:$0xff] }
 0x969   : > { %v4849_v52 = vmax.f32 %v4647_v27, 0.0  ;;  %5190 = vmatprep.mubr.f32.mxu1 %v8652_v63  ;;  %v8658_v27 = vld [vmem:[#allocation2 + $0x198] sm:$0xff]  ;;  %v8659_v63 = vld [vmem:[#allocation2 + $0x190] sm:$0xff] }
 0x96a   : > { %v4651_v43 = vpop.f32.mrb[140].mxu0 }
 0x96b   : > { %v7895_v19 = vpack.c.bf16 %v4849_v52, %v4848_v46  ;;  %v4653_v10 = vpop.f32.mrb[141].mxu0  ;;  %v4652_v30 = vadd.f32 %v4651_v43, %v12448_v18 }
 0x96c   : > { %5191 = vmatmul.mubr.f32.gmra.mrb[138].mxu1 %v8653_v31  ;;  %v8660_v10 = vld [vmem:[#allocation2 + $0x1c8] sm:$0xff] }
 0x96d   : > { %7896 = vmatpush1.bf16.msra.mxu1 %v7895_v19  ;;  %5195 = vmatprep.mubr.f32.mxu1 %v8654_v4  ;;  %v4850_v8 = vmax.f32 %v4652_v30, 0.0  ;;  %v8661_v4 = vld [vmem:[#allocation2 + $0x1c0] sm:$0xff] }
 0x96e   : > { %v4656_v56 = vpop.f32.mrb[142].mxu0  ;;  %7897 = vmatprep.subr.bf16.mxu1 %v12299_v48 }
 0x96f   : > { %v4657_v11 = vadd.f32 %v4656_v56, %v12449_v50  ;;  %v4658_v35 = vpop.f32.mrb[143].mxu0  ;;  %v12452_v56 = vld [vmem:[#allocation77_spill] sm:$0xff] }
 0x970   : > { %5196 = vmatmul.mubr.f32.gmra.mrb[140].mxu1 %v8655_v23  ;;  %v12453_v23 = vld [vmem:[#allocation78_spill] sm:$0xff] }
 0x971   : > { %v4851_v60 = vmax.f32 %v4657_v11, 0.0  ;;  %5200 = vmatprep.mubr.f32.mxu1 %v8656_v2  ;;  %v8662_v11 = vld [vmem:[#allocation2 + $0x1f8] sm:$0xff]  ;;  %v8663_v2 = vld [vmem:[#allocation2 + $0x1f0] sm:$0xff] }
 0x972   : > { %v4661_v7 = vpop.f32.mrb[144].mxu0 }
 0x973   : > { %v7898_v37 = vpack.c.bf16 %v4851_v60, %v4850_v8  ;;  %v4663_v39 = vpop.f32.mrb[145].mxu0  ;;  %v4662_v59 = vadd.f32 %v4661_v7, %v12450_v49 }
 0x974   : > { %5201 = vmatmul.mubr.f32.gmra.mrb[142].mxu1 %v8657_v58  ;;  %v8664_v39 = vld [vmem:[#allocation2 + $0x228] sm:$0xff] }
 0x975   : > { %7899 = vmatpush1.bf16.msra.mxu1 %v7898_v37  ;;  %5205 = vmatprep.mubr.f32.mxu1 %v8658_v27  ;;  %v4852_v43 = vmax.f32 %v4662_v59, 0.0  ;;  %v8665_v27 = vld [vmem:[#allocation2 + $0x220] sm:$0xff] }
 0x976   : > { %v4666_v13 = vpop.f32.mrb[146].mxu0  ;;  %7900 = vmatprep.subr.bf16.mxu1 %v12299_v48 }
 0x977   : > { %v4667_v46 = vadd.f32 %v4666_v13, %v12451_v0  ;;  %v4668_v52 = vpop.f32.mrb[147].mxu0  ;;  %v12454_v13 = vld [vmem:[#allocation79_spill] sm:$0xff] }
 0x978   : > { %5206 = vmatmul.mubr.f32.gmra.mrb[144].mxu1 %v8659_v63  ;;  %v12455_v63 = vld [vmem:[#allocation80_spill] sm:$0xff] }
 0x979   : > { %v4853_v19 = vmax.f32 %v4667_v46, 0.0  ;;  %5210 = vmatprep.mubr.f32.mxu1 %v8660_v10  ;;  %v8666_v46 = vld [vmem:[#allocation2 + $0x258] sm:$0xff]  ;;  %v8667_v10 = vld [vmem:[#allocation2 + $0x250] sm:$0xff] }
 0x97a   : > { %v4671_v31 = vpop.f32.mrb[148].mxu0 }
 0x97b   : > { %v7901_v18 = vpack.c.bf16 %v4853_v19, %v4852_v43  ;;  %v4673_v30 = vpop.f32.mrb[149].mxu0  ;;  %v4672_v50 = vadd.f32 %v4671_v31, %v12452_v56 }
 0x97c   : > { %5211 = vmatmul.mubr.f32.gmra.mrb[146].mxu1 %v8661_v4  ;;  %v8668_v30 = vld [vmem:[#allocation2 + $0x288] sm:$0xff] }
 0x97d   : > { %7902 = vmatpush1.bf16.msra.mxu1 %v7901_v18  ;;  %5215 = vmatprep.mubr.f32.mxu1 %v8662_v11  ;;  %v4854_v7 = vmax.f32 %v4672_v50, 0.0  ;;  %v8669_v11 = vld [vmem:[#allocation2 + $0x280] sm:$0xff] }
 0x97e   : > { %v4676_v35 = vpop.f32.mrb[150].mxu0  ;;  %7903 = vmatprep.subr.bf16.mxu1 %v12299_v48 }
 0x97f   : > { %v4677_v8 = vadd.f32 %v4676_v35, %v12453_v23  ;;  %v4678_v60 = vpop.f32.mrb[151].mxu0  ;;  %v12456_v35 = vld [vmem:[#allocation81_spill] sm:$0xff] }
 0x980   : > { %5216 = vmatmul.mubr.f32.gmra.mrb[148].mxu1 %v8663_v2  ;;  %v12457_v2 = vld [vmem:[#allocation82_spill] sm:$0xff] }
 0x981   : > { %v4855_v37 = vmax.f32 %v4677_v8, 0.0  ;;  %5220 = vmatprep.mubr.f32.mxu1 %v8664_v39  ;;  %v8670_v8 = vld [vmem:[#allocation2 + $0x2b8] sm:$0xff]  ;;  %v8671_v39 = vld [vmem:[#allocation2 + $0x2b0] sm:$0xff] }
 0x982   : > { %v4681_v58 = vpop.f32.mrb[152].mxu0 }
 0x983   : > { %v7904_v49 = vpack.c.bf16 %v4855_v37, %v4854_v7  ;;  %v4683_v59 = vpop.f32.mrb[153].mxu0  ;;  %v4682_v0 = vadd.f32 %v4681_v58, %v12454_v13 }
 0x984   : > { %5221 = vmatmul.mubr.f32.gmra.mrb[150].mxu1 %v8665_v27  ;;  %v8672_v59 = vld [vmem:[#allocation2 + $0x2e8] sm:$0xff] }
 0x985   : > { %7905 = vmatpush1.bf16.msra.mxu1 %v7904_v49  ;;  %5225 = vmatprep.mubr.f32.mxu1 %v8666_v46  ;;  %v4856_v31 = vmax.f32 %v4682_v0, 0.0  ;;  %v8673_v46 = vld [vmem:[#allocation2 + $0x2e0] sm:$0xff] }
 0x986   : > { %v4686_v52 = vpop.f32.mrb[154].mxu0  ;;  %7906 = vmatprep.subr.bf16.mxu1 %v12299_v48 }
 0x987   : > { %v4687_v43 = vadd.f32 %v4686_v52, %v12455_v63  ;;  %v4688_v19 = vpop.f32.mrb[155].mxu0  ;;  %v12458_v52 = vld [vmem:[#allocation83_spill] sm:$0xff] }
 0x988   : > { %5226 = vmatmul.mubr.f32.gmra.mrb[152].mxu1 %v8667_v10  ;;  %v12459_v10 = vld [vmem:[#allocation84_spill] sm:$0xff] }
 0x989   : > { %v4857_v18 = vmax.f32 %v4687_v43, 0.0  ;;  %5230 = vmatprep.mubr.f32.mxu1 %v8668_v30  ;;  %v8674_v43 = vld [vmem:[#allocation2 + $0x318] sm:$0xff]  ;;  %v8675_v30 = vld [vmem:[#allocation2 + $0x310] sm:$0xff] }
 0x98a   : > { %v4691_v4 = vpop.f32.mrb[156].mxu0 }
 0x98b   : > { %v7907_v56 = vpack.c.bf16 %v4857_v18, %v4856_v31  ;;  %v4693_v50 = vpop.f32.mrb[157].mxu0  ;;  %v4692_v23 = vadd.f32 %v4691_v4, %v12456_v35 }
 0x98c   : > { %5231 = vmatmul.mubr.f32.gmra.mrb[154].mxu1 %v8669_v11  ;;  %v8676_v50 = vld [vmem:[#allocation2 + $0x348] sm:$0xff] }
 0x98d   : > { %7908 = vmatpush1.bf16.msra.mxu1 %v7907_v56  ;;  %5235 = vmatprep.mubr.f32.mxu1 %v8670_v8  ;;  %v4858_v58 = vmax.f32 %v4692_v23, 0.0  ;;  %v8677_v8 = vld [vmem:[#allocation2 + $0x340] sm:$0xff] }
 0x98e   : > { %v4696_v60 = vpop.f32.mrb[158].mxu0  ;;  %7909 = vmatprep.subr.bf16.mxu1 %v12299_v48 }
 0x98f   : > { %v4697_v7 = vadd.f32 %v4696_v60, %v12457_v2  ;;  %v4698_v37 = vpop.f32.mrb[159].mxu0  ;;  %v12460_v60 = vld [vmem:[#allocation85_spill] sm:$0xff] }
 0x990   : > { %5236 = vmatmul.mubr.f32.gmra.mrb[156].mxu1 %v8671_v39  ;;  %v12461_v39 = vld [vmem:[#allocation86_spill] sm:$0xff] }
 0x991   : > { %v4859_v49 = vmax.f32 %v4697_v7, 0.0  ;;  %5240 = vmatprep.mubr.f32.mxu1 %v8672_v59  ;;  %v8678_v7 = vld [vmem:[#allocation2 + $0x378] sm:$0xff]  ;;  %v8679_v59 = vld [vmem:[#allocation2 + $0x370] sm:$0xff] }
 0x992   : > { %v4701_v27 = vpop.f32.mrb[160].mxu0 }
 0x993   : > { %v7910_v13 = vpack.c.bf16 %v4859_v49, %v4858_v58  ;;  %v4703_v0 = vpop.f32.mrb[161].mxu0  ;;  %v4702_v63 = vadd.f32 %v4701_v27, %v12458_v52 }
 0x994   : > { %5241 = vmatmul.mubr.f32.gmra.mrb[158].mxu1 %v8673_v46  ;;  %v8680_v0 = vld [vmem:[#allocation2 + $0x3a8] sm:$0xff] }
 0x995   : > { %7911 = vmatpush1.bf16.msra.mxu1 %v7910_v13  ;;  %5245 = vmatprep.mubr.f32.mxu1 %v8674_v43  ;;  %v4860_v4 = vmax.f32 %v4702_v63, 0.0  ;;  %v8681_v43 = vld [vmem:[#allocation2 + $0x3a0] sm:$0xff] }
 0x996   : > { %v4706_v19 = vpop.f32.mrb[162].mxu0  ;;  %7912 = vmatprep.subr.bf16.mxu1 %v12299_v48 }
 0x997   : > { %v4707_v31 = vadd.f32 %v4706_v19, %v12459_v10  ;;  %v4708_v18 = vpop.f32.mrb[163].mxu0  ;;  %v12462_v19 = vld [vmem:[#allocation87_spill] sm:$0xff] }
 0x998   : > { %5246 = vmatmul.mubr.f32.gmra.mrb[160].mxu1 %v8675_v30  ;;  %v12463_v30 = vld [vmem:[#allocation88_spill] sm:$0xff] }
 0x999   : > { %v4861_v56 = vmax.f32 %v4707_v31, 0.0  ;;  %5250 = vmatprep.mubr.f32.mxu1 %v8676_v50  ;;  %v8682_v31 = vld [vmem:[#allocation2 + $0x3d8] sm:$0xff]  ;;  %v8683_v50 = vld [vmem:[#allocation2 + $0x3d0] sm:$0xff] }
 0x99a   : > { %v4711_v11 = vpop.f32.mrb[164].mxu0 }
 0x99b   : > { %v7913_v35 = vpack.c.bf16 %v4861_v56, %v4860_v4  ;;  %v4713_v23 = vpop.f32.mrb[165].mxu0  ;;  %v4712_v2 = vadd.f32 %v4711_v11, %v12460_v60 }
 0x99c   : > { %5251 = vmatmul.mubr.f32.gmra.mrb[162].mxu1 %v8677_v8  ;;  %v8684_v23 = vld [vmem:[#allocation2 + $0x408] sm:$0xff] }
 0x99d   : > { %7914 = vmatpush1.bf16.msra.mxu1 %v7913_v35  ;;  %5255 = vmatprep.mubr.f32.mxu1 %v8678_v7  ;;  %v4862_v27 = vmax.f32 %v4712_v2, 0.0  ;;  %v8685_v7 = vld [vmem:[#allocation2 + $0x400] sm:$0xff] }
 0x99e   : > { %v4716_v37 = vpop.f32.mrb[166].mxu0  ;;  %7915 = vmatprep.subr.bf16.mxu1 %v12299_v48 }
 0x99f   : > { %v4717_v58 = vadd.f32 %v4716_v37, %v12461_v39  ;;  %v4718_v49 = vpop.f32.mrb[167].mxu0  ;;  %v12464_v37 = vld [vmem:[#allocation89_spill] sm:$0xff] }
 0x9a0   : > { %5256 = vmatmul.mubr.f32.gmra.mrb[164].mxu1 %v8679_v59  ;;  %v12465_v59 = vld [vmem:[#allocation90_spill] sm:$0xff] }
 0x9a1   : > { %v4863_v13 = vmax.f32 %v4717_v58, 0.0  ;;  %5260 = vmatprep.mubr.f32.mxu1 %v8680_v0  ;;  %v8686_v58 = vld [vmem:[#allocation2 + $0x438] sm:$0xff]  ;;  %v8687_v0 = vld [vmem:[#allocation2 + $0x430] sm:$0xff] }
 0x9a2   : > { %v4721_v46 = vpop.f32.mrb[168].mxu0 }
 0x9a3   : > { %v7916_v52 = vpack.c.bf16 %v4863_v13, %v4862_v27  ;;  %v4723_v63 = vpop.f32.mrb[169].mxu0  ;;  %v4722_v10 = vadd.f32 %v4721_v46, %v12462_v19 }
 0x9a4   : > { %5261 = vmatmul.mubr.f32.gmra.mrb[166].mxu1 %v8681_v43  ;;  %v8688_v63 = vld [vmem:[#allocation2 + $0x468] sm:$0xff] }
 0x9a5   : > { %7917 = vmatpush1.bf16.msra.mxu1 %v7916_v52  ;;  %5265 = vmatprep.mubr.f32.mxu1 %v8682_v31  ;;  %v4864_v11 = vmax.f32 %v4722_v10, 0.0  ;;  %v8689_v31 = vld [vmem:[#allocation2 + $0x460] sm:$0xff] }
 0x9a6   : > { %v4726_v18 = vpop.f32.mrb[170].mxu0  ;;  %7918 = vmatprep.subr.bf16.mxu1 %v12299_v48 }
 0x9a7   : > { %v4727_v4 = vadd.f32 %v4726_v18, %v12463_v30  ;;  %v4728_v56 = vpop.f32.mrb[171].mxu0  ;;  %v12466_v18 = vld [vmem:[#allocation91_spill] sm:$0xff] }
 0x9a8   : > { %5266 = vmatmul.mubr.f32.gmra.mrb[168].mxu1 %v8683_v50  ;;  %v12467_v50 = vld [vmem:[#allocation92_spill] sm:$0xff] }
 0x9a9   : > { %v4865_v35 = vmax.f32 %v4727_v4, 0.0  ;;  %5270 = vmatprep.mubr.f32.mxu1 %v8684_v23  ;;  %v8690_v4 = vld [vmem:[#allocation2 + $0x498] sm:$0xff]  ;;  %v8691_v23 = vld [vmem:[#allocation2 + $0x490] sm:$0xff] }
 0x9aa   : > { %v4731_v8 = vpop.f32.mrb[172].mxu0 }
 0x9ab   : > { %v7919_v60 = vpack.c.bf16 %v4865_v35, %v4864_v11  ;;  %v4733_v2 = vpop.f32.mrb[173].mxu0  ;;  %v4732_v39 = vadd.f32 %v4731_v8, %v12464_v37 }
 0x9ac   : > { %5271 = vmatmul.mubr.f32.gmra.mrb[170].mxu1 %v8685_v7  ;;  %v8692_v2 = vld [vmem:[#allocation2 + $0x4c8] sm:$0xff] }
 0x9ad   : > { %7920 = vmatpush1.bf16.msra.mxu1 %v7919_v60  ;;  %5275 = vmatprep.mubr.f32.mxu1 %v8686_v58  ;;  %v4866_v46 = vmax.f32 %v4732_v39, 0.0  ;;  %v8693_v58 = vld [vmem:[#allocation2 + $0x4c0] sm:$0xff] }
 0x9ae   : > { %v4736_v49 = vpop.f32.mrb[174].mxu0  ;;  %7921 = vmatprep.subr.bf16.mxu1 %v12299_v48 }
 0x9af   : > { %v4737_v27 = vadd.f32 %v4736_v49, %v12465_v59  ;;  %v4738_v13 = vpop.f32.mrb[175].mxu0  ;;  %v12468_v49 = vld [vmem:[#allocation93_spill] sm:$0xff] }
 0x9b0   : > { %5276 = vmatmul.mubr.f32.gmra.mrb[172].mxu1 %v8687_v0 }
 0x9b1   : > { %v4867_v52 = vmax.f32 %v4737_v27, 0.0  ;;  %5280 = vmatprep.mubr.f32.mxu1 %v8688_v63  ;;  %v8694_v27 = vld [vmem:[#allocation2 + $0x4f8] sm:$0xff] }
 0x9b2   : > { %v4741_v43 = vpop.f32.mrb[176].mxu0 }
 0x9b3   : > { %v7922_v19 = vpack.c.bf16 %v4867_v52, %v4866_v46  ;;  %v4743_v10 = vpop.f32.mrb[177].mxu0  ;;  %v4742_v30 = vadd.f32 %v4741_v43, %v12466_v18  ;;  %v8695_v52 = vld [vmem:[#allocation2 + $0x4f0] sm:$0xff] }
 0x9b4   : > { %5281 = vmatmul.mubr.f32.gmra.mrb[174].mxu1 %v8689_v31 }
 0x9b5   : > { %7923 = vmatpush1.bf16.msra.mxu1 %v7922_v19  ;;  %5285 = vmatprep.mubr.f32.mxu1 %v8690_v4  ;;  %v4868_v8 = vmax.f32 %v4742_v30, 0.0  ;;  %v8696_v19 = vld [vmem:[#allocation2 + $0x528] sm:$0xff]  ;;  %v8697_v30 = vld [vmem:[#allocation2 + $0x520] sm:$0xff] }
 0x9b6   : > { %v4746_v56 = vpop.f32.mrb[178].mxu0  ;;  %7924 = vmatprep.subr.bf16.mxu1 %v12299_v48  ;;  %v12469_v4 = vld [vmem:[#allocation94_spill] sm:$0xff] }
 0x9b7   : > { %v4747_v11 = vadd.f32 %v4746_v56, %v12467_v50  ;;  %v4748_v35 = vpop.f32.mrb[179].mxu0  ;;  %v8698_v50 = vld [vmem:[#allocation2 + $0x558] sm:$0xff] }
 0x9b8   : > { %5286 = vmatmul.mubr.f32.gmra.mrb[176].mxu1 %v8691_v23  ;;  %v8699_v23 = vld [vmem:[#allocation2 + $0x550] sm:$0xff] }
 0x9b9   : > { %v4869_v60 = vmax.f32 %v4747_v11, 0.0  ;;  %5290 = vmatprep.mubr.f32.mxu1 %v8692_v2  ;;  %v8700_v2 = vld [vmem:[#allocation2 + $0x588] sm:$0xff] }
 0x9ba   : > { %v4751_v7 = vpop.f32.mrb[180].mxu0 }
 0x9bb   : > { %v7925_v37 = vpack.c.bf16 %v4869_v60, %v4868_v8  ;;  %v4753_v39 = vpop.f32.mrb[181].mxu0  ;;  %v4752_v59 = vadd.f32 %v4751_v7, %v12468_v49 }
 0x9bc   : > { %5291 = vmatmul.mubr.f32.gmra.mrb[178].mxu1 %v8693_v58  ;;  %v8701_v58 = vld [vmem:[#allocation2 + $0x580] sm:$0xff] }
 0x9bd   : > { %7926 = vmatpush1.bf16.msra.mxu1 %v7925_v37  ;;  %5295 = vmatprep.mubr.f32.mxu1 %v8694_v27  ;;  %v4870_v63 = vmax.f32 %v4752_v59, 0.0  ;;  %v8702_v59 = vld [vmem:[#allocation2 + $0x5b8] sm:$0xff] }
 0x9be   : > { %v4756_v13 = vpop.f32.mrb[182].mxu0  ;;  %7927 = vmatprep.subr.bf16.mxu1 %v12299_v48 }
 0x9bf   : > { %v4757_v0 = vadd.f32 %v4756_v13, %v10457_v41  ;;  %v4758_v46 = vpop.f32.mrb[183].mxu0 }
 0x9c0   : > { %5296 = vmatmul.mubr.f32.gmra.mrb[180].mxu1 %v8695_v52 }
 0x9c1   : > { %v4871_v43 = vmax.f32 %v4757_v0, 0.0  ;;  %5300 = vmatprep.mubr.f32.mxu1 %v8696_v19  ;;  %v8703_v0 = vld [vmem:[#allocation2 + $0x5b0] sm:$0xff]  ;;  %v8705_v19 = vld [vmem:[#allocation2 + $0x5e0] sm:$0xff] }
 0x9c2   : > { %v4761_v10 = vpop.f32.mrb[184].mxu0 }
 0x9c3   : > { %v7928_v31 = vpack.c.bf16 %v4871_v43, %v4870_v63  ;;  %v4763_v18 = vpop.f32.mrb[185].mxu0  ;;  %v4762_v56 = vadd.f32 %v4761_v10, %v12469_v4  ;;  %v8704_v63 = vld [vmem:[#allocation2 + $0x5e8] sm:$0xff]  ;;  %v8707_v10 = vld [vmem:[#allocation2 + $0x20] sm:$0xff]  ;;  %v8713_v4 = vld [vmem:[#allocation2 + $0xb0] sm:$0xff] }
 0x9c4   : > { %5301 = vmatmul.mubr.f32.gmra.mrb[182].mxu1 %v8697_v30  ;;  %v8711_v18 = vld [vmem:[#allocation2 + $0x80] sm:$0xff]  ;;  %v8712_v30 = vld [vmem:[#allocation2 + $0xb8] sm:$0xff] }
 0x9c5   : > { %7929 = vmatpush1.bf16.msra.mxu1 %v7928_v31  ;;  %5305 = vmatprep.mubr.f32.mxu1 %v8698_v50  ;;  %v4872_v8 = vmax.f32 %v4762_v56, 0.0  ;;  %v8708_v31 = vld [vmem:[#allocation2 + $0x58] sm:$0xff]  ;;  %v8714_v56 = vld [vmem:[#allocation2 + $0xe8] sm:$0xff]  ;;  %v8715_v50 = vld [vmem:[#allocation2 + $0xe0] sm:$0xff] }
 0x9c6   : > { %v4766_v11 = vpop.f32.mrb[186].mxu0  ;;  %7930 = vmatprep.subr.bf16.mxu1 %v12299_v48 }
 0x9c7   : > { %v4767_v41 = vadd.f32 %v4766_v11, %v10468_v54  ;;  %v4768_v35 = vpop.f32.mrb[187].mxu0  ;;  %v8716_v11 = vld [vmem:[#allocation2 + $0x118] sm:$0xff] }
 0x9c8   : > { %5306 = vmatmul.mubr.f32.gmra.mrb[184].mxu1 %v8699_v23  ;;  %v8718_v35 = vld [vmem:[#allocation2 + $0x148] sm:$0xff]  ;;  %v8719_v23 = vld [vmem:[#allocation2 + $0x140] sm:$0xff] }
 0x9c9   : > { %v4873_v60 = vmax.f32 %v4767_v41, 0.0  ;;  %5310 = vmatprep.mubr.f32.mxu1 %v8700_v2  ;;  %v8717_v41 = vld [vmem:[#allocation2 + $0x110] sm:$0xff]  ;;  %v8722_v2 = vld [vmem:[#allocation2 + $0x1a8] sm:$0xff] }
 0x9ca   : > { %v4771_v7 = vpop.f32.mrb[188].mxu0 }
 0x9cb   : > { %v7931_v37 = vpack.c.bf16 %v4873_v60, %v4872_v8  ;;  %v4773_v39 = vpop.f32.mrb[189].mxu0  ;;  %v4772_v49 = vadd.f32 %v4771_v7, %v10476_v21  ;;  %v8706_v21 = vld [vmem:[#allocation2 + $0x28] sm:$0xff]  ;;  %v8720_v8 = vld [vmem:[#allocation2 + $0x178] sm:$0xff]  ;;  %v8721_v60 = vld [vmem:[#allocation2 + $0x170] sm:$0xff] }
 0x9cc   : > { %5311 = vmatmul.mubr.f32.gmra.mrb[186].mxu1 %v8701_v58  ;;  %v8723_v7 = vld [vmem:[#allocation2 + $0x1a0] sm:$0xff]  ;;  %v8725_v39 = vld [vmem:[#allocation2 + $0x1d0] sm:$0xff]  ;;  %v8726_v58 = vld [vmem:[#allocation2 + $0x208] sm:$0xff] }
 0x9cd   : > { %7932 = vmatpush1.bf16.msra.mxu1 %v7931_v37  ;;  %5315 = vmatprep.mubr.f32.mxu1 %v8702_v59  ;;  %v4874_v46 = vmax.f32 %v4772_v49, 0.0  ;;  %v8724_v37 = vld [vmem:[#allocation2 + $0x1d8] sm:$0xff]  ;;  %v8727_v49 = vld [vmem:[#allocation2 + $0x200] sm:$0xff] }
 0x9ce   : > { %v4776_v27 = vpop.f32.mrb[190].mxu0  ;;  %7933 = vmatprep.subr.bf16.mxu1 %v12299_v48  ;;  %v8709_v48 = vld [vmem:[#allocation2 + $0x50] sm:$0xff]  ;;  %v8728_v59 = vld [vmem:[#allocation2 + $0x238] sm:$0xff] }
 0x9cf   : > { %v4777_v54 = vadd.f32 %v4776_v27, %v10479_v38  ;;  %v4778_v13 = vpop.f32.mrb[191].mxu0  ;;  %v8710_v38 = vld [vmem:[#allocation2 + $0x88] sm:$0xff]  ;;  %v8729_v27 = vld [vmem:[#allocation2 + $0x230] sm:$0xff] }
 0x9d0   : > { %5316 = vmatmul.mubr.f32.gmra.mrb[188].mxu1 %v8703_v0  ;;  %v8731_v13 = vld [vmem:[#allocation2 + $0x260] sm:$0xff]  ;;  %v8732_v0 = vld [vmem:[#allocation2 + $0x298] sm:$0xff] }
 0x9d1   : > { %v4875_v52 = vmax.f32 %v4777_v54, 0.0  ;;  %5320 = vmatprep.mubr.f32.mxu1 %v8704_v63  ;;  %v8730_v54 = vld [vmem:[#allocation2 + $0x268] sm:$0xff]  ;;  %v8735_v63 = vld [vmem:[#allocation2 + $0x2c0] sm:$0xff] }
 0x9d3   : > { %v7934_v43 = vpack.c.bf16 %v4875_v52, %v4874_v46  ;;  %v8733_v46 = vld [vmem:[#allocation2 + $0x290] sm:$0xff]  ;;  %v8734_v52 = vld [vmem:[#allocation2 + $0x2c8] sm:$0xff] }
 0x9d4   : > { %5321 = vmatmul.mubr.f32.gmra.mrb[190].mxu1 %v8705_v19  ;;  %v8737_v19 = vld [vmem:[#allocation2 + $0x2f0] sm:$0xff] }
 0x9d5   : > { %7935 = vmatpush1.bf16.msra.mxu1 %v7934_v43  ;;  %5390 = vmatprep.mubr.f32.mxu1 %v8706_v21  ;;  %v8736_v43 = vld [vmem:[#allocation2 + $0x2f8] sm:$0xff]  ;;  %v8738_v21 = vld [vmem:[#allocation2 + $0x328] sm:$0xff] }
 0x9d8   : > { %5391 = vmatmul.mubr.f32.vlgmr.msra.gmra.mrb[128].mxu1 %v8707_v10  ;;  %v8739_v10 = vld [vmem:[#allocation2 + $0x320] sm:$0xff] }
 0x9d9   : > { %5395 = vmatprep.mubr.f32.mxu1 %v8708_v31  ;;  %v8740_v31 = vld [vmem:[#allocation2 + $0x358] sm:$0xff] }
 0x9dc   : > { %5396 = vmatmul.mubr.f32.gmra.mrb[130].mxu1 %v8709_v48  ;;  %v8741_v48 = vld [vmem:[#allocation2 + $0x350] sm:$0xff] }
 0x9dd   : > { %5400 = vmatprep.mubr.f32.mxu1 %v8710_v38  ;;  %v8742_v38 = vld [vmem:[#allocation2 + $0x388] sm:$0xff] }
 0x9e0   : > { %5401 = vmatmul.mubr.f32.gmra.mrb[132].mxu1 %v8711_v18  ;;  %v8743_v18 = vld [vmem:[#allocation2 + $0x380] sm:$0xff] }
 0x9e1   : > { %5405 = vmatprep.mubr.f32.mxu1 %v8712_v30  ;;  %v8744_v30 = vld [vmem:[#allocation2 + $0x3b8] sm:$0xff] }
 0x9e4   : > { %5406 = vmatmul.mubr.f32.gmra.mrb[134].mxu1 %v8713_v4  ;;  %v8745_v4 = vld [vmem:[#allocation2 + $0x3b0] sm:$0xff] }
 0x9e5   : > { %5410 = vmatprep.mubr.f32.mxu1 %v8714_v56  ;;  %v8746_v56 = vld [vmem:[#allocation2 + $0x3e8] sm:$0xff] }
 0x9e8   : > { %5411 = vmatmul.mubr.f32.gmra.mrb[136].mxu1 %v8715_v50  ;;  %v8747_v50 = vld [vmem:[#allocation2 + $0x3e0] sm:$0xff] }
 0x9e9   : > { %5415 = vmatprep.mubr.f32.mxu1 %v8716_v11  ;;  %v8748_v11 = vld [vmem:[#allocation2 + $0x418] sm:$0xff] }
 0x9ec   : > { %5416 = vmatmul.mubr.f32.gmra.mrb[138].mxu1 %v8717_v41  ;;  %v8749_v41 = vld [vmem:[#allocation2 + $0x410] sm:$0xff] }
 0x9ed   : > { %5420 = vmatprep.mubr.f32.mxu1 %v8718_v35  ;;  %v8750_v35 = vld [vmem:[#allocation2 + $0x448] sm:$0xff] }
 0x9f0   : > { %5421 = vmatmul.mubr.f32.gmra.mrb[140].mxu1 %v8719_v23  ;;  %v8751_v23 = vld [vmem:[#allocation2 + $0x440] sm:$0xff] }
 0x9f1   : > { %5425 = vmatprep.mubr.f32.mxu1 %v8720_v8  ;;  %v8752_v8 = vld [vmem:[#allocation2 + $0x478] sm:$0xff] }
 0x9f4   : > { %5426 = vmatmul.mubr.f32.gmra.mrb[142].mxu1 %v8721_v60  ;;  %v8753_v60 = vld [vmem:[#allocation2 + $0x470] sm:$0xff] }
 0x9f5   : > { %5430 = vmatprep.mubr.f32.mxu1 %v8722_v2  ;;  %v8754_v2 = vld [vmem:[#allocation2 + $0x4a8] sm:$0xff] }
 0x9f8   : > { %5431 = vmatmul.mubr.f32.gmra.mrb[144].mxu1 %v8723_v7  ;;  %v8755_v7 = vld [vmem:[#allocation2 + $0x4a0] sm:$0xff] }
 0x9f9   : > { %5435 = vmatprep.mubr.f32.mxu1 %v8724_v37  ;;  %v8756_v37 = vld [vmem:[#allocation2 + $0x4d8] sm:$0xff] }
 0x9fc   : > { %5436 = vmatmul.mubr.f32.gmra.mrb[146].mxu1 %v8725_v39  ;;  %v8757_v39 = vld [vmem:[#allocation2 + $0x4d0] sm:$0xff] }
 0x9fd   : > { %5440 = vmatprep.mubr.f32.mxu1 %v8726_v58  ;;  %v8758_v58 = vld [vmem:[#allocation2 + $0x508] sm:$0xff] }
 0xa00   : > { %5441 = vmatmul.mubr.f32.gmra.mrb[148].mxu1 %v8727_v49  ;;  %v8759_v49 = vld [vmem:[#allocation2 + $0x500] sm:$0xff] }
 0xa01   : > { %5445 = vmatprep.mubr.f32.mxu1 %v8728_v59  ;;  %v8760_v59 = vld [vmem:[#allocation2 + $0x538] sm:$0xff] }
 0xa04   : > { %5446 = vmatmul.mubr.f32.gmra.mrb[150].mxu1 %v8729_v27  ;;  %v8761_v27 = vld [vmem:[#allocation2 + $0x530] sm:$0xff] }
 0xa05   : > { %5450 = vmatprep.mubr.f32.mxu1 %v8730_v54  ;;  %v8762_v54 = vld [vmem:[#allocation2 + $0x568] sm:$0xff] }
 0xa08   : > { %5451 = vmatmul.mubr.f32.gmra.mrb[152].mxu1 %v8731_v13  ;;  %v8763_v13 = vld [vmem:[#allocation2 + $0x560] sm:$0xff] }
 0xa09   : > { %5455 = vmatprep.mubr.f32.mxu1 %v8732_v0  ;;  %v8764_v0 = vld [vmem:[#allocation2 + $0x598] sm:$0xff] }
 0xa0c   : > { %5456 = vmatmul.mubr.f32.gmra.mrb[154].mxu1 %v8733_v46  ;;  %v8765_v46 = vld [vmem:[#allocation2 + $0x590] sm:$0xff] }
 0xa0d   : > { %5460 = vmatprep.mubr.f32.mxu1 %v8734_v52  ;;  %v8766_v52 = vld [vmem:[#allocation2 + $0x5c8] sm:$0xff] }
 0xa10   : > { %5461 = vmatmul.mubr.f32.gmra.mrb[156].mxu1 %v8735_v63  ;;  %v8767_v63 = vld [vmem:[#allocation2 + $0x5c0] sm:$0xff] }
 0xa11   : > { %5465 = vmatprep.mubr.f32.mxu1 %v8736_v43  ;;  %v8768_v43 = vld [vmem:[#allocation2 + $0x5f8] sm:$0xff] }
 0xa14   : > { %5466 = vmatmul.mubr.f32.gmra.mrb[158].mxu1 %v8737_v19  ;;  %v8769_v19 = vld [vmem:[#allocation2 + $0x5f0] sm:$0xff] }
 0xa15   : > { %5470 = vmatprep.mubr.f32.mxu1 %v8738_v21  ;;  %v364_v21 = vld [vmem:[%s12188_s7] sm:$0xff] }
 0xa18   : > { %5471 = vmatmul.mubr.f32.gmra.mrb[160].mxu1 %v8739_v10  ;;  %v365_v10 = vld [vmem:[%s12188_s7 + $0x8] sm:$0xff] }
 0xa19   : > { %5475 = vmatprep.mubr.f32.mxu1 %v8740_v31  ;;  %v366_v31 = vld [vmem:[%s12188_s7 + $0x10] sm:$0xff] }
 0xa1c   : > { %5476 = vmatmul.mubr.f32.gmra.mrb[162].mxu1 %v8741_v48  ;;  %v7952_v48 = vpack.c.bf16 %v365_v10, %v364_v21 }
 0xa1d   : > { %5480 = vmatprep.mubr.f32.mxu1 %v8742_v38  ;;  %v367_v38 = vld [vmem:[%s12188_s7 + $0x18] sm:$0xff] }
 0xa1e   : > { %7968 = vmatprep.subr.bf16.mxu1 %v7952_v48  ;;  %7953 = vmatprep.subr.bf16.mxu0 %v7952_v48 }
 0xa1f   : > { %7972 = vmatpush3.bf16.msra.mxu1 %v7952_v48 }
 0xa20   : > { %5481 = vmatmul.mubr.f32.gmra.mrb[164].mxu1 %v8743_v18 }
 0xa21   : > { %5485 = vmatprep.mubr.f32.mxu1 %v8744_v30  ;;  %v7956_v30 = vpack.c.bf16 %v367_v38, %v366_v31 }
 0xa23   : > { %7969 = vmatprep.subr.bf16.mxu1 %v7956_v30 }
 0xa24   : > { %5486 = vmatmul.mubr.f32.gmra.mrb[166].mxu1 %v8745_v4 }
 0xa25   : > { %5490 = vmatprep.mubr.f32.mxu1 %v8746_v56  ;;  %v368_v56 = vld [vmem:[%s12188_s7 + $0x20] sm:$0xff]  ;;  %7973 = vmatpush3.bf16.msra.mxu1 %v7956_v30 }
 0xa28   : > { %5491 = vmatmul.mubr.f32.gmra.mrb[168].mxu1 %v8747_v50  ;;  %v369_v50 = vld [vmem:[%s12188_s7 + $0x28] sm:$0xff] }
 0xa29   : > { %5495 = vmatprep.mubr.f32.mxu1 %v8748_v11 }
 0xa2c   : > { %5496 = vmatmul.mubr.f32.gmra.mrb[170].mxu1 %v8749_v41  ;;  %v7960_v41 = vpack.c.bf16 %v369_v50, %v368_v56 }
 0xa2d   : > { %5500 = vmatprep.mubr.f32.mxu1 %v8750_v35 }
 0xa2e   : > { %7970 = vmatprep.subr.bf16.mxu1 %v7960_v41 }
 0xa2f   : > { %7974 = vmatpush3.bf16.msra.mxu1 %v7960_v41 }
 0xa30   : > { %5501 = vmatmul.mubr.f32.gmra.mrb[172].mxu1 %v8751_v23 }
 0xa31   : > { %5505 = vmatprep.mubr.f32.mxu1 %v8752_v8 }
 0xa34   : > { %5506 = vmatmul.mubr.f32.gmra.mrb[174].mxu1 %v8753_v60 }
 0xa35   : > { %5510 = vmatprep.mubr.f32.mxu1 %v8754_v2 }
 0xa38   : > { %5511 = vmatmul.mubr.f32.gmra.mrb[176].mxu1 %v8755_v7 }
 0xa39   : > { %5515 = vmatprep.mubr.f32.mxu1 %v8756_v37 }
 0xa3c   : > { %5516 = vmatmul.mubr.f32.gmra.mrb[178].mxu1 %v8757_v39 }
 0xa3d   : > { %5520 = vmatprep.mubr.f32.mxu1 %v8758_v58 }
 0xa40   : > { %5521 = vmatmul.mubr.f32.gmra.mrb[180].mxu1 %v8759_v49 }
 0xa41   : > { %5525 = vmatprep.mubr.f32.mxu1 %v8760_v59 }
 0xa44   : > { %5526 = vmatmul.mubr.f32.gmra.mrb[182].mxu1 %v8761_v27 }
 0xa45   : > { %5530 = vmatprep.mubr.f32.mxu1 %v8762_v54 }
 0xa48   : > { %5531 = vmatmul.mubr.f32.gmra.mrb[184].mxu1 %v8763_v13 }
 0xa49   : > { %5535 = vmatprep.mubr.f32.mxu1 %v8764_v0 }
 0xa4c   : > { %5536 = vmatmul.mubr.f32.gmra.mrb[186].mxu1 %v8765_v46 }
 0xa4d   : > { %5540 = vmatprep.mubr.f32.mxu1 %v8766_v52 }
 0xa50   : > { %5541 = vmatmul.mubr.f32.gmra.mrb[188].mxu1 %v8767_v63 }
 0xa51   : > { %5545 = vmatprep.mubr.f32.mxu1 %v8768_v43 }
 0xa54   : > { %5546 = vmatmul.mubr.f32.gmra.mrb[190].mxu1 %v8769_v19 }
 0xaab   : > { %v5392_v18 = vpop.f32.mrb[128].mxu1 }
 0xaac   : > { %v5394_v4 = vpop.f32.mrb[129].mxu1  ;;  %7392 = vmatprep.mubr.msk.f32.mxu0 %vm1923_vm1, %v5392_v18 }
 0xaaf   : > { %v5397_v11 = vpop.f32.mrb[130].mxu1 }
 0xab0   : > { %v5399_v35 = vpop.f32.mrb[131].mxu1  ;;  %7393 = vmatmul.mubr.msk.f32.vlgmr.msra.gmra.mrb[192].mxu0 %vm1923_vm1, %v5397_v11 }
 0xab1   : > { %7955 = vmatpush3.bf16.msra.mxu0 %v7952_v48 }
 0xab2   : > { %7957 = vmatprep.subr.bf16.mxu0 %v7956_v30 }
 0xab3   : > { %v5402_v23 = vpop.f32.mrb[132].mxu1 }
 0xab4   : > { %v5404_v8 = vpop.f32.mrb[133].mxu1  ;;  %7395 = vmatprep.mubr.msk.f32.mxu0 %vm1923_vm1, %v5402_v23 }
 0xab5   : > { %7959 = vmatpush3.bf16.msra.mxu0 %v7956_v30 }
 0xab6   : > { %7961 = vmatprep.subr.bf16.mxu0 %v7960_v41 }
 0xab7   : > { %v5407_v60 = vpop.f32.mrb[134].mxu1 }
 0xab8   : > { %v5409_v2 = vpop.f32.mrb[135].mxu1  ;;  %7396 = vmatmul.mubr.msk.f32.gmra.mrb[194].mxu0 %vm1923_vm1, %v5407_v60 }
 0xab9   : > { %7963 = vmatpush3.bf16.msra.mxu0 %v7960_v41 }
 0xabb   : > { %v5412_v7 = vpop.f32.mrb[136].mxu1 }
 0xabc   : > { %v5414_v37 = vpop.f32.mrb[137].mxu1  ;;  %7398 = vmatprep.mubr.msk.f32.mxu0 %vm1923_vm1, %v5412_v7 }
 0xabf   : > { %v5417_v39 = vpop.f32.mrb[138].mxu1 }
 0xac0   : > { %v5419_v58 = vpop.f32.mrb[139].mxu1  ;;  %7399 = vmatmul.mubr.msk.f32.gmra.mrb[196].mxu0 %vm1923_vm1, %v5417_v39 }
 0xac3   : > { %v5422_v49 = vpop.f32.mrb[140].mxu1 }
 0xac4   : > { %v5424_v59 = vpop.f32.mrb[141].mxu1  ;;  %7401 = vmatprep.mubr.msk.f32.mxu0 %vm1923_vm1, %v5422_v49 }
 0xac5   : > { %v370_v59 = vld [vmem:[%s12188_s7 + $0x30] sm:$0xff] }
 0xac7   : > { %v5427_v27 = vpop.f32.mrb[142].mxu1 }
 0xac8   : > { %v5429_v54 = vpop.f32.mrb[143].mxu1  ;;  %7402 = vmatmul.mubr.msk.f32.gmra.mrb[198].mxu0 %vm1923_vm1, %v5427_v27  ;;  %v371_v27 = vld [vmem:[%s12188_s7 + $0x38] sm:$0xff] }
 0xacb   : > { %v5432_v13 = vpop.f32.mrb[144].mxu1 }
 0xacc   : > { %v5434_v0 = vpop.f32.mrb[145].mxu1  ;;  %7404 = vmatprep.mubr.msk.f32.mxu0 %vm1923_vm1, %v5432_v13  ;;  %v7964_v13 = vpack.c.bf16 %v371_v27, %v370_v59 }
 0xace   : > { %7965 = vmatprep.subr.bf16.mxu0 %v7964_v13  ;;  %7971 = vmatprep.subr.bf16.mxu1 %v7964_v13 }
 0xacf   : > { %v5437_v46 = vpop.f32.mrb[146].mxu1  ;;  %7967 = vmatpush3.bf16.msra.mxu0 %v7964_v13  ;;  %7975 = vmatpush3.bf16.msra.mxu1 %v7964_v13 }
 0xad0   : > { %v5439_v52 = vpop.f32.mrb[147].mxu1  ;;  %7405 = vmatmul.mubr.msk.f32.gmra.mrb[200].mxu0 %vm1923_vm1, %v5437_v46 }
 0xad3   : > { %v5442_v63 = vpop.f32.mrb[148].mxu1 }
 0xad4   : > { %v5444_v43 = vpop.f32.mrb[149].mxu1  ;;  %7407 = vmatprep.mubr.msk.f32.mxu0 %vm1923_vm1, %v5442_v63 }
 0xad7   : > { %v5447_v19 = vpop.f32.mrb[150].mxu1 }
 0xad8   : > { %v5449_v21 = vpop.f32.mrb[151].mxu1  ;;  %7408 = vmatmul.mubr.msk.f32.gmra.mrb[202].mxu0 %vm1923_vm1, %v5447_v19 }
 0xadb   : > { %v5452_v10 = vpop.f32.mrb[152].mxu1 }
 0xadc   : > { %v5454_v31 = vpop.f32.mrb[153].mxu1  ;;  %7410 = vmatprep.mubr.msk.f32.mxu0 %vm1923_vm1, %v5452_v10 }
 0xadf   : > { %v5457_v48 = vpop.f32.mrb[154].mxu1 }
 0xae0   : > { %v5459_v38 = vpop.f32.mrb[155].mxu1  ;;  %7411 = vmatmul.mubr.msk.f32.gmra.mrb[204].mxu0 %vm1923_vm1, %v5457_v48 }
 0xae3   : > { %v5462_v18 = vpop.f32.mrb[156].mxu1 }
 0xae4   : > { %v5464_v30 = vpop.f32.mrb[157].mxu1  ;;  %7413 = vmatprep.mubr.msk.f32.mxu0 %vm1923_vm1, %v5462_v18 }
 0xae7   : > { %v5467_v4 = vpop.f32.mrb[158].mxu1 }
 0xae8   : > { %v5469_v56 = vpop.f32.mrb[159].mxu1  ;;  %7414 = vmatmul.mubr.msk.f32.gmra.mrb[206].mxu0 %vm1923_vm1, %v5467_v4 }
 0xaeb   : > { %v5472_v50 = vpop.f32.mrb[160].mxu1 }
 0xaec   : > { %v5474_v11 = vpop.f32.mrb[161].mxu1  ;;  %7416 = vmatprep.mubr.msk.f32.mxu0 %vm1923_vm1, %v5472_v50 }
 0xaef   : > { %v5477_v41 = vpop.f32.mrb[162].mxu1 }
 0xaf0   : > { %v5479_v35 = vpop.f32.mrb[163].mxu1  ;;  %7417 = vmatmul.mubr.msk.f32.gmra.mrb[208].mxu0 %vm1923_vm1, %v5477_v41 }
 0xaf3   : > { %v5482_v23 = vpop.f32.mrb[164].mxu1 }
 0xaf4   : > { %v5484_v8 = vpop.f32.mrb[165].mxu1  ;;  %7419 = vmatprep.mubr.msk.f32.mxu0 %vm1923_vm1, %v5482_v23  ;;  %v8770_v23 = vld [vmem:[%s12185_s4 + $0x8] sm:$0xff] }
 0xaf7   : > { %v5487_v60 = vpop.f32.mrb[166].mxu1 }
 0xaf8   : > { %v5489_v2 = vpop.f32.mrb[167].mxu1  ;;  %7420 = vmatmul.mubr.msk.f32.gmra.mrb[210].mxu0 %vm1923_vm1, %v5487_v60 }
 0xaf9   : > { %v8771_v2 = vld [vmem:[%s12185_s4] sm:$0xff] }
 0xafb   : > { %v5492_v7 = vpop.f32.mrb[168].mxu1 }
 0xafc   : > { %v5494_v37 = vpop.f32.mrb[169].mxu1  ;;  %7422 = vmatprep.mubr.msk.f32.mxu0 %vm1923_vm1, %v5492_v7 }
 0xaff   : > { %v5497_v39 = vpop.f32.mrb[170].mxu1 }
 0xb00   : > { %v5499_v58 = vpop.f32.mrb[171].mxu1  ;;  %7423 = vmatmul.mubr.msk.f32.gmra.mrb[212].mxu0 %vm1923_vm1, %v5497_v39 }
 0xb03   : > { %v5502_v49 = vpop.f32.mrb[172].mxu1 }
 0xb04   : > { %v5504_v54 = vpop.f32.mrb[173].mxu1  ;;  %7425 = vmatprep.mubr.msk.f32.mxu0 %vm1923_vm1, %v5502_v49  ;;  %v8772_v49 = vld [vmem:[%s12185_s4 + $0x18] sm:$0xff] }
 0xb05   : > { %v8773_v54 = vld [vmem:[%s12185_s4 + $0x10] sm:$0xff] }
 0xb07   : > { %v5507_v0 = vpop.f32.mrb[174].mxu1 }
 0xb08   : > { %v5509_v46 = vpop.f32.mrb[175].mxu1  ;;  %7426 = vmatmul.mubr.msk.f32.gmra.mrb[214].mxu0 %vm1923_vm1, %v5507_v0 }
 0xb09   : > { %v8774_v46 = vld [vmem:[%s12185_s4 + $0x28] sm:$0xff] }
 0xb0b   : > { %v5512_v52 = vpop.f32.mrb[176].mxu1 }
 0xb0c   : > { %v5514_v63 = vpop.f32.mrb[177].mxu1  ;;  %7428 = vmatprep.mubr.msk.f32.mxu0 %vm1923_vm1, %v5512_v52 }
 0xb0f   : > { %v5517_v43 = vpop.f32.mrb[178].mxu1 }
 0xb10   : > { %v5519_v19 = vpop.f32.mrb[179].mxu1  ;;  %7429 = vmatmul.mubr.msk.f32.gmra.mrb[216].mxu0 %vm1923_vm1, %v5517_v43  ;;  %v8775_v43 = vld [vmem:[%s12185_s4 + $0x20] sm:$0xff] }
 0xb13   : > { %v5522_v21 = vpop.f32.mrb[180].mxu1 }
 0xb14   : > { %v5524_v10 = vpop.f32.mrb[181].mxu1  ;;  %7431 = vmatprep.mubr.msk.f32.mxu0 %vm1923_vm1, %v5522_v21 }
 0xb15   : > { %v8776_v10 = vld [vmem:[%s12185_s4 + $0x38] sm:$0xff] }
 0xb17   : > { %v5527_v31 = vpop.f32.mrb[182].mxu1 }
 0xb18   : > { %v5529_v48 = vpop.f32.mrb[183].mxu1  ;;  %7432 = vmatmul.mubr.msk.f32.gmra.mrb[218].mxu0 %vm1923_vm1, %v5527_v31 }
 0xb1b   : > { %v5532_v38 = vpop.f32.mrb[184].mxu1 }
 0xb1c   : > { %v5534_v18 = vpop.f32.mrb[185].mxu1  ;;  %7434 = vmatprep.mubr.msk.f32.mxu0 %vm1923_vm1, %v5532_v38  ;;  %v8777_v38 = vld [vmem:[%s12185_s4 + $0x30] sm:$0xff] }
 0xb1f   : > { %v5537_v30 = vpop.f32.mrb[186].mxu1 }
 0xb20   : > { %v5539_v4 = vpop.f32.mrb[187].mxu1  ;;  %7435 = vmatmul.mubr.msk.f32.gmra.mrb[220].mxu0 %vm1923_vm1, %v5537_v30 }
 0xb21   : > { %v8778_v4 = vld [vmem:[%s12185_s4 + $0x48] sm:$0xff] }
 0xb23   : > { %v5542_v56 = vpop.f32.mrb[188].mxu1 }
 0xb24   : > { %v5544_v50 = vpop.f32.mrb[189].mxu1  ;;  %7437 = vmatprep.mubr.msk.f32.mxu0 %vm1923_vm1, %v5542_v56 }
 0xb27   : > { %v5547_v11 = vpop.f32.mrb[190].mxu1 }
 0xb28   : > { %v5549_v41 = vpop.f32.mrb[191].mxu1  ;;  %7438 = vmatmul.mubr.msk.f32.gmra.mrb[222].mxu0 %vm1923_vm1, %v5547_v11  ;;  %v8779_v11 = vld [vmem:[%s12185_s4 + $0x40] sm:$0xff] }
 0xb83   : > { %v7394_v35 = vpop.f32.mrb[192].mxu0 }
 0xb84   : > { %v5719_v8 = vadd.f32 %v8770_v23, %v7394_v35  ;;  %v5713_v60 = vpop.f32.mrb[193].mxu0  ;;  %v8780_v23 = vld [vmem:[%s12185_s4 + $0x58] sm:$0xff] }
 0xb85   : > { %v5714_v7 = vadd.f32 %v8771_v2, %v5713_v60  ;;  %v8781_v2 = vld [vmem:[%s12185_s4 + $0x50] sm:$0xff] }
 0xb86   : > { %v5873_v39 = vadd.f32 %v5719_v8, %v10549_v26 }
 0xb87   : > { %v5872_v37 = vadd.f32 %v5714_v7, %v10546_v12 }
 0xb89   : > { %7456 = vmatprep.mubr.msk.f32.mxu0 %vm1923_vm1, %v5872_v37 }
 0xb8a   : > { %7457 = vmatmul.mubr.msk.f32.vlgmr.msra.gmra.mrb[224].mxu0 %vm1923_vm1, %v5873_v39  ;;  %v8782_v39 = vld [vmem:[%s12185_s4 + $0x68] sm:$0xff] }
 0xb8b   : > { %v7397_v58 = vpop.f32.mrb[194].mxu0 }
 0xb8c   : > { %v5729_v59 = vadd.f32 %v8772_v49, %v7397_v58  ;;  %v5723_v27 = vpop.f32.mrb[195].mxu0 }
 0xb8d   : > { %v5724_v13 = vadd.f32 %v8773_v54, %v5723_v27 }
 0xb8e   : > { %v5875_v26 = vadd.f32 %v5729_v59, %v10565_v25  ;;  %v8783_v59 = vld [vmem:[%s12185_s4 + $0x60] sm:$0xff] }
 0xb8f   : > { %v5874_v12 = vadd.f32 %v5724_v13, %v10562_v53  ;;  %v8784_v13 = vld [vmem:[%s12185_s4 + $0x78] sm:$0xff] }
 0xb91   : > { %7459 = vmatprep.mubr.msk.f32.mxu1 %vm1923_vm1, %v5874_v12 }
 0xb92   : > { %7460 = vmatmul.mubr.msk.f32.vlgmr.msra.gmra.mrb[192].mxu1 %vm1923_vm1, %v5875_v26 }
 0xb93   : > { %v7400_v0 = vpop.f32.mrb[196].mxu0 }
 0xb94   : > { %v5739_v52 = vadd.f32 %v8774_v46, %v7400_v0  ;;  %v5733_v63 = vpop.f32.mrb[197].mxu0  ;;  %v8785_v0 = vld [vmem:[%s12185_s4 + $0x70] sm:$0xff] }
 0xb95   : > { %v5734_v19 = vadd.f32 %v8775_v43, %v5733_v63  ;;  %v8786_v63 = vld [vmem:[%s12185_s4 + $0x88] sm:$0xff] }
 0xb96   : > { %v5877_v25 = vadd.f32 %v5739_v52, %v10581_v16 }
 0xb97   : > { %v5876_v53 = vadd.f32 %v5734_v19, %v10578_v57 }
 0xb99   : > { %7462 = vmatprep.mubr.msk.f32.mxu1 %vm1923_vm1, %v5876_v53  ;;  %v8787_v53 = vld [vmem:[%s12185_s4 + $0x80] sm:$0xff] }
 0xb9a   : > { %7463 = vmatmul.mubr.msk.f32.gmra.mrb[194].mxu1 %vm1923_vm1, %v5877_v25 }
 0xb9b   : > { %v7403_v21 = vpop.f32.mrb[198].mxu0 }
 0xb9c   : > { %v5749_v31 = vadd.f32 %v8776_v10, %v7403_v21  ;;  %v5743_v48 = vpop.f32.mrb[199].mxu0  ;;  %v8788_v10 = vld [vmem:[%s12185_s4 + $0x98] sm:$0xff] }
 0xb9d   : > { %v5744_v18 = vadd.f32 %v8777_v38, %v5743_v48  ;;  %v8789_v38 = vld [vmem:[%s12185_s4 + $0x90] sm:$0xff] }
 0xb9e   : > { %v5879_v16 = vadd.f32 %v5749_v31, %v10597_v33 }
 0xb9f   : > { %v5878_v57 = vadd.f32 %v5744_v18, %v10594_v61 }
 0xba1   : > { %7465 = vmatprep.mubr.msk.f32.mxu1 %vm1923_vm1, %v5878_v57 }
 0xba2   : > { %7466 = vmatmul.mubr.msk.f32.gmra.mrb[196].mxu1 %vm1923_vm1, %v5879_v16  ;;  %v8790_v16 = vld [vmem:[%s12185_s4 + $0xa8] sm:$0xff] }
 0xba3   : > { %v7406_v30 = vpop.f32.mrb[200].mxu0 }
 0xba4   : > { %v5759_v56 = vadd.f32 %v8778_v4, %v7406_v30  ;;  %v5753_v50 = vpop.f32.mrb[201].mxu0 }
 0xba5   : > { %v5754_v41 = vadd.f32 %v8779_v11, %v5753_v50 }
 0xba6   : > { %v5881_v33 = vadd.f32 %v5759_v56, %v10613_v17  ;;  %v8791_v56 = vld [vmem:[%s12185_s4 + $0xa0] sm:$0xff] }
 0xba7   : > { %v5880_v61 = vadd.f32 %v5754_v41, %v10610_v1  ;;  %v8792_v41 = vld [vmem:[%s12185_s4 + $0xb8] sm:$0xff] }
 0xba9   : > { %7468 = vmatprep.mubr.msk.f32.mxu1 %vm1923_vm1, %v5880_v61 }
 0xbaa   : > { %7469 = vmatmul.mubr.msk.f32.gmra.mrb[198].mxu1 %vm1923_vm1, %v5881_v33 }
 0xbab   : > { %v7409_v35 = vpop.f32.mrb[202].mxu0 }
 0xbac   : > { %v5769_v8 = vadd.f32 %v8780_v23, %v7409_v35  ;;  %v5763_v60 = vpop.f32.mrb[203].mxu0  ;;  %v8793_v35 = vld [vmem:[%s12185_s4 + $0xb0] sm:$0xff] }
 0xbad   : > { %v5764_v7 = vadd.f32 %v8781_v2, %v5763_v60  ;;  %v8794_v60 = vld [vmem:[%s12185_s4 + $0xc8] sm:$0xff] }
 0xbae   : > { %v5883_v17 = vadd.f32 %v5769_v8, %v10629_v55 }
 0xbaf   : > { %v5882_v1 = vadd.f32 %v5764_v7, %v10626_v5 }
 0xbb1   : > { %7471 = vmatprep.mubr.msk.f32.mxu1 %vm1923_vm1, %v5882_v1  ;;  %v8795_v1 = vld [vmem:[%s12185_s4 + $0xc0] sm:$0xff] }
 0xbb2   : > { %7472 = vmatmul.mubr.msk.f32.gmra.mrb[200].mxu1 %vm1923_vm1, %v5883_v17 }
 0xbb3   : > { %v7412_v37 = vpop.f32.mrb[204].mxu0 }
 0xbb4   : > { %v5779_v58 = vadd.f32 %v8782_v39, %v7412_v37  ;;  %v5773_v49 = vpop.f32.mrb[205].mxu0  ;;  %v8796_v39 = vld [vmem:[%s12185_s4 + $0xd8] sm:$0xff] }
 0xbb5   : > { %v5774_v27 = vadd.f32 %v8783_v59, %v5773_v49  ;;  %v8797_v59 = vld [vmem:[%s12185_s4 + $0xd0] sm:$0xff] }
 0xbb6   : > { %v5885_v55 = vadd.f32 %v5779_v58, %v10645_v22 }
 0xbb7   : > { %v5884_v5 = vadd.f32 %v5774_v27, %v10642_v9 }
 0xbb9   : > { %7474 = vmatprep.mubr.msk.f32.mxu1 %vm1923_vm1, %v5884_v5 }
 0xbba   : > { %7475 = vmatmul.mubr.msk.f32.gmra.mrb[202].mxu1 %vm1923_vm1, %v5885_v55  ;;  %v8798_v55 = vld [vmem:[%s12185_s4 + $0xe8] sm:$0xff] }
 0xbbb   : > { %v7415_v54 = vpop.f32.mrb[206].mxu0 }
 0xbbc   : > { %v5789_v12 = vadd.f32 %v8784_v13, %v7415_v54  ;;  %v5783_v26 = vpop.f32.mrb[207].mxu0 }
 0xbbd   : > { %v5784_v46 = vadd.f32 %v8785_v0, %v5783_v26 }
 0xbbe   : > { %v5887_v22 = vadd.f32 %v5789_v12, %v10661_v34  ;;  %v8799_v12 = vld [vmem:[%s12185_s4 + $0xe0] sm:$0xff] }
 0xbbf   : > { %v5886_v9 = vadd.f32 %v5784_v46, %v10658_v14  ;;  %v8800_v46 = vld [vmem:[%s12185_s4 + $0xf8] sm:$0xff] }
 0xbc1   : > { %7477 = vmatprep.mubr.msk.f32.mxu1 %vm1923_vm1, %v5886_v9 }
 0xbc2   : > { %7478 = vmatmul.mubr.msk.f32.gmra.mrb[204].mxu1 %vm1923_vm1, %v5887_v22 }
 0xbc3   : > { %v7418_v52 = vpop.f32.mrb[208].mxu0 }
 0xbc4   : > { %v5799_v43 = vadd.f32 %v8786_v63, %v7418_v52  ;;  %v5793_v19 = vpop.f32.mrb[209].mxu0  ;;  %v8801_v52 = vld [vmem:[%s12185_s4 + $0xf0] sm:$0xff] }
 0xbc5   : > { %v5794_v25 = vadd.f32 %v8787_v53, %v5793_v19 }
 0xbc6   : > { %v5889_v34 = vadd.f32 %v5799_v43, %v10677_v44  ;;  %v11753_v43 = vld [vmem:[%s12188_s7 + $0x40] ss:$0 sm:$0xff] }
 0xbc7   : > { %v5888_v14 = vadd.f32 %v5794_v25, %v10674_v20 }
 0xbc9   : > { %7480 = vmatprep.mubr.msk.f32.mxu1 %vm1923_vm1, %v5888_v14 }
 0xbca   : > { %7481 = vmatmul.mubr.msk.f32.gmra.mrb[206].mxu1 %vm1923_vm1, %v5889_v34 }
 0xbcb   : > { %v7421_v21 = vpop.f32.mrb[210].mxu0 }
 0xbcc   : > { %v5809_v31 = vadd.f32 %v8788_v10, %v7421_v21  ;;  %v5803_v48 = vpop.f32.mrb[211].mxu0 }
 0xbcd   : > { %v5804_v18 = vadd.f32 %v8789_v38, %v5803_v48 }
 0xbce   : > { %v5891_v44 = vadd.f32 %v5809_v31, %v10693_v42 }
 0xbcf   : > { %v5890_v20 = vadd.f32 %v5804_v18, %v10690_v24 }
 0xbd1   : > { %7483 = vmatprep.mubr.msk.f32.mxu1 %vm1923_vm1, %v5890_v20 }
 0xbd2   : > { %7484 = vmatmul.mubr.msk.f32.gmra.mrb[208].mxu1 %vm1923_vm1, %v5891_v44 }
 0xbd3   : > { %v7424_v57 = vpop.f32.mrb[212].mxu0 }
 0xbd4   : > { %v5819_v30 = vadd.f32 %v8790_v16, %v7424_v57  ;;  %v5813_v4 = vpop.f32.mrb[213].mxu0 }
 0xbd5   : > { %v5814_v50 = vadd.f32 %v8791_v56, %v5813_v4 }
 0xbd6   : > { %v5893_v42 = vadd.f32 %v5819_v30, %v10709_v6 }
 0xbd7   : > { %v5892_v24 = vadd.f32 %v5814_v50, %v10706_v28 }
 0xbd9   : > { %7486 = vmatprep.mubr.msk.f32.mxu1 %vm1923_vm1, %v5892_v24 }
 0xbda   : > { %7487 = vmatmul.mubr.msk.f32.gmra.mrb[210].mxu1 %vm1923_vm1, %v5893_v42 }
 0xbdb   : > { %v7427_v11 = vpop.f32.mrb[214].mxu0 }
 0xbdc   : > { %v5829_v61 = vadd.f32 %v8792_v41, %v7427_v11  ;;  %v5823_v33 = vpop.f32.mrb[215].mxu0 }
 0xbdd   : > { %v5824_v23 = vadd.f32 %v8793_v35, %v5823_v33 }
 0xbde   : > { %v5895_v6 = vadd.f32 %v5829_v61, %v10725_v47 }
 0xbdf   : > { %v5894_v28 = vadd.f32 %v5824_v23, %v10722_v32 }
 0xbe1   : > { %7489 = vmatprep.mubr.msk.f32.mxu1 %vm1923_vm1, %v5894_v28 }
 0xbe2   : > { %7490 = vmatmul.mubr.msk.f32.gmra.mrb[212].mxu1 %vm1923_vm1, %v5895_v6 }
 0xbe3   : > { %v7430_v8 = vpop.f32.mrb[216].mxu0 }
 0xbe4   : > { %v5839_v2 = vadd.f32 %v8794_v60, %v7430_v8  ;;  %v5833_v7 = vpop.f32.mrb[217].mxu0 }
 0xbe5   : > { %v5834_v17 = vadd.f32 %v8795_v1, %v5833_v7 }
 0xbe6   : > { %v5897_v47 = vadd.f32 %v5839_v2, %v10741_v3 }
 0xbe7   : > { %v5896_v32 = vadd.f32 %v5834_v17, %v10738_v36 }
 0xbe9   : > { %7492 = vmatprep.mubr.msk.f32.mxu1 %vm1923_vm1, %v5896_v32 }
 0xbea   : > { %7493 = vmatmul.mubr.msk.f32.gmra.mrb[214].mxu1 %vm1923_vm1, %v5897_v47 }
 0xbeb   : > { %v7433_v37 = vpop.f32.mrb[218].mxu0 }
 0xbec   : > { %v5849_v58 = vadd.f32 %v8796_v39, %v7433_v37  ;;  %v5843_v49 = vpop.f32.mrb[219].mxu0 }
 0xbed   : > { %v5844_v27 = vadd.f32 %v8797_v59, %v5843_v49 }
 0xbee   : > { %v5899_v3 = vadd.f32 %v5849_v58, %v10757_v15 }
 0xbef   : > { %v5898_v36 = vadd.f32 %v5844_v27, %v10754_v40 }
 0xbf1   : > { %7495 = vmatprep.mubr.msk.f32.mxu1 %vm1923_vm1, %v5898_v36 }
 0xbf2   : > { %7496 = vmatmul.mubr.msk.f32.gmra.mrb[216].mxu1 %vm1923_vm1, %v5899_v3 }
 0xbf3   : > { %v7436_v5 = vpop.f32.mrb[220].mxu0 }
 0xbf4   : > { %v5859_v54 = vadd.f32 %v8798_v55, %v7436_v5  ;;  %v5853_v13 = vpop.f32.mrb[221].mxu0 }
 0xbf5   : > { %v5854_v26 = vadd.f32 %v8799_v12, %v5853_v13 }
 0xbf6   : > { %v5901_v15 = vadd.f32 %v5859_v54, %v10773_v29 }
 0xbf7   : > { %v5900_v40 = vadd.f32 %v5854_v26, %v10770_v45 }
 0xbf9   : > { %7498 = vmatprep.mubr.msk.f32.mxu1 %vm1923_vm1, %v5900_v40 }
 0xbfa   : > { %7499 = vmatmul.mubr.msk.f32.gmra.mrb[218].mxu1 %vm1923_vm1, %v5901_v15 }
 0xbfb   : > { %v7439_v0 = vpop.f32.mrb[222].mxu0 }
 0xbfc   : > { %v5869_v9 = vadd.f32 %v8800_v46, %v7439_v0  ;;  %v5863_v22 = vpop.f32.mrb[223].mxu0 }
 0xbfd   : > { %v5864_v63 = vadd.f32 %v8801_v52, %v5863_v22 }
 0xbfe   : > { %v5903_v29 = vadd.f32 %v5869_v9, %v10789_v62 }
 0xbff   : > { %v5902_v45 = vadd.f32 %v5864_v63, %v10786_v51 }
 0xc01   : > { %7501 = vmatprep.mubr.msk.f32.mxu1 %vm1923_vm1, %v5902_v45 }
 0xc02   : > { %7502 = vmatmul.mubr.msk.f32.gmra.mrb[220].mxu1 %vm1923_vm1, %v5903_v29 }
 0xc5d   : > { %v7458_v19 = vpop.f32.mrb[224].mxu0 }
 0xc5e   : > { %v11756_v53 = vadd.f32 %v7458_v19, %v11753_v43  ;;  %v6070_v25 = vpop.f32.mrb[225].mxu0 }
 0xc5f   : > { %v11759_v14 = vadd.f32 %v11753_v43, %v6070_v25 }
 0xc60   : > { %v6233_v51 = vsel %vm6229_vm2, %v11756_v53, -inf }
 0xc61   : > { %6234 = vmax.xlane.f32.xlu1 %v6233_v51  ;;  %v6230_v62 = vsel %vm6229_vm2, %v11759_v14, -inf }
 0xc62   : > { %6231 = vmax.xlane.f32.xlu0 %v6230_v62 }
 0xc65   : > { %v7461_v34 = vpop.f32.mrb[192].mxu1 }
 0xc66   : > { %v11766_v21 = vadd.f32 %v7461_v34, %v11753_v43  ;;  %v6080_v10 = vpop.f32.mrb[193].mxu1 }
 0xc67   : > { %v11769_v31 = vadd.f32 %v11753_v43, %v6080_v10 }
 0xc68   : > { %v6239_v48 = vsel %vm6229_vm2, %v11766_v21, -inf }
 0xc69   : > { %6240 = vmax.xlane.f32.xlu0 %v6239_v48  ;;  %v6236_v38 = vsel %vm6229_vm2, %v11769_v31, -inf }
 0xc6d   : > { %v7464_v18 = vpop.f32.mrb[194].mxu1  ;;  %6237 = vmax.xlane.f32.xlu0 %v6236_v38 }
 0xc6e   : > { %v11776_v20 = vadd.f32 %v7464_v18, %v11753_v43  ;;  %v6090_v44 = vpop.f32.mrb[195].mxu1 }
 0xc6f   : > { %v11779_v57 = vadd.f32 %v11753_v43, %v6090_v44 }
 0xc70   : > { %v6245_v16 = vsel %vm6229_vm2, %v11776_v20, -inf }
 0xc71   : > { %6246 = vmax.xlane.f32.xlu0 %v6245_v16  ;;  %v6242_v30 = vsel %vm6229_vm2, %v11779_v57, -inf }
 0xc72   : > { %6243 = vmax.xlane.f32.xlu1 %v6242_v30 }
 0xc75   : > { %v7467_v4 = vpop.f32.mrb[196].mxu1 }
 0xc76   : > { %v11786_v56 = vadd.f32 %v7467_v4, %v11753_v43  ;;  %v6100_v50 = vpop.f32.mrb[197].mxu1 }
 0xc77   : > { %v11789_v24 = vadd.f32 %v11753_v43, %v6100_v50 }
 0xc78   : > { %v6251_v42 = vsel %vm6229_vm2, %v11786_v56, -inf }
 0xc79   : > { %6252 = vmax.xlane.f32.xlu0 %v6251_v42  ;;  %v6248_v11 = vsel %vm6229_vm2, %v11789_v24, -inf }
 0xc7a   : > { %6249 = vmax.xlane.f32.xlu1 %v6248_v11 }
 0xc7d   : > { %v7470_v41 = vpop.f32.mrb[198].mxu1 }
 0xc7e   : > { %v11796_v61 = vadd.f32 %v7470_v41, %v11753_v43  ;;  %v6110_v33 = vpop.f32.mrb[199].mxu1 }
 0xc7f   : > { %v11799_v35 = vadd.f32 %v11753_v43, %v6110_v33 }
 0xc80   : > { %v6257_v23 = vsel %vm6229_vm2, %v11796_v61, -inf }
 0xc81   : > { %6258 = vmax.xlane.f32.xlu0 %v6257_v23  ;;  %v6254_v28 = vsel %vm6229_vm2, %v11799_v35, -inf }
 0xc82   : > { %6255 = vmax.xlane.f32.xlu1 %v6254_v28 }
 0xc85   : > { %v7473_v6 = vpop.f32.mrb[200].mxu1 }
 0xc86   : > { %v11806_v8 = vadd.f32 %v7473_v6, %v11753_v43  ;;  %v6120_v60 = vpop.f32.mrb[201].mxu1 }
 0xc87   : > { %v11809_v2 = vadd.f32 %v11753_v43, %v6120_v60 }
 0xc88   : > { %v6263_v7 = vsel %vm6229_vm2, %v11806_v8, -inf }
 0xc89   : > { %6264 = vmax.xlane.f32.xlu0 %v6263_v7  ;;  %v6260_v1 = vsel %vm6229_vm2, %v11809_v2, -inf }
 0xc8a   : > { %6261 = vmax.xlane.f32.xlu1 %v6260_v1 }
 0xc8d   : > { %v7476_v17 = vpop.f32.mrb[202].mxu1 }
 0xc8e   : > { %v11816_v32 = vadd.f32 %v7476_v17, %v11753_v43  ;;  %v6130_v47 = vpop.f32.mrb[203].mxu1 }
 0xc8f   : > { %v11819_v37 = vadd.f32 %v11753_v43, %v6130_v47 }
 0xc90   : > { %v6269_v39 = vsel %vm6229_vm2, %v11816_v32, -inf }
 0xc91   : > { %6270 = vmax.xlane.f32.xlu0 %v6269_v39  ;;  %v6266_v58 = vsel %vm6229_vm2, %v11819_v37, -inf }
 0xc92   : > { %6267 = vmax.xlane.f32.xlu1 %v6266_v58 }
 0xc95   : > { %v7479_v49 = vpop.f32.mrb[204].mxu1 }
 0xc96   : > { %v11826_v59 = vadd.f32 %v7479_v49, %v11753_v43  ;;  %v6140_v27 = vpop.f32.mrb[205].mxu1 }
 0xc97   : > { %v11829_v36 = vadd.f32 %v11753_v43, %v6140_v27 }
 0xc98   : > { %v6275_v3 = vsel %vm6229_vm2, %v11826_v59, -inf }
 0xc99   : > { %6276 = vmax.xlane.f32.xlu0 %v6275_v3  ;;  %v6272_v5 = vsel %vm6229_vm2, %v11829_v36, -inf }
 0xc9a   : > { %6273 = vmax.xlane.f32.xlu1 %v6272_v5 }
 0xc9d   : > { %v7482_v55 = vpop.f32.mrb[206].mxu1 }
 0xc9e   : > { %v11836_v54 = vadd.f32 %v7482_v55, %v11753_v43  ;;  %v6150_v13 = vpop.f32.mrb[207].mxu1 }
 0xc9f   : > { %v11839_v12 = vadd.f32 %v11753_v43, %v6150_v13 }
 0xca0   : > { %v6281_v26 = vsel %vm6229_vm2, %v11836_v54, -inf }
 0xca1   : > { %6282 = vmax.xlane.f32.xlu0 %v6281_v26  ;;  %v6278_v40 = vsel %vm6229_vm2, %v11839_v12, -inf }
 0xca2   : > { %6279 = vmax.xlane.f32.xlu1 %v6278_v40 }
 0xca5   : > { %v7485_v15 = vpop.f32.mrb[208].mxu1 }
 0xca6   : > { %v11846_v0 = vadd.f32 %v7485_v15, %v11753_v43  ;;  %v6160_v46 = vpop.f32.mrb[209].mxu1 }
 0xca7   : > { %v11849_v9 = vadd.f32 %v11753_v43, %v6160_v46 }
 0xca8   : > { %v6287_v22 = vsel %vm6229_vm2, %v11846_v0, -inf }
 0xca9   : > { %6288 = vmax.xlane.f32.xlu0 %v6287_v22  ;;  %v6284_v52 = vsel %vm6229_vm2, %v11849_v9, -inf }
 0xcaa   : > { %6285 = vmax.xlane.f32.xlu1 %v6284_v52 }
 0xcad   : > { %v7488_v63 = vpop.f32.mrb[210].mxu1 }
 0xcae   : > { %v11856_v45 = vadd.f32 %v7488_v63, %v11753_v43  ;;  %v6170_v29 = vpop.f32.mrb[211].mxu1 }
 0xcaf   : > { %v11859_v19 = vadd.f32 %v11753_v43, %v6170_v29 }
 0xcb0   : > { %v6293_v25 = vsel %vm6229_vm2, %v11856_v45, -inf }
 0xcb1   : > { %6294 = vmax.xlane.f32.xlu0 %v6293_v25  ;;  %v6290_v51 = vsel %vm6229_vm2, %v11859_v19, -inf }
 0xcb2   : > { %6291 = vmax.xlane.f32.xlu1 %v6290_v51 }
 0xcb5   : > { %v7491_v62 = vpop.f32.mrb[212].mxu1 }
 0xcb6   : > { %v11866_v34 = vadd.f32 %v7491_v62, %v11753_v43  ;;  %v6180_v10 = vpop.f32.mrb[213].mxu1 }
 0xcb7   : > { %v11869_v48 = vadd.f32 %v11753_v43, %v6180_v10 }
 0xcb8   : > { %v6299_v38 = vsel %vm6229_vm2, %v11866_v34, -inf }
 0xcb9   : > { %6300 = vmax.xlane.f32.xlu0 %v6299_v38  ;;  %v6296_v18 = vsel %vm6229_vm2, %v11869_v48, -inf }
 0xcba   : > { %6297 = vmax.xlane.f32.xlu1 %v6296_v18 }
 0xcbd   : > { %v7494_v44 = vpop.f32.mrb[214].mxu1 }
 0xcbe   : > { %v11876_v16 = vadd.f32 %v7494_v44, %v11753_v43  ;;  %v6190_v30 = vpop.f32.mrb[215].mxu1 }
 0xcbf   : > { %v11879_v4 = vadd.f32 %v11753_v43, %v6190_v30 }
 0xcc0   : > { %v6305_v50 = vsel %vm6229_vm2, %v11876_v16, -inf }
 0xcc1   : > { %6306 = vmax.xlane.f32.xlu0 %v6305_v50  ;;  %v6302_v42 = vsel %vm6229_vm2, %v11879_v4, -inf }
 0xcc2   : > { %6303 = vmax.xlane.f32.xlu1 %v6302_v42 }
 0xcc5   : > { %v7497_v11 = vpop.f32.mrb[216].mxu1 }
 0xcc6   : > { %v11886_v41 = vadd.f32 %v7497_v11, %v11753_v43  ;;  %v6200_v33 = vpop.f32.mrb[217].mxu1 }
 0xcc7   : > { %v11889_v23 = vadd.f32 %v11753_v43, %v6200_v33 }
 0xcc8   : > { %v6311_v28 = vsel %vm6229_vm2, %v11886_v41, -inf }
 0xcc9   : > { %6312 = vmax.xlane.f32.xlu0 %v6311_v28  ;;  %v6308_v6 = vsel %vm6229_vm2, %v11889_v23, -inf }
 0xcca   : > { %6309 = vmax.xlane.f32.xlu1 %v6308_v6 }
 0xccd   : > { %v7500_v60 = vpop.f32.mrb[218].mxu1 }
 0xcce   : > { %v11896_v7 = vadd.f32 %v7500_v60, %v11753_v43  ;;  %v6210_v1 = vpop.f32.mrb[219].mxu1 }
 0xccf   : > { %v11899_v17 = vadd.f32 %v11753_v43, %v6210_v1 }
 0xcd0   : > { %v6317_v47 = vsel %vm6229_vm2, %v11896_v7, -inf }
 0xcd1   : > { %6318 = vmax.xlane.f32.xlu0 %v6317_v47  ;;  %v6314_v39 = vsel %vm6229_vm2, %v11899_v17, -inf }
 0xcd2   : > { %6315 = vmax.xlane.f32.xlu1 %v6314_v39 }
 0xcd5   : > { %v7503_v58 = vpop.f32.mrb[220].mxu1 }
 0xcd6   : > { %v11906_v49 = vadd.f32 %v7503_v58, %v11753_v43  ;;  %v6220_v27 = vpop.f32.mrb[221].mxu1 }
 0xcd7   : > { %v11909_v3 = vadd.f32 %v11753_v43, %v6220_v27 }
 0xcd8   : > { %v6323_v5 = vsel %vm6229_vm2, %v11906_v49, -inf }
 0xcd9   : > { %6324 = vmax.xlane.f32.xlu0 %v6323_v5  ;;  %v6320_v55 = vsel %vm6229_vm2, %v11909_v3, -inf }
 0xcda   : > { %6321 = vmax.xlane.f32.xlu1 %v6320_v55 }
 0xcee   : > { %v6235_v13 = vpop.xlane.xlu1 %6234 }
 0xcef   : > { %v6327_v26 = vsub.f32 %v11756_v53, %v6235_v13  ;;  %v6232_v40 = vpop.xlane.xlu0 %6231 }
 0xcf0   : > { %v6326_v15 = vsub.f32 %v11759_v14, %v6232_v40 }
 0xcf1   : > { %v6360_v46 = vmul.f32 1.442695, %v6327_v26 }
 0xcf2   : > { %v6358_v22 = vmul.f32 1.442695, %v6326_v15 }
 0xcf3   : > { %8257 = vpow2.f32 %v6360_v46 }
 0xcf4   : > { %8259 = vpow2.f32 %v6358_v22 }
 0xcf6   : > { %v6241_v43 = vpop.xlane.xlu0 %6240 }
 0xcf7   : > { %v6329_v52 = vsub.f32 %v11766_v21, %v6241_v43 }
 0xcf9   : > { %v6364_v63 = vmul.f32 1.442695, %v6329_v52 }
 0xcfa   : > { %v6238_v29 = vpop.xlane.xlu0 %6237 }
 0xcfb   : > { %8261 = vpow2.f32 %v6364_v63  ;;  %v6328_v25 = vsub.f32 %v11769_v31, %v6238_v29 }
 0xcfd   : > { %v11919_v51 = vpop.eup %8257  ;;  %v6362_v62 = vmul.f32 1.442695, %v6328_v25 }
 0xcfe   : > { %v11921_v10 = vpop.eup %8259  ;;  %v6247_v53 = vpop.xlane.xlu0 %6246  ;;  %v6425_v14 = vsel %vm6229_vm2, %v11919_v51, 0.0 }
 0xcff   : > { %8263 = vpow2.f32 %v6362_v62  ;;  %v6331_v38 = vsub.f32 %v11776_v20, %v6247_v53  ;;  %v6244_v18 = vpop.xlane.xlu1 %6243  ;;  %6426 = vadd.xlane.f32.xlu0 %v6425_v14  ;;  %v6422_v21 = vsel %vm6229_vm2, %v11921_v10, 0.0 }
 0xd00   : > { %v6330_v44 = vsub.f32 %v11779_v57, %v6244_v18  ;;  %6423 = vadd.xlane.f32.xlu1 %v6422_v21 }
 0xd01   : > { %v6368_v31 = vmul.f32 1.442695, %v6331_v38 }
 0xd02   : > { %v6366_v30 = vmul.f32 1.442695, %v6330_v44 }
 0xd03   : > { %8265 = vpow2.f32 %v6368_v31 }
 0xd04   : > { %8267 = vpow2.f32 %v6366_v30 }
 0xd05   : > { %v11929_v50 = vpop.eup %8261 }
 0xd06   : > { %v6253_v42 = vpop.xlane.xlu0 %6252  ;;  %v6431_v11 = vsel %vm6229_vm2, %v11929_v50, 0.0 }
 0xd07   : > { %v6333_v20 = vsub.f32 %v11786_v56, %v6253_v42  ;;  %v6250_v33 = vpop.xlane.xlu1 %6249  ;;  %6432 = vadd.xlane.f32.xlu0 %v6431_v11 }
 0xd08   : > { %v6332_v28 = vsub.f32 %v11789_v24, %v6250_v33 }
 0xd09   : > { %v11935_v6 = vpop.eup %8263  ;;  %v6372_v57 = vmul.f32 1.442695, %v6333_v20 }
 0xd0a   : > { %v6370_v60 = vmul.f32 1.442695, %v6332_v28  ;;  %v6428_v1 = vsel %vm6229_vm2, %v11935_v6, 0.0 }
 0xd0b   : > { %8269 = vpow2.f32 %v6372_v57  ;;  %6429 = vadd.xlane.f32.xlu1 %v6428_v1 }
 0xd0c   : > { %8271 = vpow2.f32 %v6370_v60 }
 0xd0d   : > { %v11939_v47 = vpop.eup %8265 }
 0xd0e   : > { %v11941_v39 = vpop.eup %8267  ;;  %v6259_v58 = vpop.xlane.xlu0 %6258  ;;  %v6437_v56 = vsel %vm6229_vm2, %v11939_v47, 0.0 }
 0xd0f   : > { %v6335_v24 = vsub.f32 %v11796_v61, %v6259_v58  ;;  %v6256_v27 = vpop.xlane.xlu1 %6255  ;;  %6438 = vadd.xlane.f32.xlu0 %v6437_v56  ;;  %v6434_v5 = vsel %vm6229_vm2, %v11941_v39, 0.0 }
 0xd10   : > { %v6334_v55 = vsub.f32 %v11799_v35, %v6256_v27  ;;  %6435 = vadd.xlane.f32.xlu1 %v6434_v5 }
 0xd11   : > { %v6376_v13 = vmul.f32 1.442695, %v6335_v24 }
 0xd12   : > { %v6374_v26 = vmul.f32 1.442695, %v6334_v55 }
 0xd13   : > { %8273 = vpow2.f32 %v6376_v13 }
 0xd14   : > { %8275 = vpow2.f32 %v6374_v26 }
 0xd15   : > { %v11949_v40 = vpop.eup %8269 }
 0xd16   : > { %v11951_v15 = vpop.eup %8271  ;;  %v6265_v46 = vpop.xlane.xlu0 %6264  ;;  %v6443_v61 = vsel %vm6229_vm2, %v11949_v40, 0.0 }
 0xd17   : > { %v6337_v22 = vsub.f32 %v11806_v8, %v6265_v46  ;;  %v6262_v43 = vpop.xlane.xlu1 %6261  ;;  %6444 = vadd.xlane.f32.xlu0 %v6443_v61  ;;  %v6440_v35 = vsel %vm6229_vm2, %v11951_v15, 0.0 }
 0xd18   : > { %v6336_v52 = vsub.f32 %v11809_v2, %v6262_v43  ;;  %6441 = vadd.xlane.f32.xlu1 %v6440_v35 }
 0xd19   : > { %v6380_v63 = vmul.f32 1.442695, %v6337_v22 }
 0xd1a   : > { %v6378_v29 = vmul.f32 1.442695, %v6336_v52 }
 0xd1b   : > { %8277 = vpow2.f32 %v6380_v63 }
 0xd1c   : > { %8279 = vpow2.f32 %v6378_v29 }
 0xd1d   : > { %v11959_v25 = vpop.eup %8273 }
 0xd1e   : > { %v11961_v62 = vpop.eup %8275  ;;  %v6271_v53 = vpop.xlane.xlu0 %6270  ;;  %v6449_v8 = vsel %vm6229_vm2, %v11959_v25, 0.0 }
 0xd1f   : > { %v6339_v14 = vsub.f32 %v11816_v32, %v6271_v53  ;;  %v6268_v38 = vpop.xlane.xlu1 %6267  ;;  %6450 = vadd.xlane.f32.xlu0 %v6449_v8  ;;  %v6446_v2 = vsel %vm6229_vm2, %v11961_v62, 0.0 }
 0xd20   : > { %v6338_v18 = vsub.f32 %v11819_v37, %v6268_v38  ;;  %6447 = vadd.xlane.f32.xlu1 %v6446_v2 }
 0xd21   : > { %v6384_v21 = vmul.f32 1.442695, %v6339_v14 }
 0xd22   : > { %v6382_v44 = vmul.f32 1.442695, %v6338_v18 }
 0xd23   : > { %8281 = vpow2.f32 %v6384_v21 }
 0xd24   : > { %8283 = vpow2.f32 %v6382_v44 }
 0xd25   : > { %v11969_v31 = vpop.eup %8277 }
 0xd26   : > { %v11971_v30 = vpop.eup %8279  ;;  %v6277_v42 = vpop.xlane.xlu0 %6276  ;;  %v6455_v32 = vsel %vm6229_vm2, %v11969_v31, 0.0 }
 0xd27   : > { %v6341_v11 = vsub.f32 %v11826_v59, %v6277_v42  ;;  %v6274_v20 = vpop.xlane.xlu1 %6273  ;;  %6456 = vadd.xlane.f32.xlu0 %v6455_v32  ;;  %v6452_v37 = vsel %vm6229_vm2, %v11971_v30, 0.0 }
 0xd28   : > { %v6340_v33 = vsub.f32 %v11829_v36, %v6274_v20  ;;  %6453 = vadd.xlane.f32.xlu1 %v6452_v37 }
 0xd29   : > { %v6388_v28 = vmul.f32 1.442695, %v6341_v11 }
 0xd2a   : > { %v6386_v57 = vmul.f32 1.442695, %v6340_v33 }
 0xd2b   : > { %8285 = vpow2.f32 %v6388_v28 }
 0xd2c   : > { %8287 = vpow2.f32 %v6386_v57 }
 0xd2d   : > { %v11979_v60 = vpop.eup %8281 }
 0xd2e   : > { %v11981_v1 = vpop.eup %8283  ;;  %v6283_v58 = vpop.xlane.xlu0 %6282  ;;  %v6461_v59 = vsel %vm6229_vm2, %v11979_v60, 0.0 }
 0xd2f   : > { %v6343_v56 = vsub.f32 %v11836_v54, %v6283_v58  ;;  %v6280_v24 = vpop.xlane.xlu1 %6279  ;;  %6462 = vadd.xlane.f32.xlu0 %v6461_v59  ;;  %v6458_v36 = vsel %vm6229_vm2, %v11981_v1, 0.0 }
 0xd30   : > { %v6342_v27 = vsub.f32 %v11839_v12, %v6280_v24  ;;  %6459 = vadd.xlane.f32.xlu1 %v6458_v36 }
 0xd31   : > { %v6392_v5 = vmul.f32 1.442695, %v6343_v56 }
 0xd32   : > { %v6390_v55 = vmul.f32 1.442695, %v6342_v27 }
 0xd33   : > { %8289 = vpow2.f32 %v6392_v5 }
 0xd34   : > { %8291 = vpow2.f32 %v6390_v55 }
 0xd35   : > { %v11989_v13 = vpop.eup %8285 }
 0xd36   : > { %v11991_v26 = vpop.eup %8287  ;;  %v6289_v46 = vpop.xlane.xlu0 %6288  ;;  %v6467_v54 = vsel %vm6229_vm2, %v11989_v13, 0.0 }
 0xd37   : > { %v6345_v61 = vsub.f32 %v11846_v0, %v6289_v46  ;;  %v6286_v22 = vpop.xlane.xlu1 %6285  ;;  %6468 = vadd.xlane.f32.xlu0 %v6467_v54  ;;  %v6464_v12 = vsel %vm6229_vm2, %v11991_v26, 0.0 }
 0xd38   : > { %v6344_v43 = vsub.f32 %v11849_v9, %v6286_v22  ;;  %6465 = vadd.xlane.f32.xlu1 %v6464_v12 }
 0xd39   : > { %v6396_v35 = vmul.f32 1.442695, %v6345_v61 }
 0xd3a   : > { %v6394_v52 = vmul.f32 1.442695, %v6344_v43 }
 0xd3b   : > { %8293 = vpow2.f32 %v6396_v35 }
 0xd3c   : > { %8295 = vpow2.f32 %v6394_v52 }
 0xd3d   : > { %v11999_v63 = vpop.eup %8289 }
 0xd3e   : > { %v12001_v29 = vpop.eup %8291  ;;  %v6295_v53 = vpop.xlane.xlu0 %6294  ;;  %v6473_v0 = vsel %vm6229_vm2, %v11999_v63, 0.0 }
 0xd3f   : > { %v6347_v8 = vsub.f32 %v11856_v45, %v6295_v53  ;;  %v6292_v14 = vpop.xlane.xlu1 %6291  ;;  %6474 = vadd.xlane.f32.xlu0 %v6473_v0  ;;  %v6470_v9 = vsel %vm6229_vm2, %v12001_v29, 0.0 }
 0xd40   : > { %v6346_v38 = vsub.f32 %v11859_v19, %v6292_v14  ;;  %6471 = vadd.xlane.f32.xlu1 %v6470_v9 }
 0xd41   : > { %v6400_v2 = vmul.f32 1.442695, %v6347_v8 }
 0xd42   : > { %v6398_v18 = vmul.f32 1.442695, %v6346_v38 }
 0xd43   : > { %8297 = vpow2.f32 %v6400_v2 }
 0xd44   : > { %8299 = vpow2.f32 %v6398_v18 }
 0xd45   : > { %v12009_v21 = vpop.eup %8293 }
 0xd46   : > { %v12011_v44 = vpop.eup %8295  ;;  %v6301_v42 = vpop.xlane.xlu0 %6300  ;;  %v6479_v45 = vsel %vm6229_vm2, %v12009_v21, 0.0 }
 0xd47   : > { %v6349_v32 = vsub.f32 %v11866_v34, %v6301_v42  ;;  %v6298_v11 = vpop.xlane.xlu1 %6297  ;;  %6480 = vadd.xlane.f32.xlu0 %v6479_v45  ;;  %v6476_v19 = vsel %vm6229_vm2, %v12011_v44, 0.0 }
 0xd48   : > { %v6348_v20 = vsub.f32 %v11869_v48, %v6298_v11  ;;  %6477 = vadd.xlane.f32.xlu1 %v6476_v19 }
 0xd49   : > { %v6404_v37 = vmul.f32 1.442695, %v6349_v32 }
 0xd4a   : > { %v6402_v33 = vmul.f32 1.442695, %v6348_v20 }
 0xd4b   : > { %8301 = vpow2.f32 %v6404_v37 }
 0xd4c   : > { %8303 = vpow2.f32 %v6402_v33 }
 0xd4d   : > { %v12019_v28 = vpop.eup %8297 }
 0xd4e   : > { %v12021_v57 = vpop.eup %8299  ;;  %v6307_v58 = vpop.xlane.xlu0 %6306  ;;  %v6485_v34 = vsel %vm6229_vm2, %v12019_v28, 0.0 }
 0xd4f   : > { %v6351_v59 = vsub.f32 %v11876_v16, %v6307_v58  ;;  %v6304_v56 = vpop.xlane.xlu1 %6303  ;;  %6486 = vadd.xlane.f32.xlu0 %v6485_v34  ;;  %v6482_v48 = vsel %vm6229_vm2, %v12021_v57, 0.0 }
 0xd50   : > { %v6350_v24 = vsub.f32 %v11879_v4, %v6304_v56  ;;  %6483 = vadd.xlane.f32.xlu1 %v6482_v48 }
 0xd51   : > { %v6408_v36 = vmul.f32 1.442695, %v6351_v59 }
 0xd52   : > { %v6406_v27 = vmul.f32 1.442695, %v6350_v24 }
 0xd53   : > { %8305 = vpow2.f32 %v6408_v36 }
 0xd54   : > { %8307 = vpow2.f32 %v6406_v27 }
 0xd55   : > { %v12029_v5 = vpop.eup %8301 }
 0xd56   : > { %v12031_v55 = vpop.eup %8303  ;;  %v6313_v46 = vpop.xlane.xlu0 %6312  ;;  %v6491_v16 = vsel %vm6229_vm2, %v12029_v5, 0.0 }
 0xd57   : > { %v6353_v54 = vsub.f32 %v11886_v41, %v6313_v46  ;;  %v6310_v61 = vpop.xlane.xlu1 %6309  ;;  %6492 = vadd.xlane.f32.xlu0 %v6491_v16  ;;  %v6488_v4 = vsel %vm6229_vm2, %v12031_v55, 0.0 }
 0xd58   : > { %v6352_v22 = vsub.f32 %v11889_v23, %v6310_v61  ;;  %6489 = vadd.xlane.f32.xlu1 %v6488_v4 }
 0xd59   : > { %v6412_v12 = vmul.f32 1.442695, %v6353_v54 }
 0xd5a   : > { %v6410_v43 = vmul.f32 1.442695, %v6352_v22 }
 0xd5b   : > { %8309 = vpow2.f32 %v6412_v12 }
 0xd5c   : > { %8311 = vpow2.f32 %v6410_v43 }
 0xd5d   : > { %v12039_v35 = vpop.eup %8305 }
 0xd5e   : > { %v12041_v52 = vpop.eup %8307  ;;  %v6319_v53 = vpop.xlane.xlu0 %6318  ;;  %v6497_v41 = vsel %vm6229_vm2, %v12039_v35, 0.0 }
 0xd5f   : > { %v6355_v0 = vsub.f32 %v11896_v7, %v6319_v53  ;;  %v6316_v8 = vpop.xlane.xlu1 %6315  ;;  %6498 = vadd.xlane.f32.xlu0 %v6497_v41  ;;  %v6494_v23 = vsel %vm6229_vm2, %v12041_v52, 0.0 }
 0xd60   : > { %v6354_v14 = vsub.f32 %v11899_v17, %v6316_v8  ;;  %6495 = vadd.xlane.f32.xlu1 %v6494_v23 }
 0xd61   : > { %v6416_v9 = vmul.f32 1.442695, %v6355_v0 }
 0xd62   : > { %v6414_v38 = vmul.f32 1.442695, %v6354_v14 }
 0xd63   : > { %8313 = vpow2.f32 %v6416_v9 }
 0xd64   : > { %8315 = vpow2.f32 %v6414_v38 }
 0xd65   : > { %v12049_v2 = vpop.eup %8309 }
 0xd66   : > { %v12051_v18 = vpop.eup %8311  ;;  %v6325_v42 = vpop.xlane.xlu0 %6324  ;;  %v6503_v7 = vsel %vm6229_vm2, %v12049_v2, 0.0 }
 0xd67   : > { %v6357_v45 = vsub.f32 %v11906_v49, %v6325_v42  ;;  %v6322_v32 = vpop.xlane.xlu1 %6321  ;;  %6504 = vadd.xlane.f32.xlu0 %v6503_v7  ;;  %v6500_v17 = vsel %vm6229_vm2, %v12051_v18, 0.0 }
 0xd68   : > { %v6356_v11 = vsub.f32 %v11909_v3, %v6322_v32  ;;  %6501 = vadd.xlane.f32.xlu1 %v6500_v17 }
 0xd69   : > { %v6420_v19 = vmul.f32 1.442695, %v6357_v45 }
 0xd6a   : > { %v6418_v20 = vmul.f32 1.442695, %v6356_v11 }
 0xd6b   : > { %8317 = vpow2.f32 %v6420_v19 }
 0xd6c   : > { %8319 = vpow2.f32 %v6418_v20 }
 0xd6d   : > { %v12059_v37 = vpop.eup %8313 }
 0xd6e   : > { %v12061_v33 = vpop.eup %8315  ;;  %v6509_v58 = vsel %vm6229_vm2, %v12059_v37, 0.0 }
 0xd6f   : > { %6510 = vadd.xlane.f32.xlu0 %v6509_v58  ;;  %v6506_v49 = vsel %vm6229_vm2, %v12061_v33, 0.0 }
 0xd70   : > { %6507 = vadd.xlane.f32.xlu1 %v6506_v49 }
 0xd75   : > { %v12067_v34 = vpop.eup %8317 }
 0xd76   : > { %v12069_v3 = vpop.eup %8319  ;;  %v6515_v59 = vsel %vm6229_vm2, %v12067_v34, 0.0 }
 0xd77   : > { %6516 = vadd.xlane.f32.xlu0 %v6515_v59  ;;  %v6512_v56 = vsel %vm6229_vm2, %v12069_v3, 0.0 }
 0xd78   : > { %6513 = vadd.xlane.f32.xlu1 %v6512_v56 }
 0xd8c   : > { %v6427_v48 = vpop.xlane.xlu0 %6426 }
 0xd8d   : > { %8321 = vrcp.f32 %v6427_v48  ;;  %v6424_v24 = vpop.xlane.xlu1 %6423 }
 0xd8e   : > { %8323 = vrcp.f32 %v6424_v24 }
 0xd94   : > { %v6433_v36 = vpop.xlane.xlu0 %6432 }
 0xd95   : > { %8325 = vrcp.f32 %v6433_v36 }
 0xd97   : > { %v8322_v27 = vpop.eup %8321 }
 0xd98   : > { %v8324_v46 = vpop.eup %8323  ;;  %v6551_v16 = vmul.f32 %v8322_v27, %v11919_v51  ;;  %v6430_v54 = vpop.xlane.xlu1 %6429 }
 0xd99   : > { %v6550_v61 = vmul.f32 %v8324_v46, %v11921_v10  ;;  %8327 = vrcp.f32 %v6430_v54 }
 0xd9a   : > { %6583 = vst.msk [vmem:[%s12080_s18 + $0x8] sm:$0xff] %vm6229_vm2, %v6551_v16 }
 0xd9b   : > { %6582 = vst.msk [vmem:[%s12080_s18] sm:$0xff] %vm6229_vm2, %v6550_v61 }
 0xd9c   : > { %v6439_v4 = vpop.xlane.xlu0 %6438 }
 0xd9d   : > { %8329 = vrcp.f32 %v6439_v4  ;;  %v6436_v22 = vpop.xlane.xlu1 %6435 }
 0xd9e   : > { %8331 = vrcp.f32 %v6436_v22 }
 0xd9f   : > { %v8326_v12 = vpop.eup %8325 }
 0xda0   : > { %v6553_v43 = vmul.f32 %v8326_v12, %v11929_v50 }
 0xda2   : > { %6585 = vst.msk [vmem:[%s12080_s18 + $0x18] sm:$0xff] %vm6229_vm2, %v6553_v43 }
 0xda3   : > { %v8328_v51 = vpop.eup %8327 }
 0xda4   : > { %v6552_v10 = vmul.f32 %v8328_v51, %v11935_v6  ;;  %v6445_v53 = vpop.xlane.xlu0 %6444 }
 0xda5   : > { %8333 = vrcp.f32 %v6445_v53  ;;  %v6442_v41 = vpop.xlane.xlu1 %6441 }
 0xda6   : > { %6584 = vst.msk [vmem:[%s12080_s18 + $0x10] sm:$0xff] %vm6229_vm2, %v6552_v10  ;;  %8335 = vrcp.f32 %v6442_v41 }
 0xda7   : > { %v8330_v0 = vpop.eup %8329 }
 0xda8   : > { %v8332_v8 = vpop.eup %8331  ;;  %v6555_v23 = vmul.f32 %v8330_v0, %v11939_v47 }
 0xda9   : > { %v6554_v14 = vmul.f32 %v8332_v8, %v11941_v39 }
 0xdaa   : > { %6587 = vst.msk [vmem:[%s12080_s18 + $0x28] sm:$0xff] %vm6229_vm2, %v6555_v23 }
 0xdab   : > { %6586 = vst.msk [vmem:[%s12080_s18 + $0x20] sm:$0xff] %vm6229_vm2, %v6554_v14 }
 0xdac   : > { %v6451_v50 = vpop.xlane.xlu0 %6450 }
 0xdad   : > { %8337 = vrcp.f32 %v6451_v50  ;;  %v6448_v6 = vpop.xlane.xlu1 %6447 }
 0xdae   : > { %8339 = vrcp.f32 %v6448_v6 }
 0xdaf   : > { %v8334_v9 = vpop.eup %8333 }
 0xdb0   : > { %v8336_v38 = vpop.eup %8335  ;;  %v6557_v42 = vmul.f32 %v8334_v9, %v11949_v40 }
 0xdb1   : > { %v6556_v7 = vmul.f32 %v8336_v38, %v11951_v15 }
 0xdb2   : > { %6589 = vst.msk [vmem:[%s12080_s18 + $0x38] sm:$0xff] %vm6229_vm2, %v6557_v42 }
 0xdb3   : > { %6588 = vst.msk [vmem:[%s12080_s18 + $0x30] sm:$0xff] %vm6229_vm2, %v6556_v7 }
 0xdb4   : > { %v6457_v47 = vpop.xlane.xlu0 %6456 }
 0xdb5   : > { %8341 = vrcp.f32 %v6457_v47  ;;  %v6454_v39 = vpop.xlane.xlu1 %6453 }
 0xdb6   : > { %8343 = vrcp.f32 %v6454_v39 }
 0xdb7   : > { %v8338_v45 = vpop.eup %8337 }
 0xdb8   : > { %v8340_v32 = vpop.eup %8339  ;;  %v6559_v17 = vmul.f32 %v8338_v45, %v11959_v25 }
 0xdb9   : > { %v6558_v11 = vmul.f32 %v8340_v32, %v11961_v62 }
 0xdba   : > { %6591 = vst.msk [vmem:[%s12080_s18 + $0x48] sm:$0xff] %vm6229_vm2, %v6559_v17 }
 0xdbb   : > { %6590 = vst.msk [vmem:[%s12080_s18 + $0x40] sm:$0xff] %vm6229_vm2, %v6558_v11 }
 0xdbc   : > { %v6463_v40 = vpop.xlane.xlu0 %6462 }
 0xdbd   : > { %8345 = vrcp.f32 %v6463_v40  ;;  %v6460_v15 = vpop.xlane.xlu1 %6459 }
 0xdbe   : > { %8347 = vrcp.f32 %v6460_v15 }
 0xdbf   : > { %v8342_v19 = vpop.eup %8341 }
 0xdc0   : > { %v8344_v20 = vpop.eup %8343  ;;  %v6561_v58 = vmul.f32 %v8342_v19, %v11969_v31 }
 0xdc1   : > { %v6560_v49 = vmul.f32 %v8344_v20, %v11971_v30 }
 0xdc2   : > { %6593 = vst.msk [vmem:[%s12080_s18 + $0x58] sm:$0xff] %vm6229_vm2, %v6561_v58 }
 0xdc3   : > { %6592 = vst.msk [vmem:[%s12080_s18 + $0x50] sm:$0xff] %vm6229_vm2, %v6560_v49 }
 0xdc4   : > { %v6469_v25 = vpop.xlane.xlu0 %6468 }
 0xdc5   : > { %8349 = vrcp.f32 %v6469_v25  ;;  %v6466_v62 = vpop.xlane.xlu1 %6465 }
 0xdc6   : > { %8351 = vrcp.f32 %v6466_v62 }
 0xdc7   : > { %v8346_v59 = vpop.eup %8345 }
 0xdc8   : > { %v8348_v56 = vpop.eup %8347  ;;  %v6563_v48 = vmul.f32 %v8346_v59, %v11979_v60 }
 0xdc9   : > { %v6562_v24 = vmul.f32 %v8348_v56, %v11981_v1 }
 0xdca   : > { %6595 = vst.msk [vmem:[%s12080_s18 + $0x68] sm:$0xff] %vm6229_vm2, %v6563_v48 }
 0xdcb   : > { %6594 = vst.msk [vmem:[%s12080_s18 + $0x60] sm:$0xff] %vm6229_vm2, %v6562_v24 }
 0xdcc   : > { %v6475_v31 = vpop.xlane.xlu0 %6474 }
 0xdcd   : > { %8353 = vrcp.f32 %v6475_v31  ;;  %v6472_v30 = vpop.xlane.xlu1 %6471 }
 0xdce   : > { %8355 = vrcp.f32 %v6472_v30 }
 0xdcf   : > { %v8350_v36 = vpop.eup %8349 }
 0xdd0   : > { %v8352_v27 = vpop.eup %8351  ;;  %v6565_v46 = vmul.f32 %v8350_v36, %v11989_v13 }
 0xdd1   : > { %v6564_v16 = vmul.f32 %v8352_v27, %v11991_v26 }
 0xdd2   : > { %6597 = vst.msk [vmem:[%s12080_s18 + $0x78] sm:$0xff] %vm6229_vm2, %v6565_v46 }
 0xdd3   : > { %6596 = vst.msk [vmem:[%s12080_s18 + $0x70] sm:$0xff] %vm6229_vm2, %v6564_v16 }
 0xdd4   : > { %v6481_v60 = vpop.xlane.xlu0 %6480 }
 0xdd5   : > { %8357 = vrcp.f32 %v6481_v60  ;;  %v6478_v1 = vpop.xlane.xlu1 %6477 }
 0xdd6   : > { %8359 = vrcp.f32 %v6478_v1 }
 0xdd7   : > { %v8354_v54 = vpop.eup %8353 }
 0xdd8   : > { %v8356_v61 = vpop.eup %8355  ;;  %v6567_v4 = vmul.f32 %v8354_v54, %v11999_v63 }
 0xdd9   : > { %v6566_v22 = vmul.f32 %v8356_v61, %v12001_v29 }
 0xdda   : > { %6599 = vst.msk [vmem:[%s12080_s18 + $0x88] sm:$0xff] %vm6229_vm2, %v6567_v4 }
 0xddb   : > { %6598 = vst.msk [vmem:[%s12080_s18 + $0x80] sm:$0xff] %vm6229_vm2, %v6566_v22 }
 0xddc   : > { %v6487_v13 = vpop.xlane.xlu0 %6486 }
 0xddd   : > { %8361 = vrcp.f32 %v6487_v13  ;;  %v6484_v26 = vpop.xlane.xlu1 %6483 }
 0xdde   : > { %8363 = vrcp.f32 %v6484_v26 }
 0xddf   : > { %v8358_v12 = vpop.eup %8357 }
 0xde0   : > { %v8360_v43 = vpop.eup %8359  ;;  %v6569_v51 = vmul.f32 %v8358_v12, %v12009_v21 }
 0xde1   : > { %v6568_v10 = vmul.f32 %v8360_v43, %v12011_v44 }
 0xde2   : > { %6601 = vst.msk [vmem:[%s12080_s18 + $0x98] sm:$0xff] %vm6229_vm2, %v6569_v51 }
 0xde3   : > { %6600 = vst.msk [vmem:[%s12080_s18 + $0x90] sm:$0xff] %vm6229_vm2, %v6568_v10 }
 0xde4   : > { %v6493_v63 = vpop.xlane.xlu0 %6492 }
 0xde5   : > { %8365 = vrcp.f32 %v6493_v63  ;;  %v6490_v29 = vpop.xlane.xlu1 %6489 }
 0xde6   : > { %8367 = vrcp.f32 %v6490_v29 }
 0xde7   : > { %v8362_v53 = vpop.eup %8361 }
 0xde8   : > { %v8364_v41 = vpop.eup %8363  ;;  %v6571_v0 = vmul.f32 %v8362_v53, %v12019_v28 }
 0xde9   : > { %v6570_v8 = vmul.f32 %v8364_v41, %v12021_v57 }
 0xdea   : > { %6603 = vst.msk [vmem:[%s12080_s18 + $0xa8] sm:$0xff] %vm6229_vm2, %v6571_v0 }
 0xdeb   : > { %6602 = vst.msk [vmem:[%s12080_s18 + $0xa0] sm:$0xff] %vm6229_vm2, %v6570_v8 }
 0xdec   : > { %v6499_v21 = vpop.xlane.xlu0 %6498 }
 0xded   : > { %8369 = vrcp.f32 %v6499_v21  ;;  %v6496_v44 = vpop.xlane.xlu1 %6495 }
 0xdee   : > { %8371 = vrcp.f32 %v6496_v44 }
 0xdef   : > { %v8366_v23 = vpop.eup %8365 }
 0xdf0   : > { %v8368_v14 = vpop.eup %8367  ;;  %v6573_v50 = vmul.f32 %v8366_v23, %v12029_v5 }
 0xdf1   : > { %v6572_v6 = vmul.f32 %v8368_v14, %v12031_v55 }
 0xdf2   : > { %6605 = vst.msk [vmem:[%s12080_s18 + $0xb8] sm:$0xff] %vm6229_vm2, %v6573_v50 }
 0xdf3   : > { %6604 = vst.msk [vmem:[%s12080_s18 + $0xb0] sm:$0xff] %vm6229_vm2, %v6572_v6 }
 0xdf4   : > { %v6505_v28 = vpop.xlane.xlu0 %6504 }
 0xdf5   : > { %8373 = vrcp.f32 %v6505_v28  ;;  %v6502_v57 = vpop.xlane.xlu1 %6501 }
 0xdf6   : > { %8375 = vrcp.f32 %v6502_v57 }
 0xdf7   : > { %v8370_v9 = vpop.eup %8369 }
 0xdf8   : > { %v8372_v38 = vpop.eup %8371  ;;  %v6575_v42 = vmul.f32 %v8370_v9, %v12039_v35 }
 0xdf9   : > { %v6574_v7 = vmul.f32 %v8372_v38, %v12041_v52 }
 0xdfa   : > { %6607 = vst.msk [vmem:[%s12080_s18 + $0xc8] sm:$0xff] %vm6229_vm2, %v6575_v42 }
 0xdfb   : > { %6606 = vst.msk [vmem:[%s12080_s18 + $0xc0] sm:$0xff] %vm6229_vm2, %v6574_v7 }
 0xdfc   : > { %v6511_v5 = vpop.xlane.xlu0 %6510 }
 0xdfd   : > { %8377 = vrcp.f32 %v6511_v5  ;;  %v6508_v55 = vpop.xlane.xlu1 %6507 }
 0xdfe   : > { %8379 = vrcp.f32 %v6508_v55 }
 0xdff   : > { %v8374_v47 = vpop.eup %8373 }
 0xe00   : > { %v8376_v39 = vpop.eup %8375  ;;  %v6577_v45 = vmul.f32 %v8374_v47, %v12049_v2 }
 0xe01   : > { %v6576_v32 = vmul.f32 %v8376_v39, %v12051_v18 }
 0xe02   : > { %6609 = vst.msk [vmem:[%s12080_s18 + $0xd8] sm:$0xff] %vm6229_vm2, %v6577_v45 }
 0xe03   : > { %6608 = vst.msk [vmem:[%s12080_s18 + $0xd0] sm:$0xff] %vm6229_vm2, %v6576_v32 }
 0xe04   : > { %v6517_v35 = vpop.xlane.xlu0 %6516 }
 0xe05   : > { %8381 = vrcp.f32 %v6517_v35  ;;  %v6514_v52 = vpop.xlane.xlu1 %6513 }
 0xe06   : > { %8383 = vrcp.f32 %v6514_v52 }
 0xe07   : > { %v8378_v17 = vpop.eup %8377 }
 0xe08   : > { %v8380_v11 = vpop.eup %8379  ;;  %v6579_v40 = vmul.f32 %v8378_v17, %v12059_v37 }
 0xe09   : > { %v6578_v15 = vmul.f32 %v8380_v11, %v12061_v33 }
 0xe0a   : > { %6611 = vst.msk [vmem:[%s12080_s18 + $0xe8] sm:$0xff] %vm6229_vm2, %v6579_v40 }
 0xe0b   : > { %6610 = vst.msk [vmem:[%s12080_s18 + $0xe0] sm:$0xff] %vm6229_vm2, %v6578_v15 }
 0xe0f   : > { %v8382_v2 = vpop.eup %8381 }
 0xe10   : > { %v8384_v18 = vpop.eup %8383  ;;  %v6581_v19 = vmul.f32 %v8382_v2, %v12067_v34 }
 0xe11   : > { %v6580_v20 = vmul.f32 %v8384_v18, %v12069_v3 }
 0xe12   : > { %6613 = vst.msk [vmem:[%s12080_s18 + $0xf8] sm:$0xff] %vm6229_vm2, %v6581_v19 }
 0xe13   : > { %6612 = vst.msk [vmem:[%s12080_s18 + $0xf0] sm:$0xff] %vm6229_vm2, %v6580_v20 }
 0xe14 PF: > { %s19_s27 = sadd.s32 1, %s8840_s27  }
 0xe15   : > { %p16_p5 = scmp.ge.s32.totalorder %s19_s27, 4  }
 0xe17   :  { %18 = sbr.rel (!%p16_p5) target bundleno = 1 (0x1), region = 90 }
 0xe1e   :  { %6636 = vsyncpa [#allocation3], 1 }
 0xe1f   :  { %6638 = vsyncpa [#allocation3 + $0x1], 1 }

</bundles_post_ra>
